<compile_context>
chip_gen: v6e
topology: v6e:2x2x1
jax: 0.10.0
libtpu: 0.0.40
codegen_flags: <defaults>
</compile_context>

<pallas_src>
import functools
from collections import namedtuple

import jax
import jax.numpy as jnp
from jax.experimental import pallas as pl
from jax.experimental.pallas import tpu as pltpu


ConvMeta = namedtuple('ConvMeta',
                      ['K', 'stride', 'pad', 'C_in', 'C_out', 'T_pad', 'T_full', 'T_out'])


# ----------------------------------------------------------------------------
# Single fused kernel: encoder CNN -> bidirectional LSTM stack -> output heads
# ----------------------------------------------------------------------------
def _fused_forward_kernel(*refs, B, H, T, enc_meta, num_lstm):
    n_enc = len(enc_meta)
    pos = 0
    x_ref = refs[pos]; pos += 1
    enc_w = []
    for _ in range(n_enc):
        enc_w.append(refs[pos:pos + 3]); pos += 3            # (w, scale, shift)
    lstm_w = []
    for _ in range(num_lstm):
        lstm_w.append(refs[pos:pos + 3]); pos += 3           # (wih, bias, whh)
    w1_ref, b1_ref, w2_ref, b2_ref = refs[pos:pos + 4]; pos += 4
    out_ref = refs[pos]; pos += 1
    act_refs = refs[pos:pos + n_enc - 1]; pos += n_enc - 1   # padded inputs of layers 1..n-1
    xp_sc = refs[pos]; pos += 1                              # [T*2B, 4H] staged gate inputs
    out_sc = refs[pos]; pos += 1                             # [T*B, 2H] per-layer LSTM outputs

    fourH, twoH, twoB = 4 * H, 2 * H, 2 * B

    # Zero the encoder intermediate buffers once so their padding rows stay zero.
    for a_ref in act_refs:
        a_ref[...] = jnp.zeros_like(a_ref)

    # Stride-2 decimation matrices (built once from iota; feeds the otherwise idle MXU).
    dec = {}
    for li, m in enumerate(enc_meta):
        if m.stride > 1:
            r = jax.lax.broadcasted_iota(jnp.int32, (m.T_out, m.T_full), 0)
            c = jax.lax.broadcasted_iota(jnp.int32, (m.T_out, m.T_full), 1)
            dec[li] = (c == m.stride * r).astype(jnp.float32)

    wih0 = lstm_w[0][0][...]
    bias0 = lstm_w[0][1][...]

    # --- Encoder (per batch element) + LSTM layer-0 input projection & staging ---
    for b in range(B):
        cur = x_ref
        enc_out_b = None
        for li, m in enumerate(enc_meta):
            w_ref, sc_ref, sh_ref = enc_w[li]
            acc = jnp.zeros((m.T_full, m.C_out), jnp.float32)
            for k in range(m.K):
                xs = cur[b, k:k + m.T_full, :]                   # [T_full, C_in] unit-stride tap
                wk = w_ref[k * m.C_in:(k + 1) * m.C_in, :]       # [C_in, C_out]
                if m.C_in == 1:
                    acc = acc + xs * wk                          # rank-1 update on the VPU
                else:
                    acc = acc + jnp.dot(xs, wk,
                                        preferred_element_type=jnp.float32)
            if m.stride > 1:
                acc = jnp.dot(dec[li], acc, preferred_element_type=jnp.float32)
            y = acc * sc_ref[...] + sh_ref[...]                  # folded BatchNorm (eval mode)
            y = jnp.where(y > 0, y, 0.1 * y)                     # LeakyReLU(0.1)
            if li + 1 < n_enc:
                p_next = enc_meta[li + 1].pad
                act_refs[li][b, p_next:p_next + m.T_out, :] = y
                cur = act_refs[li]
            else:
                enc_out_b = y                                    # [T, C_enc]

        # LSTM layer-0 input projection for this batch element, staged into xp_sc so the
        # recurrence reads one contiguous [2B,4H] block per step.
        xp_b = jnp.dot(enc_out_b, wih0, preferred_element_type=jnp.float32) + bias0
        for s in range(T):
            xp_sc[s * twoB + b:s * twoB + b + 1, :] = xp_b[s:s + 1, 0:fourH]
            xp_sc[s * twoB + B + b:s * twoB + B + b + 1, :] = \
                xp_b[T - 1 - s:T - s, fourH:2 * fourH]

    # --- Hoisted per-lane constants for the recurrence ---
    lane4 = jax.lax.broadcasted_iota(jnp.int32, (twoB, fourH), 1)
    is_g = (lane4 >= twoH) & (lane4 < 3 * H)                     # tanh lanes (gate order i,f,g,o)
    post_mul = jnp.where(is_g, 1.0, 0.5)                         # sigmoid(z) = 0.5*tanh(z/2)+0.5
    post_add = jnp.where(is_g, 0.0, 0.5)                         # (the /2 is folded into weights)
    row2 = jax.lax.broadcasted_iota(jnp.int32, (twoB, twoH), 0)
    lane2 = jax.lax.broadcasted_iota(jnp.int32, (twoB, twoH), 1)
    diag_mask = ((row2 < B) == (lane2 < H)).astype(jnp.float32)  # block-diagonal h placement

    # --- Bidirectional LSTM stack ---
    for l in range(num_lstm):
        if l > 0:
            # Input projection of BOTH directions over ALL timesteps: one matmul, then
            # stage (fwd time s | bwd time T-1-s) into the same per-step row block.
            wih = lstm_w[l][0][...]
            bias = lstm_w[l][1][...]
            xp = jnp.dot(out_sc[...], wih, preferred_element_type=jnp.float32) + bias
            for s in range(T):
                xp_sc[s * twoB:s * twoB + B, :] = xp[s * B:(s + 1) * B, 0:fourH]
                xp_sc[s * twoB + B:(s + 1) * twoB, :] = \
                    xp[(T - 1 - s) * B:(T - s) * B, fourH:2 * fourH]
        whh = lstm_w[l][2][...]                                  # [2H, 4H] block-diag stack

        h = jnp.zeros((twoB, twoH), jnp.float32)                 # fwd rows 0:B, bwd rows B:2B
        c = jnp.zeros((twoB, H), jnp.float32)
        for s in range(T):
            a = xp_sc[s * twoB:(s + 1) * twoB, :]                # [2B, 4H] single static load
            gates = a + jnp.dot(h, whh, preferred_element_type=jnp.float32)
            act = jnp.tanh(gates) * post_mul + post_add          # ONE EUP pass for all gates
            i_g = act[:, 0:H]
            f_g = act[:, H:twoH]
            g_g = act[:, twoH:3 * H]
            o_g = act[:, 3 * H:fourH]
            c = f_g * c + i_g * g_g
            hh = o_g * jnp.tanh(c)                               # [2B, H]
            h = jnp.concatenate([hh, hh], axis=-1) * diag_mask   # rebuild block-diag layout
            out_sc[s * B:(s + 1) * B, 0:H] = hh[0:B]             # fwd output, time s
            out_sc[(T - 1 - s) * B:(T - s) * B, H:twoH] = hh[B:twoB]  # bwd output, time T-1-s

    # --- Output heads (onset logit/prob + velocity), fused with the last LSTM layer ---
    feat = out_sc[...]                                           # [T*B, 2H]
    t1 = jnp.dot(feat, w1_ref[...], preferred_element_type=jnp.float32) + b1_ref[...]
    logits = t1[:, 0:1]
    h1 = t1[:, 1:9]
    h1 = jnp.where(h1 > 0, h1, 0.1 * h1)                         # LeakyReLU(0.1)
    vel = jax.nn.sigmoid(
        jnp.dot(h1, w2_ref[...], preferred_element_type=jnp.float32) + b2_ref[...])
    out_ref[...] = jnp.concatenate([logits, jax.nn.sigmoid(logits), vel], axis=-1)


# ----------------------------------------------------------------------------
# Wrapper
# ----------------------------------------------------------------------------
def _encoder_meta(config, T_in, C_in):
    enc = config['encoder']
    meta = []
    t, c = T_in, C_in
    for i, (K, s, p) in enumerate(zip(enc['kernel_sizes'], enc['strides'], enc['paddings'])):
        co = enc['base_channels'] * 2 ** i
        meta.append(ConvMeta(K=K, stride=s, pad=p, C_in=c, C_out=co,
                             T_pad=t + 2 * p, T_full=t + 2 * p - K + 1,
                             T_out=(t + 2 * p - K) // s + 1))
        t, c = meta[-1].T_out, co
    return tuple(meta), t, c


def cnn_lstm_transcriber_forward(prepped, x_nct, config):
    H = config['temporal']['hidden_dim']
    B, C_in, T_in = x_nct.shape
    meta, T, _ = _encoder_meta(config, T_in, C_in)
    num_lstm = len(prepped['lstm'])

    x = jnp.transpose(x_nct, (0, 2, 1)).astype(jnp.float32)      # [B, T_in, C_in]
    x_pad = jnp.pad(x, ((0, 0), (meta[0].pad, meta[0].pad), (0, 0)))

    inputs = [x_pad]
    for lp in prepped['encoder']:
        inputs += [lp['w'], lp['scale'], lp['shift']]
    for lp in prepped['lstm']:
        inputs += [lp['wih'], lp['b'], lp['whh']]
    hd = prepped['heads']
    inputs += [hd['w1'], hd['b1'], hd['w2'], hd['b2']]

    scratch = [pltpu.VMEM((B, meta[l].T_pad, meta[l].C_in), jnp.float32)
               for l in range(1, len(meta))]
    scratch += [pltpu.VMEM((T * 2 * B, 4 * H), jnp.float32),     # staged gate inputs
                pltpu.VMEM((T * B, 2 * H), jnp.float32)]         # per-layer LSTM outputs

    kernel = functools.partial(_fused_forward_kernel, B=B, H=H, T=T,
                               enc_meta=meta, num_lstm=num_lstm)
    out = pl.pallas_call(
        kernel,
        out_shape=jax.ShapeDtypeStruct((T * B, 3), jnp.float32),
        in_specs=[pl.BlockSpec(memory_space=pltpu.MemorySpace.VMEM)] * len(inputs),
        out_specs=pl.BlockSpec(memory_space=pltpu.MemorySpace.VMEM),
        scratch_shapes=scratch,
    )(*inputs)

    res = out.reshape(T, B, 3)
    return {'onset_logits': jnp.transpose(res[:, :, 0]),         # [B, T]
            'onset_probs': jnp.transpose(res[:, :, 1]),
            'velocities': jnp.transpose(res[:, :, 2])}


# ----------------------------------------------------------------------------
# One-time parameter preparation (hoisted out of the forward pass):
# BN folding, weight transposes, fwd/bwd concatenation, sigmoid 0.5 pre-scale folding.
# ----------------------------------------------------------------------------
def prepare_params(params, config):
    eps = 1e-5
    H = config['temporal']['hidden_dim']
    prepped = {'encoder': [], 'lstm': []}

    for layer in params['encoder']:
        w = layer['w']                                           # [C_out, C_in, K]
        C_out, C_in, K = w.shape
        w_kic = jnp.transpose(w, (2, 1, 0)).reshape(K * C_in, C_out)
        scale = layer['gamma'] / jnp.sqrt(layer['rvar'] + eps)
        shift = layer['beta'] - layer['rmean'] * scale + layer['b'] * scale
        prepped['encoder'].append({'w': w_kic,
                                   'scale': scale.reshape(1, C_out),
                                   'shift': shift.reshape(1, C_out)})

    # Fold the 0.5 pre-scale of sigmoid(z) = 0.5*tanh(z/2)+0.5 into the i/f/o gate columns
    # so the kernel needs a single tanh per step (exact algebraic identity).
    gs = jnp.concatenate([jnp.full((H,), 0.5), jnp.full((H,), 0.5),
                          jnp.ones((H,)), jnp.full((H,), 0.5)]).astype(jnp.float32)

    for lp in params['lstm']:
        wih_f = lp['fwd']['w_ih'].T * gs[None, :]
        wih_b = lp['bwd']['w_ih'].T * gs[None, :]
        whh_f = lp['fwd']['w_hh'].T * gs[None, :]
        whh_b = lp['bwd']['w_hh'].T * gs[None, :]
        b_f = (lp['fwd']['b_ih'] + lp['fwd']['b_hh']) * gs
        b_b = (lp['bwd']['b_ih'] + lp['bwd']['b_hh']) * gs
        prepped['lstm'].append({
            'wih': jnp.concatenate([wih_f, wih_b], axis=1),      # [D, 8H]  fwd | bwd
            'whh': jnp.concatenate([whh_f, whh_b], axis=0),      # [2H, 4H] block-diag stack
            'b': jnp.concatenate([b_f, b_b]).reshape(1, -1),     # [1, 8H]
        })

    wo = params['onset']['w'][:, :, 0].T                         # [2H, 1]
    wv1 = params['vel1']['w'][:, :, 0].T                         # [2H, 8]
    prepped['heads'] = {
        'w1': jnp.concatenate([wo, wv1], axis=1),                # [2H, 9]  onset | vel1
        'b1': jnp.concatenate([params['onset']['b'],
                               params['vel1']['b']]).reshape(1, -1),
        'w2': params['vel2']['w'][:, :, 0].T,                    # [8, 1]
        'b2': params['vel2']['b'].reshape(1, 1),
    }
    return prepped


# ----------------------------------------------------------------------------
# Parameter init (deterministic, synthetic - shapes mirror the PyTorch module)
# ----------------------------------------------------------------------------
def init_params(key, config):
    enc = config['encoder']
    base, ci = enc['base_channels'], enc['input_channels']
    ks = enc['kernel_sizes']
    tmp = config['temporal']
    H, nl = tmp['hidden_dim'], tmp['num_layers']

    keys = iter(jax.random.split(key, 64))

    def nrm(shape, scale=0.1):
        return scale * jax.random.normal(next(keys), shape, jnp.float32)

    params = {'encoder': [], 'lstm': []}
    c = ci
    for i, k in enumerate(ks):
        co = base * 2 ** i
        params['encoder'].append({
            'w': nrm((co, c, k)), 'b': nrm((co,), 0.05),
            'gamma': 1.0 + nrm((co,), 0.05), 'beta': nrm((co,), 0.05),
            'rmean': nrm((co,), 0.05), 'rvar': 1.0 + jnp.abs(nrm((co,), 0.1)),
        })
        c = co
    enc_dim = base * 2 ** (len(ks) - 1)

    d = enc_dim
    for _ in range(nl):
        layer = {}
        for direction in ('fwd', 'bwd'):
            layer[direction] = {'w_ih': nrm((4 * H, d)), 'w_hh': nrm((4 * H, H)),
                                'b_ih': nrm((4 * H,), 0.05), 'b_hh': nrm((4 * H,), 0.05)}
        params['lstm'].append(layer)
        d = 2 * H

    params['onset'] = {'w': nrm((1, 2 * H, 1)), 'b': nrm((1,), 0.05)}
    params['vel1'] = {'w': nrm((8, 2 * H, 1)), 'b': nrm((8,), 0.05)}
    params['vel2'] = {'w': nrm((1, 8, 1)), 'b': nrm((1,), 0.05)}
    return params


if __name__ == "__main__":
    config = {
        'encoder': {'input_channels': 1, 'base_channels': 4,
                    'kernel_sizes': [7, 5, 3, 3], 'strides': [2, 2, 1, 1],
                    'paddings': [3, 2, 1, 1], 'dropout': 0.2},
        'temporal': {'hidden_dim': 32, 'num_layers': 2, 'dropout': 0.2},
    }
    key = jax.random.PRNGKey(0)
    pkey, xkey = jax.random.split(key)
    params = init_params(pkey, config)
    prepped = prepare_params(params, config)        # one-time weight prep

    # x: [batch=2, input_channels=1, time=64]  (NCT, like the PyTorch module)
    x = jax.random.normal(xkey, (2, 1, 64), jnp.float32)

    fwd = jax.jit(functools.partial(cnn_lstm_transcriber_forward, config=config))
    out = fwd(prepped, x)
    out = jax.block_until_ready(out)

    # Encoder strides (2,2,1,1) reduce T: 64 -> 32 -> 16 -> 16 -> 16
    assert out['onset_logits'].shape == (2, 16)
    assert out['onset_probs'].shape == (2, 16)
    assert out['velocities'].shape == (2, 16)
    assert bool(jnp.all(jnp.isfinite(out['onset_logits'])))
    assert bool(jnp.all((out['onset_probs'] >= 0) & (out['onset_probs'] <= 1)))
    assert bool(jnp.all((out['velocities'] >= 0) & (out['velocities'] <= 1)))

    print("KERNEL_OK")
</pallas_src>

<mosaic_0001>
module attributes {stable_mosaic.version = 11 : i64} {
  func.func @_fused_forward_kernel(%arg0: memref<2x70x1xf32, #tpu.memory_space<vmem>>, %arg1: memref<7x4xf32, #tpu.memory_space<vmem>>, %arg2: memref<1x4xf32, #tpu.memory_space<vmem>>, %arg3: memref<1x4xf32, #tpu.memory_space<vmem>>, %arg4: memref<20x8xf32, #tpu.memory_space<vmem>>, %arg5: memref<1x8xf32, #tpu.memory_space<vmem>>, %arg6: memref<1x8xf32, #tpu.memory_space<vmem>>, %arg7: memref<24x16xf32, #tpu.memory_space<vmem>>, %arg8: memref<1x16xf32, #tpu.memory_space<vmem>>, %arg9: memref<1x16xf32, #tpu.memory_space<vmem>>, %arg10: memref<48x32xf32, #tpu.memory_space<vmem>>, %arg11: memref<1x32xf32, #tpu.memory_space<vmem>>, %arg12: memref<1x32xf32, #tpu.memory_space<vmem>>, %arg13: memref<32x256xf32, #tpu.memory_space<vmem>>, %arg14: memref<1x256xf32, #tpu.memory_space<vmem>>, %arg15: memref<64x128xf32, #tpu.memory_space<vmem>>, %arg16: memref<64x256xf32, #tpu.memory_space<vmem>>, %arg17: memref<1x256xf32, #tpu.memory_space<vmem>>, %arg18: memref<64x128xf32, #tpu.memory_space<vmem>>, %arg19: memref<64x9xf32, #tpu.memory_space<vmem>>, %arg20: memref<1x9xf32, #tpu.memory_space<vmem>>, %arg21: memref<8x1xf32, #tpu.memory_space<vmem>>, %arg22: memref<1x1xf32, #tpu.memory_space<vmem>>, %arg23: memref<32x3xf32, #tpu.memory_space<vmem>>, %arg24: memref<2x36x4xf32, #tpu.memory_space<vmem>>, %arg25: memref<2x18x8xf32, #tpu.memory_space<vmem>>, %arg26: memref<2x18x16xf32, #tpu.memory_space<vmem>>, %arg27: memref<64x128xf32, #tpu.memory_space<vmem>>, %arg28: memref<32x64xf32, #tpu.memory_space<vmem>>) attributes {dimension_semantics = [], scalar_prefetch = 0 : i64, scratch_operands = 5 : i64, tpu.core_type = #tpu.core_type<tc>} {
    %cst = arith.constant 0.000000e+00 : f32
    %0 = vector.broadcast %cst : f32 to vector<2x36x4xf32>
    %c0 = arith.constant 0 : index
    %c0_0 = arith.constant 0 : index
    %c0_1 = arith.constant 0 : index
    %1 = vector.load %arg24[%c0, %c0_0, %c0_1] : memref<2x36x4xf32, #tpu.memory_space<vmem>>, vector<2x36x4xf32>
    tpu.vector_store %arg24[%c0, %c0_0, %c0_1], %0 {strides = array<i32>} : memref<2x36x4xf32, #tpu.memory_space<vmem>>, vector<2x36x4xf32>,
    %cst_2 = arith.constant 0.000000e+00 : f32
    %2 = vector.broadcast %cst_2 : f32 to vector<2x18x8xf32>
    %c0_3 = arith.constant 0 : index
    %c0_4 = arith.constant 0 : index
    %c0_5 = arith.constant 0 : index
    %3 = vector.load %arg25[%c0_3, %c0_4, %c0_5] : memref<2x18x8xf32, #tpu.memory_space<vmem>>, vector<2x18x8xf32>
    tpu.vector_store %arg25[%c0_3, %c0_4, %c0_5], %2 {strides = array<i32>} : memref<2x18x8xf32, #tpu.memory_space<vmem>>, vector<2x18x8xf32>,
    %cst_6 = arith.constant 0.000000e+00 : f32
    %4 = vector.broadcast %cst_6 : f32 to vector<2x18x16xf32>
    %c0_7 = arith.constant 0 : index
    %c0_8 = arith.constant 0 : index
    %c0_9 = arith.constant 0 : index
    %5 = vector.load %arg26[%c0_7, %c0_8, %c0_9] : memref<2x18x16xf32, #tpu.memory_space<vmem>>, vector<2x18x16xf32>
    tpu.vector_store %arg26[%c0_7, %c0_8, %c0_9], %4 {strides = array<i32>} : memref<2x18x16xf32, #tpu.memory_space<vmem>>, vector<2x18x16xf32>,
    %6 = tpu.iota {dimensions = array<i32: 0>} : vector<32x64xi32>
    %7 = tpu.iota {dimensions = array<i32: 1>} : vector<32x64xi32>
    %c2_i32 = arith.constant 2 : i32
    %8 = vector.broadcast %c2_i32 : i32 to vector<32x64xi32>
    %9 = arith.muli %8, %6 : vector<32x64xi32>
    %10 = arith.cmpi eq, %7, %9 : vector<32x64xi32>
    %11 = arith.extui %10 : vector<32x64xi1> to vector<32x64xi32>
    %12 = arith.sitofp %11 : vector<32x64xi32> to vector<32x64xf32>
    %13 = tpu.iota {dimensions = array<i32: 0>} : vector<16x32xi32>
    %14 = tpu.iota {dimensions = array<i32: 1>} : vector<16x32xi32>
    %c2_i32_10 = arith.constant 2 : i32
    %15 = vector.broadcast %c2_i32_10 : i32 to vector<16x32xi32>
    %16 = arith.muli %15, %13 : vector<16x32xi32>
    %17 = arith.cmpi eq, %14, %16 : vector<16x32xi32>
    %18 = arith.extui %17 : vector<16x32xi1> to vector<16x32xi32>
    %19 = arith.sitofp %18 : vector<16x32xi32> to vector<16x32xf32>
    %c0_11 = arith.constant 0 : index
    %c0_12 = arith.constant 0 : index
    %20 = vector.load %arg13[%c0_11, %c0_12] : memref<32x256xf32, #tpu.memory_space<vmem>>, vector<32x256xf32>
    %c0_13 = arith.constant 0 : index
    %c0_14 = arith.constant 0 : index
    %21 = vector.load %arg14[%c0_13, %c0_14] : memref<1x256xf32, #tpu.memory_space<vmem>>, vector<1x256xf32>
    %cst_15 = arith.constant 0.000000e+00 : f32
    %22 = vector.broadcast %cst_15 : f32 to vector<64x4xf32>
    %c0_16 = arith.constant 0 : index
    %c0_17 = arith.constant 0 : index
    %c0_18 = arith.constant 0 : index
    %23 = vector.load %arg0[%c0_16, %c0_17, %c0_18] : memref<2x70x1xf32, #tpu.memory_space<vmem>>, vector<1x64x1xf32>
    %24 = vector.shape_cast %23 : vector<1x64x1xf32> to vector<64x1xf32>
    %c0_19 = arith.constant 0 : index
    %c0_20 = arith.constant 0 : index
    %25 = vector.load %arg1[%c0_19, %c0_20] : memref<7x4xf32, #tpu.memory_space<vmem>>, vector<1x4xf32>
    %26 = vector.broadcast %24 : vector<64x1xf32> to vector<64x4xf32>
    %27 = vector.broadcast %25 : vector<1x4xf32> to vector<64x4xf32>
    %28 = arith.mulf %26, %27 : vector<64x4xf32>
    %29 = arith.addf %22, %28 : vector<64x4xf32>
    %c0_21 = arith.constant 0 : index
    %c1 = arith.constant 1 : index
    %c0_22 = arith.constant 0 : index
    %30 = vector.load %arg0[%c0_21, %c1, %c0_22] : memref<2x70x1xf32, #tpu.memory_space<vmem>>, vector<1x64x1xf32>
    %31 = vector.shape_cast %30 : vector<1x64x1xf32> to vector<64x1xf32>
    %c1_23 = arith.constant 1 : index
    %c0_24 = arith.constant 0 : index
    %32 = vector.load %arg1[%c1_23, %c0_24] : memref<7x4xf32, #tpu.memory_space<vmem>>, vector<1x4xf32>
    %33 = vector.broadcast %31 : vector<64x1xf32> to vector<64x4xf32>
    %34 = vector.broadcast %32 : vector<1x4xf32> to vector<64x4xf32>
    %35 = arith.mulf %33, %34 : vector<64x4xf32>
    %36 = arith.addf %29, %35 : vector<64x4xf32>
    %c0_25 = arith.constant 0 : index
    %c2 = arith.constant 2 : index
    %c0_26 = arith.constant 0 : index
    %37 = vector.load %arg0[%c0_25, %c2, %c0_26] : memref<2x70x1xf32, #tpu.memory_space<vmem>>, vector<1x64x1xf32>
    %38 = vector.shape_cast %37 : vector<1x64x1xf32> to vector<64x1xf32>
    %c2_27 = arith.constant 2 : index
    %c0_28 = arith.constant 0 : index
    %39 = vector.load %arg1[%c2_27, %c0_28] : memref<7x4xf32, #tpu.memory_space<vmem>>, vector<1x4xf32>
    %40 = vector.broadcast %38 : vector<64x1xf32> to vector<64x4xf32>
    %41 = vector.broadcast %39 : vector<1x4xf32> to vector<64x4xf32>
    %42 = arith.mulf %40, %41 : vector<64x4xf32>
    %43 = arith.addf %36, %42 : vector<64x4xf32>
    %c0_29 = arith.constant 0 : index
    %c3 = arith.constant 3 : index
    %c0_30 = arith.constant 0 : index
    %44 = vector.load %arg0[%c0_29, %c3, %c0_30] : memref<2x70x1xf32, #tpu.memory_space<vmem>>, vector<1x64x1xf32>
    %45 = vector.shape_cast %44 : vector<1x64x1xf32> to vector<64x1xf32>
    %c3_31 = arith.constant 3 : index
    %c0_32 = arith.constant 0 : index
    %46 = vector.load %arg1[%c3_31, %c0_32] : memref<7x4xf32, #tpu.memory_space<vmem>>, vector<1x4xf32>
    %47 = vector.broadcast %45 : vector<64x1xf32> to vector<64x4xf32>
    %48 = vector.broadcast %46 : vector<1x4xf32> to vector<64x4xf32>
    %49 = arith.mulf %47, %48 : vector<64x4xf32>
    %50 = arith.addf %43, %49 : vector<64x4xf32>
    %c0_33 = arith.constant 0 : index
    %c4 = arith.constant 4 : index
    %c0_34 = arith.constant 0 : index
    %51 = vector.load %arg0[%c0_33, %c4, %c0_34] : memref<2x70x1xf32, #tpu.memory_space<vmem>>, vector<1x64x1xf32>
    %52 = vector.shape_cast %51 : vector<1x64x1xf32> to vector<64x1xf32>
    %c4_35 = arith.constant 4 : index
    %c0_36 = arith.constant 0 : index
    %53 = vector.load %arg1[%c4_35, %c0_36] : memref<7x4xf32, #tpu.memory_space<vmem>>, vector<1x4xf32>
    %54 = vector.broadcast %52 : vector<64x1xf32> to vector<64x4xf32>
    %55 = vector.broadcast %53 : vector<1x4xf32> to vector<64x4xf32>
    %56 = arith.mulf %54, %55 : vector<64x4xf32>
    %57 = arith.addf %50, %56 : vector<64x4xf32>
    %c0_37 = arith.constant 0 : index
    %c5 = arith.constant 5 : index
    %c0_38 = arith.constant 0 : index
    %58 = vector.load %arg0[%c0_37, %c5, %c0_38] : memref<2x70x1xf32, #tpu.memory_space<vmem>>, vector<1x64x1xf32>
    %59 = vector.shape_cast %58 : vector<1x64x1xf32> to vector<64x1xf32>
    %c5_39 = arith.constant 5 : index
    %c0_40 = arith.constant 0 : index
    %60 = vector.load %arg1[%c5_39, %c0_40] : memref<7x4xf32, #tpu.memory_space<vmem>>, vector<1x4xf32>
    %61 = vector.broadcast %59 : vector<64x1xf32> to vector<64x4xf32>
    %62 = vector.broadcast %60 : vector<1x4xf32> to vector<64x4xf32>
    %63 = arith.mulf %61, %62 : vector<64x4xf32>
    %64 = arith.addf %57, %63 : vector<64x4xf32>
    %c0_41 = arith.constant 0 : index
    %c6 = arith.constant 6 : index
    %c0_42 = arith.constant 0 : index
    %65 = vector.load %arg0[%c0_41, %c6, %c0_42] : memref<2x70x1xf32, #tpu.memory_space<vmem>>, vector<1x64x1xf32>
    %66 = vector.shape_cast %65 : vector<1x64x1xf32> to vector<64x1xf32>
    %c6_43 = arith.constant 6 : index
    %c0_44 = arith.constant 0 : index
    %67 = vector.load %arg1[%c6_43, %c0_44] : memref<7x4xf32, #tpu.memory_space<vmem>>, vector<1x4xf32>
    %68 = vector.broadcast %66 : vector<64x1xf32> to vector<64x4xf32>
    %69 = vector.broadcast %67 : vector<1x4xf32> to vector<64x4xf32>
    %70 = arith.mulf %68, %69 : vector<64x4xf32>
    %71 = arith.addf %64, %70 : vector<64x4xf32>
    %cst_45 = arith.constant dense<0.000000e+00> : vector<32x4xf32>
    %72 = tpu.matmul %12, %71, %cst_45 {dimension_numbers = #tpu.dot_dimension_numbers<[1], [0], [0], [1], [0, 0, 1, 1], [], []>} : vector<32x64xf32>, vector<64x4xf32>, vector<32x4xf32> -> vector<32x4xf32>
    %c0_46 = arith.constant 0 : index
    %c0_47 = arith.constant 0 : index
    %73 = vector.load %arg2[%c0_46, %c0_47] : memref<1x4xf32, #tpu.memory_space<vmem>>, vector<1x4xf32>
    %74 = vector.broadcast %73 : vector<1x4xf32> to vector<32x4xf32>
    %75 = arith.mulf %72, %74 : vector<32x4xf32>
    %c0_48 = arith.constant 0 : index
    %c0_49 = arith.constant 0 : index
    %76 = vector.load %arg3[%c0_48, %c0_49] : memref<1x4xf32, #tpu.memory_space<vmem>>, vector<1x4xf32>
    %77 = vector.broadcast %76 : vector<1x4xf32> to vector<32x4xf32>
    %78 = arith.addf %75, %77 : vector<32x4xf32>
    %cst_50 = arith.constant 0.000000e+00 : f32
    %79 = vector.broadcast %cst_50 : f32 to vector<32x4xf32>
    %80 = arith.cmpf ogt, %78, %79 : vector<32x4xf32>
    %cst_51 = arith.constant 1.000000e-01 : f32
    %81 = vector.broadcast %cst_51 : f32 to vector<32x4xf32>
    %82 = arith.mulf %81, %78 : vector<32x4xf32>
    %83 = arith.select %80, %78, %82 : vector<32x4xi1>, vector<32x4xf32>
    %c0_52 = arith.constant 0 : index
    %c2_53 = arith.constant 2 : index
    %c0_54 = arith.constant 0 : index
    %84 = vector.load %arg24[%c0_52, %c2_53, %c0_54] : memref<2x36x4xf32, #tpu.memory_space<vmem>>, vector<1x32x4xf32>
    %85 = vector.shape_cast %84 : vector<1x32x4xf32> to vector<32x4xf32>
    %86 = vector.shape_cast %83 : vector<32x4xf32> to vector<1x32x4xf32>
    tpu.vector_store %arg24[%c0_52, %c2_53, %c0_54], %86 {strides = array<i32>} : memref<2x36x4xf32, #tpu.memory_space<vmem>>, vector<1x32x4xf32>,
    %cst_55 = arith.constant 0.000000e+00 : f32
    %87 = vector.broadcast %cst_55 : f32 to vector<32x8xf32>
    %c0_56 = arith.constant 0 : index
    %c0_57 = arith.constant 0 : index
    %c0_58 = arith.constant 0 : index
    %88 = vector.load %arg24[%c0_56, %c0_57, %c0_58] : memref<2x36x4xf32, #tpu.memory_space<vmem>>, vector<1x32x4xf32>
    %89 = vector.shape_cast %88 : vector<1x32x4xf32> to vector<32x4xf32>
    %c0_59 = arith.constant 0 : index
    %c0_60 = arith.constant 0 : index
    %90 = vector.load %arg4[%c0_59, %c0_60] : memref<20x8xf32, #tpu.memory_space<vmem>>, vector<4x8xf32>
    %cst_61 = arith.constant dense<0.000000e+00> : vector<32x8xf32>
    %91 = tpu.matmul %89, %90, %cst_61 {dimension_numbers = #tpu.dot_dimension_numbers<[1], [0], [0], [1], [0, 0, 1, 1], [], []>} : vector<32x4xf32>, vector<4x8xf32>, vector<32x8xf32> -> vector<32x8xf32>
    %92 = arith.addf %87, %91 : vector<32x8xf32>
    %c0_62 = arith.constant 0 : index
    %c1_63 = arith.constant 1 : index
    %c0_64 = arith.constant 0 : index
    %93 = vector.load %arg24[%c0_62, %c1_63, %c0_64] : memref<2x36x4xf32, #tpu.memory_space<vmem>>, vector<1x32x4xf32>
    %94 = vector.shape_cast %93 : vector<1x32x4xf32> to vector<32x4xf32>
    %c4_65 = arith.constant 4 : index
    %c0_66 = arith.constant 0 : index
    %95 = vector.load %arg4[%c4_65, %c0_66] : memref<20x8xf32, #tpu.memory_space<vmem>>, vector<4x8xf32>
    %cst_67 = arith.constant dense<0.000000e+00> : vector<32x8xf32>
    %96 = tpu.matmul %94, %95, %cst_67 {dimension_numbers = #tpu.dot_dimension_numbers<[1], [0], [0], [1], [0, 0, 1, 1], [], []>} : vector<32x4xf32>, vector<4x8xf32>, vector<32x8xf32> -> vector<32x8xf32>
    %97 = arith.addf %92, %96 : vector<32x8xf32>
    %c0_68 = arith.constant 0 : index
    %c2_69 = arith.constant 2 : index
    %c0_70 = arith.constant 0 : index
    %98 = vector.load %arg24[%c0_68, %c2_69, %c0_70] : memref<2x36x4xf32, #tpu.memory_space<vmem>>, vector<1x32x4xf32>
    %99 = vector.shape_cast %98 : vector<1x32x4xf32> to vector<32x4xf32>
    %c8 = arith.constant 8 : index
    %c0_71 = arith.constant 0 : index
    %100 = vector.load %arg4[%c8, %c0_71] : memref<20x8xf32, #tpu.memory_space<vmem>>, vector<4x8xf32>
    %cst_72 = arith.constant dense<0.000000e+00> : vector<32x8xf32>
    %101 = tpu.matmul %99, %100, %cst_72 {dimension_numbers = #tpu.dot_dimension_numbers<[1], [0], [0], [1], [0, 0, 1, 1], [], []>} : vector<32x4xf32>, vector<4x8xf32>, vector<32x8xf32> -> vector<32x8xf32>
    %102 = arith.addf %97, %101 : vector<32x8xf32>
    %c0_73 = arith.constant 0 : index
    %c3_74 = arith.constant 3 : index
    %c0_75 = arith.constant 0 : index
    %103 = vector.load %arg24[%c0_73, %c3_74, %c0_75] : memref<2x36x4xf32, #tpu.memory_space<vmem>>, vector<1x32x4xf32>
    %104 = vector.shape_cast %103 : vector<1x32x4xf32> to vector<32x4xf32>
    %c12 = arith.constant 12 : index
    %c0_76 = arith.constant 0 : index
    %105 = vector.load %arg4[%c12, %c0_76] : memref<20x8xf32, #tpu.memory_space<vmem>>, vector<4x8xf32>
    %cst_77 = arith.constant dense<0.000000e+00> : vector<32x8xf32>
    %106 = tpu.matmul %104, %105, %cst_77 {dimension_numbers = #tpu.dot_dimension_numbers<[1], [0], [0], [1], [0, 0, 1, 1], [], []>} : vector<32x4xf32>, vector<4x8xf32>, vector<32x8xf32> -> vector<32x8xf32>
    %107 = arith.addf %102, %106 : vector<32x8xf32>
    %c0_78 = arith.constant 0 : index
    %c4_79 = arith.constant 4 : index
    %c0_80 = arith.constant 0 : index
    %108 = vector.load %arg24[%c0_78, %c4_79, %c0_80] : memref<2x36x4xf32, #tpu.memory_space<vmem>>, vector<1x32x4xf32>
    %109 = vector.shape_cast %108 : vector<1x32x4xf32> to vector<32x4xf32>
    %c16 = arith.constant 16 : index
    %c0_81 = arith.constant 0 : index
    %110 = vector.load %arg4[%c16, %c0_81] : memref<20x8xf32, #tpu.memory_space<vmem>>, vector<4x8xf32>
    %cst_82 = arith.constant dense<0.000000e+00> : vector<32x8xf32>
    %111 = tpu.matmul %109, %110, %cst_82 {dimension_numbers = #tpu.dot_dimension_numbers<[1], [0], [0], [1], [0, 0, 1, 1], [], []>} : vector<32x4xf32>, vector<4x8xf32>, vector<32x8xf32> -> vector<32x8xf32>
    %112 = arith.addf %107, %111 : vector<32x8xf32>
    %cst_83 = arith.constant dense<0.000000e+00> : vector<16x8xf32>
    %113 = tpu.matmul %19, %112, %cst_83 {dimension_numbers = #tpu.dot_dimension_numbers<[1], [0], [0], [1], [0, 0, 1, 1], [], []>} : vector<16x32xf32>, vector<32x8xf32>, vector<16x8xf32> -> vector<16x8xf32>
    %c0_84 = arith.constant 0 : index
    %c0_85 = arith.constant 0 : index
    %114 = vector.load %arg5[%c0_84, %c0_85] : memref<1x8xf32, #tpu.memory_space<vmem>>, vector<1x8xf32>
    %115 = vector.broadcast %114 : vector<1x8xf32> to vector<16x8xf32>
    %116 = arith.mulf %113, %115 : vector<16x8xf32>
    %c0_86 = arith.constant 0 : index
    %c0_87 = arith.constant 0 : index
    %117 = vector.load %arg6[%c0_86, %c0_87] : memref<1x8xf32, #tpu.memory_space<vmem>>, vector<1x8xf32>
    %118 = vector.broadcast %117 : vector<1x8xf32> to vector<16x8xf32>
    %119 = arith.addf %116, %118 : vector<16x8xf32>
    %cst_88 = arith.constant 0.000000e+00 : f32
    %120 = vector.broadcast %cst_88 : f32 to vector<16x8xf32>
    %121 = arith.cmpf ogt, %119, %120 : vector<16x8xf32>
    %cst_89 = arith.constant 1.000000e-01 : f32
    %122 = vector.broadcast %cst_89 : f32 to vector<16x8xf32>
    %123 = arith.mulf %122, %119 : vector<16x8xf32>
    %124 = arith.select %121, %119, %123 : vector<16x8xi1>, vector<16x8xf32>
    %c0_90 = arith.constant 0 : index
    %c1_91 = arith.constant 1 : index
    %c0_92 = arith.constant 0 : index
    %125 = vector.load %arg25[%c0_90, %c1_91, %c0_92] : memref<2x18x8xf32, #tpu.memory_space<vmem>>, vector<1x16x8xf32>
    %126 = vector.shape_cast %125 : vector<1x16x8xf32> to vector<16x8xf32>
    %127 = vector.shape_cast %124 : vector<16x8xf32> to vector<1x16x8xf32>
    tpu.vector_store %arg25[%c0_90, %c1_91, %c0_92], %127 {strides = array<i32>} : memref<2x18x8xf32, #tpu.memory_space<vmem>>, vector<1x16x8xf32>,
    %cst_93 = arith.constant 0.000000e+00 : f32
    %128 = vector.broadcast %cst_93 : f32 to vector<16x16xf32>
    %c0_94 = arith.constant 0 : index
    %c0_95 = arith.constant 0 : index
    %c0_96 = arith.constant 0 : index
    %129 = vector.load %arg25[%c0_94, %c0_95, %c0_96] : memref<2x18x8xf32, #tpu.memory_space<vmem>>, vector<1x16x8xf32>
    %130 = vector.shape_cast %129 : vector<1x16x8xf32> to vector<16x8xf32>
    %c0_97 = arith.constant 0 : index
    %c0_98 = arith.constant 0 : index
    %131 = vector.load %arg7[%c0_97, %c0_98] : memref<24x16xf32, #tpu.memory_space<vmem>>, vector<8x16xf32>
    %cst_99 = arith.constant dense<0.000000e+00> : vector<16x16xf32>
    %132 = tpu.matmul %130, %131, %cst_99 {dimension_numbers = #tpu.dot_dimension_numbers<[1], [0], [0], [1], [0, 0, 1, 1], [], []>} : vector<16x8xf32>, vector<8x16xf32>, vector<16x16xf32> -> vector<16x16xf32>
    %133 = arith.addf %128, %132 : vector<16x16xf32>
    %c0_100 = arith.constant 0 : index
    %c1_101 = arith.constant 1 : index
    %c0_102 = arith.constant 0 : index
    %134 = vector.load %arg25[%c0_100, %c1_101, %c0_102] : memref<2x18x8xf32, #tpu.memory_space<vmem>>, vector<1x16x8xf32>
    %135 = vector.shape_cast %134 : vector<1x16x8xf32> to vector<16x8xf32>
    %c8_103 = arith.constant 8 : index
    %c0_104 = arith.constant 0 : index
    %136 = vector.load %arg7[%c8_103, %c0_104] : memref<24x16xf32, #tpu.memory_space<vmem>>, vector<8x16xf32>
    %cst_105 = arith.constant dense<0.000000e+00> : vector<16x16xf32>
    %137 = tpu.matmul %135, %136, %cst_105 {dimension_numbers = #tpu.dot_dimension_numbers<[1], [0], [0], [1], [0, 0, 1, 1], [], []>} : vector<16x8xf32>, vector<8x16xf32>, vector<16x16xf32> -> vector<16x16xf32>
    %138 = arith.addf %133, %137 : vector<16x16xf32>
    %c0_106 = arith.constant 0 : index
    %c2_107 = arith.constant 2 : index
    %c0_108 = arith.constant 0 : index
    %139 = vector.load %arg25[%c0_106, %c2_107, %c0_108] : memref<2x18x8xf32, #tpu.memory_space<vmem>>, vector<1x16x8xf32>
    %140 = vector.shape_cast %139 : vector<1x16x8xf32> to vector<16x8xf32>
    %c16_109 = arith.constant 16 : index
    %c0_110 = arith.constant 0 : index
    %141 = vector.load %arg7[%c16_109, %c0_110] : memref<24x16xf32, #tpu.memory_space<vmem>>, vector<8x16xf32>
    %cst_111 = arith.constant dense<0.000000e+00> : vector<16x16xf32>
    %142 = tpu.matmul %140, %141, %cst_111 {dimension_numbers = #tpu.dot_dimension_numbers<[1], [0], [0], [1], [0, 0, 1, 1], [], []>} : vector<16x8xf32>, vector<8x16xf32>, vector<16x16xf32> -> vector<16x16xf32>
    %143 = arith.addf %138, %142 : vector<16x16xf32>
    %c0_112 = arith.constant 0 : index
    %c0_113 = arith.constant 0 : index
    %144 = vector.load %arg8[%c0_112, %c0_113] : memref<1x16xf32, #tpu.memory_space<vmem>>, vector<1x16xf32>
    %145 = vector.broadcast %144 : vector<1x16xf32> to vector<16x16xf32>
    %146 = arith.mulf %143, %145 : vector<16x16xf32>
    %c0_114 = arith.constant 0 : index
    %c0_115 = arith.constant 0 : index
    %147 = vector.load %arg9[%c0_114, %c0_115] : memref<1x16xf32, #tpu.memory_space<vmem>>, vector<1x16xf32>
    %148 = vector.broadcast %147 : vector<1x16xf32> to vector<16x16xf32>
    %149 = arith.addf %146, %148 : vector<16x16xf32>
    %cst_116 = arith.constant 0.000000e+00 : f32
    %150 = vector.broadcast %cst_116 : f32 to vector<16x16xf32>
    %151 = arith.cmpf ogt, %149, %150 : vector<16x16xf32>
    %cst_117 = arith.constant 1.000000e-01 : f32
    %152 = vector.broadcast %cst_117 : f32 to vector<16x16xf32>
    %153 = arith.mulf %152, %149 : vector<16x16xf32>
    %154 = arith.select %151, %149, %153 : vector<16x16xi1>, vector<16x16xf32>
    %c0_118 = arith.constant 0 : index
    %c1_119 = arith.constant 1 : index
    %c0_120 = arith.constant 0 : index
    %155 = vector.load %arg26[%c0_118, %c1_119, %c0_120] : memref<2x18x16xf32, #tpu.memory_space<vmem>>, vector<1x16x16xf32>
    %156 = vector.shape_cast %155 : vector<1x16x16xf32> to vector<16x16xf32>
    %157 = vector.shape_cast %154 : vector<16x16xf32> to vector<1x16x16xf32>
    tpu.vector_store %arg26[%c0_118, %c1_119, %c0_120], %157 {strides = array<i32>} : memref<2x18x16xf32, #tpu.memory_space<vmem>>, vector<1x16x16xf32>,
    %cst_121 = arith.constant 0.000000e+00 : f32
    %158 = vector.broadcast %cst_121 : f32 to vector<16x32xf32>
    %c0_122 = arith.constant 0 : index
    %c0_123 = arith.constant 0 : index
    %c0_124 = arith.constant 0 : index
    %159 = vector.load %arg26[%c0_122, %c0_123, %c0_124] : memref<2x18x16xf32, #tpu.memory_space<vmem>>, vector<1x16x16xf32>
    %160 = vector.shape_cast %159 : vector<1x16x16xf32> to vector<16x16xf32>
    %c0_125 = arith.constant 0 : index
    %c0_126 = arith.constant 0 : index
    %161 = vector.load %arg10[%c0_125, %c0_126] : memref<48x32xf32, #tpu.memory_space<vmem>>, vector<16x32xf32>
    %cst_127 = arith.constant dense<0.000000e+00> : vector<16x32xf32>
    %162 = tpu.matmul %160, %161, %cst_127 {dimension_numbers = #tpu.dot_dimension_numbers<[1], [0], [0], [1], [0, 0, 1, 1], [], []>} : vector<16x16xf32>, vector<16x32xf32>, vector<16x32xf32> -> vector<16x32xf32>
    %163 = arith.addf %158, %162 : vector<16x32xf32>
    %c0_128 = arith.constant 0 : index
    %c1_129 = arith.constant 1 : index
    %c0_130 = arith.constant 0 : index
    %164 = vector.load %arg26[%c0_128, %c1_129, %c0_130] : memref<2x18x16xf32, #tpu.memory_space<vmem>>, vector<1x16x16xf32>
    %165 = vector.shape_cast %164 : vector<1x16x16xf32> to vector<16x16xf32>
    %c16_131 = arith.constant 16 : index
    %c0_132 = arith.constant 0 : index
    %166 = vector.load %arg10[%c16_131, %c0_132] : memref<48x32xf32, #tpu.memory_space<vmem>>, vector<16x32xf32>
    %cst_133 = arith.constant dense<0.000000e+00> : vector<16x32xf32>
    %167 = tpu.matmul %165, %166, %cst_133 {dimension_numbers = #tpu.dot_dimension_numbers<[1], [0], [0], [1], [0, 0, 1, 1], [], []>} : vector<16x16xf32>, vector<16x32xf32>, vector<16x32xf32> -> vector<16x32xf32>
    %168 = arith.addf %163, %167 : vector<16x32xf32>
    %c0_134 = arith.constant 0 : index
    %c2_135 = arith.constant 2 : index
    %c0_136 = arith.constant 0 : index
    %169 = vector.load %arg26[%c0_134, %c2_135, %c0_136] : memref<2x18x16xf32, #tpu.memory_space<vmem>>, vector<1x16x16xf32>
    %170 = vector.shape_cast %169 : vector<1x16x16xf32> to vector<16x16xf32>
    %c32 = arith.constant 32 : index
    %c0_137 = arith.constant 0 : index
    %171 = vector.load %arg10[%c32, %c0_137] : memref<48x32xf32, #tpu.memory_space<vmem>>, vector<16x32xf32>
    %cst_138 = arith.constant dense<0.000000e+00> : vector<16x32xf32>
    %172 = tpu.matmul %170, %171, %cst_138 {dimension_numbers = #tpu.dot_dimension_numbers<[1], [0], [0], [1], [0, 0, 1, 1], [], []>} : vector<16x16xf32>, vector<16x32xf32>, vector<16x32xf32> -> vector<16x32xf32>
    %173 = arith.addf %168, %172 : vector<16x32xf32>
    %c0_139 = arith.constant 0 : index
    %c0_140 = arith.constant 0 : index
    %174 = vector.load %arg11[%c0_139, %c0_140] : memref<1x32xf32, #tpu.memory_space<vmem>>, vector<1x32xf32>
    %175 = vector.broadcast %174 : vector<1x32xf32> to vector<16x32xf32>
    %176 = arith.mulf %173, %175 : vector<16x32xf32>
    %c0_141 = arith.constant 0 : index
    %c0_142 = arith.constant 0 : index
    %177 = vector.load %arg12[%c0_141, %c0_142] : memref<1x32xf32, #tpu.memory_space<vmem>>, vector<1x32xf32>
    %178 = vector.broadcast %177 : vector<1x32xf32> to vector<16x32xf32>
    %179 = arith.addf %176, %178 : vector<16x32xf32>
    %cst_143 = arith.constant 0.000000e+00 : f32
    %180 = vector.broadcast %cst_143 : f32 to vector<16x32xf32>
    %181 = arith.cmpf ogt, %179, %180 : vector<16x32xf32>
    %cst_144 = arith.constant 1.000000e-01 : f32
    %182 = vector.broadcast %cst_144 : f32 to vector<16x32xf32>
    %183 = arith.mulf %182, %179 : vector<16x32xf32>
    %184 = arith.select %181, %179, %183 : vector<16x32xi1>, vector<16x32xf32>
    %cst_145 = arith.constant dense<0.000000e+00> : vector<16x256xf32>
    %185 = tpu.matmul %184, %20, %cst_145 {dimension_numbers = #tpu.dot_dimension_numbers<[1], [0], [0], [1], [0, 0, 1, 1], [], []>} : vector<16x32xf32>, vector<32x256xf32>, vector<16x256xf32> -> vector<16x256xf32>
    %186 = vector.broadcast %21 : vector<1x256xf32> to vector<16x256xf32>
    %187 = arith.addf %185, %186 : vector<16x256xf32>
    %188 = vector.extract_strided_slice %187 {offsets = [0, 0], sizes = [1, 128], strides = [1, 1]} : vector<16x256xf32> to vector<1x128xf32>
    %c0_146 = arith.constant 0 : index
    %c0_147 = arith.constant 0 : index
    %189 = vector.load %arg27[%c0_146, %c0_147] : memref<64x128xf32, #tpu.memory_space<vmem>>, vector<1x128xf32>
    tpu.vector_store %arg27[%c0_146, %c0_147], %188 {strides = array<i32>} : memref<64x128xf32, #tpu.memory_space<vmem>>, vector<1x128xf32>,
    %190 = vector.extract_strided_slice %187 {offsets = [15, 128], sizes = [1, 128], strides = [1, 1]} : vector<16x256xf32> to vector<1x128xf32>
    %c2_148 = arith.constant 2 : index
    %c0_149 = arith.constant 0 : index
    %191 = vector.load %arg27[%c2_148, %c0_149] : memref<64x128xf32, #tpu.memory_space<vmem>>, vector<1x128xf32>
    tpu.vector_store %arg27[%c2_148, %c0_149], %190 {strides = array<i32>} : memref<64x128xf32, #tpu.memory_space<vmem>>, vector<1x128xf32>,
    %192 = vector.extract_strided_slice %187 {offsets = [1, 0], sizes = [1, 128], strides = [1, 1]} : vector<16x256xf32> to vector<1x128xf32>
    %c4_150 = arith.constant 4 : index
    %c0_151 = arith.constant 0 : index
    %193 = vector.load %arg27[%c4_150, %c0_151] : memref<64x128xf32, #tpu.memory_space<vmem>>, vector<1x128xf32>
    tpu.vector_store %arg27[%c4_150, %c0_151], %192 {strides = array<i32>} : memref<64x128xf32, #tpu.memory_space<vmem>>, vector<1x128xf32>,
    %194 = vector.extract_strided_slice %187 {offsets = [14, 128], sizes = [1, 128], strides = [1, 1]} : vector<16x256xf32> to vector<1x128xf32>
    %c6_152 = arith.constant 6 : index
    %c0_153 = arith.constant 0 : index
    %195 = vector.load %arg27[%c6_152, %c0_153] : memref<64x128xf32, #tpu.memory_space<vmem>>, vector<1x128xf32>
    tpu.vector_store %arg27[%c6_152, %c0_153], %194 {strides = array<i32>} : memref<64x128xf32, #tpu.memory_space<vmem>>, vector<1x128xf32>,
    %196 = vector.extract_strided_slice %187 {offsets = [2, 0], sizes = [1, 128], strides = [1, 1]} : vector<16x256xf32> to vector<1x128xf32>
    %c8_154 = arith.constant 8 : index
    %c0_155 = arith.constant 0 : index
    %197 = vector.load %arg27[%c8_154, %c0_155] : memref<64x128xf32, #tpu.memory_space<vmem>>, vector<1x128xf32>
    tpu.vector_store %arg27[%c8_154, %c0_155], %196 {strides = array<i32>} : memref<64x128xf32, #tpu.memory_space<vmem>>, vector<1x128xf32>,
    %198 = vector.extract_strided_slice %187 {offsets = [13, 128], sizes = [1, 128], strides = [1, 1]} : vector<16x256xf32> to vector<1x128xf32>
    %c10 = arith.constant 10 : index
    %c0_156 = arith.constant 0 : index
    %199 = vector.load %arg27[%c10, %c0_156] : memref<64x128xf32, #tpu.memory_space<vmem>>, vector<1x128xf32>
    tpu.vector_store %arg27[%c10, %c0_156], %198 {strides = array<i32>} : memref<64x128xf32, #tpu.memory_space<vmem>>, vector<1x128xf32>,
    %200 = vector.extract_strided_slice %187 {offsets = [3, 0], sizes = [1, 128], strides = [1, 1]} : vector<16x256xf32> to vector<1x128xf32>
    %c12_157 = arith.constant 12 : index
    %c0_158 = arith.constant 0 : index
    %201 = vector.load %arg27[%c12_157, %c0_158] : memref<64x128xf32, #tpu.memory_space<vmem>>, vector<1x128xf32>
    tpu.vector_store %arg27[%c12_157, %c0_158], %200 {strides = array<i32>} : memref<64x128xf32, #tpu.memory_space<vmem>>, vector<1x128xf32>,
    %202 = vector.extract_strided_slice %187 {offsets = [12, 128], sizes = [1, 128], strides = [1, 1]} : vector<16x256xf32> to vector<1x128xf32>
    %c14 = arith.constant 14 : index
    %c0_159 = arith.constant 0 : index
    %203 = vector.load %arg27[%c14, %c0_159] : memref<64x128xf32, #tpu.memory_space<vmem>>, vector<1x128xf32>
    tpu.vector_store %arg27[%c14, %c0_159], %202 {strides = array<i32>} : memref<64x128xf32, #tpu.memory_space<vmem>>, vector<1x128xf32>,
    %204 = vector.extract_strided_slice %187 {offsets = [4, 0], sizes = [1, 128], strides = [1, 1]} : vector<16x256xf32> to vector<1x128xf32>
    %c16_160 = arith.constant 16 : index
    %c0_161 = arith.constant 0 : index
    %205 = vector.load %arg27[%c16_160, %c0_161] : memref<64x128xf32, #tpu.memory_space<vmem>>, vector<1x128xf32>
    tpu.vector_store %arg27[%c16_160, %c0_161], %204 {strides = array<i32>} : memref<64x128xf32, #tpu.memory_space<vmem>>, vector<1x128xf32>,
    %206 = vector.extract_strided_slice %187 {offsets = [11, 128], sizes = [1, 128], strides = [1, 1]} : vector<16x256xf32> to vector<1x128xf32>
    %c18 = arith.constant 18 : index
    %c0_162 = arith.constant 0 : index
    %207 = vector.load %arg27[%c18, %c0_162] : memref<64x128xf32, #tpu.memory_space<vmem>>, vector<1x128xf32>
    tpu.vector_store %arg27[%c18, %c0_162], %206 {strides = array<i32>} : memref<64x128xf32, #tpu.memory_space<vmem>>, vector<1x128xf32>,
    %208 = vector.extract_strided_slice %187 {offsets = [5, 0], sizes = [1, 128], strides = [1, 1]} : vector<16x256xf32> to vector<1x128xf32>
    %c20 = arith.constant 20 : index
    %c0_163 = arith.constant 0 : index
    %209 = vector.load %arg27[%c20, %c0_163] : memref<64x128xf32, #tpu.memory_space<vmem>>, vector<1x128xf32>
    tpu.vector_store %arg27[%c20, %c0_163], %208 {strides = array<i32>} : memref<64x128xf32, #tpu.memory_space<vmem>>, vector<1x128xf32>,
    %210 = vector.extract_strided_slice %187 {offsets = [10, 128], sizes = [1, 128], strides = [1, 1]} : vector<16x256xf32> to vector<1x128xf32>
    %c22 = arith.constant 22 : index
    %c0_164 = arith.constant 0 : index
    %211 = vector.load %arg27[%c22, %c0_164] : memref<64x128xf32, #tpu.memory_space<vmem>>, vector<1x128xf32>
    tpu.vector_store %arg27[%c22, %c0_164], %210 {strides = array<i32>} : memref<64x128xf32, #tpu.memory_space<vmem>>, vector<1x128xf32>,
    %212 = vector.extract_strided_slice %187 {offsets = [6, 0], sizes = [1, 128], strides = [1, 1]} : vector<16x256xf32> to vector<1x128xf32>
    %c24 = arith.constant 24 : index
    %c0_165 = arith.constant 0 : index
    %213 = vector.load %arg27[%c24, %c0_165] : memref<64x128xf32, #tpu.memory_space<vmem>>, vector<1x128xf32>
    tpu.vector_store %arg27[%c24, %c0_165], %212 {strides = array<i32>} : memref<64x128xf32, #tpu.memory_space<vmem>>, vector<1x128xf32>,
    %214 = vector.extract_strided_slice %187 {offsets = [9, 128], sizes = [1, 128], strides = [1, 1]} : vector<16x256xf32> to vector<1x128xf32>
    %c26 = arith.constant 26 : index
    %c0_166 = arith.constant 0 : index
    %215 = vector.load %arg27[%c26, %c0_166] : memref<64x128xf32, #tpu.memory_space<vmem>>, vector<1x128xf32>
    tpu.vector_store %arg27[%c26, %c0_166], %214 {strides = array<i32>} : memref<64x128xf32, #tpu.memory_space<vmem>>, vector<1x128xf32>,
    %216 = vector.extract_strided_slice %187 {offsets = [7, 0], sizes = [1, 128], strides = [1, 1]} : vector<16x256xf32> to vector<1x128xf32>
    %c28 = arith.constant 28 : index
    %c0_167 = arith.constant 0 : index
    %217 = vector.load %arg27[%c28, %c0_167] : memref<64x128xf32, #tpu.memory_space<vmem>>, vector<1x128xf32>
    tpu.vector_store %arg27[%c28, %c0_167], %216 {strides = array<i32>} : memref<64x128xf32, #tpu.memory_space<vmem>>, vector<1x128xf32>,
    %218 = vector.extract_strided_slice %187 {offsets = [8, 128], sizes = [1, 128], strides = [1, 1]} : vector<16x256xf32> to vector<1x128xf32>
    %c30 = arith.constant 30 : index
    %c0_168 = arith.constant 0 : index
    %219 = vector.load %arg27[%c30, %c0_168] : memref<64x128xf32, #tpu.memory_space<vmem>>, vector<1x128xf32>
    tpu.vector_store %arg27[%c30, %c0_168], %218 {strides = array<i32>} : memref<64x128xf32, #tpu.memory_space<vmem>>, vector<1x128xf32>,
    %220 = vector.extract_strided_slice %187 {offsets = [8, 0], sizes = [1, 128], strides = [1, 1]} : vector<16x256xf32> to vector<1x128xf32>
    %c32_169 = arith.constant 32 : index
    %c0_170 = arith.constant 0 : index
    %221 = vector.load %arg27[%c32_169, %c0_170] : memref<64x128xf32, #tpu.memory_space<vmem>>, vector<1x128xf32>
    tpu.vector_store %arg27[%c32_169, %c0_170], %220 {strides = array<i32>} : memref<64x128xf32, #tpu.memory_space<vmem>>, vector<1x128xf32>,
    %222 = vector.extract_strided_slice %187 {offsets = [7, 128], sizes = [1, 128], strides = [1, 1]} : vector<16x256xf32> to vector<1x128xf32>
    %c34 = arith.constant 34 : index
    %c0_171 = arith.constant 0 : index
    %223 = vector.load %arg27[%c34, %c0_171] : memref<64x128xf32, #tpu.memory_space<vmem>>, vector<1x128xf32>
    tpu.vector_store %arg27[%c34, %c0_171], %222 {strides = array<i32>} : memref<64x128xf32, #tpu.memory_space<vmem>>, vector<1x128xf32>,
    %224 = vector.extract_strided_slice %187 {offsets = [9, 0], sizes = [1, 128], strides = [1, 1]} : vector<16x256xf32> to vector<1x128xf32>
    %c36 = arith.constant 36 : index
    %c0_172 = arith.constant 0 : index
    %225 = vector.load %arg27[%c36, %c0_172] : memref<64x128xf32, #tpu.memory_space<vmem>>, vector<1x128xf32>
    tpu.vector_store %arg27[%c36, %c0_172], %224 {strides = array<i32>} : memref<64x128xf32, #tpu.memory_space<vmem>>, vector<1x128xf32>,
    %226 = vector.extract_strided_slice %187 {offsets = [6, 128], sizes = [1, 128], strides = [1, 1]} : vector<16x256xf32> to vector<1x128xf32>
    %c38 = arith.constant 38 : index
    %c0_173 = arith.constant 0 : index
    %227 = vector.load %arg27[%c38, %c0_173] : memref<64x128xf32, #tpu.memory_space<vmem>>, vector<1x128xf32>
    tpu.vector_store %arg27[%c38, %c0_173], %226 {strides = array<i32>} : memref<64x128xf32, #tpu.memory_space<vmem>>, vector<1x128xf32>,
    %228 = vector.extract_strided_slice %187 {offsets = [10, 0], sizes = [1, 128], strides = [1, 1]} : vector<16x256xf32> to vector<1x128xf32>
    %c40 = arith.constant 40 : index
    %c0_174 = arith.constant 0 : index
    %229 = vector.load %arg27[%c40, %c0_174] : memref<64x128xf32, #tpu.memory_space<vmem>>, vector<1x128xf32>
    tpu.vector_store %arg27[%c40, %c0_174], %228 {strides = array<i32>} : memref<64x128xf32, #tpu.memory_space<vmem>>, vector<1x128xf32>,
    %230 = vector.extract_strided_slice %187 {offsets = [5, 128], sizes = [1, 128], strides = [1, 1]} : vector<16x256xf32> to vector<1x128xf32>
    %c42 = arith.constant 42 : index
    %c0_175 = arith.constant 0 : index
    %231 = vector.load %arg27[%c42, %c0_175] : memref<64x128xf32, #tpu.memory_space<vmem>>, vector<1x128xf32>
    tpu.vector_store %arg27[%c42, %c0_175], %230 {strides = array<i32>} : memref<64x128xf32, #tpu.memory_space<vmem>>, vector<1x128xf32>,
    %232 = vector.extract_strided_slice %187 {offsets = [11, 0], sizes = [1, 128], strides = [1, 1]} : vector<16x256xf32> to vector<1x128xf32>
    %c44 = arith.constant 44 : index
    %c0_176 = arith.constant 0 : index
    %233 = vector.load %arg27[%c44, %c0_176] : memref<64x128xf32, #tpu.memory_space<vmem>>, vector<1x128xf32>
    tpu.vector_store %arg27[%c44, %c0_176], %232 {strides = array<i32>} : memref<64x128xf32, #tpu.memory_space<vmem>>, vector<1x128xf32>,
    %234 = vector.extract_strided_slice %187 {offsets = [4, 128], sizes = [1, 128], strides = [1, 1]} : vector<16x256xf32> to vector<1x128xf32>
    %c46 = arith.constant 46 : index
    %c0_177 = arith.constant 0 : index
    %235 = vector.load %arg27[%c46, %c0_177] : memref<64x128xf32, #tpu.memory_space<vmem>>, vector<1x128xf32>
    tpu.vector_store %arg27[%c46, %c0_177], %234 {strides = array<i32>} : memref<64x128xf32, #tpu.memory_space<vmem>>, vector<1x128xf32>,
    %236 = vector.extract_strided_slice %187 {offsets = [12, 0], sizes = [1, 128], strides = [1, 1]} : vector<16x256xf32> to vector<1x128xf32>
    %c48 = arith.constant 48 : index
    %c0_178 = arith.constant 0 : index
    %237 = vector.load %arg27[%c48, %c0_178] : memref<64x128xf32, #tpu.memory_space<vmem>>, vector<1x128xf32>
    tpu.vector_store %arg27[%c48, %c0_178], %236 {strides = array<i32>} : memref<64x128xf32, #tpu.memory_space<vmem>>, vector<1x128xf32>,
    %238 = vector.extract_strided_slice %187 {offsets = [3, 128], sizes = [1, 128], strides = [1, 1]} : vector<16x256xf32> to vector<1x128xf32>
    %c50 = arith.constant 50 : index
    %c0_179 = arith.constant 0 : index
    %239 = vector.load %arg27[%c50, %c0_179] : memref<64x128xf32, #tpu.memory_space<vmem>>, vector<1x128xf32>
    tpu.vector_store %arg27[%c50, %c0_179], %238 {strides = array<i32>} : memref<64x128xf32, #tpu.memory_space<vmem>>, vector<1x128xf32>,
    %240 = vector.extract_strided_slice %187 {offsets = [13, 0], sizes = [1, 128], strides = [1, 1]} : vector<16x256xf32> to vector<1x128xf32>
    %c52 = arith.constant 52 : index
    %c0_180 = arith.constant 0 : index
    %241 = vector.load %arg27[%c52, %c0_180] : memref<64x128xf32, #tpu.memory_space<vmem>>, vector<1x128xf32>
    tpu.vector_store %arg27[%c52, %c0_180], %240 {strides = array<i32>} : memref<64x128xf32, #tpu.memory_space<vmem>>, vector<1x128xf32>,
    %242 = vector.extract_strided_slice %187 {offsets = [2, 128], sizes = [1, 128], strides = [1, 1]} : vector<16x256xf32> to vector<1x128xf32>
    %c54 = arith.constant 54 : index
    %c0_181 = arith.constant 0 : index
    %243 = vector.load %arg27[%c54, %c0_181] : memref<64x128xf32, #tpu.memory_space<vmem>>, vector<1x128xf32>
    tpu.vector_store %arg27[%c54, %c0_181], %242 {strides = array<i32>} : memref<64x128xf32, #tpu.memory_space<vmem>>, vector<1x128xf32>,
    %244 = vector.extract_strided_slice %187 {offsets = [14, 0], sizes = [1, 128], strides = [1, 1]} : vector<16x256xf32> to vector<1x128xf32>
    %c56 = arith.constant 56 : index
    %c0_182 = arith.constant 0 : index
    %245 = vector.load %arg27[%c56, %c0_182] : memref<64x128xf32, #tpu.memory_space<vmem>>, vector<1x128xf32>
    tpu.vector_store %arg27[%c56, %c0_182], %244 {strides = array<i32>} : memref<64x128xf32, #tpu.memory_space<vmem>>, vector<1x128xf32>,
    %246 = vector.extract_strided_slice %187 {offsets = [1, 128], sizes = [1, 128], strides = [1, 1]} : vector<16x256xf32> to vector<1x128xf32>
    %c58 = arith.constant 58 : index
    %c0_183 = arith.constant 0 : index
    %247 = vector.load %arg27[%c58, %c0_183] : memref<64x128xf32, #tpu.memory_space<vmem>>, vector<1x128xf32>
    tpu.vector_store %arg27[%c58, %c0_183], %246 {strides = array<i32>} : memref<64x128xf32, #tpu.memory_space<vmem>>, vector<1x128xf32>,
    %248 = vector.extract_strided_slice %187 {offsets = [15, 0], sizes = [1, 128], strides = [1, 1]} : vector<16x256xf32> to vector<1x128xf32>
    %c60 = arith.constant 60 : index
    %c0_184 = arith.constant 0 : index
    %249 = vector.load %arg27[%c60, %c0_184] : memref<64x128xf32, #tpu.memory_space<vmem>>, vector<1x128xf32>
    tpu.vector_store %arg27[%c60, %c0_184], %248 {strides = array<i32>} : memref<64x128xf32, #tpu.memory_space<vmem>>, vector<1x128xf32>,
    %250 = vector.extract_strided_slice %187 {offsets = [0, 128], sizes = [1, 128], strides = [1, 1]} : vector<16x256xf32> to vector<1x128xf32>
    %c62 = arith.constant 62 : index
    %c0_185 = arith.constant 0 : index
    %251 = vector.load %arg27[%c62, %c0_185] : memref<64x128xf32, #tpu.memory_space<vmem>>, vector<1x128xf32>
    tpu.vector_store %arg27[%c62, %c0_185], %250 {strides = array<i32>} : memref<64x128xf32, #tpu.memory_space<vmem>>, vector<1x128xf32>,
    %cst_186 = arith.constant 0.000000e+00 : f32
    %252 = vector.broadcast %cst_186 : f32 to vector<64x4xf32>
    %c1_187 = arith.constant 1 : index
    %c0_188 = arith.constant 0 : index
    %c0_189 = arith.constant 0 : index
    %253 = vector.load %arg0[%c1_187, %c0_188, %c0_189] : memref<2x70x1xf32, #tpu.memory_space<vmem>>, vector<1x64x1xf32>
    %254 = vector.shape_cast %253 : vector<1x64x1xf32> to vector<64x1xf32>
    %c0_190 = arith.constant 0 : index
    %c0_191 = arith.constant 0 : index
    %255 = vector.load %arg1[%c0_190, %c0_191] : memref<7x4xf32, #tpu.memory_space<vmem>>, vector<1x4xf32>
    %256 = vector.broadcast %254 : vector<64x1xf32> to vector<64x4xf32>
    %257 = vector.broadcast %255 : vector<1x4xf32> to vector<64x4xf32>
    %258 = arith.mulf %256, %257 : vector<64x4xf32>
    %259 = arith.addf %252, %258 : vector<64x4xf32>
    %c1_192 = arith.constant 1 : index
    %c1_193 = arith.constant 1 : index
    %c0_194 = arith.constant 0 : index
    %260 = vector.load %arg0[%c1_192, %c1_193, %c0_194] : memref<2x70x1xf32, #tpu.memory_space<vmem>>, vector<1x64x1xf32>
    %261 = vector.shape_cast %260 : vector<1x64x1xf32> to vector<64x1xf32>
    %c1_195 = arith.constant 1 : index
    %c0_196 = arith.constant 0 : index
    %262 = vector.load %arg1[%c1_195, %c0_196] : memref<7x4xf32, #tpu.memory_space<vmem>>, vector<1x4xf32>
    %263 = vector.broadcast %261 : vector<64x1xf32> to vector<64x4xf32>
    %264 = vector.broadcast %262 : vector<1x4xf32> to vector<64x4xf32>
    %265 = arith.mulf %263, %264 : vector<64x4xf32>
    %266 = arith.addf %259, %265 : vector<64x4xf32>
    %c1_197 = arith.constant 1 : index
    %c2_198 = arith.constant 2 : index
    %c0_199 = arith.constant 0 : index
    %267 = vector.load %arg0[%c1_197, %c2_198, %c0_199] : memref<2x70x1xf32, #tpu.memory_space<vmem>>, vector<1x64x1xf32>
    %268 = vector.shape_cast %267 : vector<1x64x1xf32> to vector<64x1xf32>
    %c2_200 = arith.constant 2 : index
    %c0_201 = arith.constant 0 : index
    %269 = vector.load %arg1[%c2_200, %c0_201] : memref<7x4xf32, #tpu.memory_space<vmem>>, vector<1x4xf32>
    %270 = vector.broadcast %268 : vector<64x1xf32> to vector<64x4xf32>
    %271 = vector.broadcast %269 : vector<1x4xf32> to vector<64x4xf32>
    %272 = arith.mulf %270, %271 : vector<64x4xf32>
    %273 = arith.addf %266, %272 : vector<64x4xf32>
    %c1_202 = arith.constant 1 : index
    %c3_203 = arith.constant 3 : index
    %c0_204 = arith.constant 0 : index
    %274 = vector.load %arg0[%c1_202, %c3_203, %c0_204] : memref<2x70x1xf32, #tpu.memory_space<vmem>>, vector<1x64x1xf32>
    %275 = vector.shape_cast %274 : vector<1x64x1xf32> to vector<64x1xf32>
    %c3_205 = arith.constant 3 : index
    %c0_206 = arith.constant 0 : index
    %276 = vector.load %arg1[%c3_205, %c0_206] : memref<7x4xf32, #tpu.memory_space<vmem>>, vector<1x4xf32>
    %277 = vector.broadcast %275 : vector<64x1xf32> to vector<64x4xf32>
    %278 = vector.broadcast %276 : vector<1x4xf32> to vector<64x4xf32>
    %279 = arith.mulf %277, %278 : vector<64x4xf32>
    %280 = arith.addf %273, %279 : vector<64x4xf32>
    %c1_207 = arith.constant 1 : index
    %c4_208 = arith.constant 4 : index
    %c0_209 = arith.constant 0 : index
    %281 = vector.load %arg0[%c1_207, %c4_208, %c0_209] : memref<2x70x1xf32, #tpu.memory_space<vmem>>, vector<1x64x1xf32>
    %282 = vector.shape_cast %281 : vector<1x64x1xf32> to vector<64x1xf32>
    %c4_210 = arith.constant 4 : index
    %c0_211 = arith.constant 0 : index
    %283 = vector.load %arg1[%c4_210, %c0_211] : memref<7x4xf32, #tpu.memory_space<vmem>>, vector<1x4xf32>
    %284 = vector.broadcast %282 : vector<64x1xf32> to vector<64x4xf32>
    %285 = vector.broadcast %283 : vector<1x4xf32> to vector<64x4xf32>
    %286 = arith.mulf %284, %285 : vector<64x4xf32>
    %287 = arith.addf %280, %286 : vector<64x4xf32>
    %c1_212 = arith.constant 1 : index
    %c5_213 = arith.constant 5 : index
    %c0_214 = arith.constant 0 : index
    %288 = vector.load %arg0[%c1_212, %c5_213, %c0_214] : memref<2x70x1xf32, #tpu.memory_space<vmem>>, vector<1x64x1xf32>
    %289 = vector.shape_cast %288 : vector<1x64x1xf32> to vector<64x1xf32>
    %c5_215 = arith.constant 5 : index
    %c0_216 = arith.constant 0 : index
    %290 = vector.load %arg1[%c5_215, %c0_216] : memref<7x4xf32, #tpu.memory_space<vmem>>, vector<1x4xf32>
    %291 = vector.broadcast %289 : vector<64x1xf32> to vector<64x4xf32>
    %292 = vector.broadcast %290 : vector<1x4xf32> to vector<64x4xf32>
    %293 = arith.mulf %291, %292 : vector<64x4xf32>
    %294 = arith.addf %287, %293 : vector<64x4xf32>
    %c1_217 = arith.constant 1 : index
    %c6_218 = arith.constant 6 : index
    %c0_219 = arith.constant 0 : index
    %295 = vector.load %arg0[%c1_217, %c6_218, %c0_219] : memref<2x70x1xf32, #tpu.memory_space<vmem>>, vector<1x64x1xf32>
    %296 = vector.shape_cast %295 : vector<1x64x1xf32> to vector<64x1xf32>
    %c6_220 = arith.constant 6 : index
    %c0_221 = arith.constant 0 : index
    %297 = vector.load %arg1[%c6_220, %c0_221] : memref<7x4xf32, #tpu.memory_space<vmem>>, vector<1x4xf32>
    %298 = vector.broadcast %296 : vector<64x1xf32> to vector<64x4xf32>
    %299 = vector.broadcast %297 : vector<1x4xf32> to vector<64x4xf32>
    %300 = arith.mulf %298, %299 : vector<64x4xf32>
    %301 = arith.addf %294, %300 : vector<64x4xf32>
    %cst_222 = arith.constant dense<0.000000e+00> : vector<32x4xf32>
    %302 = tpu.matmul %12, %301, %cst_222 {dimension_numbers = #tpu.dot_dimension_numbers<[1], [0], [0], [1], [0, 0, 1, 1], [], []>} : vector<32x64xf32>, vector<64x4xf32>, vector<32x4xf32> -> vector<32x4xf32>
    %c0_223 = arith.constant 0 : index
    %c0_224 = arith.constant 0 : index
    %303 = vector.load %arg2[%c0_223, %c0_224] : memref<1x4xf32, #tpu.memory_space<vmem>>, vector<1x4xf32>
    %304 = vector.broadcast %303 : vector<1x4xf32> to vector<32x4xf32>
    %305 = arith.mulf %302, %304 : vector<32x4xf32>
    %c0_225 = arith.constant 0 : index
    %c0_226 = arith.constant 0 : index
    %306 = vector.load %arg3[%c0_225, %c0_226] : memref<1x4xf32, #tpu.memory_space<vmem>>, vector<1x4xf32>
    %307 = vector.broadcast %306 : vector<1x4xf32> to vector<32x4xf32>
    %308 = arith.addf %305, %307 : vector<32x4xf32>
    %cst_227 = arith.constant 0.000000e+00 : f32
    %309 = vector.broadcast %cst_227 : f32 to vector<32x4xf32>
    %310 = arith.cmpf ogt, %308, %309 : vector<32x4xf32>
    %cst_228 = arith.constant 1.000000e-01 : f32
    %311 = vector.broadcast %cst_228 : f32 to vector<32x4xf32>
    %312 = arith.mulf %311, %308 : vector<32x4xf32>
    %313 = arith.select %310, %308, %312 : vector<32x4xi1>, vector<32x4xf32>
    %c1_229 = arith.constant 1 : index
    %c2_230 = arith.constant 2 : index
    %c0_231 = arith.constant 0 : index
    %314 = vector.load %arg24[%c1_229, %c2_230, %c0_231] : memref<2x36x4xf32, #tpu.memory_space<vmem>>, vector<1x32x4xf32>
    %315 = vector.shape_cast %314 : vector<1x32x4xf32> to vector<32x4xf32>
    %316 = vector.shape_cast %313 : vector<32x4xf32> to vector<1x32x4xf32>
    tpu.vector_store %arg24[%c1_229, %c2_230, %c0_231], %316 {strides = array<i32>} : memref<2x36x4xf32, #tpu.memory_space<vmem>>, vector<1x32x4xf32>,
    %cst_232 = arith.constant 0.000000e+00 : f32
    %317 = vector.broadcast %cst_232 : f32 to vector<32x8xf32>
    %c1_233 = arith.constant 1 : index
    %c0_234 = arith.constant 0 : index
    %c0_235 = arith.constant 0 : index
    %318 = vector.load %arg24[%c1_233, %c0_234, %c0_235] : memref<2x36x4xf32, #tpu.memory_space<vmem>>, vector<1x32x4xf32>
    %319 = vector.shape_cast %318 : vector<1x32x4xf32> to vector<32x4xf32>
    %c0_236 = arith.constant 0 : index
    %c0_237 = arith.constant 0 : index
    %320 = vector.load %arg4[%c0_236, %c0_237] : memref<20x8xf32, #tpu.memory_space<vmem>>, vector<4x8xf32>
    %cst_238 = arith.constant dense<0.000000e+00> : vector<32x8xf32>
    %321 = tpu.matmul %319, %320, %cst_238 {dimension_numbers = #tpu.dot_dimension_numbers<[1], [0], [0], [1], [0, 0, 1, 1], [], []>} : vector<32x4xf32>, vector<4x8xf32>, vector<32x8xf32> -> vector<32x8xf32>
    %322 = arith.addf %317, %321 : vector<32x8xf32>
    %c1_239 = arith.constant 1 : index
    %c1_240 = arith.constant 1 : index
    %c0_241 = arith.constant 0 : index
    %323 = vector.load %arg24[%c1_239, %c1_240, %c0_241] : memref<2x36x4xf32, #tpu.memory_space<vmem>>, vector<1x32x4xf32>
    %324 = vector.shape_cast %323 : vector<1x32x4xf32> to vector<32x4xf32>
    %c4_242 = arith.constant 4 : index
    %c0_243 = arith.constant 0 : index
    %325 = vector.load %arg4[%c4_242, %c0_243] : memref<20x8xf32, #tpu.memory_space<vmem>>, vector<4x8xf32>
    %cst_244 = arith.constant dense<0.000000e+00> : vector<32x8xf32>
    %326 = tpu.matmul %324, %325, %cst_244 {dimension_numbers = #tpu.dot_dimension_numbers<[1], [0], [0], [1], [0, 0, 1, 1], [], []>} : vector<32x4xf32>, vector<4x8xf32>, vector<32x8xf32> -> vector<32x8xf32>
    %327 = arith.addf %322, %326 : vector<32x8xf32>
    %c1_245 = arith.constant 1 : index
    %c2_246 = arith.constant 2 : index
    %c0_247 = arith.constant 0 : index
    %328 = vector.load %arg24[%c1_245, %c2_246, %c0_247] : memref<2x36x4xf32, #tpu.memory_space<vmem>>, vector<1x32x4xf32>
    %329 = vector.shape_cast %328 : vector<1x32x4xf32> to vector<32x4xf32>
    %c8_248 = arith.constant 8 : index
    %c0_249 = arith.constant 0 : index
    %330 = vector.load %arg4[%c8_248, %c0_249] : memref<20x8xf32, #tpu.memory_space<vmem>>, vector<4x8xf32>
    %cst_250 = arith.constant dense<0.000000e+00> : vector<32x8xf32>
    %331 = tpu.matmul %329, %330, %cst_250 {dimension_numbers = #tpu.dot_dimension_numbers<[1], [0], [0], [1], [0, 0, 1, 1], [], []>} : vector<32x4xf32>, vector<4x8xf32>, vector<32x8xf32> -> vector<32x8xf32>
    %332 = arith.addf %327, %331 : vector<32x8xf32>
    %c1_251 = arith.constant 1 : index
    %c3_252 = arith.constant 3 : index
    %c0_253 = arith.constant 0 : index
    %333 = vector.load %arg24[%c1_251, %c3_252, %c0_253] : memref<2x36x4xf32, #tpu.memory_space<vmem>>, vector<1x32x4xf32>
    %334 = vector.shape_cast %333 : vector<1x32x4xf32> to vector<32x4xf32>
    %c12_254 = arith.constant 12 : index
    %c0_255 = arith.constant 0 : index
    %335 = vector.load %arg4[%c12_254, %c0_255] : memref<20x8xf32, #tpu.memory_space<vmem>>, vector<4x8xf32>
    %cst_256 = arith.constant dense<0.000000e+00> : vector<32x8xf32>
    %336 = tpu.matmul %334, %335, %cst_256 {dimension_numbers = #tpu.dot_dimension_numbers<[1], [0], [0], [1], [0, 0, 1, 1], [], []>} : vector<32x4xf32>, vector<4x8xf32>, vector<32x8xf32> -> vector<32x8xf32>
    %337 = arith.addf %332, %336 : vector<32x8xf32>
    %c1_257 = arith.constant 1 : index
    %c4_258 = arith.constant 4 : index
    %c0_259 = arith.constant 0 : index
    %338 = vector.load %arg24[%c1_257, %c4_258, %c0_259] : memref<2x36x4xf32, #tpu.memory_space<vmem>>, vector<1x32x4xf32>
    %339 = vector.shape_cast %338 : vector<1x32x4xf32> to vector<32x4xf32>
    %c16_260 = arith.constant 16 : index
    %c0_261 = arith.constant 0 : index
    %340 = vector.load %arg4[%c16_260, %c0_261] : memref<20x8xf32, #tpu.memory_space<vmem>>, vector<4x8xf32>
    %cst_262 = arith.constant dense<0.000000e+00> : vector<32x8xf32>
    %341 = tpu.matmul %339, %340, %cst_262 {dimension_numbers = #tpu.dot_dimension_numbers<[1], [0], [0], [1], [0, 0, 1, 1], [], []>} : vector<32x4xf32>, vector<4x8xf32>, vector<32x8xf32> -> vector<32x8xf32>
    %342 = arith.addf %337, %341 : vector<32x8xf32>
    %cst_263 = arith.constant dense<0.000000e+00> : vector<16x8xf32>
    %343 = tpu.matmul %19, %342, %cst_263 {dimension_numbers = #tpu.dot_dimension_numbers<[1], [0], [0], [1], [0, 0, 1, 1], [], []>} : vector<16x32xf32>, vector<32x8xf32>, vector<16x8xf32> -> vector<16x8xf32>
    %c0_264 = arith.constant 0 : index
    %c0_265 = arith.constant 0 : index
    %344 = vector.load %arg5[%c0_264, %c0_265] : memref<1x8xf32, #tpu.memory_space<vmem>>, vector<1x8xf32>
    %345 = vector.broadcast %344 : vector<1x8xf32> to vector<16x8xf32>
    %346 = arith.mulf %343, %345 : vector<16x8xf32>
    %c0_266 = arith.constant 0 : index
    %c0_267 = arith.constant 0 : index
    %347 = vector.load %arg6[%c0_266, %c0_267] : memref<1x8xf32, #tpu.memory_space<vmem>>, vector<1x8xf32>
    %348 = vector.broadcast %347 : vector<1x8xf32> to vector<16x8xf32>
    %349 = arith.addf %346, %348 : vector<16x8xf32>
    %cst_268 = arith.constant 0.000000e+00 : f32
    %350 = vector.broadcast %cst_268 : f32 to vector<16x8xf32>
    %351 = arith.cmpf ogt, %349, %350 : vector<16x8xf32>
    %cst_269 = arith.constant 1.000000e-01 : f32
    %352 = vector.broadcast %cst_269 : f32 to vector<16x8xf32>
    %353 = arith.mulf %352, %349 : vector<16x8xf32>
    %354 = arith.select %351, %349, %353 : vector<16x8xi1>, vector<16x8xf32>
    %c1_270 = arith.constant 1 : index
    %c1_271 = arith.constant 1 : index
    %c0_272 = arith.constant 0 : index
    %355 = vector.load %arg25[%c1_270, %c1_271, %c0_272] : memref<2x18x8xf32, #tpu.memory_space<vmem>>, vector<1x16x8xf32>
    %356 = vector.shape_cast %355 : vector<1x16x8xf32> to vector<16x8xf32>
    %357 = vector.shape_cast %354 : vector<16x8xf32> to vector<1x16x8xf32>
    tpu.vector_store %arg25[%c1_270, %c1_271, %c0_272], %357 {strides = array<i32>} : memref<2x18x8xf32, #tpu.memory_space<vmem>>, vector<1x16x8xf32>,
    %cst_273 = arith.constant 0.000000e+00 : f32
    %358 = vector.broadcast %cst_273 : f32 to vector<16x16xf32>
    %c1_274 = arith.constant 1 : index
    %c0_275 = arith.constant 0 : index
    %c0_276 = arith.constant 0 : index
    %359 = vector.load %arg25[%c1_274, %c0_275, %c0_276] : memref<2x18x8xf32, #tpu.memory_space<vmem>>, vector<1x16x8xf32>
    %360 = vector.shape_cast %359 : vector<1x16x8xf32> to vector<16x8xf32>
    %c0_277 = arith.constant 0 : index
    %c0_278 = arith.constant 0 : index
    %361 = vector.load %arg7[%c0_277, %c0_278] : memref<24x16xf32, #tpu.memory_space<vmem>>, vector<8x16xf32>
    %cst_279 = arith.constant dense<0.000000e+00> : vector<16x16xf32>
    %362 = tpu.matmul %360, %361, %cst_279 {dimension_numbers = #tpu.dot_dimension_numbers<[1], [0], [0], [1], [0, 0, 1, 1], [], []>} : vector<16x8xf32>, vector<8x16xf32>, vector<16x16xf32> -> vector<16x16xf32>
    %363 = arith.addf %358, %362 : vector<16x16xf32>
    %c1_280 = arith.constant 1 : index
    %c1_281 = arith.constant 1 : index
    %c0_282 = arith.constant 0 : index
    %364 = vector.load %arg25[%c1_280, %c1_281, %c0_282] : memref<2x18x8xf32, #tpu.memory_space<vmem>>, vector<1x16x8xf32>
    %365 = vector.shape_cast %364 : vector<1x16x8xf32> to vector<16x8xf32>
    %c8_283 = arith.constant 8 : index
    %c0_284 = arith.constant 0 : index
    %366 = vector.load %arg7[%c8_283, %c0_284] : memref<24x16xf32, #tpu.memory_space<vmem>>, vector<8x16xf32>
    %cst_285 = arith.constant dense<0.000000e+00> : vector<16x16xf32>
    %367 = tpu.matmul %365, %366, %cst_285 {dimension_numbers = #tpu.dot_dimension_numbers<[1], [0], [0], [1], [0, 0, 1, 1], [], []>} : vector<16x8xf32>, vector<8x16xf32>, vector<16x16xf32> -> vector<16x16xf32>
    %368 = arith.addf %363, %367 : vector<16x16xf32>
    %c1_286 = arith.constant 1 : index
    %c2_287 = arith.constant 2 : index
    %c0_288 = arith.constant 0 : index
    %369 = vector.load %arg25[%c1_286, %c2_287, %c0_288] : memref<2x18x8xf32, #tpu.memory_space<vmem>>, vector<1x16x8xf32>
    %370 = vector.shape_cast %369 : vector<1x16x8xf32> to vector<16x8xf32>
    %c16_289 = arith.constant 16 : index
    %c0_290 = arith.constant 0 : index
    %371 = vector.load %arg7[%c16_289, %c0_290] : memref<24x16xf32, #tpu.memory_space<vmem>>, vector<8x16xf32>
    %cst_291 = arith.constant dense<0.000000e+00> : vector<16x16xf32>
    %372 = tpu.matmul %370, %371, %cst_291 {dimension_numbers = #tpu.dot_dimension_numbers<[1], [0], [0], [1], [0, 0, 1, 1], [], []>} : vector<16x8xf32>, vector<8x16xf32>, vector<16x16xf32> -> vector<16x16xf32>
    %373 = arith.addf %368, %372 : vector<16x16xf32>
    %c0_292 = arith.constant 0 : index
    %c0_293 = arith.constant 0 : index
    %374 = vector.load %arg8[%c0_292, %c0_293] : memref<1x16xf32, #tpu.memory_space<vmem>>, vector<1x16xf32>
    %375 = vector.broadcast %374 : vector<1x16xf32> to vector<16x16xf32>
    %376 = arith.mulf %373, %375 : vector<16x16xf32>
    %c0_294 = arith.constant 0 : index
    %c0_295 = arith.constant 0 : index
    %377 = vector.load %arg9[%c0_294, %c0_295] : memref<1x16xf32, #tpu.memory_space<vmem>>, vector<1x16xf32>
    %378 = vector.broadcast %377 : vector<1x16xf32> to vector<16x16xf32>
    %379 = arith.addf %376, %378 : vector<16x16xf32>
    %cst_296 = arith.constant 0.000000e+00 : f32
    %380 = vector.broadcast %cst_296 : f32 to vector<16x16xf32>
    %381 = arith.cmpf ogt, %379, %380 : vector<16x16xf32>
    %cst_297 = arith.constant 1.000000e-01 : f32
    %382 = vector.broadcast %cst_297 : f32 to vector<16x16xf32>
    %383 = arith.mulf %382, %379 : vector<16x16xf32>
    %384 = arith.select %381, %379, %383 : vector<16x16xi1>, vector<16x16xf32>
    %c1_298 = arith.constant 1 : index
    %c1_299 = arith.constant 1 : index
    %c0_300 = arith.constant 0 : index
    %385 = vector.load %arg26[%c1_298, %c1_299, %c0_300] : memref<2x18x16xf32, #tpu.memory_space<vmem>>, vector<1x16x16xf32>
    %386 = vector.shape_cast %385 : vector<1x16x16xf32> to vector<16x16xf32>
    %387 = vector.shape_cast %384 : vector<16x16xf32> to vector<1x16x16xf32>
    tpu.vector_store %arg26[%c1_298, %c1_299, %c0_300], %387 {strides = array<i32>} : memref<2x18x16xf32, #tpu.memory_space<vmem>>, vector<1x16x16xf32>,
    %cst_301 = arith.constant 0.000000e+00 : f32
    %388 = vector.broadcast %cst_301 : f32 to vector<16x32xf32>
    %c1_302 = arith.constant 1 : index
    %c0_303 = arith.constant 0 : index
    %c0_304 = arith.constant 0 : index
    %389 = vector.load %arg26[%c1_302, %c0_303, %c0_304] : memref<2x18x16xf32, #tpu.memory_space<vmem>>, vector<1x16x16xf32>
    %390 = vector.shape_cast %389 : vector<1x16x16xf32> to vector<16x16xf32>
    %c0_305 = arith.constant 0 : index
    %c0_306 = arith.constant 0 : index
    %391 = vector.load %arg10[%c0_305, %c0_306] : memref<48x32xf32, #tpu.memory_space<vmem>>, vector<16x32xf32>
    %cst_307 = arith.constant dense<0.000000e+00> : vector<16x32xf32>
    %392 = tpu.matmul %390, %391, %cst_307 {dimension_numbers = #tpu.dot_dimension_numbers<[1], [0], [0], [1], [0, 0, 1, 1], [], []>} : vector<16x16xf32>, vector<16x32xf32>, vector<16x32xf32> -> vector<16x32xf32>
    %393 = arith.addf %388, %392 : vector<16x32xf32>
    %c1_308 = arith.constant 1 : index
    %c1_309 = arith.constant 1 : index
    %c0_310 = arith.constant 0 : index
    %394 = vector.load %arg26[%c1_308, %c1_309, %c0_310] : memref<2x18x16xf32, #tpu.memory_space<vmem>>, vector<1x16x16xf32>
    %395 = vector.shape_cast %394 : vector<1x16x16xf32> to vector<16x16xf32>
    %c16_311 = arith.constant 16 : index
    %c0_312 = arith.constant 0 : index
    %396 = vector.load %arg10[%c16_311, %c0_312] : memref<48x32xf32, #tpu.memory_space<vmem>>, vector<16x32xf32>
    %cst_313 = arith.constant dense<0.000000e+00> : vector<16x32xf32>
    %397 = tpu.matmul %395, %396, %cst_313 {dimension_numbers = #tpu.dot_dimension_numbers<[1], [0], [0], [1], [0, 0, 1, 1], [], []>} : vector<16x16xf32>, vector<16x32xf32>, vector<16x32xf32> -> vector<16x32xf32>
    %398 = arith.addf %393, %397 : vector<16x32xf32>
    %c1_314 = arith.constant 1 : index
    %c2_315 = arith.constant 2 : index
    %c0_316 = arith.constant 0 : index
    %399 = vector.load %arg26[%c1_314, %c2_315, %c0_316] : memref<2x18x16xf32, #tpu.memory_space<vmem>>, vector<1x16x16xf32>
    %400 = vector.shape_cast %399 : vector<1x16x16xf32> to vector<16x16xf32>
    %c32_317 = arith.constant 32 : index
    %c0_318 = arith.constant 0 : index
    %401 = vector.load %arg10[%c32_317, %c0_318] : memref<48x32xf32, #tpu.memory_space<vmem>>, vector<16x32xf32>
    %cst_319 = arith.constant dense<0.000000e+00> : vector<16x32xf32>
    %402 = tpu.matmul %400, %401, %cst_319 {dimension_numbers = #tpu.dot_dimension_numbers<[1], [0], [0], [1], [0, 0, 1, 1], [], []>} : vector<16x16xf32>, vector<16x32xf32>, vector<16x32xf32> -> vector<16x32xf32>
    %403 = arith.addf %398, %402 : vector<16x32xf32>
    %c0_320 = arith.constant 0 : index
    %c0_321 = arith.constant 0 : index
    %404 = vector.load %arg11[%c0_320, %c0_321] : memref<1x32xf32, #tpu.memory_space<vmem>>, vector<1x32xf32>
    %405 = vector.broadcast %404 : vector<1x32xf32> to vector<16x32xf32>
    %406 = arith.mulf %403, %405 : vector<16x32xf32>
    %c0_322 = arith.constant 0 : index
    %c0_323 = arith.constant 0 : index
    %407 = vector.load %arg12[%c0_322, %c0_323] : memref<1x32xf32, #tpu.memory_space<vmem>>, vector<1x32xf32>
    %408 = vector.broadcast %407 : vector<1x32xf32> to vector<16x32xf32>
    %409 = arith.addf %406, %408 : vector<16x32xf32>
    %cst_324 = arith.constant 0.000000e+00 : f32
    %410 = vector.broadcast %cst_324 : f32 to vector<16x32xf32>
    %411 = arith.cmpf ogt, %409, %410 : vector<16x32xf32>
    %cst_325 = arith.constant 1.000000e-01 : f32
    %412 = vector.broadcast %cst_325 : f32 to vector<16x32xf32>
    %413 = arith.mulf %412, %409 : vector<16x32xf32>
    %414 = arith.select %411, %409, %413 : vector<16x32xi1>, vector<16x32xf32>
    %cst_326 = arith.constant dense<0.000000e+00> : vector<16x256xf32>
    %415 = tpu.matmul %414, %20, %cst_326 {dimension_numbers = #tpu.dot_dimension_numbers<[1], [0], [0], [1], [0, 0, 1, 1], [], []>} : vector<16x32xf32>, vector<32x256xf32>, vector<16x256xf32> -> vector<16x256xf32>
    %416 = vector.broadcast %21 : vector<1x256xf32> to vector<16x256xf32>
    %417 = arith.addf %415, %416 : vector<16x256xf32>
    %418 = vector.extract_strided_slice %417 {offsets = [0, 0], sizes = [1, 128], strides = [1, 1]} : vector<16x256xf32> to vector<1x128xf32>
    %c1_327 = arith.constant 1 : index
    %c0_328 = arith.constant 0 : index
    %419 = vector.load %arg27[%c1_327, %c0_328] : memref<64x128xf32, #tpu.memory_space<vmem>>, vector<1x128xf32>
    tpu.vector_store %arg27[%c1_327, %c0_328], %418 {strides = array<i32>} : memref<64x128xf32, #tpu.memory_space<vmem>>, vector<1x128xf32>,
    %420 = vector.extract_strided_slice %417 {offsets = [15, 128], sizes = [1, 128], strides = [1, 1]} : vector<16x256xf32> to vector<1x128xf32>
    %c3_329 = arith.constant 3 : index
    %c0_330 = arith.constant 0 : index
    %421 = vector.load %arg27[%c3_329, %c0_330] : memref<64x128xf32, #tpu.memory_space<vmem>>, vector<1x128xf32>
    tpu.vector_store %arg27[%c3_329, %c0_330], %420 {strides = array<i32>} : memref<64x128xf32, #tpu.memory_space<vmem>>, vector<1x128xf32>,
    %422 = vector.extract_strided_slice %417 {offsets = [1, 0], sizes = [1, 128], strides = [1, 1]} : vector<16x256xf32> to vector<1x128xf32>
    %c5_331 = arith.constant 5 : index
    %c0_332 = arith.constant 0 : index
    %423 = vector.load %arg27[%c5_331, %c0_332] : memref<64x128xf32, #tpu.memory_space<vmem>>, vector<1x128xf32>
    tpu.vector_store %arg27[%c5_331, %c0_332], %422 {strides = array<i32>} : memref<64x128xf32, #tpu.memory_space<vmem>>, vector<1x128xf32>,
    %424 = vector.extract_strided_slice %417 {offsets = [14, 128], sizes = [1, 128], strides = [1, 1]} : vector<16x256xf32> to vector<1x128xf32>
    %c7 = arith.constant 7 : index
    %c0_333 = arith.constant 0 : index
    %425 = vector.load %arg27[%c7, %c0_333] : memref<64x128xf32, #tpu.memory_space<vmem>>, vector<1x128xf32>
    tpu.vector_store %arg27[%c7, %c0_333], %424 {strides = array<i32>} : memref<64x128xf32, #tpu.memory_space<vmem>>, vector<1x128xf32>,
    %426 = vector.extract_strided_slice %417 {offsets = [2, 0], sizes = [1, 128], strides = [1, 1]} : vector<16x256xf32> to vector<1x128xf32>
    %c9 = arith.constant 9 : index
    %c0_334 = arith.constant 0 : index
    %427 = vector.load %arg27[%c9, %c0_334] : memref<64x128xf32, #tpu.memory_space<vmem>>, vector<1x128xf32>
    tpu.vector_store %arg27[%c9, %c0_334], %426 {strides = array<i32>} : memref<64x128xf32, #tpu.memory_space<vmem>>, vector<1x128xf32>,
    %428 = vector.extract_strided_slice %417 {offsets = [13, 128], sizes = [1, 128], strides = [1, 1]} : vector<16x256xf32> to vector<1x128xf32>
    %c11 = arith.constant 11 : index
    %c0_335 = arith.constant 0 : index
    %429 = vector.load %arg27[%c11, %c0_335] : memref<64x128xf32, #tpu.memory_space<vmem>>, vector<1x128xf32>
    tpu.vector_store %arg27[%c11, %c0_335], %428 {strides = array<i32>} : memref<64x128xf32, #tpu.memory_space<vmem>>, vector<1x128xf32>,
    %430 = vector.extract_strided_slice %417 {offsets = [3, 0], sizes = [1, 128], strides = [1, 1]} : vector<16x256xf32> to vector<1x128xf32>
    %c13 = arith.constant 13 : index
    %c0_336 = arith.constant 0 : index
    %431 = vector.load %arg27[%c13, %c0_336] : memref<64x128xf32, #tpu.memory_space<vmem>>, vector<1x128xf32>
    tpu.vector_store %arg27[%c13, %c0_336], %430 {strides = array<i32>} : memref<64x128xf32, #tpu.memory_space<vmem>>, vector<1x128xf32>,
    %432 = vector.extract_strided_slice %417 {offsets = [12, 128], sizes = [1, 128], strides = [1, 1]} : vector<16x256xf32> to vector<1x128xf32>
    %c15 = arith.constant 15 : index
    %c0_337 = arith.constant 0 : index
    %433 = vector.load %arg27[%c15, %c0_337] : memref<64x128xf32, #tpu.memory_space<vmem>>, vector<1x128xf32>
    tpu.vector_store %arg27[%c15, %c0_337], %432 {strides = array<i32>} : memref<64x128xf32, #tpu.memory_space<vmem>>, vector<1x128xf32>,
    %434 = vector.extract_strided_slice %417 {offsets = [4, 0], sizes = [1, 128], strides = [1, 1]} : vector<16x256xf32> to vector<1x128xf32>
    %c17 = arith.constant 17 : index
    %c0_338 = arith.constant 0 : index
    %435 = vector.load %arg27[%c17, %c0_338] : memref<64x128xf32, #tpu.memory_space<vmem>>, vector<1x128xf32>
    tpu.vector_store %arg27[%c17, %c0_338], %434 {strides = array<i32>} : memref<64x128xf32, #tpu.memory_space<vmem>>, vector<1x128xf32>,
    %436 = vector.extract_strided_slice %417 {offsets = [11, 128], sizes = [1, 128], strides = [1, 1]} : vector<16x256xf32> to vector<1x128xf32>
    %c19 = arith.constant 19 : index
    %c0_339 = arith.constant 0 : index
    %437 = vector.load %arg27[%c19, %c0_339] : memref<64x128xf32, #tpu.memory_space<vmem>>, vector<1x128xf32>
    tpu.vector_store %arg27[%c19, %c0_339], %436 {strides = array<i32>} : memref<64x128xf32, #tpu.memory_space<vmem>>, vector<1x128xf32>,
    %438 = vector.extract_strided_slice %417 {offsets = [5, 0], sizes = [1, 128], strides = [1, 1]} : vector<16x256xf32> to vector<1x128xf32>
    %c21 = arith.constant 21 : index
    %c0_340 = arith.constant 0 : index
    %439 = vector.load %arg27[%c21, %c0_340] : memref<64x128xf32, #tpu.memory_space<vmem>>, vector<1x128xf32>
    tpu.vector_store %arg27[%c21, %c0_340], %438 {strides = array<i32>} : memref<64x128xf32, #tpu.memory_space<vmem>>, vector<1x128xf32>,
    %440 = vector.extract_strided_slice %417 {offsets = [10, 128], sizes = [1, 128], strides = [1, 1]} : vector<16x256xf32> to vector<1x128xf32>
    %c23 = arith.constant 23 : index
    %c0_341 = arith.constant 0 : index
    %441 = vector.load %arg27[%c23, %c0_341] : memref<64x128xf32, #tpu.memory_space<vmem>>, vector<1x128xf32>
    tpu.vector_store %arg27[%c23, %c0_341], %440 {strides = array<i32>} : memref<64x128xf32, #tpu.memory_space<vmem>>, vector<1x128xf32>,
    %442 = vector.extract_strided_slice %417 {offsets = [6, 0], sizes = [1, 128], strides = [1, 1]} : vector<16x256xf32> to vector<1x128xf32>
    %c25 = arith.constant 25 : index
    %c0_342 = arith.constant 0 : index
    %443 = vector.load %arg27[%c25, %c0_342] : memref<64x128xf32, #tpu.memory_space<vmem>>, vector<1x128xf32>
    tpu.vector_store %arg27[%c25, %c0_342], %442 {strides = array<i32>} : memref<64x128xf32, #tpu.memory_space<vmem>>, vector<1x128xf32>,
    %444 = vector.extract_strided_slice %417 {offsets = [9, 128], sizes = [1, 128], strides = [1, 1]} : vector<16x256xf32> to vector<1x128xf32>
    %c27 = arith.constant 27 : index
    %c0_343 = arith.constant 0 : index
    %445 = vector.load %arg27[%c27, %c0_343] : memref<64x128xf32, #tpu.memory_space<vmem>>, vector<1x128xf32>
    tpu.vector_store %arg27[%c27, %c0_343], %444 {strides = array<i32>} : memref<64x128xf32, #tpu.memory_space<vmem>>, vector<1x128xf32>,
    %446 = vector.extract_strided_slice %417 {offsets = [7, 0], sizes = [1, 128], strides = [1, 1]} : vector<16x256xf32> to vector<1x128xf32>
    %c29 = arith.constant 29 : index
    %c0_344 = arith.constant 0 : index
    %447 = vector.load %arg27[%c29, %c0_344] : memref<64x128xf32, #tpu.memory_space<vmem>>, vector<1x128xf32>
    tpu.vector_store %arg27[%c29, %c0_344], %446 {strides = array<i32>} : memref<64x128xf32, #tpu.memory_space<vmem>>, vector<1x128xf32>,
    %448 = vector.extract_strided_slice %417 {offsets = [8, 128], sizes = [1, 128], strides = [1, 1]} : vector<16x256xf32> to vector<1x128xf32>
    %c31 = arith.constant 31 : index
    %c0_345 = arith.constant 0 : index
    %449 = vector.load %arg27[%c31, %c0_345] : memref<64x128xf32, #tpu.memory_space<vmem>>, vector<1x128xf32>
    tpu.vector_store %arg27[%c31, %c0_345], %448 {strides = array<i32>} : memref<64x128xf32, #tpu.memory_space<vmem>>, vector<1x128xf32>,
    %450 = vector.extract_strided_slice %417 {offsets = [8, 0], sizes = [1, 128], strides = [1, 1]} : vector<16x256xf32> to vector<1x128xf32>
    %c33 = arith.constant 33 : index
    %c0_346 = arith.constant 0 : index
    %451 = vector.load %arg27[%c33, %c0_346] : memref<64x128xf32, #tpu.memory_space<vmem>>, vector<1x128xf32>
    tpu.vector_store %arg27[%c33, %c0_346], %450 {strides = array<i32>} : memref<64x128xf32, #tpu.memory_space<vmem>>, vector<1x128xf32>,
    %452 = vector.extract_strided_slice %417 {offsets = [7, 128], sizes = [1, 128], strides = [1, 1]} : vector<16x256xf32> to vector<1x128xf32>
    %c35 = arith.constant 35 : index
    %c0_347 = arith.constant 0 : index
    %453 = vector.load %arg27[%c35, %c0_347] : memref<64x128xf32, #tpu.memory_space<vmem>>, vector<1x128xf32>
    tpu.vector_store %arg27[%c35, %c0_347], %452 {strides = array<i32>} : memref<64x128xf32, #tpu.memory_space<vmem>>, vector<1x128xf32>,
    %454 = vector.extract_strided_slice %417 {offsets = [9, 0], sizes = [1, 128], strides = [1, 1]} : vector<16x256xf32> to vector<1x128xf32>
    %c37 = arith.constant 37 : index
    %c0_348 = arith.constant 0 : index
    %455 = vector.load %arg27[%c37, %c0_348] : memref<64x128xf32, #tpu.memory_space<vmem>>, vector<1x128xf32>
    tpu.vector_store %arg27[%c37, %c0_348], %454 {strides = array<i32>} : memref<64x128xf32, #tpu.memory_space<vmem>>, vector<1x128xf32>,
    %456 = vector.extract_strided_slice %417 {offsets = [6, 128], sizes = [1, 128], strides = [1, 1]} : vector<16x256xf32> to vector<1x128xf32>
    %c39 = arith.constant 39 : index
    %c0_349 = arith.constant 0 : index
    %457 = vector.load %arg27[%c39, %c0_349] : memref<64x128xf32, #tpu.memory_space<vmem>>, vector<1x128xf32>
    tpu.vector_store %arg27[%c39, %c0_349], %456 {strides = array<i32>} : memref<64x128xf32, #tpu.memory_space<vmem>>, vector<1x128xf32>,
    %458 = vector.extract_strided_slice %417 {offsets = [10, 0], sizes = [1, 128], strides = [1, 1]} : vector<16x256xf32> to vector<1x128xf32>
    %c41 = arith.constant 41 : index
    %c0_350 = arith.constant 0 : index
    %459 = vector.load %arg27[%c41, %c0_350] : memref<64x128xf32, #tpu.memory_space<vmem>>, vector<1x128xf32>
    tpu.vector_store %arg27[%c41, %c0_350], %458 {strides = array<i32>} : memref<64x128xf32, #tpu.memory_space<vmem>>, vector<1x128xf32>,
    %460 = vector.extract_strided_slice %417 {offsets = [5, 128], sizes = [1, 128], strides = [1, 1]} : vector<16x256xf32> to vector<1x128xf32>
    %c43 = arith.constant 43 : index
    %c0_351 = arith.constant 0 : index
    %461 = vector.load %arg27[%c43, %c0_351] : memref<64x128xf32, #tpu.memory_space<vmem>>, vector<1x128xf32>
    tpu.vector_store %arg27[%c43, %c0_351], %460 {strides = array<i32>} : memref<64x128xf32, #tpu.memory_space<vmem>>, vector<1x128xf32>,
    %462 = vector.extract_strided_slice %417 {offsets = [11, 0], sizes = [1, 128], strides = [1, 1]} : vector<16x256xf32> to vector<1x128xf32>
    %c45 = arith.constant 45 : index
    %c0_352 = arith.constant 0 : index
    %463 = vector.load %arg27[%c45, %c0_352] : memref<64x128xf32, #tpu.memory_space<vmem>>, vector<1x128xf32>
    tpu.vector_store %arg27[%c45, %c0_352], %462 {strides = array<i32>} : memref<64x128xf32, #tpu.memory_space<vmem>>, vector<1x128xf32>,
    %464 = vector.extract_strided_slice %417 {offsets = [4, 128], sizes = [1, 128], strides = [1, 1]} : vector<16x256xf32> to vector<1x128xf32>
    %c47 = arith.constant 47 : index
    %c0_353 = arith.constant 0 : index
    %465 = vector.load %arg27[%c47, %c0_353] : memref<64x128xf32, #tpu.memory_space<vmem>>, vector<1x128xf32>
    tpu.vector_store %arg27[%c47, %c0_353], %464 {strides = array<i32>} : memref<64x128xf32, #tpu.memory_space<vmem>>, vector<1x128xf32>,
    %466 = vector.extract_strided_slice %417 {offsets = [12, 0], sizes = [1, 128], strides = [1, 1]} : vector<16x256xf32> to vector<1x128xf32>
    %c49 = arith.constant 49 : index
    %c0_354 = arith.constant 0 : index
    %467 = vector.load %arg27[%c49, %c0_354] : memref<64x128xf32, #tpu.memory_space<vmem>>, vector<1x128xf32>
    tpu.vector_store %arg27[%c49, %c0_354], %466 {strides = array<i32>} : memref<64x128xf32, #tpu.memory_space<vmem>>, vector<1x128xf32>,
    %468 = vector.extract_strided_slice %417 {offsets = [3, 128], sizes = [1, 128], strides = [1, 1]} : vector<16x256xf32> to vector<1x128xf32>
    %c51 = arith.constant 51 : index
    %c0_355 = arith.constant 0 : index
    %469 = vector.load %arg27[%c51, %c0_355] : memref<64x128xf32, #tpu.memory_space<vmem>>, vector<1x128xf32>
    tpu.vector_store %arg27[%c51, %c0_355], %468 {strides = array<i32>} : memref<64x128xf32, #tpu.memory_space<vmem>>, vector<1x128xf32>,
    %470 = vector.extract_strided_slice %417 {offsets = [13, 0], sizes = [1, 128], strides = [1, 1]} : vector<16x256xf32> to vector<1x128xf32>
    %c53 = arith.constant 53 : index
    %c0_356 = arith.constant 0 : index
    %471 = vector.load %arg27[%c53, %c0_356] : memref<64x128xf32, #tpu.memory_space<vmem>>, vector<1x128xf32>
    tpu.vector_store %arg27[%c53, %c0_356], %470 {strides = array<i32>} : memref<64x128xf32, #tpu.memory_space<vmem>>, vector<1x128xf32>,
    %472 = vector.extract_strided_slice %417 {offsets = [2, 128], sizes = [1, 128], strides = [1, 1]} : vector<16x256xf32> to vector<1x128xf32>
    %c55 = arith.constant 55 : index
    %c0_357 = arith.constant 0 : index
    %473 = vector.load %arg27[%c55, %c0_357] : memref<64x128xf32, #tpu.memory_space<vmem>>, vector<1x128xf32>
    tpu.vector_store %arg27[%c55, %c0_357], %472 {strides = array<i32>} : memref<64x128xf32, #tpu.memory_space<vmem>>, vector<1x128xf32>,
    %474 = vector.extract_strided_slice %417 {offsets = [14, 0], sizes = [1, 128], strides = [1, 1]} : vector<16x256xf32> to vector<1x128xf32>
    %c57 = arith.constant 57 : index
    %c0_358 = arith.constant 0 : index
    %475 = vector.load %arg27[%c57, %c0_358] : memref<64x128xf32, #tpu.memory_space<vmem>>, vector<1x128xf32>
    tpu.vector_store %arg27[%c57, %c0_358], %474 {strides = array<i32>} : memref<64x128xf32, #tpu.memory_space<vmem>>, vector<1x128xf32>,
    %476 = vector.extract_strided_slice %417 {offsets = [1, 128], sizes = [1, 128], strides = [1, 1]} : vector<16x256xf32> to vector<1x128xf32>
    %c59 = arith.constant 59 : index
    %c0_359 = arith.constant 0 : index
    %477 = vector.load %arg27[%c59, %c0_359] : memref<64x128xf32, #tpu.memory_space<vmem>>, vector<1x128xf32>
    tpu.vector_store %arg27[%c59, %c0_359], %476 {strides = array<i32>} : memref<64x128xf32, #tpu.memory_space<vmem>>, vector<1x128xf32>,
    %478 = vector.extract_strided_slice %417 {offsets = [15, 0], sizes = [1, 128], strides = [1, 1]} : vector<16x256xf32> to vector<1x128xf32>
    %c61 = arith.constant 61 : index
    %c0_360 = arith.constant 0 : index
    %479 = vector.load %arg27[%c61, %c0_360] : memref<64x128xf32, #tpu.memory_space<vmem>>, vector<1x128xf32>
    tpu.vector_store %arg27[%c61, %c0_360], %478 {strides = array<i32>} : memref<64x128xf32, #tpu.memory_space<vmem>>, vector<1x128xf32>,
    %480 = vector.extract_strided_slice %417 {offsets = [0, 128], sizes = [1, 128], strides = [1, 1]} : vector<16x256xf32> to vector<1x128xf32>
    %c63 = arith.constant 63 : index
    %c0_361 = arith.constant 0 : index
    %481 = vector.load %arg27[%c63, %c0_361] : memref<64x128xf32, #tpu.memory_space<vmem>>, vector<1x128xf32>
    tpu.vector_store %arg27[%c63, %c0_361], %480 {strides = array<i32>} : memref<64x128xf32, #tpu.memory_space<vmem>>, vector<1x128xf32>,
    %482 = tpu.iota {dimensions = array<i32: 1>} : vector<4x128xi32>
    %c64_i32 = arith.constant 64 : i32
    %483 = vector.broadcast %c64_i32 : i32 to vector<4x128xi32>
    %484 = arith.cmpi sge, %482, %483 : vector<4x128xi32>
    %c96_i32 = arith.constant 96 : i32
    %485 = vector.broadcast %c96_i32 : i32 to vector<4x128xi32>
    %486 = arith.cmpi slt, %482, %485 : vector<4x128xi32>
    %487 = arith.andi %484, %486 : vector<4x128xi1>
    %cst_362 = arith.constant 1.000000e+00 : f32
    %cst_363 = arith.constant 5.000000e-01 : f32
    %488 = vector.broadcast %cst_362 : f32 to vector<4x128xf32>
    %489 = vector.broadcast %cst_363 : f32 to vector<4x128xf32>
    %490 = arith.select %487, %488, %489 : vector<4x128xi1>, vector<4x128xf32>
    %cst_364 = arith.constant 0.000000e+00 : f32
    %cst_365 = arith.constant 5.000000e-01 : f32
    %491 = vector.broadcast %cst_364 : f32 to vector<4x128xf32>
    %492 = vector.broadcast %cst_365 : f32 to vector<4x128xf32>
    %493 = arith.select %487, %491, %492 : vector<4x128xi1>, vector<4x128xf32>
    %494 = tpu.iota {dimensions = array<i32: 0>} : vector<4x64xi32>
    %495 = tpu.iota {dimensions = array<i32: 1>} : vector<4x64xi32>
    %c2_i32_366 = arith.constant 2 : i32
    %496 = vector.broadcast %c2_i32_366 : i32 to vector<4x64xi32>
    %497 = arith.cmpi slt, %494, %496 : vector<4x64xi32>
    %c32_i32 = arith.constant 32 : i32
    %498 = vector.broadcast %c32_i32 : i32 to vector<4x64xi32>
    %499 = arith.cmpi slt, %495, %498 : vector<4x64xi32>
    %500 = arith.xori %497, %499 : vector<4x64xi1>
    %cst_367 = arith.constant dense<true> : vector<4x64xi1>
    %501 = arith.xori %500, %cst_367 : vector<4x64xi1>
    %502 = arith.extui %501 : vector<4x64xi1> to vector<4x64xi32>
    %503 = arith.sitofp %502 : vector<4x64xi32> to vector<4x64xf32>
    %c0_368 = arith.constant 0 : index
    %c0_369 = arith.constant 0 : index
    %504 = vector.load %arg15[%c0_368, %c0_369] : memref<64x128xf32, #tpu.memory_space<vmem>>, vector<64x128xf32>
    %cst_370 = arith.constant 0.000000e+00 : f32
    %505 = vector.broadcast %cst_370 : f32 to vector<4x64xf32>
    %cst_371 = arith.constant 0.000000e+00 : f32
    %506 = vector.broadcast %cst_371 : f32 to vector<4x32xf32>
    %c0_372 = arith.constant 0 : index
    %c0_373 = arith.constant 0 : index
    %507 = vector.load %arg27[%c0_372, %c0_373] : memref<64x128xf32, #tpu.memory_space<vmem>>, vector<4x128xf32>
    %cst_374 = arith.constant dense<0.000000e+00> : vector<4x128xf32>
    %508 = tpu.matmul %505, %504, %cst_374 {dimension_numbers = #tpu.dot_dimension_numbers<[1], [0], [0], [1], [0, 0, 1, 1], [], []>} : vector<4x64xf32>, vector<64x128xf32>, vector<4x128xf32> -> vector<4x128xf32>
    %509 = arith.addf %507, %508 : vector<4x128xf32>
    %510 = math.tanh %509 : vector<4x128xf32>
    %511 = arith.mulf %510, %490 : vector<4x128xf32>
    %512 = arith.addf %511, %493 : vector<4x128xf32>
    %513 = vector.extract_strided_slice %512 {offsets = [0, 0], sizes = [4, 32], strides = [1, 1]} : vector<4x128xf32> to vector<4x32xf32>
    %514 = vector.extract_strided_slice %512 {offsets = [0, 32], sizes = [4, 32], strides = [1, 1]} : vector<4x128xf32> to vector<4x32xf32>
    %515 = vector.extract_strided_slice %512 {offsets = [0, 64], sizes = [4, 32], strides = [1, 1]} : vector<4x128xf32> to vector<4x32xf32>
    %516 = vector.extract_strided_slice %512 {offsets = [0, 96], sizes = [4, 32], strides = [1, 1]} : vector<4x128xf32> to vector<4x32xf32>
    %517 = arith.mulf %514, %506 : vector<4x32xf32>
    %518 = arith.mulf %513, %515 : vector<4x32xf32>
    %519 = arith.addf %517, %518 : vector<4x32xf32>
    %520 = math.tanh %519 : vector<4x32xf32>
    %521 = arith.mulf %516, %520 : vector<4x32xf32>
    %522 = tpu.concatenate %521, %521 in 1 : vector<4x32xf32>, vector<4x32xf32> -> vector<4x64xf32>
    %523 = arith.mulf %522, %503 : vector<4x64xf32>
    %524 = vector.extract_strided_slice %521 {offsets = [0, 0], sizes = [2, 32], strides = [1, 1]} : vector<4x32xf32> to vector<2x32xf32>
    %c0_375 = arith.constant 0 : index
    %c0_376 = arith.constant 0 : index
    %525 = vector.load %arg28[%c0_375, %c0_376] : memref<32x64xf32, #tpu.memory_space<vmem>>, vector<2x32xf32>
    tpu.vector_store %arg28[%c0_375, %c0_376], %524 {strides = array<i32>} : memref<32x64xf32, #tpu.memory_space<vmem>>, vector<2x32xf32>,
    %526 = vector.extract_strided_slice %521 {offsets = [2, 0], sizes = [2, 32], strides = [1, 1]} : vector<4x32xf32> to vector<2x32xf32>
    %c30_377 = arith.constant 30 : index
    %c32_378 = arith.constant 32 : index
    %527 = vector.load %arg28[%c30_377, %c32_378] : memref<32x64xf32, #tpu.memory_space<vmem>>, vector<2x32xf32>
    tpu.vector_store %arg28[%c30_377, %c32_378], %526 {strides = array<i32>} : memref<32x64xf32, #tpu.memory_space<vmem>>, vector<2x32xf32>,
    %c4_379 = arith.constant 4 : index
    %c0_380 = arith.constant 0 : index
    %528 = vector.load %arg27[%c4_379, %c0_380] : memref<64x128xf32, #tpu.memory_space<vmem>>, vector<4x128xf32>
    %cst_381 = arith.constant dense<0.000000e+00> : vector<4x128xf32>
    %529 = tpu.matmul %523, %504, %cst_381 {dimension_numbers = #tpu.dot_dimension_numbers<[1], [0], [0], [1], [0, 0, 1, 1], [], []>} : vector<4x64xf32>, vector<64x128xf32>, vector<4x128xf32> -> vector<4x128xf32>
    %530 = arith.addf %528, %529 : vector<4x128xf32>
    %531 = math.tanh %530 : vector<4x128xf32>
    %532 = arith.mulf %531, %490 : vector<4x128xf32>
    %533 = arith.addf %532, %493 : vector<4x128xf32>
    %534 = vector.extract_strided_slice %533 {offsets = [0, 0], sizes = [4, 32], strides = [1, 1]} : vector<4x128xf32> to vector<4x32xf32>
    %535 = vector.extract_strided_slice %533 {offsets = [0, 32], sizes = [4, 32], strides = [1, 1]} : vector<4x128xf32> to vector<4x32xf32>
    %536 = vector.extract_strided_slice %533 {offsets = [0, 64], sizes = [4, 32], strides = [1, 1]} : vector<4x128xf32> to vector<4x32xf32>
    %537 = vector.extract_strided_slice %533 {offsets = [0, 96], sizes = [4, 32], strides = [1, 1]} : vector<4x128xf32> to vector<4x32xf32>
    %538 = arith.mulf %535, %519 : vector<4x32xf32>
    %539 = arith.mulf %534, %536 : vector<4x32xf32>
    %540 = arith.addf %538, %539 : vector<4x32xf32>
    %541 = math.tanh %540 : vector<4x32xf32>
    %542 = arith.mulf %537, %541 : vector<4x32xf32>
    %543 = tpu.concatenate %542, %542 in 1 : vector<4x32xf32>, vector<4x32xf32> -> vector<4x64xf32>
    %544 = arith.mulf %543, %503 : vector<4x64xf32>
    %545 = vector.extract_strided_slice %542 {offsets = [0, 0], sizes = [2, 32], strides = [1, 1]} : vector<4x32xf32> to vector<2x32xf32>
    %c2_382 = arith.constant 2 : index
    %c0_383 = arith.constant 0 : index
    %546 = vector.load %arg28[%c2_382, %c0_383] : memref<32x64xf32, #tpu.memory_space<vmem>>, vector<2x32xf32>
    tpu.vector_store %arg28[%c2_382, %c0_383], %545 {strides = array<i32>} : memref<32x64xf32, #tpu.memory_space<vmem>>, vector<2x32xf32>,
    %547 = vector.extract_strided_slice %542 {offsets = [2, 0], sizes = [2, 32], strides = [1, 1]} : vector<4x32xf32> to vector<2x32xf32>
    %c28_384 = arith.constant 28 : index
    %c32_385 = arith.constant 32 : index
    %548 = vector.load %arg28[%c28_384, %c32_385] : memref<32x64xf32, #tpu.memory_space<vmem>>, vector<2x32xf32>
    tpu.vector_store %arg28[%c28_384, %c32_385], %547 {strides = array<i32>} : memref<32x64xf32, #tpu.memory_space<vmem>>, vector<2x32xf32>,
    %c8_386 = arith.constant 8 : index
    %c0_387 = arith.constant 0 : index
    %549 = vector.load %arg27[%c8_386, %c0_387] : memref<64x128xf32, #tpu.memory_space<vmem>>, vector<4x128xf32>
    %cst_388 = arith.constant dense<0.000000e+00> : vector<4x128xf32>
    %550 = tpu.matmul %544, %504, %cst_388 {dimension_numbers = #tpu.dot_dimension_numbers<[1], [0], [0], [1], [0, 0, 1, 1], [], []>} : vector<4x64xf32>, vector<64x128xf32>, vector<4x128xf32> -> vector<4x128xf32>
    %551 = arith.addf %549, %550 : vector<4x128xf32>
    %552 = math.tanh %551 : vector<4x128xf32>
    %553 = arith.mulf %552, %490 : vector<4x128xf32>
    %554 = arith.addf %553, %493 : vector<4x128xf32>
    %555 = vector.extract_strided_slice %554 {offsets = [0, 0], sizes = [4, 32], strides = [1, 1]} : vector<4x128xf32> to vector<4x32xf32>
    %556 = vector.extract_strided_slice %554 {offsets = [0, 32], sizes = [4, 32], strides = [1, 1]} : vector<4x128xf32> to vector<4x32xf32>
    %557 = vector.extract_strided_slice %554 {offsets = [0, 64], sizes = [4, 32], strides = [1, 1]} : vector<4x128xf32> to vector<4x32xf32>
    %558 = vector.extract_strided_slice %554 {offsets = [0, 96], sizes = [4, 32], strides = [1, 1]} : vector<4x128xf32> to vector<4x32xf32>
    %559 = arith.mulf %556, %540 : vector<4x32xf32>
    %560 = arith.mulf %555, %557 : vector<4x32xf32>
    %561 = arith.addf %559, %560 : vector<4x32xf32>
    %562 = math.tanh %561 : vector<4x32xf32>
    %563 = arith.mulf %558, %562 : vector<4x32xf32>
    %564 = tpu.concatenate %563, %563 in 1 : vector<4x32xf32>, vector<4x32xf32> -> vector<4x64xf32>
    %565 = arith.mulf %564, %503 : vector<4x64xf32>
    %566 = vector.extract_strided_slice %563 {offsets = [0, 0], sizes = [2, 32], strides = [1, 1]} : vector<4x32xf32> to vector<2x32xf32>
    %c4_389 = arith.constant 4 : index
    %c0_390 = arith.constant 0 : index
    %567 = vector.load %arg28[%c4_389, %c0_390] : memref<32x64xf32, #tpu.memory_space<vmem>>, vector<2x32xf32>
    tpu.vector_store %arg28[%c4_389, %c0_390], %566 {strides = array<i32>} : memref<32x64xf32, #tpu.memory_space<vmem>>, vector<2x32xf32>,
    %568 = vector.extract_strided_slice %563 {offsets = [2, 0], sizes = [2, 32], strides = [1, 1]} : vector<4x32xf32> to vector<2x32xf32>
    %c26_391 = arith.constant 26 : index
    %c32_392 = arith.constant 32 : index
    %569 = vector.load %arg28[%c26_391, %c32_392] : memref<32x64xf32, #tpu.memory_space<vmem>>, vector<2x32xf32>
    tpu.vector_store %arg28[%c26_391, %c32_392], %568 {strides = array<i32>} : memref<32x64xf32, #tpu.memory_space<vmem>>, vector<2x32xf32>,
    %c12_393 = arith.constant 12 : index
    %c0_394 = arith.constant 0 : index
    %570 = vector.load %arg27[%c12_393, %c0_394] : memref<64x128xf32, #tpu.memory_space<vmem>>, vector<4x128xf32>
    %cst_395 = arith.constant dense<0.000000e+00> : vector<4x128xf32>
    %571 = tpu.matmul %565, %504, %cst_395 {dimension_numbers = #tpu.dot_dimension_numbers<[1], [0], [0], [1], [0, 0, 1, 1], [], []>} : vector<4x64xf32>, vector<64x128xf32>, vector<4x128xf32> -> vector<4x128xf32>
    %572 = arith.addf %570, %571 : vector<4x128xf32>
    %573 = math.tanh %572 : vector<4x128xf32>
    %574 = arith.mulf %573, %490 : vector<4x128xf32>
    %575 = arith.addf %574, %493 : vector<4x128xf32>
    %576 = vector.extract_strided_slice %575 {offsets = [0, 0], sizes = [4, 32], strides = [1, 1]} : vector<4x128xf32> to vector<4x32xf32>
    %577 = vector.extract_strided_slice %575 {offsets = [0, 32], sizes = [4, 32], strides = [1, 1]} : vector<4x128xf32> to vector<4x32xf32>
    %578 = vector.extract_strided_slice %575 {offsets = [0, 64], sizes = [4, 32], strides = [1, 1]} : vector<4x128xf32> to vector<4x32xf32>
    %579 = vector.extract_strided_slice %575 {offsets = [0, 96], sizes = [4, 32], strides = [1, 1]} : vector<4x128xf32> to vector<4x32xf32>
    %580 = arith.mulf %577, %561 : vector<4x32xf32>
    %581 = arith.mulf %576, %578 : vector<4x32xf32>
    %582 = arith.addf %580, %581 : vector<4x32xf32>
    %583 = math.tanh %582 : vector<4x32xf32>
    %584 = arith.mulf %579, %583 : vector<4x32xf32>
    %585 = tpu.concatenate %584, %584 in 1 : vector<4x32xf32>, vector<4x32xf32> -> vector<4x64xf32>
    %586 = arith.mulf %585, %503 : vector<4x64xf32>
    %587 = vector.extract_strided_slice %584 {offsets = [0, 0], sizes = [2, 32], strides = [1, 1]} : vector<4x32xf32> to vector<2x32xf32>
    %c6_396 = arith.constant 6 : index
    %c0_397 = arith.constant 0 : index
    %588 = vector.load %arg28[%c6_396, %c0_397] : memref<32x64xf32, #tpu.memory_space<vmem>>, vector<2x32xf32>
    tpu.vector_store %arg28[%c6_396, %c0_397], %587 {strides = array<i32>} : memref<32x64xf32, #tpu.memory_space<vmem>>, vector<2x32xf32>,
    %589 = vector.extract_strided_slice %584 {offsets = [2, 0], sizes = [2, 32], strides = [1, 1]} : vector<4x32xf32> to vector<2x32xf32>
    %c24_398 = arith.constant 24 : index
    %c32_399 = arith.constant 32 : index
    %590 = vector.load %arg28[%c24_398, %c32_399] : memref<32x64xf32, #tpu.memory_space<vmem>>, vector<2x32xf32>
    tpu.vector_store %arg28[%c24_398, %c32_399], %589 {strides = array<i32>} : memref<32x64xf32, #tpu.memory_space<vmem>>, vector<2x32xf32>,
    %c16_400 = arith.constant 16 : index
    %c0_401 = arith.constant 0 : index
    %591 = vector.load %arg27[%c16_400, %c0_401] : memref<64x128xf32, #tpu.memory_space<vmem>>, vector<4x128xf32>
    %cst_402 = arith.constant dense<0.000000e+00> : vector<4x128xf32>
    %592 = tpu.matmul %586, %504, %cst_402 {dimension_numbers = #tpu.dot_dimension_numbers<[1], [0], [0], [1], [0, 0, 1, 1], [], []>} : vector<4x64xf32>, vector<64x128xf32>, vector<4x128xf32> -> vector<4x128xf32>
    %593 = arith.addf %591, %592 : vector<4x128xf32>
    %594 = math.tanh %593 : vector<4x128xf32>
    %595 = arith.mulf %594, %490 : vector<4x128xf32>
    %596 = arith.addf %595, %493 : vector<4x128xf32>
    %597 = vector.extract_strided_slice %596 {offsets = [0, 0], sizes = [4, 32], strides = [1, 1]} : vector<4x128xf32> to vector<4x32xf32>
    %598 = vector.extract_strided_slice %596 {offsets = [0, 32], sizes = [4, 32], strides = [1, 1]} : vector<4x128xf32> to vector<4x32xf32>
    %599 = vector.extract_strided_slice %596 {offsets = [0, 64], sizes = [4, 32], strides = [1, 1]} : vector<4x128xf32> to vector<4x32xf32>
    %600 = vector.extract_strided_slice %596 {offsets = [0, 96], sizes = [4, 32], strides = [1, 1]} : vector<4x128xf32> to vector<4x32xf32>
    %601 = arith.mulf %598, %582 : vector<4x32xf32>
    %602 = arith.mulf %597, %599 : vector<4x32xf32>
    %603 = arith.addf %601, %602 : vector<4x32xf32>
    %604 = math.tanh %603 : vector<4x32xf32>
    %605 = arith.mulf %600, %604 : vector<4x32xf32>
    %606 = tpu.concatenate %605, %605 in 1 : vector<4x32xf32>, vector<4x32xf32> -> vector<4x64xf32>
    %607 = arith.mulf %606, %503 : vector<4x64xf32>
    %608 = vector.extract_strided_slice %605 {offsets = [0, 0], sizes = [2, 32], strides = [1, 1]} : vector<4x32xf32> to vector<2x32xf32>
    %c8_403 = arith.constant 8 : index
    %c0_404 = arith.constant 0 : index
    %609 = vector.load %arg28[%c8_403, %c0_404] : memref<32x64xf32, #tpu.memory_space<vmem>>, vector<2x32xf32>
    tpu.vector_store %arg28[%c8_403, %c0_404], %608 {strides = array<i32>} : memref<32x64xf32, #tpu.memory_space<vmem>>, vector<2x32xf32>,
    %610 = vector.extract_strided_slice %605 {offsets = [2, 0], sizes = [2, 32], strides = [1, 1]} : vector<4x32xf32> to vector<2x32xf32>
    %c22_405 = arith.constant 22 : index
    %c32_406 = arith.constant 32 : index
    %611 = vector.load %arg28[%c22_405, %c32_406] : memref<32x64xf32, #tpu.memory_space<vmem>>, vector<2x32xf32>
    tpu.vector_store %arg28[%c22_405, %c32_406], %610 {strides = array<i32>} : memref<32x64xf32, #tpu.memory_space<vmem>>, vector<2x32xf32>,
    %c20_407 = arith.constant 20 : index
    %c0_408 = arith.constant 0 : index
    %612 = vector.load %arg27[%c20_407, %c0_408] : memref<64x128xf32, #tpu.memory_space<vmem>>, vector<4x128xf32>
    %cst_409 = arith.constant dense<0.000000e+00> : vector<4x128xf32>
    %613 = tpu.matmul %607, %504, %cst_409 {dimension_numbers = #tpu.dot_dimension_numbers<[1], [0], [0], [1], [0, 0, 1, 1], [], []>} : vector<4x64xf32>, vector<64x128xf32>, vector<4x128xf32> -> vector<4x128xf32>
    %614 = arith.addf %612, %613 : vector<4x128xf32>
    %615 = math.tanh %614 : vector<4x128xf32>
    %616 = arith.mulf %615, %490 : vector<4x128xf32>
    %617 = arith.addf %616, %493 : vector<4x128xf32>
    %618 = vector.extract_strided_slice %617 {offsets = [0, 0], sizes = [4, 32], strides = [1, 1]} : vector<4x128xf32> to vector<4x32xf32>
    %619 = vector.extract_strided_slice %617 {offsets = [0, 32], sizes = [4, 32], strides = [1, 1]} : vector<4x128xf32> to vector<4x32xf32>
    %620 = vector.extract_strided_slice %617 {offsets = [0, 64], sizes = [4, 32], strides = [1, 1]} : vector<4x128xf32> to vector<4x32xf32>
    %621 = vector.extract_strided_slice %617 {offsets = [0, 96], sizes = [4, 32], strides = [1, 1]} : vector<4x128xf32> to vector<4x32xf32>
    %622 = arith.mulf %619, %603 : vector<4x32xf32>
    %623 = arith.mulf %618, %620 : vector<4x32xf32>
    %624 = arith.addf %622, %623 : vector<4x32xf32>
    %625 = math.tanh %624 : vector<4x32xf32>
    %626 = arith.mulf %621, %625 : vector<4x32xf32>
    %627 = tpu.concatenate %626, %626 in 1 : vector<4x32xf32>, vector<4x32xf32> -> vector<4x64xf32>
    %628 = arith.mulf %627, %503 : vector<4x64xf32>
    %629 = vector.extract_strided_slice %626 {offsets = [0, 0], sizes = [2, 32], strides = [1, 1]} : vector<4x32xf32> to vector<2x32xf32>
    %c10_410 = arith.constant 10 : index
    %c0_411 = arith.constant 0 : index
    %630 = vector.load %arg28[%c10_410, %c0_411] : memref<32x64xf32, #tpu.memory_space<vmem>>, vector<2x32xf32>
    tpu.vector_store %arg28[%c10_410, %c0_411], %629 {strides = array<i32>} : memref<32x64xf32, #tpu.memory_space<vmem>>, vector<2x32xf32>,
    %631 = vector.extract_strided_slice %626 {offsets = [2, 0], sizes = [2, 32], strides = [1, 1]} : vector<4x32xf32> to vector<2x32xf32>
    %c20_412 = arith.constant 20 : index
    %c32_413 = arith.constant 32 : index
    %632 = vector.load %arg28[%c20_412, %c32_413] : memref<32x64xf32, #tpu.memory_space<vmem>>, vector<2x32xf32>
    tpu.vector_store %arg28[%c20_412, %c32_413], %631 {strides = array<i32>} : memref<32x64xf32, #tpu.memory_space<vmem>>, vector<2x32xf32>,
    %c24_414 = arith.constant 24 : index
    %c0_415 = arith.constant 0 : index
    %633 = vector.load %arg27[%c24_414, %c0_415] : memref<64x128xf32, #tpu.memory_space<vmem>>, vector<4x128xf32>
    %cst_416 = arith.constant dense<0.000000e+00> : vector<4x128xf32>
    %634 = tpu.matmul %628, %504, %cst_416 {dimension_numbers = #tpu.dot_dimension_numbers<[1], [0], [0], [1], [0, 0, 1, 1], [], []>} : vector<4x64xf32>, vector<64x128xf32>, vector<4x128xf32> -> vector<4x128xf32>
    %635 = arith.addf %633, %634 : vector<4x128xf32>
    %636 = math.tanh %635 : vector<4x128xf32>
    %637 = arith.mulf %636, %490 : vector<4x128xf32>
    %638 = arith.addf %637, %493 : vector<4x128xf32>
    %639 = vector.extract_strided_slice %638 {offsets = [0, 0], sizes = [4, 32], strides = [1, 1]} : vector<4x128xf32> to vector<4x32xf32>
    %640 = vector.extract_strided_slice %638 {offsets = [0, 32], sizes = [4, 32], strides = [1, 1]} : vector<4x128xf32> to vector<4x32xf32>
    %641 = vector.extract_strided_slice %638 {offsets = [0, 64], sizes = [4, 32], strides = [1, 1]} : vector<4x128xf32> to vector<4x32xf32>
    %642 = vector.extract_strided_slice %638 {offsets = [0, 96], sizes = [4, 32], strides = [1, 1]} : vector<4x128xf32> to vector<4x32xf32>
    %643 = arith.mulf %640, %624 : vector<4x32xf32>
    %644 = arith.mulf %639, %641 : vector<4x32xf32>
    %645 = arith.addf %643, %644 : vector<4x32xf32>
    %646 = math.tanh %645 : vector<4x32xf32>
    %647 = arith.mulf %642, %646 : vector<4x32xf32>
    %648 = tpu.concatenate %647, %647 in 1 : vector<4x32xf32>, vector<4x32xf32> -> vector<4x64xf32>
    %649 = arith.mulf %648, %503 : vector<4x64xf32>
    %650 = vector.extract_strided_slice %647 {offsets = [0, 0], sizes = [2, 32], strides = [1, 1]} : vector<4x32xf32> to vector<2x32xf32>
    %c12_417 = arith.constant 12 : index
    %c0_418 = arith.constant 0 : index
    %651 = vector.load %arg28[%c12_417, %c0_418] : memref<32x64xf32, #tpu.memory_space<vmem>>, vector<2x32xf32>
    tpu.vector_store %arg28[%c12_417, %c0_418], %650 {strides = array<i32>} : memref<32x64xf32, #tpu.memory_space<vmem>>, vector<2x32xf32>,
    %652 = vector.extract_strided_slice %647 {offsets = [2, 0], sizes = [2, 32], strides = [1, 1]} : vector<4x32xf32> to vector<2x32xf32>
    %c18_419 = arith.constant 18 : index
    %c32_420 = arith.constant 32 : index
    %653 = vector.load %arg28[%c18_419, %c32_420] : memref<32x64xf32, #tpu.memory_space<vmem>>, vector<2x32xf32>
    tpu.vector_store %arg28[%c18_419, %c32_420], %652 {strides = array<i32>} : memref<32x64xf32, #tpu.memory_space<vmem>>, vector<2x32xf32>,
    %c28_421 = arith.constant 28 : index
    %c0_422 = arith.constant 0 : index
    %654 = vector.load %arg27[%c28_421, %c0_422] : memref<64x128xf32, #tpu.memory_space<vmem>>, vector<4x128xf32>
    %cst_423 = arith.constant dense<0.000000e+00> : vector<4x128xf32>
    %655 = tpu.matmul %649, %504, %cst_423 {dimension_numbers = #tpu.dot_dimension_numbers<[1], [0], [0], [1], [0, 0, 1, 1], [], []>} : vector<4x64xf32>, vector<64x128xf32>, vector<4x128xf32> -> vector<4x128xf32>
    %656 = arith.addf %654, %655 : vector<4x128xf32>
    %657 = math.tanh %656 : vector<4x128xf32>
    %658 = arith.mulf %657, %490 : vector<4x128xf32>
    %659 = arith.addf %658, %493 : vector<4x128xf32>
    %660 = vector.extract_strided_slice %659 {offsets = [0, 0], sizes = [4, 32], strides = [1, 1]} : vector<4x128xf32> to vector<4x32xf32>
    %661 = vector.extract_strided_slice %659 {offsets = [0, 32], sizes = [4, 32], strides = [1, 1]} : vector<4x128xf32> to vector<4x32xf32>
    %662 = vector.extract_strided_slice %659 {offsets = [0, 64], sizes = [4, 32], strides = [1, 1]} : vector<4x128xf32> to vector<4x32xf32>
    %663 = vector.extract_strided_slice %659 {offsets = [0, 96], sizes = [4, 32], strides = [1, 1]} : vector<4x128xf32> to vector<4x32xf32>
    %664 = arith.mulf %661, %645 : vector<4x32xf32>
    %665 = arith.mulf %660, %662 : vector<4x32xf32>
    %666 = arith.addf %664, %665 : vector<4x32xf32>
    %667 = math.tanh %666 : vector<4x32xf32>
    %668 = arith.mulf %663, %667 : vector<4x32xf32>
    %669 = tpu.concatenate %668, %668 in 1 : vector<4x32xf32>, vector<4x32xf32> -> vector<4x64xf32>
    %670 = arith.mulf %669, %503 : vector<4x64xf32>
    %671 = vector.extract_strided_slice %668 {offsets = [0, 0], sizes = [2, 32], strides = [1, 1]} : vector<4x32xf32> to vector<2x32xf32>
    %c14_424 = arith.constant 14 : index
    %c0_425 = arith.constant 0 : index
    %672 = vector.load %arg28[%c14_424, %c0_425] : memref<32x64xf32, #tpu.memory_space<vmem>>, vector<2x32xf32>
    tpu.vector_store %arg28[%c14_424, %c0_425], %671 {strides = array<i32>} : memref<32x64xf32, #tpu.memory_space<vmem>>, vector<2x32xf32>,
    %673 = vector.extract_strided_slice %668 {offsets = [2, 0], sizes = [2, 32], strides = [1, 1]} : vector<4x32xf32> to vector<2x32xf32>
    %c16_426 = arith.constant 16 : index
    %c32_427 = arith.constant 32 : index
    %674 = vector.load %arg28[%c16_426, %c32_427] : memref<32x64xf32, #tpu.memory_space<vmem>>, vector<2x32xf32>
    tpu.vector_store %arg28[%c16_426, %c32_427], %673 {strides = array<i32>} : memref<32x64xf32, #tpu.memory_space<vmem>>, vector<2x32xf32>,
    %c32_428 = arith.constant 32 : index
    %c0_429 = arith.constant 0 : index
    %675 = vector.load %arg27[%c32_428, %c0_429] : memref<64x128xf32, #tpu.memory_space<vmem>>, vector<4x128xf32>
    %cst_430 = arith.constant dense<0.000000e+00> : vector<4x128xf32>
    %676 = tpu.matmul %670, %504, %cst_430 {dimension_numbers = #tpu.dot_dimension_numbers<[1], [0], [0], [1], [0, 0, 1, 1], [], []>} : vector<4x64xf32>, vector<64x128xf32>, vector<4x128xf32> -> vector<4x128xf32>
    %677 = arith.addf %675, %676 : vector<4x128xf32>
    %678 = math.tanh %677 : vector<4x128xf32>
    %679 = arith.mulf %678, %490 : vector<4x128xf32>
    %680 = arith.addf %679, %493 : vector<4x128xf32>
    %681 = vector.extract_strided_slice %680 {offsets = [0, 0], sizes = [4, 32], strides = [1, 1]} : vector<4x128xf32> to vector<4x32xf32>
    %682 = vector.extract_strided_slice %680 {offsets = [0, 32], sizes = [4, 32], strides = [1, 1]} : vector<4x128xf32> to vector<4x32xf32>
    %683 = vector.extract_strided_slice %680 {offsets = [0, 64], sizes = [4, 32], strides = [1, 1]} : vector<4x128xf32> to vector<4x32xf32>
    %684 = vector.extract_strided_slice %680 {offsets = [0, 96], sizes = [4, 32], strides = [1, 1]} : vector<4x128xf32> to vector<4x32xf32>
    %685 = arith.mulf %682, %666 : vector<4x32xf32>
    %686 = arith.mulf %681, %683 : vector<4x32xf32>
    %687 = arith.addf %685, %686 : vector<4x32xf32>
    %688 = math.tanh %687 : vector<4x32xf32>
    %689 = arith.mulf %684, %688 : vector<4x32xf32>
    %690 = tpu.concatenate %689, %689 in 1 : vector<4x32xf32>, vector<4x32xf32> -> vector<4x64xf32>
    %691 = arith.mulf %690, %503 : vector<4x64xf32>
    %692 = vector.extract_strided_slice %689 {offsets = [0, 0], sizes = [2, 32], strides = [1, 1]} : vector<4x32xf32> to vector<2x32xf32>
    %c16_431 = arith.constant 16 : index
    %c0_432 = arith.constant 0 : index
    %693 = vector.load %arg28[%c16_431, %c0_432] : memref<32x64xf32, #tpu.memory_space<vmem>>, vector<2x32xf32>
    tpu.vector_store %arg28[%c16_431, %c0_432], %692 {strides = array<i32>} : memref<32x64xf32, #tpu.memory_space<vmem>>, vector<2x32xf32>,
    %694 = vector.extract_strided_slice %689 {offsets = [2, 0], sizes = [2, 32], strides = [1, 1]} : vector<4x32xf32> to vector<2x32xf32>
    %c14_433 = arith.constant 14 : index
    %c32_434 = arith.constant 32 : index
    %695 = vector.load %arg28[%c14_433, %c32_434] : memref<32x64xf32, #tpu.memory_space<vmem>>, vector<2x32xf32>
    tpu.vector_store %arg28[%c14_433, %c32_434], %694 {strides = array<i32>} : memref<32x64xf32, #tpu.memory_space<vmem>>, vector<2x32xf32>,
    %c36_435 = arith.constant 36 : index
    %c0_436 = arith.constant 0 : index
    %696 = vector.load %arg27[%c36_435, %c0_436] : memref<64x128xf32, #tpu.memory_space<vmem>>, vector<4x128xf32>
    %cst_437 = arith.constant dense<0.000000e+00> : vector<4x128xf32>
    %697 = tpu.matmul %691, %504, %cst_437 {dimension_numbers = #tpu.dot_dimension_numbers<[1], [0], [0], [1], [0, 0, 1, 1], [], []>} : vector<4x64xf32>, vector<64x128xf32>, vector<4x128xf32> -> vector<4x128xf32>
    %698 = arith.addf %696, %697 : vector<4x128xf32>
    %699 = math.tanh %698 : vector<4x128xf32>
    %700 = arith.mulf %699, %490 : vector<4x128xf32>
    %701 = arith.addf %700, %493 : vector<4x128xf32>
    %702 = vector.extract_strided_slice %701 {offsets = [0, 0], sizes = [4, 32], strides = [1, 1]} : vector<4x128xf32> to vector<4x32xf32>
    %703 = vector.extract_strided_slice %701 {offsets = [0, 32], sizes = [4, 32], strides = [1, 1]} : vector<4x128xf32> to vector<4x32xf32>
    %704 = vector.extract_strided_slice %701 {offsets = [0, 64], sizes = [4, 32], strides = [1, 1]} : vector<4x128xf32> to vector<4x32xf32>
    %705 = vector.extract_strided_slice %701 {offsets = [0, 96], sizes = [4, 32], strides = [1, 1]} : vector<4x128xf32> to vector<4x32xf32>
    %706 = arith.mulf %703, %687 : vector<4x32xf32>
    %707 = arith.mulf %702, %704 : vector<4x32xf32>
    %708 = arith.addf %706, %707 : vector<4x32xf32>
    %709 = math.tanh %708 : vector<4x32xf32>
    %710 = arith.mulf %705, %709 : vector<4x32xf32>
    %711 = tpu.concatenate %710, %710 in 1 : vector<4x32xf32>, vector<4x32xf32> -> vector<4x64xf32>
    %712 = arith.mulf %711, %503 : vector<4x64xf32>
    %713 = vector.extract_strided_slice %710 {offsets = [0, 0], sizes = [2, 32], strides = [1, 1]} : vector<4x32xf32> to vector<2x32xf32>
    %c18_438 = arith.constant 18 : index
    %c0_439 = arith.constant 0 : index
    %714 = vector.load %arg28[%c18_438, %c0_439] : memref<32x64xf32, #tpu.memory_space<vmem>>, vector<2x32xf32>
    tpu.vector_store %arg28[%c18_438, %c0_439], %713 {strides = array<i32>} : memref<32x64xf32, #tpu.memory_space<vmem>>, vector<2x32xf32>,
    %715 = vector.extract_strided_slice %710 {offsets = [2, 0], sizes = [2, 32], strides = [1, 1]} : vector<4x32xf32> to vector<2x32xf32>
    %c12_440 = arith.constant 12 : index
    %c32_441 = arith.constant 32 : index
    %716 = vector.load %arg28[%c12_440, %c32_441] : memref<32x64xf32, #tpu.memory_space<vmem>>, vector<2x32xf32>
    tpu.vector_store %arg28[%c12_440, %c32_441], %715 {strides = array<i32>} : memref<32x64xf32, #tpu.memory_space<vmem>>, vector<2x32xf32>,
    %c40_442 = arith.constant 40 : index
    %c0_443 = arith.constant 0 : index
    %717 = vector.load %arg27[%c40_442, %c0_443] : memref<64x128xf32, #tpu.memory_space<vmem>>, vector<4x128xf32>
    %cst_444 = arith.constant dense<0.000000e+00> : vector<4x128xf32>
    %718 = tpu.matmul %712, %504, %cst_444 {dimension_numbers = #tpu.dot_dimension_numbers<[1], [0], [0], [1], [0, 0, 1, 1], [], []>} : vector<4x64xf32>, vector<64x128xf32>, vector<4x128xf32> -> vector<4x128xf32>
    %719 = arith.addf %717, %718 : vector<4x128xf32>
    %720 = math.tanh %719 : vector<4x128xf32>
    %721 = arith.mulf %720, %490 : vector<4x128xf32>
    %722 = arith.addf %721, %493 : vector<4x128xf32>
    %723 = vector.extract_strided_slice %722 {offsets = [0, 0], sizes = [4, 32], strides = [1, 1]} : vector<4x128xf32> to vector<4x32xf32>
    %724 = vector.extract_strided_slice %722 {offsets = [0, 32], sizes = [4, 32], strides = [1, 1]} : vector<4x128xf32> to vector<4x32xf32>
    %725 = vector.extract_strided_slice %722 {offsets = [0, 64], sizes = [4, 32], strides = [1, 1]} : vector<4x128xf32> to vector<4x32xf32>
    %726 = vector.extract_strided_slice %722 {offsets = [0, 96], sizes = [4, 32], strides = [1, 1]} : vector<4x128xf32> to vector<4x32xf32>
    %727 = arith.mulf %724, %708 : vector<4x32xf32>
    %728 = arith.mulf %723, %725 : vector<4x32xf32>
    %729 = arith.addf %727, %728 : vector<4x32xf32>
    %730 = math.tanh %729 : vector<4x32xf32>
    %731 = arith.mulf %726, %730 : vector<4x32xf32>
    %732 = tpu.concatenate %731, %731 in 1 : vector<4x32xf32>, vector<4x32xf32> -> vector<4x64xf32>
    %733 = arith.mulf %732, %503 : vector<4x64xf32>
    %734 = vector.extract_strided_slice %731 {offsets = [0, 0], sizes = [2, 32], strides = [1, 1]} : vector<4x32xf32> to vector<2x32xf32>
    %c20_445 = arith.constant 20 : index
    %c0_446 = arith.constant 0 : index
    %735 = vector.load %arg28[%c20_445, %c0_446] : memref<32x64xf32, #tpu.memory_space<vmem>>, vector<2x32xf32>
    tpu.vector_store %arg28[%c20_445, %c0_446], %734 {strides = array<i32>} : memref<32x64xf32, #tpu.memory_space<vmem>>, vector<2x32xf32>,
    %736 = vector.extract_strided_slice %731 {offsets = [2, 0], sizes = [2, 32], strides = [1, 1]} : vector<4x32xf32> to vector<2x32xf32>
    %c10_447 = arith.constant 10 : index
    %c32_448 = arith.constant 32 : index
    %737 = vector.load %arg28[%c10_447, %c32_448] : memref<32x64xf32, #tpu.memory_space<vmem>>, vector<2x32xf32>
    tpu.vector_store %arg28[%c10_447, %c32_448], %736 {strides = array<i32>} : memref<32x64xf32, #tpu.memory_space<vmem>>, vector<2x32xf32>,
    %c44_449 = arith.constant 44 : index
    %c0_450 = arith.constant 0 : index
    %738 = vector.load %arg27[%c44_449, %c0_450] : memref<64x128xf32, #tpu.memory_space<vmem>>, vector<4x128xf32>
    %cst_451 = arith.constant dense<0.000000e+00> : vector<4x128xf32>
    %739 = tpu.matmul %733, %504, %cst_451 {dimension_numbers = #tpu.dot_dimension_numbers<[1], [0], [0], [1], [0, 0, 1, 1], [], []>} : vector<4x64xf32>, vector<64x128xf32>, vector<4x128xf32> -> vector<4x128xf32>
    %740 = arith.addf %738, %739 : vector<4x128xf32>
    %741 = math.tanh %740 : vector<4x128xf32>
    %742 = arith.mulf %741, %490 : vector<4x128xf32>
    %743 = arith.addf %742, %493 : vector<4x128xf32>
    %744 = vector.extract_strided_slice %743 {offsets = [0, 0], sizes = [4, 32], strides = [1, 1]} : vector<4x128xf32> to vector<4x32xf32>
    %745 = vector.extract_strided_slice %743 {offsets = [0, 32], sizes = [4, 32], strides = [1, 1]} : vector<4x128xf32> to vector<4x32xf32>
    %746 = vector.extract_strided_slice %743 {offsets = [0, 64], sizes = [4, 32], strides = [1, 1]} : vector<4x128xf32> to vector<4x32xf32>
    %747 = vector.extract_strided_slice %743 {offsets = [0, 96], sizes = [4, 32], strides = [1, 1]} : vector<4x128xf32> to vector<4x32xf32>
    %748 = arith.mulf %745, %729 : vector<4x32xf32>
    %749 = arith.mulf %744, %746 : vector<4x32xf32>
    %750 = arith.addf %748, %749 : vector<4x32xf32>
    %751 = math.tanh %750 : vector<4x32xf32>
    %752 = arith.mulf %747, %751 : vector<4x32xf32>
    %753 = tpu.concatenate %752, %752 in 1 : vector<4x32xf32>, vector<4x32xf32> -> vector<4x64xf32>
    %754 = arith.mulf %753, %503 : vector<4x64xf32>
    %755 = vector.extract_strided_slice %752 {offsets = [0, 0], sizes = [2, 32], strides = [1, 1]} : vector<4x32xf32> to vector<2x32xf32>
    %c22_452 = arith.constant 22 : index
    %c0_453 = arith.constant 0 : index
    %756 = vector.load %arg28[%c22_452, %c0_453] : memref<32x64xf32, #tpu.memory_space<vmem>>, vector<2x32xf32>
    tpu.vector_store %arg28[%c22_452, %c0_453], %755 {strides = array<i32>} : memref<32x64xf32, #tpu.memory_space<vmem>>, vector<2x32xf32>,
    %757 = vector.extract_strided_slice %752 {offsets = [2, 0], sizes = [2, 32], strides = [1, 1]} : vector<4x32xf32> to vector<2x32xf32>
    %c8_454 = arith.constant 8 : index
    %c32_455 = arith.constant 32 : index
    %758 = vector.load %arg28[%c8_454, %c32_455] : memref<32x64xf32, #tpu.memory_space<vmem>>, vector<2x32xf32>
    tpu.vector_store %arg28[%c8_454, %c32_455], %757 {strides = array<i32>} : memref<32x64xf32, #tpu.memory_space<vmem>>, vector<2x32xf32>,
    %c48_456 = arith.constant 48 : index
    %c0_457 = arith.constant 0 : index
    %759 = vector.load %arg27[%c48_456, %c0_457] : memref<64x128xf32, #tpu.memory_space<vmem>>, vector<4x128xf32>
    %cst_458 = arith.constant dense<0.000000e+00> : vector<4x128xf32>
    %760 = tpu.matmul %754, %504, %cst_458 {dimension_numbers = #tpu.dot_dimension_numbers<[1], [0], [0], [1], [0, 0, 1, 1], [], []>} : vector<4x64xf32>, vector<64x128xf32>, vector<4x128xf32> -> vector<4x128xf32>
    %761 = arith.addf %759, %760 : vector<4x128xf32>
    %762 = math.tanh %761 : vector<4x128xf32>
    %763 = arith.mulf %762, %490 : vector<4x128xf32>
    %764 = arith.addf %763, %493 : vector<4x128xf32>
    %765 = vector.extract_strided_slice %764 {offsets = [0, 0], sizes = [4, 32], strides = [1, 1]} : vector<4x128xf32> to vector<4x32xf32>
    %766 = vector.extract_strided_slice %764 {offsets = [0, 32], sizes = [4, 32], strides = [1, 1]} : vector<4x128xf32> to vector<4x32xf32>
    %767 = vector.extract_strided_slice %764 {offsets = [0, 64], sizes = [4, 32], strides = [1, 1]} : vector<4x128xf32> to vector<4x32xf32>
    %768 = vector.extract_strided_slice %764 {offsets = [0, 96], sizes = [4, 32], strides = [1, 1]} : vector<4x128xf32> to vector<4x32xf32>
    %769 = arith.mulf %766, %750 : vector<4x32xf32>
    %770 = arith.mulf %765, %767 : vector<4x32xf32>
    %771 = arith.addf %769, %770 : vector<4x32xf32>
    %772 = math.tanh %771 : vector<4x32xf32>
    %773 = arith.mulf %768, %772 : vector<4x32xf32>
    %774 = tpu.concatenate %773, %773 in 1 : vector<4x32xf32>, vector<4x32xf32> -> vector<4x64xf32>
    %775 = arith.mulf %774, %503 : vector<4x64xf32>
    %776 = vector.extract_strided_slice %773 {offsets = [0, 0], sizes = [2, 32], strides = [1, 1]} : vector<4x32xf32> to vector<2x32xf32>
    %c24_459 = arith.constant 24 : index
    %c0_460 = arith.constant 0 : index
    %777 = vector.load %arg28[%c24_459, %c0_460] : memref<32x64xf32, #tpu.memory_space<vmem>>, vector<2x32xf32>
    tpu.vector_store %arg28[%c24_459, %c0_460], %776 {strides = array<i32>} : memref<32x64xf32, #tpu.memory_space<vmem>>, vector<2x32xf32>,
    %778 = vector.extract_strided_slice %773 {offsets = [2, 0], sizes = [2, 32], strides = [1, 1]} : vector<4x32xf32> to vector<2x32xf32>
    %c6_461 = arith.constant 6 : index
    %c32_462 = arith.constant 32 : index
    %779 = vector.load %arg28[%c6_461, %c32_462] : memref<32x64xf32, #tpu.memory_space<vmem>>, vector<2x32xf32>
    tpu.vector_store %arg28[%c6_461, %c32_462], %778 {strides = array<i32>} : memref<32x64xf32, #tpu.memory_space<vmem>>, vector<2x32xf32>,
    %c52_463 = arith.constant 52 : index
    %c0_464 = arith.constant 0 : index
    %780 = vector.load %arg27[%c52_463, %c0_464] : memref<64x128xf32, #tpu.memory_space<vmem>>, vector<4x128xf32>
    %cst_465 = arith.constant dense<0.000000e+00> : vector<4x128xf32>
    %781 = tpu.matmul %775, %504, %cst_465 {dimension_numbers = #tpu.dot_dimension_numbers<[1], [0], [0], [1], [0, 0, 1, 1], [], []>} : vector<4x64xf32>, vector<64x128xf32>, vector<4x128xf32> -> vector<4x128xf32>
    %782 = arith.addf %780, %781 : vector<4x128xf32>
    %783 = math.tanh %782 : vector<4x128xf32>
    %784 = arith.mulf %783, %490 : vector<4x128xf32>
    %785 = arith.addf %784, %493 : vector<4x128xf32>
    %786 = vector.extract_strided_slice %785 {offsets = [0, 0], sizes = [4, 32], strides = [1, 1]} : vector<4x128xf32> to vector<4x32xf32>
    %787 = vector.extract_strided_slice %785 {offsets = [0, 32], sizes = [4, 32], strides = [1, 1]} : vector<4x128xf32> to vector<4x32xf32>
    %788 = vector.extract_strided_slice %785 {offsets = [0, 64], sizes = [4, 32], strides = [1, 1]} : vector<4x128xf32> to vector<4x32xf32>
    %789 = vector.extract_strided_slice %785 {offsets = [0, 96], sizes = [4, 32], strides = [1, 1]} : vector<4x128xf32> to vector<4x32xf32>
    %790 = arith.mulf %787, %771 : vector<4x32xf32>
    %791 = arith.mulf %786, %788 : vector<4x32xf32>
    %792 = arith.addf %790, %791 : vector<4x32xf32>
    %793 = math.tanh %792 : vector<4x32xf32>
    %794 = arith.mulf %789, %793 : vector<4x32xf32>
    %795 = tpu.concatenate %794, %794 in 1 : vector<4x32xf32>, vector<4x32xf32> -> vector<4x64xf32>
    %796 = arith.mulf %795, %503 : vector<4x64xf32>
    %797 = vector.extract_strided_slice %794 {offsets = [0, 0], sizes = [2, 32], strides = [1, 1]} : vector<4x32xf32> to vector<2x32xf32>
    %c26_466 = arith.constant 26 : index
    %c0_467 = arith.constant 0 : index
    %798 = vector.load %arg28[%c26_466, %c0_467] : memref<32x64xf32, #tpu.memory_space<vmem>>, vector<2x32xf32>
    tpu.vector_store %arg28[%c26_466, %c0_467], %797 {strides = array<i32>} : memref<32x64xf32, #tpu.memory_space<vmem>>, vector<2x32xf32>,
    %799 = vector.extract_strided_slice %794 {offsets = [2, 0], sizes = [2, 32], strides = [1, 1]} : vector<4x32xf32> to vector<2x32xf32>
    %c4_468 = arith.constant 4 : index
    %c32_469 = arith.constant 32 : index
    %800 = vector.load %arg28[%c4_468, %c32_469] : memref<32x64xf32, #tpu.memory_space<vmem>>, vector<2x32xf32>
    tpu.vector_store %arg28[%c4_468, %c32_469], %799 {strides = array<i32>} : memref<32x64xf32, #tpu.memory_space<vmem>>, vector<2x32xf32>,
    %c56_470 = arith.constant 56 : index
    %c0_471 = arith.constant 0 : index
    %801 = vector.load %arg27[%c56_470, %c0_471] : memref<64x128xf32, #tpu.memory_space<vmem>>, vector<4x128xf32>
    %cst_472 = arith.constant dense<0.000000e+00> : vector<4x128xf32>
    %802 = tpu.matmul %796, %504, %cst_472 {dimension_numbers = #tpu.dot_dimension_numbers<[1], [0], [0], [1], [0, 0, 1, 1], [], []>} : vector<4x64xf32>, vector<64x128xf32>, vector<4x128xf32> -> vector<4x128xf32>
    %803 = arith.addf %801, %802 : vector<4x128xf32>
    %804 = math.tanh %803 : vector<4x128xf32>
    %805 = arith.mulf %804, %490 : vector<4x128xf32>
    %806 = arith.addf %805, %493 : vector<4x128xf32>
    %807 = vector.extract_strided_slice %806 {offsets = [0, 0], sizes = [4, 32], strides = [1, 1]} : vector<4x128xf32> to vector<4x32xf32>
    %808 = vector.extract_strided_slice %806 {offsets = [0, 32], sizes = [4, 32], strides = [1, 1]} : vector<4x128xf32> to vector<4x32xf32>
    %809 = vector.extract_strided_slice %806 {offsets = [0, 64], sizes = [4, 32], strides = [1, 1]} : vector<4x128xf32> to vector<4x32xf32>
    %810 = vector.extract_strided_slice %806 {offsets = [0, 96], sizes = [4, 32], strides = [1, 1]} : vector<4x128xf32> to vector<4x32xf32>
    %811 = arith.mulf %808, %792 : vector<4x32xf32>
    %812 = arith.mulf %807, %809 : vector<4x32xf32>
    %813 = arith.addf %811, %812 : vector<4x32xf32>
    %814 = math.tanh %813 : vector<4x32xf32>
    %815 = arith.mulf %810, %814 : vector<4x32xf32>
    %816 = tpu.concatenate %815, %815 in 1 : vector<4x32xf32>, vector<4x32xf32> -> vector<4x64xf32>
    %817 = arith.mulf %816, %503 : vector<4x64xf32>
    %818 = vector.extract_strided_slice %815 {offsets = [0, 0], sizes = [2, 32], strides = [1, 1]} : vector<4x32xf32> to vector<2x32xf32>
    %c28_473 = arith.constant 28 : index
    %c0_474 = arith.constant 0 : index
    %819 = vector.load %arg28[%c28_473, %c0_474] : memref<32x64xf32, #tpu.memory_space<vmem>>, vector<2x32xf32>
    tpu.vector_store %arg28[%c28_473, %c0_474], %818 {strides = array<i32>} : memref<32x64xf32, #tpu.memory_space<vmem>>, vector<2x32xf32>,
    %820 = vector.extract_strided_slice %815 {offsets = [2, 0], sizes = [2, 32], strides = [1, 1]} : vector<4x32xf32> to vector<2x32xf32>
    %c2_475 = arith.constant 2 : index
    %c32_476 = arith.constant 32 : index
    %821 = vector.load %arg28[%c2_475, %c32_476] : memref<32x64xf32, #tpu.memory_space<vmem>>, vector<2x32xf32>
    tpu.vector_store %arg28[%c2_475, %c32_476], %820 {strides = array<i32>} : memref<32x64xf32, #tpu.memory_space<vmem>>, vector<2x32xf32>,
    %c60_477 = arith.constant 60 : index
    %c0_478 = arith.constant 0 : index
    %822 = vector.load %arg27[%c60_477, %c0_478] : memref<64x128xf32, #tpu.memory_space<vmem>>, vector<4x128xf32>
    %cst_479 = arith.constant dense<0.000000e+00> : vector<4x128xf32>
    %823 = tpu.matmul %817, %504, %cst_479 {dimension_numbers = #tpu.dot_dimension_numbers<[1], [0], [0], [1], [0, 0, 1, 1], [], []>} : vector<4x64xf32>, vector<64x128xf32>, vector<4x128xf32> -> vector<4x128xf32>
    %824 = arith.addf %822, %823 : vector<4x128xf32>
    %825 = math.tanh %824 : vector<4x128xf32>
    %826 = arith.mulf %825, %490 : vector<4x128xf32>
    %827 = arith.addf %826, %493 : vector<4x128xf32>
    %828 = vector.extract_strided_slice %827 {offsets = [0, 0], sizes = [4, 32], strides = [1, 1]} : vector<4x128xf32> to vector<4x32xf32>
    %829 = vector.extract_strided_slice %827 {offsets = [0, 32], sizes = [4, 32], strides = [1, 1]} : vector<4x128xf32> to vector<4x32xf32>
    %830 = vector.extract_strided_slice %827 {offsets = [0, 64], sizes = [4, 32], strides = [1, 1]} : vector<4x128xf32> to vector<4x32xf32>
    %831 = vector.extract_strided_slice %827 {offsets = [0, 96], sizes = [4, 32], strides = [1, 1]} : vector<4x128xf32> to vector<4x32xf32>
    %832 = arith.mulf %829, %813 : vector<4x32xf32>
    %833 = arith.mulf %828, %830 : vector<4x32xf32>
    %834 = arith.addf %832, %833 : vector<4x32xf32>
    %835 = math.tanh %834 : vector<4x32xf32>
    %836 = arith.mulf %831, %835 : vector<4x32xf32>
    %837 = vector.extract_strided_slice %836 {offsets = [0, 0], sizes = [2, 32], strides = [1, 1]} : vector<4x32xf32> to vector<2x32xf32>
    %c30_480 = arith.constant 30 : index
    %c0_481 = arith.constant 0 : index
    %838 = vector.load %arg28[%c30_480, %c0_481] : memref<32x64xf32, #tpu.memory_space<vmem>>, vector<2x32xf32>
    tpu.vector_store %arg28[%c30_480, %c0_481], %837 {strides = array<i32>} : memref<32x64xf32, #tpu.memory_space<vmem>>, vector<2x32xf32>,
    %839 = vector.extract_strided_slice %836 {offsets = [2, 0], sizes = [2, 32], strides = [1, 1]} : vector<4x32xf32> to vector<2x32xf32>
    %c0_482 = arith.constant 0 : index
    %c32_483 = arith.constant 32 : index
    %840 = vector.load %arg28[%c0_482, %c32_483] : memref<32x64xf32, #tpu.memory_space<vmem>>, vector<2x32xf32>
    tpu.vector_store %arg28[%c0_482, %c32_483], %839 {strides = array<i32>} : memref<32x64xf32, #tpu.memory_space<vmem>>, vector<2x32xf32>,
    %c0_484 = arith.constant 0 : index
    %c0_485 = arith.constant 0 : index
    %841 = vector.load %arg16[%c0_484, %c0_485] : memref<64x256xf32, #tpu.memory_space<vmem>>, vector<64x256xf32>
    %c0_486 = arith.constant 0 : index
    %c0_487 = arith.constant 0 : index
    %842 = vector.load %arg17[%c0_486, %c0_487] : memref<1x256xf32, #tpu.memory_space<vmem>>, vector<1x256xf32>
    %c0_488 = arith.constant 0 : index
    %c0_489 = arith.constant 0 : index
    %843 = vector.load %arg28[%c0_488, %c0_489] : memref<32x64xf32, #tpu.memory_space<vmem>>, vector<32x64xf32>
    %cst_490 = arith.constant dense<0.000000e+00> : vector<32x256xf32>
    %844 = tpu.matmul %843, %841, %cst_490 {dimension_numbers = #tpu.dot_dimension_numbers<[1], [0], [0], [1], [0, 0, 1, 1], [], []>} : vector<32x64xf32>, vector<64x256xf32>, vector<32x256xf32> -> vector<32x256xf32>
    %845 = vector.broadcast %842 : vector<1x256xf32> to vector<32x256xf32>
    %846 = arith.addf %844, %845 : vector<32x256xf32>
    %847 = vector.extract_strided_slice %846 {offsets = [0, 0], sizes = [2, 128], strides = [1, 1]} : vector<32x256xf32> to vector<2x128xf32>
    %c0_491 = arith.constant 0 : index
    %c0_492 = arith.constant 0 : index
    %848 = vector.load %arg27[%c0_491, %c0_492] : memref<64x128xf32, #tpu.memory_space<vmem>>, vector<2x128xf32>
    tpu.vector_store %arg27[%c0_491, %c0_492], %847 {strides = array<i32>} : memref<64x128xf32, #tpu.memory_space<vmem>>, vector<2x128xf32>,
    %849 = vector.extract_strided_slice %846 {offsets = [30, 128], sizes = [2, 128], strides = [1, 1]} : vector<32x256xf32> to vector<2x128xf32>
    %c2_493 = arith.constant 2 : index
    %c0_494 = arith.constant 0 : index
    %850 = vector.load %arg27[%c2_493, %c0_494] : memref<64x128xf32, #tpu.memory_space<vmem>>, vector<2x128xf32>
    tpu.vector_store %arg27[%c2_493, %c0_494], %849 {strides = array<i32>} : memref<64x128xf32, #tpu.memory_space<vmem>>, vector<2x128xf32>,
    %851 = vector.extract_strided_slice %846 {offsets = [2, 0], sizes = [2, 128], strides = [1, 1]} : vector<32x256xf32> to vector<2x128xf32>
    %c4_495 = arith.constant 4 : index
    %c0_496 = arith.constant 0 : index
    %852 = vector.load %arg27[%c4_495, %c0_496] : memref<64x128xf32, #tpu.memory_space<vmem>>, vector<2x128xf32>
    tpu.vector_store %arg27[%c4_495, %c0_496], %851 {strides = array<i32>} : memref<64x128xf32, #tpu.memory_space<vmem>>, vector<2x128xf32>,
    %853 = vector.extract_strided_slice %846 {offsets = [28, 128], sizes = [2, 128], strides = [1, 1]} : vector<32x256xf32> to vector<2x128xf32>
    %c6_497 = arith.constant 6 : index
    %c0_498 = arith.constant 0 : index
    %854 = vector.load %arg27[%c6_497, %c0_498] : memref<64x128xf32, #tpu.memory_space<vmem>>, vector<2x128xf32>
    tpu.vector_store %arg27[%c6_497, %c0_498], %853 {strides = array<i32>} : memref<64x128xf32, #tpu.memory_space<vmem>>, vector<2x128xf32>,
    %855 = vector.extract_strided_slice %846 {offsets = [4, 0], sizes = [2, 128], strides = [1, 1]} : vector<32x256xf32> to vector<2x128xf32>
    %c8_499 = arith.constant 8 : index
    %c0_500 = arith.constant 0 : index
    %856 = vector.load %arg27[%c8_499, %c0_500] : memref<64x128xf32, #tpu.memory_space<vmem>>, vector<2x128xf32>
    tpu.vector_store %arg27[%c8_499, %c0_500], %855 {strides = array<i32>} : memref<64x128xf32, #tpu.memory_space<vmem>>, vector<2x128xf32>,
    %857 = vector.extract_strided_slice %846 {offsets = [26, 128], sizes = [2, 128], strides = [1, 1]} : vector<32x256xf32> to vector<2x128xf32>
    %c10_501 = arith.constant 10 : index
    %c0_502 = arith.constant 0 : index
    %858 = vector.load %arg27[%c10_501, %c0_502] : memref<64x128xf32, #tpu.memory_space<vmem>>, vector<2x128xf32>
    tpu.vector_store %arg27[%c10_501, %c0_502], %857 {strides = array<i32>} : memref<64x128xf32, #tpu.memory_space<vmem>>, vector<2x128xf32>,
    %859 = vector.extract_strided_slice %846 {offsets = [6, 0], sizes = [2, 128], strides = [1, 1]} : vector<32x256xf32> to vector<2x128xf32>
    %c12_503 = arith.constant 12 : index
    %c0_504 = arith.constant 0 : index
    %860 = vector.load %arg27[%c12_503, %c0_504] : memref<64x128xf32, #tpu.memory_space<vmem>>, vector<2x128xf32>
    tpu.vector_store %arg27[%c12_503, %c0_504], %859 {strides = array<i32>} : memref<64x128xf32, #tpu.memory_space<vmem>>, vector<2x128xf32>,
    %861 = vector.extract_strided_slice %846 {offsets = [24, 128], sizes = [2, 128], strides = [1, 1]} : vector<32x256xf32> to vector<2x128xf32>
    %c14_505 = arith.constant 14 : index
    %c0_506 = arith.constant 0 : index
    %862 = vector.load %arg27[%c14_505, %c0_506] : memref<64x128xf32, #tpu.memory_space<vmem>>, vector<2x128xf32>
    tpu.vector_store %arg27[%c14_505, %c0_506], %861 {strides = array<i32>} : memref<64x128xf32, #tpu.memory_space<vmem>>, vector<2x128xf32>,
    %863 = vector.extract_strided_slice %846 {offsets = [8, 0], sizes = [2, 128], strides = [1, 1]} : vector<32x256xf32> to vector<2x128xf32>
    %c16_507 = arith.constant 16 : index
    %c0_508 = arith.constant 0 : index
    %864 = vector.load %arg27[%c16_507, %c0_508] : memref<64x128xf32, #tpu.memory_space<vmem>>, vector<2x128xf32>
    tpu.vector_store %arg27[%c16_507, %c0_508], %863 {strides = array<i32>} : memref<64x128xf32, #tpu.memory_space<vmem>>, vector<2x128xf32>,
    %865 = vector.extract_strided_slice %846 {offsets = [22, 128], sizes = [2, 128], strides = [1, 1]} : vector<32x256xf32> to vector<2x128xf32>
    %c18_509 = arith.constant 18 : index
    %c0_510 = arith.constant 0 : index
    %866 = vector.load %arg27[%c18_509, %c0_510] : memref<64x128xf32, #tpu.memory_space<vmem>>, vector<2x128xf32>
    tpu.vector_store %arg27[%c18_509, %c0_510], %865 {strides = array<i32>} : memref<64x128xf32, #tpu.memory_space<vmem>>, vector<2x128xf32>,
    %867 = vector.extract_strided_slice %846 {offsets = [10, 0], sizes = [2, 128], strides = [1, 1]} : vector<32x256xf32> to vector<2x128xf32>
    %c20_511 = arith.constant 20 : index
    %c0_512 = arith.constant 0 : index
    %868 = vector.load %arg27[%c20_511, %c0_512] : memref<64x128xf32, #tpu.memory_space<vmem>>, vector<2x128xf32>
    tpu.vector_store %arg27[%c20_511, %c0_512], %867 {strides = array<i32>} : memref<64x128xf32, #tpu.memory_space<vmem>>, vector<2x128xf32>,
    %869 = vector.extract_strided_slice %846 {offsets = [20, 128], sizes = [2, 128], strides = [1, 1]} : vector<32x256xf32> to vector<2x128xf32>
    %c22_513 = arith.constant 22 : index
    %c0_514 = arith.constant 0 : index
    %870 = vector.load %arg27[%c22_513, %c0_514] : memref<64x128xf32, #tpu.memory_space<vmem>>, vector<2x128xf32>
    tpu.vector_store %arg27[%c22_513, %c0_514], %869 {strides = array<i32>} : memref<64x128xf32, #tpu.memory_space<vmem>>, vector<2x128xf32>,
    %871 = vector.extract_strided_slice %846 {offsets = [12, 0], sizes = [2, 128], strides = [1, 1]} : vector<32x256xf32> to vector<2x128xf32>
    %c24_515 = arith.constant 24 : index
    %c0_516 = arith.constant 0 : index
    %872 = vector.load %arg27[%c24_515, %c0_516] : memref<64x128xf32, #tpu.memory_space<vmem>>, vector<2x128xf32>
    tpu.vector_store %arg27[%c24_515, %c0_516], %871 {strides = array<i32>} : memref<64x128xf32, #tpu.memory_space<vmem>>, vector<2x128xf32>,
    %873 = vector.extract_strided_slice %846 {offsets = [18, 128], sizes = [2, 128], strides = [1, 1]} : vector<32x256xf32> to vector<2x128xf32>
    %c26_517 = arith.constant 26 : index
    %c0_518 = arith.constant 0 : index
    %874 = vector.load %arg27[%c26_517, %c0_518] : memref<64x128xf32, #tpu.memory_space<vmem>>, vector<2x128xf32>
    tpu.vector_store %arg27[%c26_517, %c0_518], %873 {strides = array<i32>} : memref<64x128xf32, #tpu.memory_space<vmem>>, vector<2x128xf32>,
    %875 = vector.extract_strided_slice %846 {offsets = [14, 0], sizes = [2, 128], strides = [1, 1]} : vector<32x256xf32> to vector<2x128xf32>
    %c28_519 = arith.constant 28 : index
    %c0_520 = arith.constant 0 : index
    %876 = vector.load %arg27[%c28_519, %c0_520] : memref<64x128xf32, #tpu.memory_space<vmem>>, vector<2x128xf32>
    tpu.vector_store %arg27[%c28_519, %c0_520], %875 {strides = array<i32>} : memref<64x128xf32, #tpu.memory_space<vmem>>, vector<2x128xf32>,
    %877 = vector.extract_strided_slice %846 {offsets = [16, 128], sizes = [2, 128], strides = [1, 1]} : vector<32x256xf32> to vector<2x128xf32>
    %c30_521 = arith.constant 30 : index
    %c0_522 = arith.constant 0 : index
    %878 = vector.load %arg27[%c30_521, %c0_522] : memref<64x128xf32, #tpu.memory_space<vmem>>, vector<2x128xf32>
    tpu.vector_store %arg27[%c30_521, %c0_522], %877 {strides = array<i32>} : memref<64x128xf32, #tpu.memory_space<vmem>>, vector<2x128xf32>,
    %879 = vector.extract_strided_slice %846 {offsets = [16, 0], sizes = [2, 128], strides = [1, 1]} : vector<32x256xf32> to vector<2x128xf32>
    %c32_523 = arith.constant 32 : index
    %c0_524 = arith.constant 0 : index
    %880 = vector.load %arg27[%c32_523, %c0_524] : memref<64x128xf32, #tpu.memory_space<vmem>>, vector<2x128xf32>
    tpu.vector_store %arg27[%c32_523, %c0_524], %879 {strides = array<i32>} : memref<64x128xf32, #tpu.memory_space<vmem>>, vector<2x128xf32>,
    %881 = vector.extract_strided_slice %846 {offsets = [14, 128], sizes = [2, 128], strides = [1, 1]} : vector<32x256xf32> to vector<2x128xf32>
    %c34_525 = arith.constant 34 : index
    %c0_526 = arith.constant 0 : index
    %882 = vector.load %arg27[%c34_525, %c0_526] : memref<64x128xf32, #tpu.memory_space<vmem>>, vector<2x128xf32>
    tpu.vector_store %arg27[%c34_525, %c0_526], %881 {strides = array<i32>} : memref<64x128xf32, #tpu.memory_space<vmem>>, vector<2x128xf32>,
    %883 = vector.extract_strided_slice %846 {offsets = [18, 0], sizes = [2, 128], strides = [1, 1]} : vector<32x256xf32> to vector<2x128xf32>
    %c36_527 = arith.constant 36 : index
    %c0_528 = arith.constant 0 : index
    %884 = vector.load %arg27[%c36_527, %c0_528] : memref<64x128xf32, #tpu.memory_space<vmem>>, vector<2x128xf32>
    tpu.vector_store %arg27[%c36_527, %c0_528], %883 {strides = array<i32>} : memref<64x128xf32, #tpu.memory_space<vmem>>, vector<2x128xf32>,
    %885 = vector.extract_strided_slice %846 {offsets = [12, 128], sizes = [2, 128], strides = [1, 1]} : vector<32x256xf32> to vector<2x128xf32>
    %c38_529 = arith.constant 38 : index
    %c0_530 = arith.constant 0 : index
    %886 = vector.load %arg27[%c38_529, %c0_530] : memref<64x128xf32, #tpu.memory_space<vmem>>, vector<2x128xf32>
    tpu.vector_store %arg27[%c38_529, %c0_530], %885 {strides = array<i32>} : memref<64x128xf32, #tpu.memory_space<vmem>>, vector<2x128xf32>,
    %887 = vector.extract_strided_slice %846 {offsets = [20, 0], sizes = [2, 128], strides = [1, 1]} : vector<32x256xf32> to vector<2x128xf32>
    %c40_531 = arith.constant 40 : index
    %c0_532 = arith.constant 0 : index
    %888 = vector.load %arg27[%c40_531, %c0_532] : memref<64x128xf32, #tpu.memory_space<vmem>>, vector<2x128xf32>
    tpu.vector_store %arg27[%c40_531, %c0_532], %887 {strides = array<i32>} : memref<64x128xf32, #tpu.memory_space<vmem>>, vector<2x128xf32>,
    %889 = vector.extract_strided_slice %846 {offsets = [10, 128], sizes = [2, 128], strides = [1, 1]} : vector<32x256xf32> to vector<2x128xf32>
    %c42_533 = arith.constant 42 : index
    %c0_534 = arith.constant 0 : index
    %890 = vector.load %arg27[%c42_533, %c0_534] : memref<64x128xf32, #tpu.memory_space<vmem>>, vector<2x128xf32>
    tpu.vector_store %arg27[%c42_533, %c0_534], %889 {strides = array<i32>} : memref<64x128xf32, #tpu.memory_space<vmem>>, vector<2x128xf32>,
    %891 = vector.extract_strided_slice %846 {offsets = [22, 0], sizes = [2, 128], strides = [1, 1]} : vector<32x256xf32> to vector<2x128xf32>
    %c44_535 = arith.constant 44 : index
    %c0_536 = arith.constant 0 : index
    %892 = vector.load %arg27[%c44_535, %c0_536] : memref<64x128xf32, #tpu.memory_space<vmem>>, vector<2x128xf32>
    tpu.vector_store %arg27[%c44_535, %c0_536], %891 {strides = array<i32>} : memref<64x128xf32, #tpu.memory_space<vmem>>, vector<2x128xf32>,
    %893 = vector.extract_strided_slice %846 {offsets = [8, 128], sizes = [2, 128], strides = [1, 1]} : vector<32x256xf32> to vector<2x128xf32>
    %c46_537 = arith.constant 46 : index
    %c0_538 = arith.constant 0 : index
    %894 = vector.load %arg27[%c46_537, %c0_538] : memref<64x128xf32, #tpu.memory_space<vmem>>, vector<2x128xf32>
    tpu.vector_store %arg27[%c46_537, %c0_538], %893 {strides = array<i32>} : memref<64x128xf32, #tpu.memory_space<vmem>>, vector<2x128xf32>,
    %895 = vector.extract_strided_slice %846 {offsets = [24, 0], sizes = [2, 128], strides = [1, 1]} : vector<32x256xf32> to vector<2x128xf32>
    %c48_539 = arith.constant 48 : index
    %c0_540 = arith.constant 0 : index
    %896 = vector.load %arg27[%c48_539, %c0_540] : memref<64x128xf32, #tpu.memory_space<vmem>>, vector<2x128xf32>
    tpu.vector_store %arg27[%c48_539, %c0_540], %895 {strides = array<i32>} : memref<64x128xf32, #tpu.memory_space<vmem>>, vector<2x128xf32>,
    %897 = vector.extract_strided_slice %846 {offsets = [6, 128], sizes = [2, 128], strides = [1, 1]} : vector<32x256xf32> to vector<2x128xf32>
    %c50_541 = arith.constant 50 : index
    %c0_542 = arith.constant 0 : index
    %898 = vector.load %arg27[%c50_541, %c0_542] : memref<64x128xf32, #tpu.memory_space<vmem>>, vector<2x128xf32>
    tpu.vector_store %arg27[%c50_541, %c0_542], %897 {strides = array<i32>} : memref<64x128xf32, #tpu.memory_space<vmem>>, vector<2x128xf32>,
    %899 = vector.extract_strided_slice %846 {offsets = [26, 0], sizes = [2, 128], strides = [1, 1]} : vector<32x256xf32> to vector<2x128xf32>
    %c52_543 = arith.constant 52 : index
    %c0_544 = arith.constant 0 : index
    %900 = vector.load %arg27[%c52_543, %c0_544] : memref<64x128xf32, #tpu.memory_space<vmem>>, vector<2x128xf32>
    tpu.vector_store %arg27[%c52_543, %c0_544], %899 {strides = array<i32>} : memref<64x128xf32, #tpu.memory_space<vmem>>, vector<2x128xf32>,
    %901 = vector.extract_strided_slice %846 {offsets = [4, 128], sizes = [2, 128], strides = [1, 1]} : vector<32x256xf32> to vector<2x128xf32>
    %c54_545 = arith.constant 54 : index
    %c0_546 = arith.constant 0 : index
    %902 = vector.load %arg27[%c54_545, %c0_546] : memref<64x128xf32, #tpu.memory_space<vmem>>, vector<2x128xf32>
    tpu.vector_store %arg27[%c54_545, %c0_546], %901 {strides = array<i32>} : memref<64x128xf32, #tpu.memory_space<vmem>>, vector<2x128xf32>,
    %903 = vector.extract_strided_slice %846 {offsets = [28, 0], sizes = [2, 128], strides = [1, 1]} : vector<32x256xf32> to vector<2x128xf32>
    %c56_547 = arith.constant 56 : index
    %c0_548 = arith.constant 0 : index
    %904 = vector.load %arg27[%c56_547, %c0_548] : memref<64x128xf32, #tpu.memory_space<vmem>>, vector<2x128xf32>
    tpu.vector_store %arg27[%c56_547, %c0_548], %903 {strides = array<i32>} : memref<64x128xf32, #tpu.memory_space<vmem>>, vector<2x128xf32>,
    %905 = vector.extract_strided_slice %846 {offsets = [2, 128], sizes = [2, 128], strides = [1, 1]} : vector<32x256xf32> to vector<2x128xf32>
    %c58_549 = arith.constant 58 : index
    %c0_550 = arith.constant 0 : index
    %906 = vector.load %arg27[%c58_549, %c0_550] : memref<64x128xf32, #tpu.memory_space<vmem>>, vector<2x128xf32>
    tpu.vector_store %arg27[%c58_549, %c0_550], %905 {strides = array<i32>} : memref<64x128xf32, #tpu.memory_space<vmem>>, vector<2x128xf32>,
    %907 = vector.extract_strided_slice %846 {offsets = [30, 0], sizes = [2, 128], strides = [1, 1]} : vector<32x256xf32> to vector<2x128xf32>
    %c60_551 = arith.constant 60 : index
    %c0_552 = arith.constant 0 : index
    %908 = vector.load %arg27[%c60_551, %c0_552] : memref<64x128xf32, #tpu.memory_space<vmem>>, vector<2x128xf32>
    tpu.vector_store %arg27[%c60_551, %c0_552], %907 {strides = array<i32>} : memref<64x128xf32, #tpu.memory_space<vmem>>, vector<2x128xf32>,
    %909 = vector.extract_strided_slice %846 {offsets = [0, 128], sizes = [2, 128], strides = [1, 1]} : vector<32x256xf32> to vector<2x128xf32>
    %c62_553 = arith.constant 62 : index
    %c0_554 = arith.constant 0 : index
    %910 = vector.load %arg27[%c62_553, %c0_554] : memref<64x128xf32, #tpu.memory_space<vmem>>, vector<2x128xf32>
    tpu.vector_store %arg27[%c62_553, %c0_554], %909 {strides = array<i32>} : memref<64x128xf32, #tpu.memory_space<vmem>>, vector<2x128xf32>,
    %c0_555 = arith.constant 0 : index
    %c0_556 = arith.constant 0 : index
    %911 = vector.load %arg18[%c0_555, %c0_556] : memref<64x128xf32, #tpu.memory_space<vmem>>, vector<64x128xf32>
    %cst_557 = arith.constant 0.000000e+00 : f32
    %912 = vector.broadcast %cst_557 : f32 to vector<4x64xf32>
    %cst_558 = arith.constant 0.000000e+00 : f32
    %913 = vector.broadcast %cst_558 : f32 to vector<4x32xf32>
    %c0_559 = arith.constant 0 : index
    %c0_560 = arith.constant 0 : index
    %914 = vector.load %arg27[%c0_559, %c0_560] : memref<64x128xf32, #tpu.memory_space<vmem>>, vector<4x128xf32>
    %cst_561 = arith.constant dense<0.000000e+00> : vector<4x128xf32>
    %915 = tpu.matmul %912, %911, %cst_561 {dimension_numbers = #tpu.dot_dimension_numbers<[1], [0], [0], [1], [0, 0, 1, 1], [], []>} : vector<4x64xf32>, vector<64x128xf32>, vector<4x128xf32> -> vector<4x128xf32>
    %916 = arith.addf %914, %915 : vector<4x128xf32>
    %917 = math.tanh %916 : vector<4x128xf32>
    %918 = arith.mulf %917, %490 : vector<4x128xf32>
    %919 = arith.addf %918, %493 : vector<4x128xf32>
    %920 = vector.extract_strided_slice %919 {offsets = [0, 0], sizes = [4, 32], strides = [1, 1]} : vector<4x128xf32> to vector<4x32xf32>
    %921 = vector.extract_strided_slice %919 {offsets = [0, 32], sizes = [4, 32], strides = [1, 1]} : vector<4x128xf32> to vector<4x32xf32>
    %922 = vector.extract_strided_slice %919 {offsets = [0, 64], sizes = [4, 32], strides = [1, 1]} : vector<4x128xf32> to vector<4x32xf32>
    %923 = vector.extract_strided_slice %919 {offsets = [0, 96], sizes = [4, 32], strides = [1, 1]} : vector<4x128xf32> to vector<4x32xf32>
    %924 = arith.mulf %921, %913 : vector<4x32xf32>
    %925 = arith.mulf %920, %922 : vector<4x32xf32>
    %926 = arith.addf %924, %925 : vector<4x32xf32>
    %927 = math.tanh %926 : vector<4x32xf32>
    %928 = arith.mulf %923, %927 : vector<4x32xf32>
    %929 = tpu.concatenate %928, %928 in 1 : vector<4x32xf32>, vector<4x32xf32> -> vector<4x64xf32>
    %930 = arith.mulf %929, %503 : vector<4x64xf32>
    %931 = vector.extract_strided_slice %928 {offsets = [0, 0], sizes = [2, 32], strides = [1, 1]} : vector<4x32xf32> to vector<2x32xf32>
    %c0_562 = arith.constant 0 : index
    %c0_563 = arith.constant 0 : index
    %932 = vector.load %arg28[%c0_562, %c0_563] : memref<32x64xf32, #tpu.memory_space<vmem>>, vector<2x32xf32>
    tpu.vector_store %arg28[%c0_562, %c0_563], %931 {strides = array<i32>} : memref<32x64xf32, #tpu.memory_space<vmem>>, vector<2x32xf32>,
    %933 = vector.extract_strided_slice %928 {offsets = [2, 0], sizes = [2, 32], strides = [1, 1]} : vector<4x32xf32> to vector<2x32xf32>
    %c30_564 = arith.constant 30 : index
    %c32_565 = arith.constant 32 : index
    %934 = vector.load %arg28[%c30_564, %c32_565] : memref<32x64xf32, #tpu.memory_space<vmem>>, vector<2x32xf32>
    tpu.vector_store %arg28[%c30_564, %c32_565], %933 {strides = array<i32>} : memref<32x64xf32, #tpu.memory_space<vmem>>, vector<2x32xf32>,
    %c4_566 = arith.constant 4 : index
    %c0_567 = arith.constant 0 : index
    %935 = vector.load %arg27[%c4_566, %c0_567] : memref<64x128xf32, #tpu.memory_space<vmem>>, vector<4x128xf32>
    %cst_568 = arith.constant dense<0.000000e+00> : vector<4x128xf32>
    %936 = tpu.matmul %930, %911, %cst_568 {dimension_numbers = #tpu.dot_dimension_numbers<[1], [0], [0], [1], [0, 0, 1, 1], [], []>} : vector<4x64xf32>, vector<64x128xf32>, vector<4x128xf32> -> vector<4x128xf32>
    %937 = arith.addf %935, %936 : vector<4x128xf32>
    %938 = math.tanh %937 : vector<4x128xf32>
    %939 = arith.mulf %938, %490 : vector<4x128xf32>
    %940 = arith.addf %939, %493 : vector<4x128xf32>
    %941 = vector.extract_strided_slice %940 {offsets = [0, 0], sizes = [4, 32], strides = [1, 1]} : vector<4x128xf32> to vector<4x32xf32>
    %942 = vector.extract_strided_slice %940 {offsets = [0, 32], sizes = [4, 32], strides = [1, 1]} : vector<4x128xf32> to vector<4x32xf32>
    %943 = vector.extract_strided_slice %940 {offsets = [0, 64], sizes = [4, 32], strides = [1, 1]} : vector<4x128xf32> to vector<4x32xf32>
    %944 = vector.extract_strided_slice %940 {offsets = [0, 96], sizes = [4, 32], strides = [1, 1]} : vector<4x128xf32> to vector<4x32xf32>
    %945 = arith.mulf %942, %926 : vector<4x32xf32>
    %946 = arith.mulf %941, %943 : vector<4x32xf32>
    %947 = arith.addf %945, %946 : vector<4x32xf32>
    %948 = math.tanh %947 : vector<4x32xf32>
    %949 = arith.mulf %944, %948 : vector<4x32xf32>
    %950 = tpu.concatenate %949, %949 in 1 : vector<4x32xf32>, vector<4x32xf32> -> vector<4x64xf32>
    %951 = arith.mulf %950, %503 : vector<4x64xf32>
    %952 = vector.extract_strided_slice %949 {offsets = [0, 0], sizes = [2, 32], strides = [1, 1]} : vector<4x32xf32> to vector<2x32xf32>
    %c2_569 = arith.constant 2 : index
    %c0_570 = arith.constant 0 : index
    %953 = vector.load %arg28[%c2_569, %c0_570] : memref<32x64xf32, #tpu.memory_space<vmem>>, vector<2x32xf32>
    tpu.vector_store %arg28[%c2_569, %c0_570], %952 {strides = array<i32>} : memref<32x64xf32, #tpu.memory_space<vmem>>, vector<2x32xf32>,
    %954 = vector.extract_strided_slice %949 {offsets = [2, 0], sizes = [2, 32], strides = [1, 1]} : vector<4x32xf32> to vector<2x32xf32>
    %c28_571 = arith.constant 28 : index
    %c32_572 = arith.constant 32 : index
    %955 = vector.load %arg28[%c28_571, %c32_572] : memref<32x64xf32, #tpu.memory_space<vmem>>, vector<2x32xf32>
    tpu.vector_store %arg28[%c28_571, %c32_572], %954 {strides = array<i32>} : memref<32x64xf32, #tpu.memory_space<vmem>>, vector<2x32xf32>,
    %c8_573 = arith.constant 8 : index
    %c0_574 = arith.constant 0 : index
    %956 = vector.load %arg27[%c8_573, %c0_574] : memref<64x128xf32, #tpu.memory_space<vmem>>, vector<4x128xf32>
    %cst_575 = arith.constant dense<0.000000e+00> : vector<4x128xf32>
    %957 = tpu.matmul %951, %911, %cst_575 {dimension_numbers = #tpu.dot_dimension_numbers<[1], [0], [0], [1], [0, 0, 1, 1], [], []>} : vector<4x64xf32>, vector<64x128xf32>, vector<4x128xf32> -> vector<4x128xf32>
    %958 = arith.addf %956, %957 : vector<4x128xf32>
    %959 = math.tanh %958 : vector<4x128xf32>
    %960 = arith.mulf %959, %490 : vector<4x128xf32>
    %961 = arith.addf %960, %493 : vector<4x128xf32>
    %962 = vector.extract_strided_slice %961 {offsets = [0, 0], sizes = [4, 32], strides = [1, 1]} : vector<4x128xf32> to vector<4x32xf32>
    %963 = vector.extract_strided_slice %961 {offsets = [0, 32], sizes = [4, 32], strides = [1, 1]} : vector<4x128xf32> to vector<4x32xf32>
    %964 = vector.extract_strided_slice %961 {offsets = [0, 64], sizes = [4, 32], strides = [1, 1]} : vector<4x128xf32> to vector<4x32xf32>
    %965 = vector.extract_strided_slice %961 {offsets = [0, 96], sizes = [4, 32], strides = [1, 1]} : vector<4x128xf32> to vector<4x32xf32>
    %966 = arith.mulf %963, %947 : vector<4x32xf32>
    %967 = arith.mulf %962, %964 : vector<4x32xf32>
    %968 = arith.addf %966, %967 : vector<4x32xf32>
    %969 = math.tanh %968 : vector<4x32xf32>
    %970 = arith.mulf %965, %969 : vector<4x32xf32>
    %971 = tpu.concatenate %970, %970 in 1 : vector<4x32xf32>, vector<4x32xf32> -> vector<4x64xf32>
    %972 = arith.mulf %971, %503 : vector<4x64xf32>
    %973 = vector.extract_strided_slice %970 {offsets = [0, 0], sizes = [2, 32], strides = [1, 1]} : vector<4x32xf32> to vector<2x32xf32>
    %c4_576 = arith.constant 4 : index
    %c0_577 = arith.constant 0 : index
    %974 = vector.load %arg28[%c4_576, %c0_577] : memref<32x64xf32, #tpu.memory_space<vmem>>, vector<2x32xf32>
    tpu.vector_store %arg28[%c4_576, %c0_577], %973 {strides = array<i32>} : memref<32x64xf32, #tpu.memory_space<vmem>>, vector<2x32xf32>,
    %975 = vector.extract_strided_slice %970 {offsets = [2, 0], sizes = [2, 32], strides = [1, 1]} : vector<4x32xf32> to vector<2x32xf32>
    %c26_578 = arith.constant 26 : index
    %c32_579 = arith.constant 32 : index
    %976 = vector.load %arg28[%c26_578, %c32_579] : memref<32x64xf32, #tpu.memory_space<vmem>>, vector<2x32xf32>
    tpu.vector_store %arg28[%c26_578, %c32_579], %975 {strides = array<i32>} : memref<32x64xf32, #tpu.memory_space<vmem>>, vector<2x32xf32>,
    %c12_580 = arith.constant 12 : index
    %c0_581 = arith.constant 0 : index
    %977 = vector.load %arg27[%c12_580, %c0_581] : memref<64x128xf32, #tpu.memory_space<vmem>>, vector<4x128xf32>
    %cst_582 = arith.constant dense<0.000000e+00> : vector<4x128xf32>
    %978 = tpu.matmul %972, %911, %cst_582 {dimension_numbers = #tpu.dot_dimension_numbers<[1], [0], [0], [1], [0, 0, 1, 1], [], []>} : vector<4x64xf32>, vector<64x128xf32>, vector<4x128xf32> -> vector<4x128xf32>
    %979 = arith.addf %977, %978 : vector<4x128xf32>
    %980 = math.tanh %979 : vector<4x128xf32>
    %981 = arith.mulf %980, %490 : vector<4x128xf32>
    %982 = arith.addf %981, %493 : vector<4x128xf32>
    %983 = vector.extract_strided_slice %982 {offsets = [0, 0], sizes = [4, 32], strides = [1, 1]} : vector<4x128xf32> to vector<4x32xf32>
    %984 = vector.extract_strided_slice %982 {offsets = [0, 32], sizes = [4, 32], strides = [1, 1]} : vector<4x128xf32> to vector<4x32xf32>
    %985 = vector.extract_strided_slice %982 {offsets = [0, 64], sizes = [4, 32], strides = [1, 1]} : vector<4x128xf32> to vector<4x32xf32>
    %986 = vector.extract_strided_slice %982 {offsets = [0, 96], sizes = [4, 32], strides = [1, 1]} : vector<4x128xf32> to vector<4x32xf32>
    %987 = arith.mulf %984, %968 : vector<4x32xf32>
    %988 = arith.mulf %983, %985 : vector<4x32xf32>
    %989 = arith.addf %987, %988 : vector<4x32xf32>
    %990 = math.tanh %989 : vector<4x32xf32>
    %991 = arith.mulf %986, %990 : vector<4x32xf32>
    %992 = tpu.concatenate %991, %991 in 1 : vector<4x32xf32>, vector<4x32xf32> -> vector<4x64xf32>
    %993 = arith.mulf %992, %503 : vector<4x64xf32>
    %994 = vector.extract_strided_slice %991 {offsets = [0, 0], sizes = [2, 32], strides = [1, 1]} : vector<4x32xf32> to vector<2x32xf32>
    %c6_583 = arith.constant 6 : index
    %c0_584 = arith.constant 0 : index
    %995 = vector.load %arg28[%c6_583, %c0_584] : memref<32x64xf32, #tpu.memory_space<vmem>>, vector<2x32xf32>
    tpu.vector_store %arg28[%c6_583, %c0_584], %994 {strides = array<i32>} : memref<32x64xf32, #tpu.memory_space<vmem>>, vector<2x32xf32>,
    %996 = vector.extract_strided_slice %991 {offsets = [2, 0], sizes = [2, 32], strides = [1, 1]} : vector<4x32xf32> to vector<2x32xf32>
    %c24_585 = arith.constant 24 : index
    %c32_586 = arith.constant 32 : index
    %997 = vector.load %arg28[%c24_585, %c32_586] : memref<32x64xf32, #tpu.memory_space<vmem>>, vector<2x32xf32>
    tpu.vector_store %arg28[%c24_585, %c32_586], %996 {strides = array<i32>} : memref<32x64xf32, #tpu.memory_space<vmem>>, vector<2x32xf32>,
    %c16_587 = arith.constant 16 : index
    %c0_588 = arith.constant 0 : index
    %998 = vector.load %arg27[%c16_587, %c0_588] : memref<64x128xf32, #tpu.memory_space<vmem>>, vector<4x128xf32>
    %cst_589 = arith.constant dense<0.000000e+00> : vector<4x128xf32>
    %999 = tpu.matmul %993, %911, %cst_589 {dimension_numbers = #tpu.dot_dimension_numbers<[1], [0], [0], [1], [0, 0, 1, 1], [], []>} : vector<4x64xf32>, vector<64x128xf32>, vector<4x128xf32> -> vector<4x128xf32>
    %1000 = arith.addf %998, %999 : vector<4x128xf32>
    %1001 = math.tanh %1000 : vector<4x128xf32>
    %1002 = arith.mulf %1001, %490 : vector<4x128xf32>
    %1003 = arith.addf %1002, %493 : vector<4x128xf32>
    %1004 = vector.extract_strided_slice %1003 {offsets = [0, 0], sizes = [4, 32], strides = [1, 1]} : vector<4x128xf32> to vector<4x32xf32>
    %1005 = vector.extract_strided_slice %1003 {offsets = [0, 32], sizes = [4, 32], strides = [1, 1]} : vector<4x128xf32> to vector<4x32xf32>
    %1006 = vector.extract_strided_slice %1003 {offsets = [0, 64], sizes = [4, 32], strides = [1, 1]} : vector<4x128xf32> to vector<4x32xf32>
    %1007 = vector.extract_strided_slice %1003 {offsets = [0, 96], sizes = [4, 32], strides = [1, 1]} : vector<4x128xf32> to vector<4x32xf32>
    %1008 = arith.mulf %1005, %989 : vector<4x32xf32>
    %1009 = arith.mulf %1004, %1006 : vector<4x32xf32>
    %1010 = arith.addf %1008, %1009 : vector<4x32xf32>
    %1011 = math.tanh %1010 : vector<4x32xf32>
    %1012 = arith.mulf %1007, %1011 : vector<4x32xf32>
    %1013 = tpu.concatenate %1012, %1012 in 1 : vector<4x32xf32>, vector<4x32xf32> -> vector<4x64xf32>
    %1014 = arith.mulf %1013, %503 : vector<4x64xf32>
    %1015 = vector.extract_strided_slice %1012 {offsets = [0, 0], sizes = [2, 32], strides = [1, 1]} : vector<4x32xf32> to vector<2x32xf32>
    %c8_590 = arith.constant 8 : index
    %c0_591 = arith.constant 0 : index
    %1016 = vector.load %arg28[%c8_590, %c0_591] : memref<32x64xf32, #tpu.memory_space<vmem>>, vector<2x32xf32>
    tpu.vector_store %arg28[%c8_590, %c0_591], %1015 {strides = array<i32>} : memref<32x64xf32, #tpu.memory_space<vmem>>, vector<2x32xf32>,
    %1017 = vector.extract_strided_slice %1012 {offsets = [2, 0], sizes = [2, 32], strides = [1, 1]} : vector<4x32xf32> to vector<2x32xf32>
    %c22_592 = arith.constant 22 : index
    %c32_593 = arith.constant 32 : index
    %1018 = vector.load %arg28[%c22_592, %c32_593] : memref<32x64xf32, #tpu.memory_space<vmem>>, vector<2x32xf32>
    tpu.vector_store %arg28[%c22_592, %c32_593], %1017 {strides = array<i32>} : memref<32x64xf32, #tpu.memory_space<vmem>>, vector<2x32xf32>,
    %c20_594 = arith.constant 20 : index
    %c0_595 = arith.constant 0 : index
    %1019 = vector.load %arg27[%c20_594, %c0_595] : memref<64x128xf32, #tpu.memory_space<vmem>>, vector<4x128xf32>
    %cst_596 = arith.constant dense<0.000000e+00> : vector<4x128xf32>
    %1020 = tpu.matmul %1014, %911, %cst_596 {dimension_numbers = #tpu.dot_dimension_numbers<[1], [0], [0], [1], [0, 0, 1, 1], [], []>} : vector<4x64xf32>, vector<64x128xf32>, vector<4x128xf32> -> vector<4x128xf32>
    %1021 = arith.addf %1019, %1020 : vector<4x128xf32>
    %1022 = math.tanh %1021 : vector<4x128xf32>
    %1023 = arith.mulf %1022, %490 : vector<4x128xf32>
    %1024 = arith.addf %1023, %493 : vector<4x128xf32>
    %1025 = vector.extract_strided_slice %1024 {offsets = [0, 0], sizes = [4, 32], strides = [1, 1]} : vector<4x128xf32> to vector<4x32xf32>
    %1026 = vector.extract_strided_slice %1024 {offsets = [0, 32], sizes = [4, 32], strides = [1, 1]} : vector<4x128xf32> to vector<4x32xf32>
    %1027 = vector.extract_strided_slice %1024 {offsets = [0, 64], sizes = [4, 32], strides = [1, 1]} : vector<4x128xf32> to vector<4x32xf32>
    %1028 = vector.extract_strided_slice %1024 {offsets = [0, 96], sizes = [4, 32], strides = [1, 1]} : vector<4x128xf32> to vector<4x32xf32>
    %1029 = arith.mulf %1026, %1010 : vector<4x32xf32>
    %1030 = arith.mulf %1025, %1027 : vector<4x32xf32>
    %1031 = arith.addf %1029, %1030 : vector<4x32xf32>
    %1032 = math.tanh %1031 : vector<4x32xf32>
    %1033 = arith.mulf %1028, %1032 : vector<4x32xf32>
    %1034 = tpu.concatenate %1033, %1033 in 1 : vector<4x32xf32>, vector<4x32xf32> -> vector<4x64xf32>
    %1035 = arith.mulf %1034, %503 : vector<4x64xf32>
    %1036 = vector.extract_strided_slice %1033 {offsets = [0, 0], sizes = [2, 32], strides = [1, 1]} : vector<4x32xf32> to vector<2x32xf32>
    %c10_597 = arith.constant 10 : index
    %c0_598 = arith.constant 0 : index
    %1037 = vector.load %arg28[%c10_597, %c0_598] : memref<32x64xf32, #tpu.memory_space<vmem>>, vector<2x32xf32>
    tpu.vector_store %arg28[%c10_597, %c0_598], %1036 {strides = array<i32>} : memref<32x64xf32, #tpu.memory_space<vmem>>, vector<2x32xf32>,
    %1038 = vector.extract_strided_slice %1033 {offsets = [2, 0], sizes = [2, 32], strides = [1, 1]} : vector<4x32xf32> to vector<2x32xf32>
    %c20_599 = arith.constant 20 : index
    %c32_600 = arith.constant 32 : index
    %1039 = vector.load %arg28[%c20_599, %c32_600] : memref<32x64xf32, #tpu.memory_space<vmem>>, vector<2x32xf32>
    tpu.vector_store %arg28[%c20_599, %c32_600], %1038 {strides = array<i32>} : memref<32x64xf32, #tpu.memory_space<vmem>>, vector<2x32xf32>,
    %c24_601 = arith.constant 24 : index
    %c0_602 = arith.constant 0 : index
    %1040 = vector.load %arg27[%c24_601, %c0_602] : memref<64x128xf32, #tpu.memory_space<vmem>>, vector<4x128xf32>
    %cst_603 = arith.constant dense<0.000000e+00> : vector<4x128xf32>
    %1041 = tpu.matmul %1035, %911, %cst_603 {dimension_numbers = #tpu.dot_dimension_numbers<[1], [0], [0], [1], [0, 0, 1, 1], [], []>} : vector<4x64xf32>, vector<64x128xf32>, vector<4x128xf32> -> vector<4x128xf32>
    %1042 = arith.addf %1040, %1041 : vector<4x128xf32>
    %1043 = math.tanh %1042 : vector<4x128xf32>
    %1044 = arith.mulf %1043, %490 : vector<4x128xf32>
    %1045 = arith.addf %1044, %493 : vector<4x128xf32>
    %1046 = vector.extract_strided_slice %1045 {offsets = [0, 0], sizes = [4, 32], strides = [1, 1]} : vector<4x128xf32> to vector<4x32xf32>
    %1047 = vector.extract_strided_slice %1045 {offsets = [0, 32], sizes = [4, 32], strides = [1, 1]} : vector<4x128xf32> to vector<4x32xf32>
    %1048 = vector.extract_strided_slice %1045 {offsets = [0, 64], sizes = [4, 32], strides = [1, 1]} : vector<4x128xf32> to vector<4x32xf32>
    %1049 = vector.extract_strided_slice %1045 {offsets = [0, 96], sizes = [4, 32], strides = [1, 1]} : vector<4x128xf32> to vector<4x32xf32>
    %1050 = arith.mulf %1047, %1031 : vector<4x32xf32>
    %1051 = arith.mulf %1046, %1048 : vector<4x32xf32>
    %1052 = arith.addf %1050, %1051 : vector<4x32xf32>
    %1053 = math.tanh %1052 : vector<4x32xf32>
    %1054 = arith.mulf %1049, %1053 : vector<4x32xf32>
    %1055 = tpu.concatenate %1054, %1054 in 1 : vector<4x32xf32>, vector<4x32xf32> -> vector<4x64xf32>
    %1056 = arith.mulf %1055, %503 : vector<4x64xf32>
    %1057 = vector.extract_strided_slice %1054 {offsets = [0, 0], sizes = [2, 32], strides = [1, 1]} : vector<4x32xf32> to vector<2x32xf32>
    %c12_604 = arith.constant 12 : index
    %c0_605 = arith.constant 0 : index
    %1058 = vector.load %arg28[%c12_604, %c0_605] : memref<32x64xf32, #tpu.memory_space<vmem>>, vector<2x32xf32>
    tpu.vector_store %arg28[%c12_604, %c0_605], %1057 {strides = array<i32>} : memref<32x64xf32, #tpu.memory_space<vmem>>, vector<2x32xf32>,
    %1059 = vector.extract_strided_slice %1054 {offsets = [2, 0], sizes = [2, 32], strides = [1, 1]} : vector<4x32xf32> to vector<2x32xf32>
    %c18_606 = arith.constant 18 : index
    %c32_607 = arith.constant 32 : index
    %1060 = vector.load %arg28[%c18_606, %c32_607] : memref<32x64xf32, #tpu.memory_space<vmem>>, vector<2x32xf32>
    tpu.vector_store %arg28[%c18_606, %c32_607], %1059 {strides = array<i32>} : memref<32x64xf32, #tpu.memory_space<vmem>>, vector<2x32xf32>,
    %c28_608 = arith.constant 28 : index
    %c0_609 = arith.constant 0 : index
    %1061 = vector.load %arg27[%c28_608, %c0_609] : memref<64x128xf32, #tpu.memory_space<vmem>>, vector<4x128xf32>
    %cst_610 = arith.constant dense<0.000000e+00> : vector<4x128xf32>
    %1062 = tpu.matmul %1056, %911, %cst_610 {dimension_numbers = #tpu.dot_dimension_numbers<[1], [0], [0], [1], [0, 0, 1, 1], [], []>} : vector<4x64xf32>, vector<64x128xf32>, vector<4x128xf32> -> vector<4x128xf32>
    %1063 = arith.addf %1061, %1062 : vector<4x128xf32>
    %1064 = math.tanh %1063 : vector<4x128xf32>
    %1065 = arith.mulf %1064, %490 : vector<4x128xf32>
    %1066 = arith.addf %1065, %493 : vector<4x128xf32>
    %1067 = vector.extract_strided_slice %1066 {offsets = [0, 0], sizes = [4, 32], strides = [1, 1]} : vector<4x128xf32> to vector<4x32xf32>
    %1068 = vector.extract_strided_slice %1066 {offsets = [0, 32], sizes = [4, 32], strides = [1, 1]} : vector<4x128xf32> to vector<4x32xf32>
    %1069 = vector.extract_strided_slice %1066 {offsets = [0, 64], sizes = [4, 32], strides = [1, 1]} : vector<4x128xf32> to vector<4x32xf32>
    %1070 = vector.extract_strided_slice %1066 {offsets = [0, 96], sizes = [4, 32], strides = [1, 1]} : vector<4x128xf32> to vector<4x32xf32>
    %1071 = arith.mulf %1068, %1052 : vector<4x32xf32>
    %1072 = arith.mulf %1067, %1069 : vector<4x32xf32>
    %1073 = arith.addf %1071, %1072 : vector<4x32xf32>
    %1074 = math.tanh %1073 : vector<4x32xf32>
    %1075 = arith.mulf %1070, %1074 : vector<4x32xf32>
    %1076 = tpu.concatenate %1075, %1075 in 1 : vector<4x32xf32>, vector<4x32xf32> -> vector<4x64xf32>
    %1077 = arith.mulf %1076, %503 : vector<4x64xf32>
    %1078 = vector.extract_strided_slice %1075 {offsets = [0, 0], sizes = [2, 32], strides = [1, 1]} : vector<4x32xf32> to vector<2x32xf32>
    %c14_611 = arith.constant 14 : index
    %c0_612 = arith.constant 0 : index
    %1079 = vector.load %arg28[%c14_611, %c0_612] : memref<32x64xf32, #tpu.memory_space<vmem>>, vector<2x32xf32>
    tpu.vector_store %arg28[%c14_611, %c0_612], %1078 {strides = array<i32>} : memref<32x64xf32, #tpu.memory_space<vmem>>, vector<2x32xf32>,
    %1080 = vector.extract_strided_slice %1075 {offsets = [2, 0], sizes = [2, 32], strides = [1, 1]} : vector<4x32xf32> to vector<2x32xf32>
    %c16_613 = arith.constant 16 : index
    %c32_614 = arith.constant 32 : index
    %1081 = vector.load %arg28[%c16_613, %c32_614] : memref<32x64xf32, #tpu.memory_space<vmem>>, vector<2x32xf32>
    tpu.vector_store %arg28[%c16_613, %c32_614], %1080 {strides = array<i32>} : memref<32x64xf32, #tpu.memory_space<vmem>>, vector<2x32xf32>,
    %c32_615 = arith.constant 32 : index
    %c0_616 = arith.constant 0 : index
    %1082 = vector.load %arg27[%c32_615, %c0_616] : memref<64x128xf32, #tpu.memory_space<vmem>>, vector<4x128xf32>
    %cst_617 = arith.constant dense<0.000000e+00> : vector<4x128xf32>
    %1083 = tpu.matmul %1077, %911, %cst_617 {dimension_numbers = #tpu.dot_dimension_numbers<[1], [0], [0], [1], [0, 0, 1, 1], [], []>} : vector<4x64xf32>, vector<64x128xf32>, vector<4x128xf32> -> vector<4x128xf32>
    %1084 = arith.addf %1082, %1083 : vector<4x128xf32>
    %1085 = math.tanh %1084 : vector<4x128xf32>
    %1086 = arith.mulf %1085, %490 : vector<4x128xf32>
    %1087 = arith.addf %1086, %493 : vector<4x128xf32>
    %1088 = vector.extract_strided_slice %1087 {offsets = [0, 0], sizes = [4, 32], strides = [1, 1]} : vector<4x128xf32> to vector<4x32xf32>
    %1089 = vector.extract_strided_slice %1087 {offsets = [0, 32], sizes = [4, 32], strides = [1, 1]} : vector<4x128xf32> to vector<4x32xf32>
    %1090 = vector.extract_strided_slice %1087 {offsets = [0, 64], sizes = [4, 32], strides = [1, 1]} : vector<4x128xf32> to vector<4x32xf32>
    %1091 = vector.extract_strided_slice %1087 {offsets = [0, 96], sizes = [4, 32], strides = [1, 1]} : vector<4x128xf32> to vector<4x32xf32>
    %1092 = arith.mulf %1089, %1073 : vector<4x32xf32>
    %1093 = arith.mulf %1088, %1090 : vector<4x32xf32>
    %1094 = arith.addf %1092, %1093 : vector<4x32xf32>
    %1095 = math.tanh %1094 : vector<4x32xf32>
    %1096 = arith.mulf %1091, %1095 : vector<4x32xf32>
    %1097 = tpu.concatenate %1096, %1096 in 1 : vector<4x32xf32>, vector<4x32xf32> -> vector<4x64xf32>
    %1098 = arith.mulf %1097, %503 : vector<4x64xf32>
    %1099 = vector.extract_strided_slice %1096 {offsets = [0, 0], sizes = [2, 32], strides = [1, 1]} : vector<4x32xf32> to vector<2x32xf32>
    %c16_618 = arith.constant 16 : index
    %c0_619 = arith.constant 0 : index
    %1100 = vector.load %arg28[%c16_618, %c0_619] : memref<32x64xf32, #tpu.memory_space<vmem>>, vector<2x32xf32>
    tpu.vector_store %arg28[%c16_618, %c0_619], %1099 {strides = array<i32>} : memref<32x64xf32, #tpu.memory_space<vmem>>, vector<2x32xf32>,
    %1101 = vector.extract_strided_slice %1096 {offsets = [2, 0], sizes = [2, 32], strides = [1, 1]} : vector<4x32xf32> to vector<2x32xf32>
    %c14_620 = arith.constant 14 : index
    %c32_621 = arith.constant 32 : index
    %1102 = vector.load %arg28[%c14_620, %c32_621] : memref<32x64xf32, #tpu.memory_space<vmem>>, vector<2x32xf32>
    tpu.vector_store %arg28[%c14_620, %c32_621], %1101 {strides = array<i32>} : memref<32x64xf32, #tpu.memory_space<vmem>>, vector<2x32xf32>,
    %c36_622 = arith.constant 36 : index
    %c0_623 = arith.constant 0 : index
    %1103 = vector.load %arg27[%c36_622, %c0_623] : memref<64x128xf32, #tpu.memory_space<vmem>>, vector<4x128xf32>
    %cst_624 = arith.constant dense<0.000000e+00> : vector<4x128xf32>
    %1104 = tpu.matmul %1098, %911, %cst_624 {dimension_numbers = #tpu.dot_dimension_numbers<[1], [0], [0], [1], [0, 0, 1, 1], [], []>} : vector<4x64xf32>, vector<64x128xf32>, vector<4x128xf32> -> vector<4x128xf32>
    %1105 = arith.addf %1103, %1104 : vector<4x128xf32>
    %1106 = math.tanh %1105 : vector<4x128xf32>
    %1107 = arith.mulf %1106, %490 : vector<4x128xf32>
    %1108 = arith.addf %1107, %493 : vector<4x128xf32>
    %1109 = vector.extract_strided_slice %1108 {offsets = [0, 0], sizes = [4, 32], strides = [1, 1]} : vector<4x128xf32> to vector<4x32xf32>
    %1110 = vector.extract_strided_slice %1108 {offsets = [0, 32], sizes = [4, 32], strides = [1, 1]} : vector<4x128xf32> to vector<4x32xf32>
    %1111 = vector.extract_strided_slice %1108 {offsets = [0, 64], sizes = [4, 32], strides = [1, 1]} : vector<4x128xf32> to vector<4x32xf32>
    %1112 = vector.extract_strided_slice %1108 {offsets = [0, 96], sizes = [4, 32], strides = [1, 1]} : vector<4x128xf32> to vector<4x32xf32>
    %1113 = arith.mulf %1110, %1094 : vector<4x32xf32>
    %1114 = arith.mulf %1109, %1111 : vector<4x32xf32>
    %1115 = arith.addf %1113, %1114 : vector<4x32xf32>
    %1116 = math.tanh %1115 : vector<4x32xf32>
    %1117 = arith.mulf %1112, %1116 : vector<4x32xf32>
    %1118 = tpu.concatenate %1117, %1117 in 1 : vector<4x32xf32>, vector<4x32xf32> -> vector<4x64xf32>
    %1119 = arith.mulf %1118, %503 : vector<4x64xf32>
    %1120 = vector.extract_strided_slice %1117 {offsets = [0, 0], sizes = [2, 32], strides = [1, 1]} : vector<4x32xf32> to vector<2x32xf32>
    %c18_625 = arith.constant 18 : index
    %c0_626 = arith.constant 0 : index
    %1121 = vector.load %arg28[%c18_625, %c0_626] : memref<32x64xf32, #tpu.memory_space<vmem>>, vector<2x32xf32>
    tpu.vector_store %arg28[%c18_625, %c0_626], %1120 {strides = array<i32>} : memref<32x64xf32, #tpu.memory_space<vmem>>, vector<2x32xf32>,
    %1122 = vector.extract_strided_slice %1117 {offsets = [2, 0], sizes = [2, 32], strides = [1, 1]} : vector<4x32xf32> to vector<2x32xf32>
    %c12_627 = arith.constant 12 : index
    %c32_628 = arith.constant 32 : index
    %1123 = vector.load %arg28[%c12_627, %c32_628] : memref<32x64xf32, #tpu.memory_space<vmem>>, vector<2x32xf32>
    tpu.vector_store %arg28[%c12_627, %c32_628], %1122 {strides = array<i32>} : memref<32x64xf32, #tpu.memory_space<vmem>>, vector<2x32xf32>,
    %c40_629 = arith.constant 40 : index
    %c0_630 = arith.constant 0 : index
    %1124 = vector.load %arg27[%c40_629, %c0_630] : memref<64x128xf32, #tpu.memory_space<vmem>>, vector<4x128xf32>
    %cst_631 = arith.constant dense<0.000000e+00> : vector<4x128xf32>
    %1125 = tpu.matmul %1119, %911, %cst_631 {dimension_numbers = #tpu.dot_dimension_numbers<[1], [0], [0], [1], [0, 0, 1, 1], [], []>} : vector<4x64xf32>, vector<64x128xf32>, vector<4x128xf32> -> vector<4x128xf32>
    %1126 = arith.addf %1124, %1125 : vector<4x128xf32>
    %1127 = math.tanh %1126 : vector<4x128xf32>
    %1128 = arith.mulf %1127, %490 : vector<4x128xf32>
    %1129 = arith.addf %1128, %493 : vector<4x128xf32>
    %1130 = vector.extract_strided_slice %1129 {offsets = [0, 0], sizes = [4, 32], strides = [1, 1]} : vector<4x128xf32> to vector<4x32xf32>
    %1131 = vector.extract_strided_slice %1129 {offsets = [0, 32], sizes = [4, 32], strides = [1, 1]} : vector<4x128xf32> to vector<4x32xf32>
    %1132 = vector.extract_strided_slice %1129 {offsets = [0, 64], sizes = [4, 32], strides = [1, 1]} : vector<4x128xf32> to vector<4x32xf32>
    %1133 = vector.extract_strided_slice %1129 {offsets = [0, 96], sizes = [4, 32], strides = [1, 1]} : vector<4x128xf32> to vector<4x32xf32>
    %1134 = arith.mulf %1131, %1115 : vector<4x32xf32>
    %1135 = arith.mulf %1130, %1132 : vector<4x32xf32>
    %1136 = arith.addf %1134, %1135 : vector<4x32xf32>
    %1137 = math.tanh %1136 : vector<4x32xf32>
    %1138 = arith.mulf %1133, %1137 : vector<4x32xf32>
    %1139 = tpu.concatenate %1138, %1138 in 1 : vector<4x32xf32>, vector<4x32xf32> -> vector<4x64xf32>
    %1140 = arith.mulf %1139, %503 : vector<4x64xf32>
    %1141 = vector.extract_strided_slice %1138 {offsets = [0, 0], sizes = [2, 32], strides = [1, 1]} : vector<4x32xf32> to vector<2x32xf32>
    %c20_632 = arith.constant 20 : index
    %c0_633 = arith.constant 0 : index
    %1142 = vector.load %arg28[%c20_632, %c0_633] : memref<32x64xf32, #tpu.memory_space<vmem>>, vector<2x32xf32>
    tpu.vector_store %arg28[%c20_632, %c0_633], %1141 {strides = array<i32>} : memref<32x64xf32, #tpu.memory_space<vmem>>, vector<2x32xf32>,
    %1143 = vector.extract_strided_slice %1138 {offsets = [2, 0], sizes = [2, 32], strides = [1, 1]} : vector<4x32xf32> to vector<2x32xf32>
    %c10_634 = arith.constant 10 : index
    %c32_635 = arith.constant 32 : index
    %1144 = vector.load %arg28[%c10_634, %c32_635] : memref<32x64xf32, #tpu.memory_space<vmem>>, vector<2x32xf32>
    tpu.vector_store %arg28[%c10_634, %c32_635], %1143 {strides = array<i32>} : memref<32x64xf32, #tpu.memory_space<vmem>>, vector<2x32xf32>,
    %c44_636 = arith.constant 44 : index
    %c0_637 = arith.constant 0 : index
    %1145 = vector.load %arg27[%c44_636, %c0_637] : memref<64x128xf32, #tpu.memory_space<vmem>>, vector<4x128xf32>
    %cst_638 = arith.constant dense<0.000000e+00> : vector<4x128xf32>
    %1146 = tpu.matmul %1140, %911, %cst_638 {dimension_numbers = #tpu.dot_dimension_numbers<[1], [0], [0], [1], [0, 0, 1, 1], [], []>} : vector<4x64xf32>, vector<64x128xf32>, vector<4x128xf32> -> vector<4x128xf32>
    %1147 = arith.addf %1145, %1146 : vector<4x128xf32>
    %1148 = math.tanh %1147 : vector<4x128xf32>
    %1149 = arith.mulf %1148, %490 : vector<4x128xf32>
    %1150 = arith.addf %1149, %493 : vector<4x128xf32>
    %1151 = vector.extract_strided_slice %1150 {offsets = [0, 0], sizes = [4, 32], strides = [1, 1]} : vector<4x128xf32> to vector<4x32xf32>
    %1152 = vector.extract_strided_slice %1150 {offsets = [0, 32], sizes = [4, 32], strides = [1, 1]} : vector<4x128xf32> to vector<4x32xf32>
    %1153 = vector.extract_strided_slice %1150 {offsets = [0, 64], sizes = [4, 32], strides = [1, 1]} : vector<4x128xf32> to vector<4x32xf32>
    %1154 = vector.extract_strided_slice %1150 {offsets = [0, 96], sizes = [4, 32], strides = [1, 1]} : vector<4x128xf32> to vector<4x32xf32>
    %1155 = arith.mulf %1152, %1136 : vector<4x32xf32>
    %1156 = arith.mulf %1151, %1153 : vector<4x32xf32>
    %1157 = arith.addf %1155, %1156 : vector<4x32xf32>
    %1158 = math.tanh %1157 : vector<4x32xf32>
    %1159 = arith.mulf %1154, %1158 : vector<4x32xf32>
    %1160 = tpu.concatenate %1159, %1159 in 1 : vector<4x32xf32>, vector<4x32xf32> -> vector<4x64xf32>
    %1161 = arith.mulf %1160, %503 : vector<4x64xf32>
    %1162 = vector.extract_strided_slice %1159 {offsets = [0, 0], sizes = [2, 32], strides = [1, 1]} : vector<4x32xf32> to vector<2x32xf32>
    %c22_639 = arith.constant 22 : index
    %c0_640 = arith.constant 0 : index
    %1163 = vector.load %arg28[%c22_639, %c0_640] : memref<32x64xf32, #tpu.memory_space<vmem>>, vector<2x32xf32>
    tpu.vector_store %arg28[%c22_639, %c0_640], %1162 {strides = array<i32>} : memref<32x64xf32, #tpu.memory_space<vmem>>, vector<2x32xf32>,
    %1164 = vector.extract_strided_slice %1159 {offsets = [2, 0], sizes = [2, 32], strides = [1, 1]} : vector<4x32xf32> to vector<2x32xf32>
    %c8_641 = arith.constant 8 : index
    %c32_642 = arith.constant 32 : index
    %1165 = vector.load %arg28[%c8_641, %c32_642] : memref<32x64xf32, #tpu.memory_space<vmem>>, vector<2x32xf32>
    tpu.vector_store %arg28[%c8_641, %c32_642], %1164 {strides = array<i32>} : memref<32x64xf32, #tpu.memory_space<vmem>>, vector<2x32xf32>,
    %c48_643 = arith.constant 48 : index
    %c0_644 = arith.constant 0 : index
    %1166 = vector.load %arg27[%c48_643, %c0_644] : memref<64x128xf32, #tpu.memory_space<vmem>>, vector<4x128xf32>
    %cst_645 = arith.constant dense<0.000000e+00> : vector<4x128xf32>
    %1167 = tpu.matmul %1161, %911, %cst_645 {dimension_numbers = #tpu.dot_dimension_numbers<[1], [0], [0], [1], [0, 0, 1, 1], [], []>} : vector<4x64xf32>, vector<64x128xf32>, vector<4x128xf32> -> vector<4x128xf32>
    %1168 = arith.addf %1166, %1167 : vector<4x128xf32>
    %1169 = math.tanh %1168 : vector<4x128xf32>
    %1170 = arith.mulf %1169, %490 : vector<4x128xf32>
    %1171 = arith.addf %1170, %493 : vector<4x128xf32>
    %1172 = vector.extract_strided_slice %1171 {offsets = [0, 0], sizes = [4, 32], strides = [1, 1]} : vector<4x128xf32> to vector<4x32xf32>
    %1173 = vector.extract_strided_slice %1171 {offsets = [0, 32], sizes = [4, 32], strides = [1, 1]} : vector<4x128xf32> to vector<4x32xf32>
    %1174 = vector.extract_strided_slice %1171 {offsets = [0, 64], sizes = [4, 32], strides = [1, 1]} : vector<4x128xf32> to vector<4x32xf32>
    %1175 = vector.extract_strided_slice %1171 {offsets = [0, 96], sizes = [4, 32], strides = [1, 1]} : vector<4x128xf32> to vector<4x32xf32>
    %1176 = arith.mulf %1173, %1157 : vector<4x32xf32>
    %1177 = arith.mulf %1172, %1174 : vector<4x32xf32>
    %1178 = arith.addf %1176, %1177 : vector<4x32xf32>
    %1179 = math.tanh %1178 : vector<4x32xf32>
    %1180 = arith.mulf %1175, %1179 : vector<4x32xf32>
    %1181 = tpu.concatenate %1180, %1180 in 1 : vector<4x32xf32>, vector<4x32xf32> -> vector<4x64xf32>
    %1182 = arith.mulf %1181, %503 : vector<4x64xf32>
    %1183 = vector.extract_strided_slice %1180 {offsets = [0, 0], sizes = [2, 32], strides = [1, 1]} : vector<4x32xf32> to vector<2x32xf32>
    %c24_646 = arith.constant 24 : index
    %c0_647 = arith.constant 0 : index
    %1184 = vector.load %arg28[%c24_646, %c0_647] : memref<32x64xf32, #tpu.memory_space<vmem>>, vector<2x32xf32>
    tpu.vector_store %arg28[%c24_646, %c0_647], %1183 {strides = array<i32>} : memref<32x64xf32, #tpu.memory_space<vmem>>, vector<2x32xf32>,
    %1185 = vector.extract_strided_slice %1180 {offsets = [2, 0], sizes = [2, 32], strides = [1, 1]} : vector<4x32xf32> to vector<2x32xf32>
    %c6_648 = arith.constant 6 : index
    %c32_649 = arith.constant 32 : index
    %1186 = vector.load %arg28[%c6_648, %c32_649] : memref<32x64xf32, #tpu.memory_space<vmem>>, vector<2x32xf32>
    tpu.vector_store %arg28[%c6_648, %c32_649], %1185 {strides = array<i32>} : memref<32x64xf32, #tpu.memory_space<vmem>>, vector<2x32xf32>,
    %c52_650 = arith.constant 52 : index
    %c0_651 = arith.constant 0 : index
    %1187 = vector.load %arg27[%c52_650, %c0_651] : memref<64x128xf32, #tpu.memory_space<vmem>>, vector<4x128xf32>
    %cst_652 = arith.constant dense<0.000000e+00> : vector<4x128xf32>
    %1188 = tpu.matmul %1182, %911, %cst_652 {dimension_numbers = #tpu.dot_dimension_numbers<[1], [0], [0], [1], [0, 0, 1, 1], [], []>} : vector<4x64xf32>, vector<64x128xf32>, vector<4x128xf32> -> vector<4x128xf32>
    %1189 = arith.addf %1187, %1188 : vector<4x128xf32>
    %1190 = math.tanh %1189 : vector<4x128xf32>
    %1191 = arith.mulf %1190, %490 : vector<4x128xf32>
    %1192 = arith.addf %1191, %493 : vector<4x128xf32>
    %1193 = vector.extract_strided_slice %1192 {offsets = [0, 0], sizes = [4, 32], strides = [1, 1]} : vector<4x128xf32> to vector<4x32xf32>
    %1194 = vector.extract_strided_slice %1192 {offsets = [0, 32], sizes = [4, 32], strides = [1, 1]} : vector<4x128xf32> to vector<4x32xf32>
    %1195 = vector.extract_strided_slice %1192 {offsets = [0, 64], sizes = [4, 32], strides = [1, 1]} : vector<4x128xf32> to vector<4x32xf32>
    %1196 = vector.extract_strided_slice %1192 {offsets = [0, 96], sizes = [4, 32], strides = [1, 1]} : vector<4x128xf32> to vector<4x32xf32>
    %1197 = arith.mulf %1194, %1178 : vector<4x32xf32>
    %1198 = arith.mulf %1193, %1195 : vector<4x32xf32>
    %1199 = arith.addf %1197, %1198 : vector<4x32xf32>
    %1200 = math.tanh %1199 : vector<4x32xf32>
    %1201 = arith.mulf %1196, %1200 : vector<4x32xf32>
    %1202 = tpu.concatenate %1201, %1201 in 1 : vector<4x32xf32>, vector<4x32xf32> -> vector<4x64xf32>
    %1203 = arith.mulf %1202, %503 : vector<4x64xf32>
    %1204 = vector.extract_strided_slice %1201 {offsets = [0, 0], sizes = [2, 32], strides = [1, 1]} : vector<4x32xf32> to vector<2x32xf32>
    %c26_653 = arith.constant 26 : index
    %c0_654 = arith.constant 0 : index
    %1205 = vector.load %arg28[%c26_653, %c0_654] : memref<32x64xf32, #tpu.memory_space<vmem>>, vector<2x32xf32>
    tpu.vector_store %arg28[%c26_653, %c0_654], %1204 {strides = array<i32>} : memref<32x64xf32, #tpu.memory_space<vmem>>, vector<2x32xf32>,
    %1206 = vector.extract_strided_slice %1201 {offsets = [2, 0], sizes = [2, 32], strides = [1, 1]} : vector<4x32xf32> to vector<2x32xf32>
    %c4_655 = arith.constant 4 : index
    %c32_656 = arith.constant 32 : index
    %1207 = vector.load %arg28[%c4_655, %c32_656] : memref<32x64xf32, #tpu.memory_space<vmem>>, vector<2x32xf32>
    tpu.vector_store %arg28[%c4_655, %c32_656], %1206 {strides = array<i32>} : memref<32x64xf32, #tpu.memory_space<vmem>>, vector<2x32xf32>,
    %c56_657 = arith.constant 56 : index
    %c0_658 = arith.constant 0 : index
    %1208 = vector.load %arg27[%c56_657, %c0_658] : memref<64x128xf32, #tpu.memory_space<vmem>>, vector<4x128xf32>
    %cst_659 = arith.constant dense<0.000000e+00> : vector<4x128xf32>
    %1209 = tpu.matmul %1203, %911, %cst_659 {dimension_numbers = #tpu.dot_dimension_numbers<[1], [0], [0], [1], [0, 0, 1, 1], [], []>} : vector<4x64xf32>, vector<64x128xf32>, vector<4x128xf32> -> vector<4x128xf32>
    %1210 = arith.addf %1208, %1209 : vector<4x128xf32>
    %1211 = math.tanh %1210 : vector<4x128xf32>
    %1212 = arith.mulf %1211, %490 : vector<4x128xf32>
    %1213 = arith.addf %1212, %493 : vector<4x128xf32>
    %1214 = vector.extract_strided_slice %1213 {offsets = [0, 0], sizes = [4, 32], strides = [1, 1]} : vector<4x128xf32> to vector<4x32xf32>
    %1215 = vector.extract_strided_slice %1213 {offsets = [0, 32], sizes = [4, 32], strides = [1, 1]} : vector<4x128xf32> to vector<4x32xf32>
    %1216 = vector.extract_strided_slice %1213 {offsets = [0, 64], sizes = [4, 32], strides = [1, 1]} : vector<4x128xf32> to vector<4x32xf32>
    %1217 = vector.extract_strided_slice %1213 {offsets = [0, 96], sizes = [4, 32], strides = [1, 1]} : vector<4x128xf32> to vector<4x32xf32>
    %1218 = arith.mulf %1215, %1199 : vector<4x32xf32>
    %1219 = arith.mulf %1214, %1216 : vector<4x32xf32>
    %1220 = arith.addf %1218, %1219 : vector<4x32xf32>
    %1221 = math.tanh %1220 : vector<4x32xf32>
    %1222 = arith.mulf %1217, %1221 : vector<4x32xf32>
    %1223 = tpu.concatenate %1222, %1222 in 1 : vector<4x32xf32>, vector<4x32xf32> -> vector<4x64xf32>
    %1224 = arith.mulf %1223, %503 : vector<4x64xf32>
    %1225 = vector.extract_strided_slice %1222 {offsets = [0, 0], sizes = [2, 32], strides = [1, 1]} : vector<4x32xf32> to vector<2x32xf32>
    %c28_660 = arith.constant 28 : index
    %c0_661 = arith.constant 0 : index
    %1226 = vector.load %arg28[%c28_660, %c0_661] : memref<32x64xf32, #tpu.memory_space<vmem>>, vector<2x32xf32>
    tpu.vector_store %arg28[%c28_660, %c0_661], %1225 {strides = array<i32>} : memref<32x64xf32, #tpu.memory_space<vmem>>, vector<2x32xf32>,
    %1227 = vector.extract_strided_slice %1222 {offsets = [2, 0], sizes = [2, 32], strides = [1, 1]} : vector<4x32xf32> to vector<2x32xf32>
    %c2_662 = arith.constant 2 : index
    %c32_663 = arith.constant 32 : index
    %1228 = vector.load %arg28[%c2_662, %c32_663] : memref<32x64xf32, #tpu.memory_space<vmem>>, vector<2x32xf32>
    tpu.vector_store %arg28[%c2_662, %c32_663], %1227 {strides = array<i32>} : memref<32x64xf32, #tpu.memory_space<vmem>>, vector<2x32xf32>,
    %c60_664 = arith.constant 60 : index
    %c0_665 = arith.constant 0 : index
    %1229 = vector.load %arg27[%c60_664, %c0_665] : memref<64x128xf32, #tpu.memory_space<vmem>>, vector<4x128xf32>
    %cst_666 = arith.constant dense<0.000000e+00> : vector<4x128xf32>
    %1230 = tpu.matmul %1224, %911, %cst_666 {dimension_numbers = #tpu.dot_dimension_numbers<[1], [0], [0], [1], [0, 0, 1, 1], [], []>} : vector<4x64xf32>, vector<64x128xf32>, vector<4x128xf32> -> vector<4x128xf32>
    %1231 = arith.addf %1229, %1230 : vector<4x128xf32>
    %1232 = math.tanh %1231 : vector<4x128xf32>
    %1233 = arith.mulf %1232, %490 : vector<4x128xf32>
    %1234 = arith.addf %1233, %493 : vector<4x128xf32>
    %1235 = vector.extract_strided_slice %1234 {offsets = [0, 0], sizes = [4, 32], strides = [1, 1]} : vector<4x128xf32> to vector<4x32xf32>
    %1236 = vector.extract_strided_slice %1234 {offsets = [0, 32], sizes = [4, 32], strides = [1, 1]} : vector<4x128xf32> to vector<4x32xf32>
    %1237 = vector.extract_strided_slice %1234 {offsets = [0, 64], sizes = [4, 32], strides = [1, 1]} : vector<4x128xf32> to vector<4x32xf32>
    %1238 = vector.extract_strided_slice %1234 {offsets = [0, 96], sizes = [4, 32], strides = [1, 1]} : vector<4x128xf32> to vector<4x32xf32>
    %1239 = arith.mulf %1236, %1220 : vector<4x32xf32>
    %1240 = arith.mulf %1235, %1237 : vector<4x32xf32>
    %1241 = arith.addf %1239, %1240 : vector<4x32xf32>
    %1242 = math.tanh %1241 : vector<4x32xf32>
    %1243 = arith.mulf %1238, %1242 : vector<4x32xf32>
    %1244 = vector.extract_strided_slice %1243 {offsets = [0, 0], sizes = [2, 32], strides = [1, 1]} : vector<4x32xf32> to vector<2x32xf32>
    %c30_667 = arith.constant 30 : index
    %c0_668 = arith.constant 0 : index
    %1245 = vector.load %arg28[%c30_667, %c0_668] : memref<32x64xf32, #tpu.memory_space<vmem>>, vector<2x32xf32>
    tpu.vector_store %arg28[%c30_667, %c0_668], %1244 {strides = array<i32>} : memref<32x64xf32, #tpu.memory_space<vmem>>, vector<2x32xf32>,
    %1246 = vector.extract_strided_slice %1243 {offsets = [2, 0], sizes = [2, 32], strides = [1, 1]} : vector<4x32xf32> to vector<2x32xf32>
    %c0_669 = arith.constant 0 : index
    %c32_670 = arith.constant 32 : index
    %1247 = vector.load %arg28[%c0_669, %c32_670] : memref<32x64xf32, #tpu.memory_space<vmem>>, vector<2x32xf32>
    tpu.vector_store %arg28[%c0_669, %c32_670], %1246 {strides = array<i32>} : memref<32x64xf32, #tpu.memory_space<vmem>>, vector<2x32xf32>,
    %c0_671 = arith.constant 0 : index
    %c0_672 = arith.constant 0 : index
    %1248 = vector.load %arg28[%c0_671, %c0_672] : memref<32x64xf32, #tpu.memory_space<vmem>>, vector<32x64xf32>
    %c0_673 = arith.constant 0 : index
    %c0_674 = arith.constant 0 : index
    %1249 = vector.load %arg19[%c0_673, %c0_674] : memref<64x9xf32, #tpu.memory_space<vmem>>, vector<64x9xf32>
    %cst_675 = arith.constant dense<0.000000e+00> : vector<32x9xf32>
    %1250 = tpu.matmul %1248, %1249, %cst_675 {dimension_numbers = #tpu.dot_dimension_numbers<[1], [0], [0], [1], [0, 0, 1, 1], [], []>} : vector<32x64xf32>, vector<64x9xf32>, vector<32x9xf32> -> vector<32x9xf32>
    %c0_676 = arith.constant 0 : index
    %c0_677 = arith.constant 0 : index
    %1251 = vector.load %arg20[%c0_676, %c0_677] : memref<1x9xf32, #tpu.memory_space<vmem>>, vector<1x9xf32>
    %1252 = vector.broadcast %1251 : vector<1x9xf32> to vector<32x9xf32>
    %1253 = arith.addf %1250, %1252 : vector<32x9xf32>
    %1254 = vector.extract_strided_slice %1253 {offsets = [0, 0], sizes = [32, 1], strides = [1, 1]} : vector<32x9xf32> to vector<32x1xf32>
    %1255 = vector.extract_strided_slice %1253 {offsets = [0, 1], sizes = [32, 8], strides = [1, 1]} : vector<32x9xf32> to vector<32x8xf32>
    %cst_678 = arith.constant 0.000000e+00 : f32
    %1256 = vector.broadcast %cst_678 : f32 to vector<32x8xf32>
    %1257 = arith.cmpf ogt, %1255, %1256 : vector<32x8xf32>
    %cst_679 = arith.constant 1.000000e-01 : f32
    %1258 = vector.broadcast %cst_679 : f32 to vector<32x8xf32>
    %1259 = arith.mulf %1258, %1255 : vector<32x8xf32>
    %1260 = arith.select %1257, %1255, %1259 : vector<32x8xi1>, vector<32x8xf32>
    %c0_680 = arith.constant 0 : index
    %c0_681 = arith.constant 0 : index
    %1261 = vector.load %arg21[%c0_680, %c0_681] : memref<8x1xf32, #tpu.memory_space<vmem>>, vector<8x1xf32>
    %cst_682 = arith.constant dense<0.000000e+00> : vector<32x1xf32>
    %1262 = tpu.matmul %1260, %1261, %cst_682 {dimension_numbers = #tpu.dot_dimension_numbers<[1], [0], [0], [1], [0, 0, 1, 1], [], []>} : vector<32x8xf32>, vector<8x1xf32>, vector<32x1xf32> -> vector<32x1xf32>
    %c0_683 = arith.constant 0 : index
    %c0_684 = arith.constant 0 : index
    %1263 = vector.load %arg22[%c0_683, %c0_684] : memref<1x1xf32, #tpu.memory_space<vmem>>, vector<1x1xf32>
    %1264 = vector.broadcast %1263 : vector<1x1xf32> to vector<32x1xf32>
    %1265 = arith.addf %1262, %1264 : vector<32x1xf32>
    %1266 = arith.negf %1265 : vector<32x1xf32>
    %1267 = math.exp %1266 : vector<32x1xf32>
    %cst_685 = arith.constant 1.000000e+00 : f32
    %1268 = vector.broadcast %cst_685 : f32 to vector<32x1xf32>
    %1269 = arith.addf %1268, %1267 : vector<32x1xf32>
    %1270 = arith.divf %1268, %1269 : vector<32x1xf32>
    %1271 = arith.negf %1254 : vector<32x1xf32>
    %1272 = math.exp %1271 : vector<32x1xf32>
    %cst_686 = arith.constant 1.000000e+00 : f32
    %1273 = vector.broadcast %cst_686 : f32 to vector<32x1xf32>
    %1274 = arith.addf %1273, %1272 : vector<32x1xf32>
    %1275 = arith.divf %1273, %1274 : vector<32x1xf32>
    %1276 = tpu.concatenate %1254, %1275, %1270 in 1 : vector<32x1xf32>, vector<32x1xf32>, vector<32x1xf32> -> vector<32x3xf32>
    %c0_687 = arith.constant 0 : index
    %c0_688 = arith.constant 0 : index
    %1277 = vector.load %arg23[%c0_687, %c0_688] : memref<32x3xf32, #tpu.memory_space<vmem>>, vector<32x3xf32>
    tpu.vector_store %arg23[%c0_687, %c0_688], %1276 {strides = array<i32>} : memref<32x3xf32, #tpu.memory_space<vmem>>, vector<32x3xf32>,
    return
  }
}

</mosaic_0001>

<bundles_post_ra>
// kernel: cnn_lstm_transcriber_forward.1
= control target key start
LH: loop header
LB: loop body
LE: loop exit
PB: predicated region body
PF: predicated region fallthrough
CT: control target
= control target key end

     0   :  { %v9646_v0 = vmov 0   ;;  %v104_v55 = vlaneseq  ;;  %vm619_vm1 = vcmask 523264   ;;  %v12317_v63 = vmov 0.0   ;;  %s12289_s0 = inlined_call_operand.vmem [shape: f32[2,70,1], index: 0, kind: input, shape index: {}]   ;;  %s12290_s1 = inlined_call_operand.vmem [shape: f32[7,4], index: 1, kind: input, shape index: {}]   ;;  %s12291_s4 = inlined_call_operand.vmem [shape: f32[20,8], index: 4, kind: input, shape index: {}]   ;;  %s12292_s2 = inlined_call_operand.vmem [shape: f32[1,4], index: 2, kind: input, shape index: {}]   ;;  %s12293_s3 = inlined_call_operand.vmem [shape: f32[1,4], index: 3, kind: input, shape index: {}]   ;;  %s12294_s7 = inlined_call_operand.vmem [shape: f32[24,16], index: 7, kind: input, shape index: {}]   ;;  %s12295_s5 = inlined_call_operand.vmem [shape: f32[1,8], index: 5, kind: input, shape index: {}]   ;;  %s12296_s6 = inlined_call_operand.vmem [shape: f32[1,8], index: 6, kind: input, shape index: {}]   ;;  %s12297_s10 = inlined_call_operand.vmem [shape: f32[48,32], index: 10, kind: input, shape index: {}]   ;;  %s12298_s8 = inlined_call_operand.vmem [shape: f32[1,16], index: 8, kind: input, shape index: {}]   ;;  %s12299_s9 = inlined_call_operand.vmem [shape: f32[1,16], index: 9, kind: input, shape index: {}]   ;;  %s12300_s13 = inlined_call_operand.vmem [shape: f32[32,256], index: 13, kind: input, shape index: {}]   ;;  %s12301_s11 = inlined_call_operand.vmem [shape: f32[1,32], index: 11, kind: input, shape index: {}]   ;;  %s12302_s12 = inlined_call_operand.vmem [shape: f32[1,32], index: 12, kind: input, shape index: {}]   ;;  %s12303_s14 = inlined_call_operand.vmem [shape: f32[1,256], index: 14, kind: input, shape index: {}]   ;;  %s12304_s15 = inlined_call_operand.vmem [shape: f32[64,128], index: 15, kind: input, shape index: {}]   ;;  %s12305_s16 = inlined_call_operand.vmem [shape: f32[64,256], index: 16, kind: input, shape index: {}]   ;;  %s12306_s18 = inlined_call_operand.vmem [shape: f32[64,128], index: 18, kind: input, shape index: {}]   ;;  %s12307_s17 = inlined_call_operand.vmem [shape: f32[1,256], index: 17, kind: input, shape index: {}]   ;;  %s12308_s19 = inlined_call_operand.vmem [shape: f32[64,9], index: 19, kind: input, shape index: {}]   ;;  %s12309_s21 = inlined_call_operand.vmem [shape: f32[8,1], index: 21, kind: input, shape index: {}]   ;;  %s12310_s20 = inlined_call_operand.vmem [shape: f32[1,9], index: 20, kind: input, shape index: {}]   ;;  %s12311_s22 = inlined_call_operand.<no memory space> [shape: f32[1,1], index: 22, kind: input, shape index: {}]   ;;  %s12312_s23 = inlined_call_operand.vmem [shape: f32[32,3], index: 23, kind: output, shape index: {}]  }
   0x1   :  { %12351 = sst [smem:[#allocation27_spill]] %s12289_s0  ;;  %9462 = vset.pattern.permute.xlu1 %v9646_v0  ;;  %9461 = vset.pattern.permute.xlu0 %v9646_v0  ;;  %vm76_vm2 = vcmask 31744   ;;  %vm81_vm6 = vcmask 27648   ;;  %vm777_vm7 = vcmask 1043456   ;;  %vm1293_vm12 = vcmask 261120  }
   0x2   :  { %12352 = sst [smem:[#allocation28_spill]] %s12290_s1  ;;  %v9944_v58 = vshrl.u32 %v104_v55, 7  ;;  %v9946_v59 = vand.u32 127, %v104_v55  ;;  %78 = vst.msk [vmem:[#allocation2 + $0x8] sm:$0xff] %vm76_vm2, %v12317_v63  ;;  %79 = vst.msk [vmem:[#allocation2 + $0x10] sm:$0xff] %vm76_vm2, %v12317_v63  ;;  %vm88_vm13 = vcmask 64512  }
   0x3   :  { %12353 = sst [smem:[#allocation29_spill]] %s12291_s4  ;;  %77 = vst.msk [vmem:[#allocation2] sm:$0xff] %vm76_vm2, %v12317_v63  ;;  %80 = vst.msk [vmem:[#allocation2 + $0x18] sm:$0xff] %vm76_vm2, %v12317_v63  ;;  %vm91_vm14 = vcmask 58368  }
   0x4   :  { %12354 = sst [smem:[#allocation30_spill]] %s12292_s2  ;;  %12360 = vst [vmem:[#allocation8_spill] sm:$0xff] %v9944_v58  ;;  %12361 = vst [vmem:[#allocation9_spill] sm:$0xff] %v9946_v59  ;;  %v111_v60 = vmul.u32 2, %v9944_v58 }
   0x5   :  { %12355 = sst [smem:[#allocation31_spill]] %s12293_s3  ;;  %83 = vst.msk [vmem:[#allocation2 + $0x28] sm:$0xff] %vm76_vm2, %v12317_v63  ;;  %84 = vst.msk [vmem:[#allocation2 + $0x30] sm:$0xff] %vm76_vm2, %v12317_v63 }
   0x6   :  { %12356 = sst [smem:[#allocation32_spill]] %s12294_s7  ;;  %vm115_vm0 = vcmp.eq.s32.totalorder %v9946_v59, %v111_v60  ;;  %85 = vst.msk [vmem:[#allocation2 + $0x38] sm:$0xff] %vm76_vm2, %v12317_v63  ;;  %86 = vst.msk [vmem:[#allocation2 + $0x40] sm:$0xff] %vm76_vm2, %v12317_v63  ;;  %s9651_s7 = smov 32  }
   0x7   :  { %12357 = sst [smem:[#allocation33_spill]] %s12295_s5  ;;  %v9957_v0 = vsel %vm115_vm0, 1.0, %v12317_v63  ;;  %82 = vst.msk [vmem:[#allocation2 + $0x20] sm:$0xf] %vm81_vm6, %v12317_v63  ;;  %87 = vst.msk [vmem:[#allocation2 + $0x48] sm:$0xf] %vm81_vm6, %v12317_v63 }
   0x8   :  { %12358 = sst [smem:[#allocation34_spill]] %s12296_s6  ;;  %12362 = vst [vmem:[#allocation10_spill] sm:$0xff] %v9957_v0  ;;  %8611 = vmatprep.mubr.msk.f32.mxu0 %vm619_vm1, %v9957_v0  ;;  %90 = vst.msk [vmem:[#allocation3 + $0x8] sm:$0xff] %vm88_vm13, %v12317_v63  ;;  %s9654_s6 = smov 1  }
   0x9   :  { %s12359_s24 = sld [smem:[#allocation27_spill]]  ;;  %92 = vst.msk [vmem:[#allocation3 + $0x10] sm:$0x3] %vm91_vm14, %v12317_v63  ;;  %95 = vst.msk [vmem:[#allocation3 + $0x28] sm:$0x3] %vm91_vm14, %v12317_v63 }
   0xa   :  { %s12363_s2 = sld [smem:[#allocation28_spill]]  ;;  %89 = vst.msk [vmem:[#allocation3] sm:$0xff] %vm88_vm13, %v12317_v63  ;;  %93 = vst.msk [vmem:[#allocation3 + $0x18] sm:$0xff] %vm88_vm13, %v12317_v63 }
   0xb   :  { %s12367_s5 = sld [smem:[#allocation29_spill]]  ;;  %94 = vst.msk [vmem:[#allocation3 + $0x20] sm:$0xff] %vm88_vm13, %v12317_v63 }
   0xc   :  { %s12368_s30 = sld [smem:[#allocation30_spill]] }
   0xd   :  { %s12370_s1 = sld [smem:[#allocation31_spill]] }
   0xe   :  { %s12372_s29 = sld [smem:[#allocation32_spill]] }
   0xf   :  { %v143_v1 = vld [vmem:[%s12359_s24 + $0x38] sm:$0xff]  ;;  %v142_v2 = vld [vmem:[%s12359_s24 + $0x30] sm:$0xff]  ;;  %v141_v6 = vld [vmem:[%s12359_s24 + $0x28] sm:$0xff]  ;;  %s12376_s26 = sld [smem:[#allocation33_spill]] }
  0x10   :  { %182 = vperm.xlu0 %9461, %v143_v1   ;;  %177 = vperm.xlu1 %9462, %v142_v2   ;;  %v212_v3 = vld [vmem:[%s12359_s24 + $0x39] sm:$0xff]  ;;  %v211_v4 = vld [vmem:[%s12359_s24 + $0x31] sm:$0xff]  ;;  %v210_v7 = vld [vmem:[%s12359_s24 + $0x29] sm:$0xff]  ;;  %s12378_s27 = sld [smem:[#allocation34_spill]] }
  0x11   :  { %v281_v5 = vld [vmem:[%s12359_s24 + $0x3a] sm:$0xff]  ;;  %v280_v8 = vld [vmem:[%s12359_s24 + $0x32] sm:$0xff]  ;;  %v279_v12 = vld [vmem:[%s12359_s24 + $0x2a] sm:$0xff] }
  0x12   :  { %v350_v9 = vld [vmem:[%s12359_s24 + $0x3b] sm:$0xff]  ;;  %v349_v13 = vld [vmem:[%s12359_s24 + $0x33] sm:$0xff]  ;;  %v348_v17 = vld [vmem:[%s12359_s24 + $0x2b] sm:$0xff] }
  0x13   :  { %v140_v10 = vld [vmem:[%s12359_s24 + $0x20] sm:$0xff]  ;;  %v139_v16 = vld [vmem:[%s12359_s24 + $0x18] sm:$0xff]  ;;  %v138_v22 = vld [vmem:[%s12359_s24 + $0x10] sm:$0xff] }
  0x14   :  { %251 = vperm.xlu0 %9461, %v212_v3   ;;  %246 = vperm.xlu1 %9462, %v211_v4   ;;  %v209_v11 = vld [vmem:[%s12359_s24 + $0x21] sm:$0xff]  ;;  %v208_v15 = vld [vmem:[%s12359_s24 + $0x19] sm:$0xff]  ;;  %v207_v21 = vld [vmem:[%s12359_s24 + $0x11] sm:$0xff] }
  0x15   :  { %v419_v14 = vld [vmem:[%s12359_s24 + $0x3c] sm:$0xff]  ;;  %v418_v20 = vld [vmem:[%s12359_s24 + $0x34] sm:$0xff]  ;;  %v417_v26 = vld [vmem:[%s12359_s24 + $0x2c] sm:$0xff] }
  0x16   :  { %v278_v18 = vld [vmem:[%s12359_s24 + $0x22] sm:$0xff]  ;;  %v277_v24 = vld [vmem:[%s12359_s24 + $0x1a] sm:$0xff]  ;;  %v276_v30 = vld [vmem:[%s12359_s24 + $0x12] sm:$0xff] }
  0x17   :  { %v488_v19 = vld [vmem:[%s12359_s24 + $0x3d] sm:$0xff]  ;;  %v487_v25 = vld [vmem:[%s12359_s24 + $0x35] sm:$0xff]  ;;  %v137_v28 = vld [vmem:[%s12359_s24 + $0x8] sm:$0xff] }
  0x18   :  { %320 = vperm.xlu0 %9461, %v281_v5   ;;  %172 = vperm.xlu1 %9462, %v141_v6   ;;  %v347_v23 = vld [vmem:[%s12359_s24 + $0x23] sm:$0xff]  ;;  %v346_v31 = vld [vmem:[%s12359_s24 + $0x1b] sm:$0xff]  ;;  %v486_v33 = vld [vmem:[%s12359_s24 + $0x2d] sm:$0xff] }
  0x19   :  { %v557_v27 = vld [vmem:[%s12359_s24 + $0x3e] sm:$0xff]  ;;  %v206_v29 = vld [vmem:[%s12359_s24 + $0x9] sm:$0xff]  ;;  %v556_v34 = vld [vmem:[%s12359_s24 + $0x36] sm:$0xff] }
  0x1a   :  { %v416_v32 = vld [vmem:[%s12359_s24 + $0x24] sm:$0xff]  ;;  %v345_v37 = vld [vmem:[%s12359_s24 + $0x13] sm:$0xff]  ;;  %v415_v40 = vld [vmem:[%s12359_s24 + $0x1c] sm:$0xff] }
  0x1b   :  { %v205_v35 = vld [vmem:[%s12359_s24 + $0x1] sm:$0xff]  ;;  %v275_v38 = vld [vmem:[%s12359_s24 + $0xa] sm:$0xff]  ;;  %v414_v43 = vld [vmem:[%s12359_s24 + $0x14] sm:$0xff] }
  0x1c   :  { %241 = vperm.xlu0 %9461, %v210_v7   ;;  %315 = vperm.xlu1 %9462, %v280_v8   ;;  %v136_v36 = vld [vmem:[%s12359_s24] sm:$0xff]  ;;  %v555_v42 = vld [vmem:[%s12359_s24 + $0x2e] sm:$0xff]  ;;  %v552_v54 = vld [vmem:[%s12359_s24 + $0x16] sm:$0xff] }
  0x1d   :  { %v485_v39 = vld [vmem:[%s12359_s24 + $0x25] sm:$0xff]  ;;  %v484_v46 = vld [vmem:[%s12359_s24 + $0x1d] sm:$0xff]  ;;  %v483_v50 = vld [vmem:[%s12359_s24 + $0x15] sm:$0xff] }
  0x1e   :  { %v274_v41 = vld [vmem:[%s12359_s24 + $0x2] sm:$0xff]  ;;  %v344_v44 = vld [vmem:[%s12359_s24 + $0xb] sm:$0xff]  ;;  %v8008_v1 = vld [vmem:[%s12359_s24 + $0x79] sm:$0xff] }
  0x1f   :  { %v554_v45 = vld [vmem:[%s12359_s24 + $0x26] sm:$0xff]  ;;  %v553_v49 = vld [vmem:[%s12359_s24 + $0x1e] sm:$0xff]  ;;  %v551_v57 = vld [vmem:[%s12359_s24 + $0xe] sm:$0xff] }
  0x20   :  { %389 = vperm.xlu0 %9461, %v350_v9   ;;  %167 = vperm.xlu1 %9462, %v140_v10   ;;  %v413_v47 = vld [vmem:[%s12359_s24 + $0xc] sm:$0xff]  ;;  %v343_v48 = vld [vmem:[%s12359_s24 + $0x3] sm:$0xff]  ;;  %v7999_v2 = vld [vmem:[%s12359_s24 + $0x78] sm:$0xff] }
  0x21   :  { %v482_v51 = vld [vmem:[%s12359_s24 + $0xd] sm:$0xff]  ;;  %v412_v52 = vld [vmem:[%s12359_s24 + $0x4] sm:$0xff]  ;;  %v8017_v5 = vld [vmem:[%s12359_s24 + $0x7a] sm:$0xff] }
  0x22   :  { %v481_v53 = vld [vmem:[%s12359_s24 + $0x5] sm:$0xff]  ;;  %v7998_v3 = vld [vmem:[%s12359_s24 + $0x70] sm:$0xff]  ;;  %v10106_v60 = vld [vmem:[%s12363_s2 + $0x4] ss:$0 sm:$0xff] }
  0x23   :  { %v550_v56 = vld [vmem:[%s12359_s24 + $0x6] sm:$0xff]  ;;  %v8007_v6 = vld [vmem:[%s12359_s24 + $0x71] sm:$0xff] }
  0x24   :  { %236 = vperm.xlu0 %9461, %v209_v11   ;;  %310 = vperm.xlu1 %9462, %v279_v12   ;;  %v8009_v61 = vld [vmem:[%s12359_s24 + $0x81] sm:$0xff]  ;;  %v8003_v55 = vld [vmem:[%s12359_s24 + $0x51] sm:$0xff] }
  0x25   :  { %v8000_v62 = vld [vmem:[%s12359_s24 + $0x80] sm:$0xff]  ;;  %v7997_v9 = vld [vmem:[%s12359_s24 + $0x68] sm:$0xff] }
  0x26   :  { %v8018_v4 = vld [vmem:[%s12359_s24 + $0x82] sm:$0xff] }
  0x27   :  { %v8027_v10 = vld [vmem:[%s12359_s24 + $0x83] sm:$0xff] }
  0x28   :  { %384 = vperm.xlu0 %9461, %v349_v13   ;;  %458 = vperm.xlu1 %9462, %v419_v14   ;;  %v8016_v13 = vld [vmem:[%s12359_s24 + $0x72] sm:$0xff]  ;;  %v8006_v14 = vld [vmem:[%s12359_s24 + $0x69] sm:$0xff] }
  0x2c   :  { %231 = vperm.xlu1 %9462, %v208_v15   ;;  %162 = vperm.xlu0 %9461, %v139_v16  }
  0x30   :  { %379 = vperm.xlu1 %9462, %v348_v17   ;;  %305 = vperm.xlu0 %9461, %v278_v18   ;;  %v8036_v17 = vld [vmem:[%s12359_s24 + $0x84] sm:$0xff]  ;;  %v8026_v18 = vld [vmem:[%s12359_s24 + $0x7b] sm:$0xff] }
  0x34   :  { %527 = vperm.xlu1 %9462, %v488_v19   ;;  %453 = vperm.xlu0 %9461, %v418_v20  }
  0x38   :  { %226 = vperm.xlu1 %9462, %v207_v21   ;;  %157 = vperm.xlu0 %9461, %v138_v22   ;;  %v8005_v21 = vld [vmem:[%s12359_s24 + $0x61] sm:$0xff] }
  0x39   :  { %v7996_v22 = vld [vmem:[%s12359_s24 + $0x60] sm:$0xff] }
  0x3c   :  { %374 = vperm.xlu1 %9462, %v347_v23   ;;  %300 = vperm.xlu0 %9461, %v277_v24  }
  0x40   :  { %522 = vperm.xlu1 %9462, %v487_v25   ;;  %448 = vperm.xlu0 %9461, %v417_v26   ;;  %v8025_v25 = vld [vmem:[%s12359_s24 + $0x73] sm:$0xff]  ;;  %v8015_v26 = vld [vmem:[%s12359_s24 + $0x6a] sm:$0xff] }
  0x44   :  { %596 = vperm.xlu0 %9461, %v557_v27   ;;  %152 = vperm.xlu1 %9462, %v137_v28  }
  0x48   :  { %221 = vperm.xlu0 %9461, %v206_v29   ;;  %295 = vperm.xlu1 %9462, %v276_v30   ;;  %v8045_v29 = vld [vmem:[%s12359_s24 + $0x85] sm:$0xff]  ;;  %v8035_v30 = vld [vmem:[%s12359_s24 + $0x7c] sm:$0xff] }
  0x4c   :  { %369 = vperm.xlu0 %9461, %v346_v31   ;;  %443 = vperm.xlu1 %9462, %v416_v32  }
  0x50   :  { %517 = vperm.xlu0 %9461, %v486_v33   ;;  %591 = vperm.xlu1 %9462, %v556_v34   ;;  %v8004_v33 = vld [vmem:[%s12359_s24 + $0x59] sm:$0xff] }
  0x51   :  { %v7995_v34 = vld [vmem:[%s12359_s24 + $0x58] sm:$0xff] }
  0x54   :  { %216 = vperm.xlu1 %9462, %v205_v35   ;;  %147 = vperm.xlu0 %9461, %v136_v36  }
  0x58   :  { %364 = vperm.xlu1 %9462, %v345_v37   ;;  %290 = vperm.xlu0 %9461, %v275_v38   ;;  %v8024_v37 = vld [vmem:[%s12359_s24 + $0x6b] sm:$0xff]  ;;  %v8014_v38 = vld [vmem:[%s12359_s24 + $0x62] sm:$0xff] }
  0x5c   :  { %512 = vperm.xlu1 %9462, %v485_v39   ;;  %438 = vperm.xlu0 %9461, %v415_v40  }
  0x60   :  { %285 = vperm.xlu1 %9462, %v274_v41   ;;  %586 = vperm.xlu0 %9461, %v555_v42   ;;  %v8044_v41 = vld [vmem:[%s12359_s24 + $0x7d] sm:$0xff]  ;;  %v8034_v42 = vld [vmem:[%s12359_s24 + $0x74] sm:$0xff] }
  0x64   :  { %433 = vperm.xlu1 %9462, %v414_v43   ;;  %359 = vperm.xlu0 %9461, %v344_v44  }
  0x68   :  { %581 = vperm.xlu1 %9462, %v554_v45   ;;  %507 = vperm.xlu0 %9461, %v484_v46   ;;  %v10066_v45 = vld [vmem:[%s12363_s2 + $0x1] ss:$0 sm:$0xff]  ;;  %v7994_v46 = vld [vmem:[%s12359_s24 + $0x50] sm:$0xff] }
  0x6c   :  { %428 = vperm.xlu1 %9462, %v413_v47   ;;  %354 = vperm.xlu0 %9461, %v343_v48   ;;  %v8054_v47 = vld [vmem:[%s12359_s24 + $0x86] sm:$0xff]  ;;  %v10077_v48 = vld [vmem:[%s12363_s2] ss:$0 sm:$0xff] }
  0x70   :  { %576 = vperm.xlu1 %9462, %v553_v49   ;;  %502 = vperm.xlu0 %9461, %v483_v50   ;;  %v10082_v49 = vld [vmem:[%s12363_s2 + $0x2] ss:$0 sm:$0xff] }
  0x74   :  { %497 = vperm.xlu1 %9462, %v482_v51   ;;  %423 = vperm.xlu0 %9461, %v412_v52  }
  0x78   :  { %492 = vperm.xlu1 %9462, %v481_v53   ;;  %571 = vperm.xlu0 %9461, %v552_v54   ;;  %v10092_v53 = vld [vmem:[%s12363_s2 + $0x3] ss:$0 sm:$0xff]  ;;  %v8013_v54 = vld [vmem:[%s12359_s24 + $0x5a] sm:$0xff] }
  0x7c   :  { %561 = vperm.xlu1 %9462, %v550_v56   ;;  %566 = vperm.xlu0 %9461, %v551_v57  }
  0x80   :  { %2202 = vperm.xlu1 %9462, %v8009_v61   ;;  %2133 = vperm.xlu0 %9461, %v8000_v62  }
  0x84   :  { %2197 = vperm.xlu1 %9462, %v8008_v1   ;;  %2128 = vperm.xlu0 %9461, %v7999_v2  }
  0x88   :  { %2123 = vperm.xlu1 %9462, %v7998_v3   ;;  %2271 = vperm.xlu0 %9461, %v8018_v4   ;;  %v10116_v3 = vld [vmem:[%s12363_s2 + $0x5] ss:$0 sm:$0xff]  ;;  %v8033_v4 = vld [vmem:[%s12359_s24 + $0x6c] sm:$0xff] }
  0x8b   :  { %v9979_v7 = vpop.permute.xlu0 %182  ;;  %v9981_v8 = vpop.permute.xlu1 %177 }
  0x8c   :  { %2266 = vperm.xlu1 %9462, %v8017_v5   ;;  %2192 = vperm.xlu0 %9461, %v8007_v6   ;;  %v196_v56 = vmul.f32 %v10077_v48, %v9979_v7  ;;  %v8023_v5 = vld [vmem:[%s12359_s24 + $0x63] sm:$0xff] }
  0x8f   :  { %v252_v11 = vpop.permute.xlu0 %251  ;;  %v9989_v12 = vpop.permute.xlu1 %246 }
  0x90   :  { %2118 = vperm.xlu1 %9462, %v7997_v9   ;;  %2340 = vperm.xlu0 %9461, %v8027_v10   ;;  %v265_v52 = vmul.f32 %v10066_v45, %v252_v11 }
  0x92   :  { %v273_v1 = vadd.f32 %v265_v52, %v196_v56 }
  0x93   :  { %v321_v15 = vpop.permute.xlu0 %320  ;;  %v9997_v16 = vpop.permute.xlu1 %172 }
  0x94   :  { %2261 = vperm.xlu1 %9462, %v8016_v13   ;;  %2187 = vperm.xlu0 %9461, %v8006_v14   ;;  %v334_v57 = vmul.f32 %v10082_v49, %v321_v15  ;;  %v10131_v14 = vld [vmem:[%s12363_s2 + $0x6] ss:$0 sm:$0xff]  ;;  %v8053_v15 = vld [vmem:[%s12359_s24 + $0x7e] sm:$0xff] }
  0x96   :  { %v342_v6 = vadd.f32 %v334_v57, %v273_v1 }
  0x97   :  { %v10005_v19 = vpop.permute.xlu0 %241  ;;  %v10007_v20 = vpop.permute.xlu1 %315 }
  0x98   :  { %2409 = vperm.xlu1 %9462, %v8036_v17   ;;  %2335 = vperm.xlu0 %9461, %v8026_v18   ;;  %v8043_v17 = vld [vmem:[%s12359_s24 + $0x75] sm:$0xff] }
  0x9b   :  { %v390_v23 = vpop.permute.xlu0 %389  ;;  %v10015_v24 = vpop.permute.xlu1 %167 }
  0x9c   :  { %2182 = vperm.xlu1 %9462, %v8005_v21   ;;  %2113 = vperm.xlu0 %9461, %v7996_v22   ;;  %v403_v2 = vmul.f32 %v10092_v53, %v390_v23  ;;  %v264_v23 = vmul.f32 %v10066_v45, %v9989_v12  ;;  %v7993_v12 = vld [vmem:[%s12359_s24 + $0x48] sm:$0xff] }
  0x9e   :  { %v411_v11 = vadd.f32 %v403_v2, %v342_v6  ;;  %v8052_v6 = vld [vmem:[%s12359_s24 + $0x76] sm:$0xff] }
  0x9f   :  { %v10023_v27 = vpop.permute.xlu0 %236  ;;  %v10025_v28 = vpop.permute.xlu1 %310 }
  0xa0   :  { %2330 = vperm.xlu1 %9462, %v8025_v25   ;;  %2256 = vperm.xlu0 %9461, %v8015_v26  }
  0xa3   :  { %v10033_v31 = vpop.permute.xlu0 %384  ;;  %v459_v32 = vpop.permute.xlu1 %458 }
  0xa4   :  { %2478 = vperm.xlu1 %9462, %v8045_v29   ;;  %2404 = vperm.xlu0 %9461, %v8035_v30   ;;  %v472_v7 = vmul.f32 %v10106_v60, %v459_v32  ;;  %v8002_v29 = vld [vmem:[%s12359_s24 + $0x49] sm:$0xff]  ;;  %v195_v30 = vmul.f32 %v10077_v48, %v9981_v8  ;;  %v333_v32 = vmul.f32 %v10082_v49, %v10007_v20  ;;  %v8022_v8 = vld [vmem:[%s12359_s24 + $0x5b] sm:$0xff] }
  0xa6   :  { %v480_v18 = vadd.f32 %v472_v7, %v411_v11  ;;  %v263_v11 = vmul.f32 %v10066_v45, %v10005_v19 }
  0xa7   :  { %v10041_v35 = vpop.permute.xlu1 %231  ;;  %v10043_v36 = vpop.permute.xlu0 %162 }
  0xa8   :  { %2177 = vperm.xlu1 %9462, %v8004_v33   ;;  %2108 = vperm.xlu0 %9461, %v7995_v34  }
  0xab   :  { %v10051_v39 = vpop.permute.xlu1 %379  ;;  %v10053_v40 = vpop.permute.xlu0 %305 }
  0xac   :  { %2325 = vperm.xlu1 %9462, %v8024_v37   ;;  %2251 = vperm.xlu0 %9461, %v8014_v38   ;;  %v272_v38 = vadd.f32 %v264_v23, %v195_v30 }
  0xae   :  { %v341_v20 = vadd.f32 %v333_v32, %v272_v38  ;;  %v8030_v38 = vld [vmem:[%s12359_s24 + $0x54] sm:$0xff] }
  0xaf   :  { %v528_v43 = vpop.permute.xlu1 %527  ;;  %v10061_v44 = vpop.permute.xlu0 %453 }
  0xb0   :  { %2473 = vperm.xlu1 %9462, %v8044_v41   ;;  %2399 = vperm.xlu0 %9461, %v8034_v42   ;;  %v541_v13 = vmul.f32 %v10116_v3, %v528_v43  ;;  %v402_v41 = vmul.f32 %v10092_v53, %v10033_v31  ;;  %v471_v42 = vmul.f32 %v10106_v60, %v10061_v44  ;;  %v8012_v43 = vld [vmem:[%s12359_s24 + $0x52] sm:$0xff]  ;;  %v8032_v44 = vld [vmem:[%s12359_s24 + $0x64] sm:$0xff] }
  0xb2   :  { %v549_v26 = vadd.f32 %v541_v13, %v480_v18  ;;  %v410_v31 = vadd.f32 %v402_v41, %v341_v20  ;;  %v8031_v13 = vld [vmem:[%s12359_s24 + $0x5c] sm:$0xff]  ;;  %v8021_v18 = vld [vmem:[%s12359_s24 + $0x53] sm:$0xff]  ;;  %v331_v41 = vmul.f32 %v10082_v49, %v10053_v40 }
  0xb3   :  { %v10084_v50 = vpop.permute.xlu1 %226  ;;  %v10086_v51 = vpop.permute.xlu0 %157 }
  0xb4   :  { %2103 = vperm.xlu1 %9462, %v7994_v46   ;;  %2547 = vperm.xlu0 %9461, %v8054_v47  }
  0xb7   :  { %v10108_v61 = vpop.permute.xlu1 %374  ;;  %v10110_v62 = vpop.permute.xlu0 %300 }
  0xb8   :  { %2246 = vperm.xlu1 %9462, %v8013_v54   ;;  %2172 = vperm.xlu0 %9461, %v8003_v55   ;;  %v8042_v54 = vld [vmem:[%s12359_s24 + $0x6d] sm:$0xff]  ;;  %v479_v55 = vadd.f32 %v471_v42, %v410_v31  ;;  %v400_v31 = vmul.f32 %v10092_v53, %v10108_v61  ;;  %v261_v61 = vmul.f32 %v10066_v45, %v10041_v35 }
  0xb9   :  { %v330_v35 = vmul.f32 %v10082_v49, %v10110_v62  ;;  %v8038_v62 = vld [vmem:[%s12359_s24 + $0x4d] sm:$0xff] }
  0xbb   :  { %v523_v9 = vpop.permute.xlu1 %522  ;;  %v10125_v10 = vpop.permute.xlu0 %448 }
  0xbc   :  { %2394 = vperm.xlu1 %9462, %v8033_v4   ;;  %2320 = vperm.xlu0 %9461, %v8023_v5   ;;  %v540_v52 = vmul.f32 %v10116_v3, %v523_v9  ;;  %v8011_v4 = vld [vmem:[%s12359_s24 + $0x4a] sm:$0xff] }
  0xbe   :  { %v548_v1 = vadd.f32 %v540_v52, %v479_v55 }
  0xbf   :  { %v597_v21 = vpop.permute.xlu0 %596  ;;  %v10139_v22 = vpop.permute.xlu1 %152 }
  0xc0   :  { %v610_v25 = vmul.f32 %v10131_v14, %v597_v21  ;;  %2542 = vperm.xlu1 %9462, %v8053_v15   ;;  %2468 = vperm.xlu0 %9461, %v8043_v17   ;;  %v194_v15 = vmul.f32 %v10077_v48, %v9997_v16  ;;  %v332_v17 = vmul.f32 %v10082_v49, %v10025_v28  ;;  %v8051_v16 = vld [vmem:[%s12359_s24 + $0x6e] sm:$0xff] }
  0xc1   :  { %v470_v28 = vmul.f32 %v10106_v60, %v10125_v10  ;;  %v193_v10 = vmul.f32 %v10077_v48, %v10015_v24  ;;  %v8050_v24 = vld [vmem:[%s12359_s24 + $0x66] sm:$0xff] }
  0xc2   :  { %v618_v33 = vadd.f32 %v610_v25, %v549_v26  ;;  %v271_v23 = vadd.f32 %v263_v11, %v194_v15  ;;  %v401_v25 = vmul.f32 %v10092_v53, %v10051_v39  ;;  %v8029_v11 = vld [vmem:[%s12359_s24 + $0x4c] sm:$0xff] }
  0xc3   :  { %v10154_v34 = vpop.permute.xlu0 %221  ;;  %v10156_v37 = vpop.permute.xlu1 %295 }
  0xc4   :  { %8595 = vmatprep.subr.mxu0 %v618_v33  ;;  %2167 = vperm.xlu1 %9462, %v8002_v29   ;;  %v340_v26 = vadd.f32 %v332_v17, %v271_v23  ;;  %v8041_v29 = vld [vmem:[%s12359_s24 + $0x65] sm:$0xff] }
  0xc5   :  { %2098 = vperm.xlu0 %9461, %v7993_v12   ;;  %8596 = vmatpush3.msra.mxu0 %v618_v33  ;;  %v262_v33 = vmul.f32 %v10066_v45, %v10023_v27  ;;  %v8020_v27 = vld [vmem:[%s12359_s24 + $0x4b] sm:$0xff] }
  0xc6   :  { %v409_v39 = vadd.f32 %v401_v25, %v340_v26 }
  0xc7   :  { %v10168_v46 = vpop.permute.xlu0 %369  ;;  %v444_v47 = vpop.permute.xlu1 %443 }
  0xc8   :  { %2315 = vperm.xlu1 %9462, %v8022_v8   ;;  %v478_v8 = vadd.f32 %v470_v28, %v409_v39  ;;  %v469_v55 = vmul.f32 %v10106_v60, %v444_v47  ;;  %v8039_v47 = vld [vmem:[%s12359_s24 + $0x55] sm:$0xff]  ;;  %v399_v17 = vmul.f32 %v10092_v53, %v10168_v46  ;;  %v8049_v28 = vld [vmem:[%s12359_s24 + $0x5e] sm:$0xff]  ;;  %v260_v46 = vmul.f32 %v10066_v45, %v10084_v50 }
  0xc9   :  { %2241 = vperm.xlu0 %9461, %v8012_v43   ;;  %v270_v43 = vadd.f32 %v262_v33, %v193_v10  ;;  %v191_v33 = vmul.f32 %v10077_v48, %v10086_v51  ;;  %v8048_v10 = vld [vmem:[%s12359_s24 + $0x56] sm:$0xff]  ;;  %v259_v51 = vmul.f32 %v10066_v45, %v10154_v34  ;;  %v190_v34 = vmul.f32 %v10077_v48, %v10139_v22 }
  0xcb   :  { %v518_v56 = vpop.permute.xlu0 %517  ;;  %v592_v57 = vpop.permute.xlu1 %591  ;;  %v339_v40 = vadd.f32 %v331_v41, %v270_v43 }
  0xcc   :  { %v609_v2 = vmul.f32 %v10131_v14, %v592_v57  ;;  %2463 = vperm.xlu1 %9462, %v8042_v54   ;;  %v539_v12 = vmul.f32 %v10116_v3, %v518_v56  ;;  %v8040_v56 = vld [vmem:[%s12359_s24 + $0x5d] sm:$0xff] }
  0xcd   :  { %2389 = vperm.xlu0 %9461, %v8032_v44  }
  0xce   :  { %v617_v5 = vadd.f32 %v609_v2, %v548_v1  ;;  %v547_v52 = vadd.f32 %v539_v12, %v478_v8  ;;  %v192_v2 = vmul.f32 %v10077_v48, %v10043_v36 }
  0xcf   :  { %v10184_v7 = vpop.permute.xlu1 %216  ;;  %v10186_v9 = vpop.permute.xlu0 %147 }
  0xd0   :  { %2236 = vperm.xlu1 %9462, %v8011_v4   ;;  %8597 = vmatprep.subr.mxu0 %v617_v5  ;;  %v408_v4 = vadd.f32 %v400_v31, %v339_v40  ;;  %v269_v15 = vadd.f32 %v261_v61, %v192_v2 }
  0xd1   :  { %2537 = vperm.xlu0 %9461, %v8052_v6   ;;  %8598 = vmatpush3.msra.mxu0 %v617_v5 }
  0xd2   :  { %v477_v6 = vadd.f32 %v469_v55, %v408_v4  ;;  %v338_v25 = vadd.f32 %v330_v35, %v269_v15  ;;  %v267_v55 = vadd.f32 %v259_v51, %v190_v34  ;;  %v106_v4 = vadd.s32 8, %v9944_v58  ;;  %v1079_v51 = vld [vmem:[%s12367_s5 + $0xc] sm:$0xf] }
  0xd3   :  { %v10200_v21 = vpop.permute.xlu1 %364  ;;  %v10202_v19 = vpop.permute.xlu0 %290 }
  0xd4   :  { %2384 = vperm.xlu1 %9462, %v8031_v13   ;;  %v407_v39 = vadd.f32 %v399_v17, %v338_v25  ;;  %v112_v17 = vmul.u32 2, %v106_v4 }
  0xd5   :  { %2310 = vperm.xlu0 %9461, %v8021_v18  }
  0xd6   :  { %vm116_vm3 = vcmp.eq.s32.totalorder %v9946_v59, %v112_v17 }
  0xd7   :  { %v513_v30 = vpop.permute.xlu1 %512  ;;  %v439_v32 = vpop.permute.xlu0 %438 }
  0xd8   :  { %2532 = vperm.xlu1 %9462, %v8051_v16   ;;  %v538_v5 = vmul.f32 %v10116_v3, %v513_v30  ;;  %v468_v16 = vmul.f32 %v10106_v60, %v439_v32  ;;  %v8047_v32 = vld [vmem:[%s12359_s24 + $0x4e] sm:$0xff] }
  0xd9   :  { %2458 = vperm.xlu0 %9461, %v8041_v29  }
  0xda   :  { %v546_v18 = vadd.f32 %v538_v5, %v477_v6  ;;  %v476_v50 = vadd.f32 %v468_v16, %v407_v39  ;;  %v107_v6 = vadd.s32 16, %v9944_v58 }
  0xdb   :  { %v10227_v20 = vpop.permute.xlu1 %285  ;;  %v587_v42 = vpop.permute.xlu0 %586 }
  0xdc   :  { %v608_v54 = vmul.f32 %v10131_v14, %v587_v42  ;;  %2379 = vperm.xlu1 %9462, %v8030_v38   ;;  %v329_v38 = vmul.f32 %v10082_v49, %v10156_v37  ;;  %v398_v42 = vmul.f32 %v10092_v53, %v10200_v21  ;;  %v258_v37 = vmul.f32 %v10066_v45, %v10184_v7 }
  0xdd   :  { %2305 = vperm.xlu0 %9461, %v8020_v27   ;;  %v268_v27 = vadd.f32 %v260_v46, %v191_v33  ;;  %v189_v21 = vmul.f32 %v10077_v48, %v10186_v9 }
  0xde   :  { %v616_v44 = vadd.f32 %v608_v54, %v547_v52  ;;  %v328_v52 = vmul.f32 %v10082_v49, %v10202_v19 }
  0xdf   :  { %v10241_v57 = vpop.permute.xlu1 %433  ;;  %v10243_v1 = vpop.permute.xlu0 %359  ;;  %v337_v54 = vadd.f32 %v329_v38, %v268_v27  ;;  %v266_v19 = vadd.f32 %v258_v37, %v189_v21  ;;  %v10368_v27 = vld [vmem:[%s12370_s1] ss:$0 sm:$0xff] }
  0xe0   :  { %2527 = vperm.xlu1 %9462, %v8050_v24   ;;  %8599 = vmatprep.subr.mxu0 %v616_v44  ;;  %v467_v24 = vmul.f32 %v10106_v60, %v10241_v57  ;;  %v397_v22 = vmul.f32 %v10092_v53, %v10243_v1  ;;  %v336_v2 = vadd.f32 %v328_v52, %v267_v55 }
  0xe1   :  { %2453 = vperm.xlu0 %9461, %v8040_v56   ;;  %8600 = vmatpush3.msra.mxu0 %v616_v44  ;;  %v327_v44 = vmul.f32 %v10082_v49, %v10227_v20  ;;  %v406_v61 = vadd.f32 %v398_v42, %v337_v54  ;;  %12371 = vst [vmem:[#allocation15_spill] sm:$0xff] %v10368_v27 }
  0xe2   :  { %v405_v20 = vadd.f32 %v397_v22, %v336_v2 }
  0xe3   :  { %v582_v36 = vpop.permute.xlu1 %581  ;;  %v508_v13 = vpop.permute.xlu0 %507  ;;  %v475_v57 = vadd.f32 %v467_v24, %v406_v61  ;;  %v335_v49 = vadd.f32 %v327_v44, %v266_v19 }
  0xe4   :  { %v607_v23 = vmul.f32 %v10131_v14, %v582_v36  ;;  %2448 = vperm.xlu1 %9462, %v8039_v47   ;;  %v537_v12 = vmul.f32 %v10116_v3, %v508_v13 }
  0xe5   :  { %2374 = vperm.xlu0 %9461, %v8029_v11  }
  0xe6   :  { %v615_v26 = vadd.f32 %v607_v23, %v546_v18  ;;  %v545_v43 = vadd.f32 %v537_v12, %v476_v50  ;;  %v108_v18 = vadd.s32 24, %v9944_v58  ;;  %v764_v50 = vld [vmem:[%s12367_s5 + $0x4] sm:$0xf] }
  0xe7   :  { %v429_v29 = vpop.permute.xlu1 %428  ;;  %v355_v30 = vpop.permute.xlu0 %354  ;;  %8617 = vmatprep.subr.msk.mxu1 %vm777_vm7, %v764_v50 }
  0xe8   :  { %2443 = vperm.xlu1 %9462, %v8038_v62   ;;  %8601 = vmatprep.subr.mxu0 %v615_v26  ;;  %v466_v5 = vmul.f32 %v10106_v60, %v429_v29  ;;  %v396_v47 = vmul.f32 %v10092_v53, %v355_v30  ;;  %v114_v12 = vmul.u32 2, %v108_v18 }
  0xe9   :  { %2522 = vperm.xlu0 %9461, %v8049_v28   ;;  %8602 = vmatpush3.msra.mxu0 %v615_v26  ;;  %v113_v28 = vmul.u32 2, %v107_v6 }
  0xea   :  { %v474_v23 = vadd.f32 %v466_v5, %v405_v20  ;;  %v404_v62 = vadd.f32 %v396_v47, %v335_v49  ;;  %vm118_vm5 = vcmp.eq.s32.totalorder %v9946_v59, %v114_v12  ;;  %8618 = vmatpush3.msk.msra.mxu1 %vm777_vm7, %v764_v50  ;;  %v970_v47 = vld [vmem:[%s12367_s5 + $0x8] sm:$0xf] }
  0xeb   :  { %v577_v41 = vpop.permute.xlu1 %576  ;;  %v503_v8 = vpop.permute.xlu0 %502  ;;  %vm117_vm4 = vcmp.eq.s32.totalorder %v9946_v59, %v113_v28 }
  0xec   :  { %v606_v31 = vmul.f32 %v10131_v14, %v577_v41  ;;  %2512 = vperm.xlu1 %9462, %v8047_v32   ;;  %v536_v9 = vmul.f32 %v10116_v3, %v503_v8  ;;  %v10329_v32 = vsel %vm116_vm3, 1.0, %v12317_v63  ;;  %v10332_v38 = vsel %vm117_vm4, 1.0, %v12317_v63  ;;  %v10363_v41 = vld [vmem:[%s12368_s30] ss:$0 sm:$0xff] }
  0xed   :  { %2517 = vperm.xlu0 %9461, %v8048_v10   ;;  %12364 = vst [vmem:[#allocation11_spill] sm:$0xff] %v10329_v32  ;;  %12365 = vst [vmem:[#allocation12_spill] sm:$0xff] %v10332_v38  ;;  %v759_v10 = vld [vmem:[%s12367_s5] sm:$0xf]  ;;  %vm96_vm3 = vcmask 130048   ;;  %vm99_vm4 = vcmask 123904  }
  0xee   :  { %v614_v40 = vadd.f32 %v606_v31, %v545_v43  ;;  %v544_v11 = vadd.f32 %v536_v9, %v475_v57  ;;  %8625 = vmatprep.subr.msk.mxu1 %vm777_vm7, %v759_v10  ;;  %12369 = vst [vmem:[#allocation14_spill] sm:$0xff] %v10363_v41  ;;  %98 = vst.msk [vmem:[#allocation4 + $0x8] sm:$0xff] %vm96_vm3, %v12317_v63 }
  0xef   :  { %v498_v7 = vpop.permute.xlu1 %497  ;;  %v424_v56 = vpop.permute.xlu0 %423  ;;  %100 = vst.msk [vmem:[#allocation4 + $0x10] sm:$0x3] %vm99_vm4, %v12317_v63  ;;  %103 = vst.msk [vmem:[#allocation4 + $0x28] sm:$0x3] %vm99_vm4, %v12317_v63 }
  0xf0   :  { %8603 = vmatprep.subr.mxu0 %v614_v40  ;;  %v535_v36 = vmul.f32 %v10116_v3, %v498_v7  ;;  %v465_v13 = vmul.f32 %v10106_v60, %v424_v56  ;;  %97 = vst.msk [vmem:[#allocation4] sm:$0xff] %vm96_vm3, %v12317_v63  ;;  %101 = vst.msk [vmem:[#allocation4 + $0x18] sm:$0xff] %vm96_vm3, %v12317_v63 }
  0xf1   :  { %8604 = vmatpush3.msra.mxu0 %v614_v40  ;;  %102 = vst.msk [vmem:[#allocation4 + $0x20] sm:$0xff] %vm96_vm3, %v12317_v63 }
  0xf2   :  { %v543_v46 = vadd.f32 %v535_v36, %v474_v23  ;;  %v473_v29 = vadd.f32 %v465_v13, %v404_v62  ;;  %v1188_v13 = vld [vmem:[%s12367_s5 + $0x10] sm:$0xf] }
  0xf3   :  { %v493_v35 = vpop.permute.xlu1 %492  ;;  %v572_v1 = vpop.permute.xlu0 %571 }
  0xf4   :  { %v605_v15 = vmul.f32 %v10131_v14, %v572_v1  ;;  %v534_v53 = vmul.f32 %v10116_v3, %v493_v35 }
  0xf6   :  { %v613_v25 = vadd.f32 %v605_v15, %v544_v11  ;;  %v542_v60 = vadd.f32 %v534_v53, %v473_v29 }
  0xf7   :  { %v562_v16 = vpop.permute.xlu1 %561  ;;  %v567_v26 = vpop.permute.xlu0 %566 }
  0xf8   :  { %v603_v30 = vmul.f32 %v10131_v14, %v562_v16  ;;  %v604_v33 = vmul.f32 %v10131_v14, %v567_v26  ;;  %8605 = vmatprep.subr.mxu0 %v613_v25  ;;  %v10340_v14 = vsel %vm118_vm5, 1.0, %v12317_v63 }
  0xf9   :  { %8606 = vmatpush3.msra.mxu0 %v613_v25  ;;  %12366 = vst [vmem:[#allocation13_spill] sm:$0xff] %v10340_v14 }
  0xfa   :  { %v612_v39 = vadd.f32 %v604_v33, %v543_v46  ;;  %v611_v3 = vadd.f32 %v603_v30, %v542_v60 }
  0xfc   :  { %8607 = vmatprep.subr.mxu0 %v612_v39 }
  0xfd   :  { %8608 = vmatpush3.msra.mxu0 %v612_v39 }
  0xfe   :  { %8609 = vmatprep.subr.mxu0 %v611_v3 }
  0xff   :  { %8610 = vmatpush3.msra.mxu0 %v611_v3 }
 0x100   :  { %8612 = vmatmul.mubr.msk.f32.vlgmr.msra.gmra.mxu0 %vm619_vm1, %v10329_v32  ;;  %8641 = vmatprep.subr.msk.mxu0 %vm777_vm7, %v1079_v51 }
 0x101   :  { %8614 = vmatprep.mubr.msk.f32.mxu0 %vm619_vm1, %v10332_v38  ;;  %8642 = vmatpush3.msk.msra.mxu0 %vm777_vm7, %v1079_v51 }
 0x104   :  { %8615 = vmatmul.mubr.msk.f32.gmra.mxu0 %vm619_vm1, %v10340_v14 }
 0x1c0   :  { %v8613_v8 = vpop.f32.mrf.mxu0 }
 0x1c1   :  { %v725_v42 = vmul.f32 %v8613_v8, %v10363_v41 }
 0x1c2   :  { %v698_v43 = vpop.f32.mrf.mxu0 }
 0x1c3   :  { %v736_v31 = vadd.f32 %v10368_v27, %v725_v42  ;;  %v724_v34 = vmul.f32 %v10363_v41, %v698_v43 }
 0x1c4   :  { %v8616_v37 = vpop.f32.mrf.mxu0 }
 0x1c5   :  { %vm740_vm8 = vcmp.gt.f32.partialorder %v736_v31, 0.0  ;;  %v744_v21 = vmul.f32 0.1, %v736_v31  ;;  %v735_v52 = vadd.f32 %v10368_v27, %v724_v34  ;;  %v727_v54 = vmul.f32 %v8616_v37, %v10363_v41 }
 0x1c6   :  { %v708_v24 = vpop.f32.mrf.mxu0 }
 0x1c7   :  { %v748_v40 = vsel %vm740_vm8, %v736_v31, %v744_v21  ;;  %vm739_vm9 = vcmp.gt.f32.partialorder %v735_v52, 0.0  ;;  %v743_v55 = vmul.f32 0.1, %v735_v52  ;;  %v738_v44 = vadd.f32 %v10368_v27, %v727_v54 }
 0x1c8   :  { %752 = vst.msk [vmem:[#allocation2 + $0xa] sm:$0xff] %vm76_vm2, %v748_v40  ;;  %v726_v22 = vmul.f32 %v10363_v41, %v708_v24 }
 0x1c9   :  { %v747_v7 = vsel %vm739_vm9, %v735_v52, %v743_v55  ;;  %vm742_vm10 = vcmp.gt.f32.partialorder %v738_v44, 0.0  ;;  %v746_v56 = vmul.f32 0.1, %v738_v44 }
 0x1ca   :  { %751 = vst.msk [vmem:[#allocation2 + $0x2] sm:$0xff] %vm76_vm2, %v747_v7  ;;  %v737_v61 = vadd.f32 %v10368_v27, %v726_v22 }
 0x1cb   :  { %v750_v9 = vsel %vm742_vm10, %v738_v44, %v746_v56 }
 0x1cc   :  { %754 = vst.msk [vmem:[#allocation2 + $0x1a] sm:$0xff] %vm76_vm2, %v750_v9  ;;  %vm741_vm11 = vcmp.gt.f32.partialorder %v737_v61, 0.0  ;;  %v745_v19 = vmul.f32 0.1, %v737_v61 }
 0x1ce   :  { %v749_v2 = vsel %vm741_vm11, %v737_v61, %v745_v19 }
 0x1cf   :  { %753 = vst.msk [vmem:[#allocation2 + $0x12] sm:$0xff] %vm76_vm2, %v749_v2  ;;  %v967_v23 = vld [vmem:[#allocation2 + $0xa] sm:$0xff] }
 0x1d1   :  { %v760_v4 = vld [vmem:[#allocation2 + $0x1] sm:$0xff]  ;;  %v761_v5 = vld [vmem:[#allocation2 + $0x9] sm:$0xff] }
 0x1d2   :  { %v1075_v57 = vld [vmem:[#allocation2 + $0x3] sm:$0xff]  ;;  %8619 = vmatprep.mubr.msk.f32.mxu1 %vm76_vm2, %v760_v4 }
 0x1d3   :  { %8643 = vmatprep.mubr.msk.f32.mxu0 %vm76_vm2, %v1075_v57  ;;  %8620 = vmatmul.mubr.msk.f32.vlgmr.msra.gmra.mxu1 %vm76_vm2, %v761_v5  ;;  %v755_v6 = vld [vmem:[#allocation2] sm:$0xff]  ;;  %v756_v36 = vld [vmem:[#allocation2 + $0x8] sm:$0xff] }
 0x1d4   :  { %8626 = vmatpush3.msk.msra.mxu1 %vm777_vm7, %v759_v10  ;;  %v1078_v11 = vld [vmem:[#allocation2 + $0x1b] sm:$0xff]  ;;  %v1184_v25 = vld [vmem:[#allocation2 + $0x4] sm:$0xff] }
 0x1d5   :  { %8633 = vmatprep.subr.msk.mxu1 %vm777_vm7, %v970_v47  ;;  %v966_v18 = vld [vmem:[#allocation2 + $0x2] sm:$0xff]  ;;  %v969_v53 = vld [vmem:[#allocation2 + $0x1a] sm:$0xff] }
 0x1d6   :  { %v762_v49 = vld [vmem:[#allocation2 + $0x11] sm:$0xff]  ;;  %v763_v35 = vld [vmem:[#allocation2 + $0x19] sm:$0xff] }
 0x1d7   :  { %v1076_v20 = vld [vmem:[#allocation2 + $0xb] sm:$0xff]  ;;  %8622 = vmatprep.mubr.msk.f32.mxu1 %vm76_vm2, %v762_v49  ;;  %v1077_v1 = vld [vmem:[#allocation2 + $0x13] sm:$0xff]  ;;  %v1187_v28 = vld [vmem:[#allocation2 + $0x1c] sm:$0xff] }
 0x1d8   :  { %8644 = vmatmul.mubr.msk.f32.vlgmr.msra.gmra.mxu0 %vm76_vm2, %v1076_v20  ;;  %8623 = vmatmul.mubr.msk.f32.gmra.mxu1 %vm76_vm2, %v763_v35  ;;  %v757_v15 = vld [vmem:[#allocation2 + $0x10] sm:$0xff]  ;;  %v758_v17 = vld [vmem:[#allocation2 + $0x18] sm:$0xff]  ;;  %v10430_v20 = vld [vmem:[%s12372_s29 + $0x8] sm:$0xff] }
 0x1d9   :  { %8646 = vmatprep.mubr.msk.f32.mxu0 %vm76_vm2, %v1077_v1  ;;  %8627 = vmatprep.mubr.msk.f32.mxu1 %vm76_vm2, %v755_v6  ;;  %v968_v62 = vld [vmem:[#allocation2 + $0x12] sm:$0xff]  ;;  %12373 = vst [vmem:[#allocation16_spill] sm:$0xff] %v10430_v20  ;;  %v10435_v35 = vld [vmem:[%s12372_s29] sm:$0xff] }
 0x1da   :  { %v1185_v16 = vld [vmem:[#allocation2 + $0xc] sm:$0xff]  ;;  %v1186_v26 = vld [vmem:[#allocation2 + $0x14] sm:$0xff]  ;;  %12374 = vst [vmem:[#allocation17_spill] sm:$0xff] %v10435_v35  ;;  %v10450_v6 = vld [vmem:[%s12376_s26] ss:$0 sm:$0xff] }
 0x1db   :  { %v10444_v1 = vld [vmem:[%s12372_s29 + $0x10] sm:$0xff]  ;;  %12377 = vst [vmem:[#allocation19_spill] sm:$0xff] %v10450_v6 }
 0x1dc   :  { %8647 = vmatmul.mubr.msk.f32.gmra.mxu0 %vm76_vm2, %v1078_v11  ;;  %8628 = vmatmul.mubr.msk.f32.vlgmr.msra.gmra.mxu1 %vm76_vm2, %v756_v36  ;;  %12375 = vst [vmem:[#allocation18_spill] sm:$0xff] %v10444_v1  ;;  %v10455_v36 = vld [vmem:[%s12378_s27] ss:$0 sm:$0xff] }
 0x1dd   :  { %8630 = vmatprep.mubr.msk.f32.mxu1 %vm76_vm2, %v757_v15  ;;  %8634 = vmatpush3.msk.msra.mxu1 %vm777_vm7, %v970_v47  ;;  %12379 = vst [vmem:[#allocation20_spill] sm:$0xff] %v10455_v36 }
 0x1de   :  { %8649 = vmatprep.subr.msk.mxu1 %vm777_vm7, %v1188_v13  ;;  %8665 = vmatprep.mubr.msk.f32.mxu0 %vm1293_vm12, %v9957_v0 }
 0x1e0   :  { %8631 = vmatmul.mubr.msk.f32.gmra.mxu1 %vm76_vm2, %v758_v17 }
 0x1e1   :  { %8635 = vmatprep.mubr.msk.f32.mxu1 %vm76_vm2, %v966_v18 }
 0x1e4   :  { %8636 = vmatmul.mubr.msk.f32.vlgmr.msra.gmra.mxu1 %vm76_vm2, %v967_v23 }
 0x1e5   :  { %8638 = vmatprep.mubr.msk.f32.mxu1 %vm76_vm2, %v968_v62  ;;  %8650 = vmatpush3.msk.msra.mxu1 %vm777_vm7, %v1188_v13 }
 0x1e6   :  { %8668 = vmatprep.subr.mxu1 %v10430_v20 }
 0x1e8   :  { %8639 = vmatmul.mubr.msk.f32.gmra.mxu1 %vm76_vm2, %v969_v53 }
 0x1e9   :  { %8651 = vmatprep.mubr.msk.f32.mxu1 %vm76_vm2, %v1184_v25 }
 0x1ec   :  { %8652 = vmatmul.mubr.msk.f32.vlgmr.msra.gmra.mxu1 %vm76_vm2, %v1185_v16 }
 0x1ed   :  { %8654 = vmatprep.mubr.msk.f32.mxu1 %vm76_vm2, %v1186_v26  ;;  %8669 = vmatpush3.msra.mxu1 %v10430_v20  ;;  %v10613_v20 = vld [vmem:[%s12298_s8] ss:$0 sm:$0xff] }
 0x1ee   :  { %8678 = vmatprep.subr.mxu1 %v10444_v1 }
 0x1f0   :  { %8655 = vmatmul.mubr.msk.f32.gmra.mxu1 %vm76_vm2, %v1187_v28 }
 0x293   :  { %v8621_v46 = vpop.f32.mrf.mxu1 }
 0x295   :  { %v847_v29 = vpop.f32.mrf.mxu1 }
 0x298   :  { %v8624_v30 = vpop.f32.mrf.mxu1  ;;  %v8645_v50 = vpop.f32.mrf.mxu0 }
 0x29a   :  { %v857_v33 = vpop.f32.mrf.mxu1  ;;  %v1161_v8 = vpop.f32.mrf.mxu0 }
 0x29c   :  { %v8629_v60 = vpop.f32.mrf.mxu1  ;;  %v8648_v21 = vpop.f32.mrf.mxu0 }
 0x29d   :  { %v953_v54 = vadd.f32 %v8629_v60, %v8621_v46  ;;  %v10470_v60 = vpop.permute.xlu0 %2133 }
 0x29e   :  { %v947_v39 = vpop.f32.mrf.mxu1  ;;  %v1171_v7 = vpop.f32.mrf.mxu0 }
 0x29f   :  { %v948_v55 = vadd.f32 %v947_v39, %v847_v29  ;;  %v10472_v39 = vpop.permute.xlu1 %2202 }
 0x2a0   :  { %v8632_v12 = vpop.f32.mrf.mxu1 }
 0x2a1   :  { %v963_v43 = vadd.f32 %v8632_v12, %v8624_v30  ;;  %v10474_v12 = vpop.permute.xlu0 %2128 }
 0x2a2   :  { %v957_v3 = vpop.f32.mrf.mxu1 }
 0x2a3   :  { %v958_v34 = vadd.f32 %v957_v3, %v857_v33  ;;  %v10486_v3 = vpop.permute.xlu1 %2197 }
 0x2a4   :  { %v8637_v10 = vpop.f32.mrf.mxu1 }
 0x2a5   :  { %v1072_v44 = vadd.f32 %v8637_v10, %v953_v54 }
 0x2a6   :  { %v1052_v51 = vpop.f32.mrf.mxu1 }
 0x2a7   :  { %v1071_v61 = vadd.f32 %v1052_v51, %v948_v55  ;;  %v1181_v4 = vadd.f32 %v8645_v50, %v1072_v44  ;;  %v10488_v50 = vpop.permute.xlu0 %2271  ;;  %v10490_v10 = vpop.permute.xlu1 %2123 }
 0x2a8   :  { %v8640_v42 = vpop.f32.mrf.mxu1 }
 0x2a9   :  { %v1074_v37 = vadd.f32 %v8640_v42, %v963_v43  ;;  %v1180_v47 = vadd.f32 %v1161_v8, %v1071_v61  ;;  %v10497_v8 = vld [vmem:[%s12297_s10 + $0x18] sm:$0xff]  ;;  %v10502_v42 = vld [vmem:[%s12297_s10 + $0x8] sm:$0xff]  ;;  %v10507_v43 = vld [vmem:[%s12297_s10 + $0x10] sm:$0xff] }
 0x2aa   :  { %v1062_v31 = vpop.f32.mrf.mxu1  ;;  %12380 = vst [vmem:[#allocation21_spill] sm:$0xff] %v10497_v8  ;;  %12381 = vst [vmem:[#allocation22_spill] sm:$0xff] %v10502_v42 }
 0x2ab   :  { %v1073_v24 = vadd.f32 %v1062_v31, %v958_v34  ;;  %v1183_v22 = vadd.f32 %v8648_v21, %v1074_v37  ;;  %v10492_v51 = vpop.permute.xlu0 %2192  ;;  %12382 = vst [vmem:[#allocation23_spill] sm:$0xff] %v10507_v43  ;;  %v10509_v31 = vpop.permute.xlu1 %2266  ;;  %v10516_v34 = vld [vmem:[%s12297_s10] sm:$0xff] }
 0x2ac   :  { %v8653_v52 = vpop.f32.mrf.mxu1  ;;  %12383 = vst [vmem:[#allocation24_spill] sm:$0xff] %v10516_v34 }
 0x2ad   :  { %v1182_v19 = vadd.f32 %v1171_v7, %v1073_v24  ;;  %v1290_v5 = vadd.f32 %v8653_v52, %v1181_v4  ;;  %v10531_v52 = vld [vmem:[%s12297_s10 + $0x28] sm:$0xff] }
 0x2ae   :  { %v1270_v40 = vpop.f32.mrf.mxu1 }
 0x2af   :  { %v1289_v49 = vadd.f32 %v1270_v40, %v1180_v47  ;;  %v10522_v37 = vpop.permute.xlu0 %2340  ;;  %v10526_v21 = vpop.permute.xlu1 %2118 }
 0x2b0   :  { %v8656_v56 = vpop.f32.mrf.mxu1 }
 0x2b1   :  { %v1292_v9 = vadd.f32 %v8656_v56, %v1183_v22 }
 0x2b2   :  { %v1280_v2 = vpop.f32.mrf.mxu1 }
 0x2b3   :  { %v1291_v57 = vadd.f32 %v1280_v2, %v1182_v19  ;;  %8657 = vmatprep.subr.mxu0 %v1292_v9  ;;  %v10534_v54 = vpop.permute.xlu0 %2187  ;;  %v10536_v24 = vpop.permute.xlu1 %2261 }
 0x2b4   :  { %8658 = vmatpush3.msra.mxu0 %v1292_v9 }
 0x2b5   :  { %8659 = vmatprep.subr.mxu0 %v1291_v57 }
 0x2b6   :  { %8660 = vmatpush3.msra.mxu0 %v1291_v57 }
 0x2b7   :  { %8661 = vmatprep.subr.mxu0 %v1290_v5  ;;  %v10538_v40 = vpop.permute.xlu0 %2335  ;;  %v10540_v55 = vpop.permute.xlu1 %2409 }
 0x2b8   :  { %8662 = vmatpush3.msra.mxu0 %v1290_v5 }
 0x2b9   :  { %8663 = vmatprep.subr.mxu0 %v1289_v49 }
 0x2ba   :  { %8664 = vmatpush3.msra.mxu0 %v1289_v49 }
 0x2bb   :  { %8666 = vmatmul.mubr.msk.f32.vlgmr.msra.gmra.mxu0 %vm1293_vm12, %v10329_v32  ;;  %8673 = vmatprep.subr.mxu0 %v10435_v35  ;;  %v10542_v44 = vpop.permute.xlu0 %2113  ;;  %v10544_v22 = vpop.permute.xlu1 %2182 }
 0x2bc   :  { %8674 = vmatpush3.msra.mxu0 %v10435_v35  ;;  %v2147_v35 = vmul.f32 %v10077_v48, %v10470_v60  ;;  %v10625_v48 = vld [vmem:[%s12363_s2] ss:$0 sm:$0xff] }
 0x2bd   :  { %8683 = vmatprep.subr.mxu0 %v10497_v8  ;;  %v2146_v60 = vmul.f32 %v10625_v48, %v10474_v12  ;;  %v2145_v38 = vmul.f32 %v10625_v48, %v10490_v10 }
 0x2bf   :  { %v10546_v7 = vpop.permute.xlu0 %2256  ;;  %v10548_v56 = vpop.permute.xlu1 %2330 }
 0x2c3   :  { %v10550_v61 = vpop.permute.xlu0 %2404  ;;  %v10552_v9 = vpop.permute.xlu1 %2478 }
 0x2c7   :  { %v10554_v19 = vpop.permute.xlu0 %2108  ;;  %v10556_v2 = vpop.permute.xlu1 %2177 }
 0x2cb   :  { %v10558_v4 = vpop.permute.xlu0 %2251  ;;  %v10560_v57 = vpop.permute.xlu1 %2325 }
 0x2cf   :  { %v10562_v5 = vpop.permute.xlu0 %2399  ;;  %v10564_v47 = vpop.permute.xlu1 %2473 }
 0x2d3   :  { %v10566_v49 = vpop.permute.xlu0 %2547 }
 0x37b   :  { %v8667_v11 = vpop.f32.mrf.mxu0 }
 0x37c   :  { %v1381_v13 = vmul.f32 %v8667_v11, %v10450_v6  ;;  %v10568_v11 = vpop.permute.xlu1 %2103 }
 0x37d   :  { %v1364_v15 = vpop.f32.mrf.mxu0 }
 0x37e   :  { %v1390_v17 = vadd.f32 %v10455_v36, %v1381_v13  ;;  %v1380_v18 = vmul.f32 %v10450_v6, %v1364_v15  ;;  %v10570_v13 = vpop.permute.xlu0 %2172 }
 0x380   :  { %vm1392_vm15 = vcmp.gt.f32.partialorder %v1390_v17, 0.0  ;;  %v1394_v23 = vmul.f32 0.1, %v1390_v17  ;;  %v1389_v62 = vadd.f32 %v10455_v36, %v1380_v18  ;;  %v10572_v15 = vpop.permute.xlu1 %2246 }
 0x382   :  { %v1396_v53 = vsel %vm1392_vm15, %v1390_v17, %v1394_v23  ;;  %vm1391_vm0 = vcmp.gt.f32.partialorder %v1389_v62, 0.0  ;;  %v1393_v25 = vmul.f32 0.1, %v1389_v62  ;;  %v10574_v17 = vpop.permute.xlu0 %2320 }
 0x383   :  { %1398 = vst.msk [vmem:[#allocation3 + $0x9] sm:$0xff] %vm88_vm13, %v1396_v53 }
 0x384   :  { %v1395_v16 = vsel %vm1391_vm0, %v1389_v62, %v1393_v25  ;;  %v10576_v18 = vpop.permute.xlu1 %2394 }
 0x385   :  { %1397 = vst.msk [vmem:[#allocation3 + $0x1] sm:$0xff] %vm88_vm13, %v1395_v16 }
 0x386   :  { %v10578_v23 = vpop.permute.xlu0 %2468 }
 0x388   :  { %v10580_v62 = vpop.permute.xlu1 %2542 }
 0x38a   :  { %v1403_v29 = vld [vmem:[#allocation3 + $0x9] sm:$0xff]  ;;  %v10582_v53 = vpop.permute.xlu0 %2098 }
 0x38b   :  { %v1568_v33 = vld [vmem:[#allocation3 + $0xa] sm:$0xff] }
 0x38c   :  { %v1402_v26 = vld [vmem:[#allocation3 + $0x1] sm:$0xff]  ;;  %v10584_v25 = vpop.permute.xlu1 %2167 }
 0x38d   :  { %v1399_v28 = vld [vmem:[#allocation3] sm:$0xff]  ;;  %v1400_v46 = vld [vmem:[#allocation3 + $0x8] sm:$0xff]  ;;  %8670 = vmatprep.mubr.msk.f32.mxu1 %vm88_vm13, %v1402_v26 }
 0x38e   :  { %8675 = vmatprep.mubr.msk.f32.mxu0 %vm88_vm13, %v1399_v28  ;;  %8671 = vmatmul.mubr.msk.f32.vlgmr.msra.gmra.mxu1 %vm88_vm13, %v1403_v29  ;;  %v1567_v30 = vld [vmem:[#allocation3 + $0x2] sm:$0xff]  ;;  %v10586_v16 = vpop.permute.xlu0 %2241 }
 0x38f   :  { %8676 = vmatmul.mubr.msk.f32.vlgmr.msra.gmra.mxu0 %vm88_vm13, %v1400_v46  ;;  %8679 = vmatpush3.msra.mxu1 %v10444_v1 }
 0x390   :  { %8680 = vmatprep.mubr.msk.f32.mxu1 %vm88_vm13, %v1567_v30  ;;  %8690 = vmatprep.subr.mxu1 %v10502_v42  ;;  %v10588_v26 = vpop.permute.xlu1 %2315 }
 0x391   :  { %8684 = vmatpush3.msra.mxu0 %v10497_v8  ;;  %v2216_v8 = vmul.f32 %v10066_v45, %v10472_v39 }
 0x392   :  { %8681 = vmatmul.mubr.msk.f32.vlgmr.msra.gmra.mxu1 %vm88_vm13, %v1568_v33  ;;  %8685 = vmatprep.subr.mxu0 %v10507_v43  ;;  %v10590_v28 = vpop.permute.xlu0 %2389 }
 0x393   :  { %8691 = vmatpush3.msra.mxu1 %v10502_v42  ;;  %8686 = vmatpush3.msra.mxu0 %v10507_v43 }
 0x394   :  { %8692 = vmatprep.subr.mxu1 %v10516_v34  ;;  %8697 = vmatprep.subr.mxu0 %v10531_v52  ;;  %v10592_v46 = vpop.permute.xlu1 %2463 }
 0x395   :  { %8693 = vmatpush3.msra.mxu1 %v10516_v34 }
 0x396   :  { %v10594_v29 = vpop.permute.xlu0 %2537 }
 0x398   :  { %v10596_v30 = vpop.permute.xlu1 %2236 }
 0x39a   :  { %v10598_v33 = vpop.permute.xlu0 %2310 }
 0x39c   :  { %v10600_v63 = vpop.permute.xlu1 %2384 }
 0x39e   :  { %v10602_v43 = vpop.permute.xlu0 %2458 }
 0x39f   :  { %12384 = vst [vmem:[#allocation25_spill] sm:$0xff] %v10602_v43  ;;  %v2144_v43 = vmul.f32 %v10625_v48, %v10526_v21 }
 0x3a0   :  { %v10608_v58 = vpop.permute.xlu1 %2532 }
 0x3a2   :  { %v10644_v14 = vpop.permute.xlu0 %2305 }
 0x3a3   :  { %12385 = vst [vmem:[#allocation26_spill] sm:$0xff] %v10644_v14 }
 0x44e   :  { %v8672_v59 = vpop.f32.mrf.mxu1 }
 0x44f   :  { %v8677_v34 = vpop.f32.mrf.mxu0 }
 0x450   :  { %v1477_v42 = vpop.f32.mrf.mxu1  ;;  %v1564_v6 = vadd.f32 %v8677_v34, %v8672_v59  ;;  %v10618_v59 = vld [vmem:[%s12363_s2 + $0x1] ss:$0 sm:$0xff]  ;;  %v2224_v34 = vadd.f32 %v2216_v8, %v2147_v35  ;;  %v10659_v8 = vpop.permute.xlu1 %2379 }
 0x451   :  { %v1558_v36 = vpop.f32.mrf.mxu0  ;;  %v2215_v45 = vmul.f32 %v10618_v59, %v10486_v3  ;;  %v2214_v3 = vmul.f32 %v10618_v59, %v10492_v51 }
 0x452   :  { %v8682_v1 = vpop.f32.mrf.mxu1  ;;  %v1559_v27 = vadd.f32 %v1558_v36, %v1477_v42  ;;  %v10639_v36 = vld [vmem:[%s12299_s9] ss:$0 sm:$0xff] }
 0x453   :  { %v1652_v41 = vadd.f32 %v8682_v1, %v1564_v6  ;;  %v10632_v1 = vld [vmem:[%s12363_s2 + $0x2] ss:$0 sm:$0xff]  ;;  %v2222_v10 = vadd.f32 %v2214_v3, %v2145_v38 }
 0x454   :  { %v2285_v6 = vmul.f32 %v10632_v1, %v10488_v50  ;;  %v1642_v39 = vpop.f32.mrf.mxu1  ;;  %v10651_v50 = vld [vmem:[%s12363_s2 + $0x3] ss:$0 sm:$0xff]  ;;  %v2284_v35 = vmul.f32 %v10632_v1, %v10509_v31  ;;  %v10671_v31 = vld [vmem:[%s12363_s2 + $0x4] ss:$0 sm:$0xff] }
 0x455   :  { %v1661_v42 = vmul.f32 %v10613_v20, %v1652_v41  ;;  %v1651_v12 = vadd.f32 %v1642_v39, %v1559_v27  ;;  %v2354_v32 = vmul.f32 %v10651_v50, %v10522_v37  ;;  %v2223_v41 = vadd.f32 %v2215_v45, %v2146_v60 }
 0x456   :  { %v2293_v27 = vadd.f32 %v2285_v6, %v2224_v34  ;;  %v2283_v37 = vmul.f32 %v10632_v1, %v10536_v24  ;;  %v2213_v45 = vmul.f32 %v10618_v59, %v10534_v54  ;;  %v2423_v38 = vmul.f32 %v10671_v31, %v10540_v55 }
 0x457   :  { %v1670_v0 = vadd.f32 %v10639_v36, %v1661_v42  ;;  %v1660_v51 = vmul.f32 %v10613_v20, %v1651_v12  ;;  %v2353_v21 = vmul.f32 %v10651_v50, %v10538_v40  ;;  %v2212_v24 = vmul.f32 %v10618_v59, %v10544_v22  ;;  %v10683_v12 = vpop.permute.xlu0 %2453  ;;  %v10691_v40 = vld [vmem:[%s12363_s2 + $0x5] ss:$0 sm:$0xff] }
 0x458   :  { %v2362_v60 = vadd.f32 %v2354_v32, %v2293_v27  ;;  %v2143_v54 = vmul.f32 %v10625_v48, %v10542_v44  ;;  %v2352_v42 = vmul.f32 %v10651_v50, %v10548_v56  ;;  %v2292_v32 = vadd.f32 %v2284_v35, %v2223_v41  ;;  %v10697_v27 = vpop.permute.xlu1 %2527 }
 0x459   :  { %vm1672_vm5 = vcmp.gt.f32.partialorder %v1670_v0, 0.0  ;;  %v1674_v39 = vmul.f32 0.1, %v1670_v0  ;;  %v1669_v14 = vadd.f32 %v10639_v36, %v1660_v51  ;;  %v2492_v55 = vmul.f32 %v10691_v40, %v10552_v9 }
 0x45a   :  { %v2291_v22 = vadd.f32 %v2283_v37, %v2222_v10  ;;  %v2221_v34 = vadd.f32 %v2213_v45, %v2144_v43  ;;  %v2431_v56 = vadd.f32 %v2423_v38, %v2362_v60  ;;  %v2422_v51 = vmul.f32 %v10671_v31, %v10550_v61 }
 0x45b   :  { %v1676_v6 = vsel %vm1672_vm5, %v1670_v0, %v1674_v39  ;;  %vm1671_vm6 = vcmp.gt.f32.partialorder %v1669_v14, 0.0  ;;  %v1673_v3 = vmul.f32 0.1, %v1669_v14  ;;  %v2282_v0 = vmul.f32 %v10632_v1, %v10546_v7  ;;  %v10725_v60 = vpop.permute.xlu0 %2374 }
 0x45c   :  { %1678 = vst.msk [vmem:[#allocation4 + $0x9] sm:$0xff] %vm96_vm3, %v1676_v6  ;;  %v2211_v7 = vmul.f32 %v10618_v59, %v10556_v2  ;;  %v2142_v41 = vmul.f32 %v10625_v48, %v10554_v19  ;;  %v2351_v9 = vmul.f32 %v10651_v50, %v10560_v57  ;;  %v2361_v43 = vadd.f32 %v2353_v21, %v2292_v32  ;;  %v10715_v19 = vld [vmem:[%s12363_s2 + $0x6] ss:$0 sm:$0xff] }
 0x45d   :  { %v1675_v44 = vsel %vm1671_vm6, %v1669_v14, %v1673_v3  ;;  %v2281_v14 = vmul.f32 %v10632_v1, %v10558_v4  ;;  %v2220_v35 = vadd.f32 %v2212_v24, %v2143_v54  ;;  %v2360_v10 = vadd.f32 %v2352_v42, %v2291_v22  ;;  %v2449_v54 = vpop.permute.xlu1 %2448 }
 0x45e   :  { %1677 = vst.msk [vmem:[#allocation4 + $0x1] sm:$0xff] %vm96_vm3, %v1675_v44  ;;  %v2491_v61 = vmul.f32 %v10691_v40, %v10564_v47  ;;  %v2290_v39 = vadd.f32 %v2282_v0, %v2221_v34  ;;  %v2500_v37 = vadd.f32 %v2492_v55, %v2431_v56  ;;  %v2421_v2 = vmul.f32 %v10671_v31, %v10562_v5 }
 0x45f   :  { %v2561_v57 = vmul.f32 %v10715_v19, %v10566_v49  ;;  %v2430_v4 = vadd.f32 %v2422_v51, %v2361_v43  ;;  %v2280_v45 = vmul.f32 %v10632_v1, %v10572_v15  ;;  %v2210_v47 = vmul.f32 %v10618_v59, %v10570_v13 }
 0x460   :  { %v2420_v38 = vmul.f32 %v10671_v31, %v10576_v18  ;;  %v2219_v5 = vadd.f32 %v2211_v7, %v2142_v41  ;;  %v2359_v6 = vadd.f32 %v2351_v9, %v2290_v39  ;;  %v2289_v3 = vadd.f32 %v2281_v14, %v2220_v35  ;;  %v2523_v41 = vpop.permute.xlu0 %2522 }
 0x461   :  { %v2350_v21 = vmul.f32 %v10651_v50, %v10574_v17  ;;  %v2499_v24 = vadd.f32 %v2491_v61, %v2430_v4  ;;  %v2141_v49 = vmul.f32 %v10625_v48, %v10568_v11  ;;  %v2560_v15 = vmul.f32 %v10715_v19, %v10580_v62  ;;  %v10744_v62 = vld [vmem:[%s12297_s10 + $0x20] sm:$0xff] }
 0x462   :  { %v2490_v13 = vmul.f32 %v10691_v40, %v10578_v23  ;;  %v2429_v18 = vadd.f32 %v2421_v2, %v2360_v10  ;;  %v2569_v42 = vadd.f32 %v2561_v57, %v2500_v37  ;;  %v2209_v32 = vmul.f32 %v10618_v59, %v10584_v25  ;;  %v12387_v37 = vld [vmem:[#allocation25_spill] sm:$0xff] }
 0x463   :  { %v2140_v0 = vmul.f32 %v10625_v48, %v10582_v53  ;;  %v2288_v22 = vadd.f32 %v2280_v45, %v2219_v5  ;;  %v2218_v11 = vadd.f32 %v2210_v47, %v2141_v49  ;;  %v2428_v34 = vadd.f32 %v2420_v38, %v2359_v6  ;;  %v1684_v23 = vld [vmem:[#allocation4 + $0x9] sm:$0xff] }
 0x464   :  { %v2358_v25 = vadd.f32 %v2350_v21, %v2289_v3  ;;  %v2349_v53 = vmul.f32 %v10651_v50, %v10588_v26  ;;  %v2279_v59 = vmul.f32 %v10632_v1, %v10586_v16  ;;  %v2568_v56 = vadd.f32 %v2560_v15, %v2499_v24  ;;  %v2518_v3 = vpop.permute.xlu0 %2517 }
 0x465   :  { %v1683_v17 = vld [vmem:[#allocation4 + $0x1] sm:$0xff]  ;;  %v2498_v51 = vadd.f32 %v2490_v13, %v2429_v18  ;;  %v2489_v7 = vmul.f32 %v10691_v40, %v10592_v46  ;;  %v2217_v9 = vadd.f32 %v2209_v32, %v2140_v0  ;;  %v2419_v26 = vmul.f32 %v10671_v31, %v10590_v28  ;;  %v2444_v28 = vpop.permute.xlu1 %2443 }
 0x466   :  { %v1679_v55 = vld [vmem:[#allocation4] sm:$0xff]  ;;  %v1680_v44 = vld [vmem:[#allocation4 + $0x8] sm:$0xff]  ;;  %8687 = vmatprep.mubr.msk.f32.mxu0 %vm96_vm3, %v1683_v17  ;;  %v2559_v16 = vmul.f32 %v10715_v19, %v10594_v29  ;;  %v12386_v14 = vmov 0.0   ;;  %v2278_v43 = vmul.f32 %v10632_v1, %v10596_v30  ;;  %v2418_v46 = vmul.f32 %v10671_v31, %v10600_v63 }
 0x467   :  { %8694 = vmatprep.mubr.msk.f32.mxu1 %vm96_vm3, %v1679_v55  ;;  %8688 = vmatmul.mubr.msk.f32.vlgmr.msra.gmra.mxu0 %vm96_vm3, %v1684_v23  ;;  %v1849_v48 = vld [vmem:[#allocation4 + $0x2] sm:$0xff]  ;;  %v2348_v35 = vmul.f32 %v10651_v50, %v10598_v33  ;;  %v2558_v10 = vmul.f32 %v10715_v19, %v10608_v58  ;;  %v1850_v29 = vld [vmem:[#allocation4 + $0xa] sm:$0xff]  ;;  %v2357_v61 = vadd.f32 %v2349_v53, %v2288_v22  ;;  %v10824_v53 = vld [vmem:[%s12300_s13 + $0x18] sm:$0xff] }
 0x468   :  { %8695 = vmatmul.mubr.msk.f32.vlgmr.msra.gmra.mxu1 %vm96_vm3, %v1680_v44  ;;  %8698 = vmatpush3.msra.mxu0 %v10531_v52  ;;  %v2287_v39 = vadd.f32 %v2279_v59, %v2218_v11  ;;  %v2488_v2 = vmul.f32 %v10691_v40, %v12387_v37  ;;  %v2497_v30 = vadd.f32 %v2489_v7, %v2428_v34  ;;  %v12388_v33 = vld [vmem:[#allocation26_spill] sm:$0xff]  ;;  %v12391_v22 = vld [vmem:[#allocation12_spill] sm:$0xff]  ;;  %v12392_v11 = vld [vmem:[#allocation13_spill] sm:$0xff] }
 0x469   :  { %8701 = vmatprep.mubr.msk.f32.mxu0 %vm96_vm3, %v1849_v48  ;;  %8699 = vmatprep.subr.mxu0 %v10744_v62  ;;  %v2417_v63 = vmul.f32 %v10671_v31, %v10659_v8  ;;  %v2347_v1 = vmul.f32 %v10651_v50, %v12388_v33  ;;  %v12389_v58 = vld [vmem:[#allocation10_spill] sm:$0xff]  ;;  %v2427_v57 = vadd.f32 %v2419_v26, %v2358_v25  ;;  %v2513_v13 = vpop.permute.xlu1 %2512  ;;  %v10806_v34 = vld [vmem:[%s12300_s13 + $0x30] sm:$0xff] }
 0x46a   :  { %2041 = vmatprep.mubr.f32.mxu1 %v12386_v14  ;;  %8700 = vmatpush3.msra.mxu0 %v10744_v62  ;;  %v2567_v4 = vadd.f32 %v2559_v16, %v2498_v51  ;;  %v2557_v45 = vmul.f32 %v10715_v19, %v10697_v27  ;;  %v2487_v47 = vmul.f32 %v10691_v40, %v10683_v12  ;;  %v10812_v23 = vld [vmem:[%s12300_s13 + $0x28] sm:$0xff]  ;;  %v10818_v25 = vld [vmem:[%s12300_s13 + $0x20] sm:$0xff]  ;;  %v10829_v59 = vld [vmem:[%s12300_s13 + $0x10] sm:$0xff] }
 0x46b   :  { %8704 = vmatprep.subr.mxu0 %v2569_v42  ;;  %8702 = vmatmul.mubr.msk.f32.vlgmr.msra.gmra.mxu0 %vm96_vm3, %v1850_v29  ;;  %v2286_v38 = vadd.f32 %v2278_v43, %v2217_v9  ;;  %v2426_v5 = vadd.f32 %v2418_v46, %v2357_v61  ;;  %v2356_v6 = vadd.f32 %v2348_v35, %v2287_v39  ;;  %v10834_v48 = vld [vmem:[%s12300_s13 + $0x8] sm:$0xff]  ;;  %v2703_v51 = vld [vmem:[%s12367_s5 + $0x4] sm:$0xf] }
 0x46c   :  { %8705 = vmatpush3.msra.mxu0 %v2569_v42  ;;  %8720 = vmatprep.mubr.msk.f32.mxu0 %vm619_vm1, %v12389_v58  ;;  %v2566_v8 = vadd.f32 %v2558_v10, %v2497_v30  ;;  %v2496_v50 = vadd.f32 %v2488_v2, %v2427_v57  ;;  %v2486_v21 = vmul.f32 %v10691_v40, %v2449_v54  ;;  %v2908_v7 = vld [vmem:[%s12367_s5 + $0x8] sm:$0xf]  ;;  %v10864_v10 = vld [vmem:[%s12301_s11] ss:$0 sm:$0xff]  ;;  %s9650_s11 = smov 64  }
 0x46d   :  { %8706 = vmatprep.subr.mxu0 %v2568_v56  ;;  %v2416_v24 = vmul.f32 %v10671_v31, %v10725_v60  ;;  %v2556_v49 = vmul.f32 %v10715_v19, %v2523_v41  ;;  %v2425_v27 = vadd.f32 %v2417_v63, %v2356_v6  ;;  %v2355_v15 = vadd.f32 %v2347_v1, %v2286_v38  ;;  %v10857_v41 = vld [vmem:[%s12367_s5 + $0x10] sm:$0xf]  ;;  %v10870_v2 = vld [vmem:[%s12302_s12] ss:$0 sm:$0xff] }
 0x46e   :  { %8707 = vmatpush3.msra.mxu0 %v2568_v56  ;;  %v2565_v12 = vadd.f32 %v2557_v45, %v2496_v50  ;;  %v2495_v18 = vadd.f32 %v2487_v47, %v2426_v5  ;;  %v2485_v42 = vmul.f32 %v10691_v40, %v2444_v28  ;;  %v2555_v32 = vmul.f32 %v10715_v19, %v2518_v3  ;;  %v12390_v40 = vld [vmem:[#allocation11_spill] sm:$0xff]  ;;  %v10840_v56 = vld [vmem:[%s12300_s13] sm:$0xff] }
 0x46f   :  { %8708 = vmatprep.subr.mxu0 %v2567_v4  ;;  %v2494_v0 = vadd.f32 %v2486_v21, %v2425_v27  ;;  %v2424_v54 = vadd.f32 %v2416_v24, %v2355_v15  ;;  %v2554_v31 = vmul.f32 %v10715_v19, %v2513_v13  ;;  %v10800_v19 = vld [vmem:[%s12300_s13 + $0x38] sm:$0xff]  ;;  %v2698_v45 = vld [vmem:[%s12367_s5] sm:$0xf]  ;;  %v12394_v3 = vld [vmem:[#allocation15_spill] sm:$0xff] }
 0x470   :  { %8709 = vmatpush3.msra.mxu0 %v2567_v4  ;;  %v2564_v17 = vadd.f32 %v2556_v49, %v2495_v18  ;;  %2001 = vmatprep.subr.mxu1 %v10800_v19  ;;  %v12393_v5 = vld [vmem:[#allocation14_spill] sm:$0xff] }
 0x471   :  { %8710 = vmatprep.subr.mxu0 %v2566_v8  ;;  %v2493_v60 = vadd.f32 %v2485_v42, %v2424_v54  ;;  %v2563_v55 = vadd.f32 %v2555_v32, %v2494_v0  ;;  %2002 = vmatpush1.msra.mxu1 %v10806_v34 }
 0x472   :  { %8711 = vmatpush3.msra.mxu0 %v2566_v8  ;;  %2003 = vmatprep.subr.mxu1 %v10812_v23 }
 0x473   :  { %8712 = vmatprep.subr.mxu0 %v2565_v12  ;;  %v2562_v44 = vadd.f32 %v2554_v31, %v2493_v60  ;;  %2004 = vmatpush1.msra.mxu1 %v10818_v25 }
 0x474   :  { %8713 = vmatpush3.msra.mxu0 %v2565_v12  ;;  %2005 = vmatprep.subr.mxu1 %v10824_v53 }
 0x475   :  { %8714 = vmatprep.subr.mxu0 %v2564_v17  ;;  %2006 = vmatpush1.msra.mxu1 %v10829_v59 }
 0x476   :  { %8715 = vmatpush3.msra.mxu0 %v2564_v17  ;;  %2007 = vmatprep.subr.mxu1 %v10834_v48 }
 0x477   :  { %8716 = vmatprep.subr.mxu0 %v2563_v55  ;;  %2008 = vmatpush1.msra.mxu1 %v10840_v56 }
 0x478   :  { %8717 = vmatpush3.msra.mxu0 %v2563_v55  ;;  %8726 = vmatprep.subr.msk.mxu1 %vm777_vm7, %v2703_v51 }
 0x479   :  { %8718 = vmatprep.subr.mxu0 %v2562_v44 }
 0x47a   :  { %8719 = vmatpush3.msra.mxu0 %v2562_v44 }
 0x47b   :  { %8721 = vmatmul.mubr.msk.f32.vlgmr.msra.gmra.mxu0 %vm619_vm1, %v12390_v40  ;;  %8742 = vmatprep.subr.msk.mxu0 %vm777_vm7, %v2908_v7 }
 0x47c   :  { %8723 = vmatprep.mubr.msk.f32.mxu0 %vm619_vm1, %v12391_v22  ;;  %8743 = vmatpush3.msk.msra.mxu0 %vm777_vm7, %v2908_v7  ;;  %v3017_v7 = vld [vmem:[%s12367_s5 + $0xc] sm:$0xf] }
 0x47d   :  { %8758 = vmatprep.subr.msk.mxu0 %vm777_vm7, %v10857_v41 }
 0x47f   :  { %8724 = vmatmul.mubr.msk.f32.gmra.mxu0 %vm619_vm1, %v12392_v11 }
 0x527   :  { %v8689_v9 = vpop.f32.mrf.mxu0 }
 0x528   :  { %v8696_v26 = vpop.f32.mrf.mxu1 }
 0x529   :  { %v1759_v16 = vpop.f32.mrf.mxu0  ;;  %v1846_v46 = vadd.f32 %v8696_v26, %v8689_v9  ;;  %v12395_v9 = vld [vmem:[#allocation16_spill] sm:$0xff] }
 0x52a   :  { %v1840_v43 = vpop.f32.mrf.mxu1 }
 0x52b   :  { %v8703_v35 = vpop.f32.mrf.mxu0  ;;  %v1841_v28 = vadd.f32 %v1840_v43, %v1759_v16 }
 0x52c   :  { %v1935_v29 = vadd.f32 %v8703_v35, %v1846_v46 }
 0x52d   :  { %v1925_v61 = vpop.f32.mrf.mxu0 }
 0x52e   :  { %v1944_v39 = vmul.f32 %v10864_v10, %v1935_v29  ;;  %v1934_v37 = vadd.f32 %v1925_v61, %v1841_v28 }
 0x530   :  { %v1943_v30 = vmul.f32 %v10864_v10, %v1934_v37  ;;  %v1953_v63 = vadd.f32 %v10870_v2, %v1944_v39 }
 0x532   :  { %v1952_v33 = vadd.f32 %v10870_v2, %v1943_v30  ;;  %v1957_v4 = vmul.f32 0.1, %v1953_v63  ;;  %vm1955_vm9 = vcmp.gt.f32.partialorder %v1953_v63, 0.0 }
 0x534   :  { %v1956_v1 = vmul.f32 0.1, %v1952_v33  ;;  %vm1954_vm8 = vcmp.gt.f32.partialorder %v1952_v33, 0.0  ;;  %v1959_v47 = vsel %vm1955_vm9, %v1953_v63, %v1957_v4  ;;  %v12396_v63 = vld [vmem:[#allocation18_spill] sm:$0xff] }
 0x536   :  { %v1958_v57 = vsel %vm1954_vm8, %v1952_v33, %v1956_v1 }
 0x537   :  { %7991 = vmatmul.mubr.msk.f32.vlgmr.msra.gmra.mxu1 %vm1293_vm12, %v1958_v57 }
 0x538   :  { %2047 = vmatprep.mubr.f32.mxu1 %v12386_v14  ;;  %8727 = vmatpush3.msk.msra.mxu1 %vm777_vm7, %v2703_v51 }
 0x539   :  { %8734 = vmatprep.subr.msk.mxu1 %vm777_vm7, %v2698_v45 }
 0x53b   :  { %v8722_v38 = vpop.f32.mrf.mxu0  ;;  %7992 = vmatmul.mubr.msk.f32.gmra.mxu1 %vm1293_vm12, %v1959_v47 }
 0x53c   :  { %v2663_v6 = vmul.f32 %v8722_v38, %v12393_v5  ;;  %v135_v38 = vld [vmem:[%s12303_s14] sm:$0x3] }
 0x53d   :  { %v2636_v8 = vpop.f32.mrf.mxu0 }
 0x53e   :  { %v2674_v50 = vadd.f32 %v12394_v3, %v2663_v6  ;;  %v2662_v21 = vmul.f32 %v12393_v5, %v2636_v8 }
 0x53f   :  { %v8725_v24 = vpop.f32.mrf.mxu0 }
 0x540   :  { %vm2678_vm10 = vcmp.gt.f32.partialorder %v2674_v50, 0.0  ;;  %v2682_v49 = vmul.f32 0.1, %v2674_v50  ;;  %v2673_v27 = vadd.f32 %v12394_v3, %v2662_v21  ;;  %v2665_v15 = vmul.f32 %v8725_v24, %v12393_v5 }
 0x541   :  { %v2646_v13 = vpop.f32.mrf.mxu0 }
 0x542   :  { %v2686_v12 = vsel %vm2678_vm10, %v2674_v50, %v2682_v49  ;;  %vm2677_vm11 = vcmp.gt.f32.partialorder %v2673_v27, 0.0  ;;  %v2681_v18 = vmul.f32 0.1, %v2673_v27  ;;  %v2676_v42 = vadd.f32 %v12394_v3, %v2665_v15 }
 0x543   :  { %2691 = vst.msk [vmem:[#allocation2 + $0x32] sm:$0xff] %vm76_vm2, %v2686_v12  ;;  %v2664_v32 = vmul.f32 %v12393_v5, %v2646_v13 }
 0x544   :  { %v2685_v0 = vsel %vm2677_vm11, %v2673_v27, %v2681_v18  ;;  %vm2680_vm14 = vcmp.gt.f32.partialorder %v2676_v42, 0.0  ;;  %v2684_v54 = vmul.f32 0.1, %v2676_v42 }
 0x545   :  { %2690 = vst.msk [vmem:[#allocation2 + $0x2a] sm:$0xff] %vm76_vm2, %v2685_v0  ;;  %v2675_v17 = vadd.f32 %v12394_v3, %v2664_v32 }
 0x546   :  { %v2688_v31 = vsel %vm2680_vm14, %v2676_v42, %v2684_v54 }
 0x547   :  { %2693 = vst.msk [vmem:[#allocation2 + $0x42] sm:$0xff] %vm76_vm2, %v2688_v31  ;;  %vm2679_vm15 = vcmp.gt.f32.partialorder %v2675_v17, 0.0  ;;  %v2683_v60 = vmul.f32 0.1, %v2675_v17 }
 0x549   :  { %v2687_v55 = vsel %vm2679_vm15, %v2675_v17, %v2683_v60 }
 0x54a   :  { %2692 = vst.msk [vmem:[#allocation2 + $0x3a] sm:$0xff] %vm76_vm2, %v2687_v55  ;;  %v2905_v51 = vld [vmem:[#allocation2 + $0x32] sm:$0xff] }
 0x54c   :  { %v2699_v44 = vld [vmem:[#allocation2 + $0x29] sm:$0xff]  ;;  %v2700_v11 = vld [vmem:[#allocation2 + $0x31] sm:$0xff] }
 0x54d   :  { %v2904_v22 = vld [vmem:[#allocation2 + $0x2a] sm:$0xff]  ;;  %8728 = vmatprep.mubr.msk.f32.mxu1 %vm76_vm2, %v2699_v44 }
 0x54e   :  { %8744 = vmatprep.mubr.msk.f32.mxu0 %vm76_vm2, %v2904_v22  ;;  %8729 = vmatmul.mubr.msk.f32.vlgmr.msra.gmra.mxu1 %vm76_vm2, %v2700_v11  ;;  %v2907_v46 = vld [vmem:[#allocation2 + $0x42] sm:$0xff]  ;;  %v3122_v28 = vld [vmem:[#allocation2 + $0x2c] sm:$0xff] }
 0x54f   :  { %8745 = vmatmul.mubr.msk.f32.vlgmr.msra.gmra.mxu0 %vm76_vm2, %v2905_v51  ;;  %8735 = vmatpush3.msk.msra.mxu1 %vm777_vm7, %v2698_v45  ;;  %v2694_v35 = vld [vmem:[#allocation2 + $0x28] sm:$0xff]  ;;  %v12397_v45 = vld [vmem:[#allocation8_spill] sm:$0xff] }
 0x550   :  { %8759 = vmatpush3.msk.msra.mxu0 %vm777_vm7, %v10857_v41  ;;  %8750 = vmatprep.subr.msk.mxu1 %vm777_vm7, %v3017_v7  ;;  %v2695_v41 = vld [vmem:[#allocation2 + $0x30] sm:$0xff]  ;;  %v3125_v30 = vld [vmem:[#allocation2 + $0x44] sm:$0xff]  ;;  %v1963_v47 = vsub.s32 0, %v12397_v45  ;;  %v1967_v5 = vsub.s32 1, %v12397_v45  ;;  %vm4015_vm11 = vcmp.lt.s32.totalorder %v12397_v45, 2 }
 0x551   :  { %8777 = vmatprep.subr.mxu0 %v12395_v9  ;;  %v2701_v26 = vld [vmem:[#allocation2 + $0x39] sm:$0xff]  ;;  %v2702_v43 = vld [vmem:[#allocation2 + $0x41] sm:$0xff]  ;;  %v3013_v33 = vld [vmem:[#allocation2 + $0x2b] sm:$0xff] }
 0x552   :  { %v2906_v16 = vld [vmem:[#allocation2 + $0x3a] sm:$0xff]  ;;  %8731 = vmatprep.mubr.msk.f32.mxu1 %vm76_vm2, %v2701_v26  ;;  %v3016_v4 = vld [vmem:[#allocation2 + $0x43] sm:$0xff]  ;;  %v10935_v6 = vrot.slane %v135_v38, %v1963_v47  ;;  %v10939_v8 = vrot.slane %v135_v38, %v1967_v5 }
 0x553   :  { %8747 = vmatprep.mubr.msk.f32.mxu0 %vm76_vm2, %v2906_v16  ;;  %8732 = vmatmul.mubr.msk.f32.gmra.mxu1 %vm76_vm2, %v2702_v43  ;;  %v3123_v29 = vld [vmem:[#allocation2 + $0x34] sm:$0xff]  ;;  %v3124_v39 = vld [vmem:[#allocation2 + $0x3c] sm:$0xff] }
 0x554   :  { %8748 = vmatmul.mubr.msk.f32.gmra.mxu0 %vm76_vm2, %v2907_v46  ;;  %8736 = vmatprep.mubr.msk.f32.mxu1 %vm76_vm2, %v2694_v35  ;;  %v2696_v61 = vld [vmem:[#allocation2 + $0x38] sm:$0xff]  ;;  %v2697_v37 = vld [vmem:[#allocation2 + $0x40] sm:$0xff] }
 0x555   :  { %8760 = vmatprep.mubr.msk.f32.mxu0 %vm76_vm2, %v3122_v28  ;;  %v3014_v1 = vld [vmem:[#allocation2 + $0x33] sm:$0xff]  ;;  %v3015_v57 = vld [vmem:[#allocation2 + $0x3b] sm:$0xff] }
 0x557   :  { %8737 = vmatmul.mubr.msk.f32.vlgmr.msra.gmra.mxu1 %vm76_vm2, %v2695_v41 }
 0x558   :  { %8761 = vmatmul.mubr.msk.f32.vlgmr.msra.gmra.mxu0 %vm76_vm2, %v3123_v29  ;;  %8739 = vmatprep.mubr.msk.f32.mxu1 %vm76_vm2, %v2696_v61 }
 0x559   :  { %8751 = vmatpush3.msk.msra.mxu1 %vm777_vm7, %v3017_v7  ;;  %8763 = vmatprep.mubr.msk.f32.mxu0 %vm76_vm2, %v3124_v39 }
 0x55a   :  { %8778 = vmatpush3.msra.mxu0 %v12395_v9 }
 0x55b   :  { %8787 = vmatprep.subr.mxu0 %v12396_v63  ;;  %8740 = vmatmul.mubr.msk.f32.gmra.mxu1 %vm76_vm2, %v2697_v37 }
 0x55c   :  { %8764 = vmatmul.mubr.msk.f32.gmra.mxu0 %vm76_vm2, %v3125_v30  ;;  %8752 = vmatprep.mubr.msk.f32.mxu1 %vm76_vm2, %v3013_v33 }
 0x55f   :  { %8753 = vmatmul.mubr.msk.f32.vlgmr.msra.gmra.mxu1 %vm76_vm2, %v3014_v1 }
 0x560   :  { %8755 = vmatprep.mubr.msk.f32.mxu1 %vm76_vm2, %v3015_v57 }
 0x563   :  { %8756 = vmatmul.mubr.msk.f32.gmra.mxu1 %vm76_vm2, %v3016_v4 }
 0x564   :  { %8774 = vmatprep.mubr.msk.f32.mxu1 %vm1293_vm12, %v12389_v58 }
 0x5f7   :  { %v2043_v3 = vpop.f32.mrf.mxu1 }
 0x5f8   :  { %v2044_v50 = vadd.f32 %v2043_v3, %v10935_v6 }
 0x5f9   :  { %v2045_v58 = vpop.f32.mrf.mxu1 }
 0x5fa   :  { %2054 = vst [vmem:[#allocation5] ss:$16 sps:$4 sm:$0x11] %v2044_v50   ;;  %2056 = vst [vmem:[#allocation5 + $0x3] ss:$16 sps:$4 sm:$0x22] %v2044_v50   ;;  %v2046_v21 = vadd.f32 %v2045_v58, %v10939_v8 }
 0x5fb   :  { %2058 = vst [vmem:[#allocation5 + $0x6] ss:$16 sps:$4 sm:$0x44] %v2044_v50   ;;  %2060 = vst [vmem:[#allocation5 + $0x9] ss:$16 sps:$4 sm:$0x88] %v2044_v50   ;;  %v2049_v24 = vpop.f32.mrf.mxu1 }
 0x5fc   :  { %2071 = vst [vmem:[#allocation5 + $0x2f] ss:$-16 sps:$4 sm:$0x88] %v2046_v21   ;;  %2073 = vst [vmem:[#allocation5 + $0x34] ss:$-16 sps:$4 sm:$0x44] %v2046_v21   ;;  %v2050_v49 = vadd.f32 %v2049_v24, %v10935_v6 }
 0x5fd   :  { %2075 = vst [vmem:[#allocation5 + $0x39] ss:$-16 sps:$4 sm:$0x22] %v2046_v21   ;;  %2077 = vst [vmem:[#allocation5 + $0x3e] ss:$-16 sps:$4 sm:$0x11] %v2046_v21   ;;  %v2051_v27 = vpop.f32.mrf.mxu1 }
 0x5fe   :  { %2070 = vst [vmem:[#allocation5 + $0x20] ss:$16 sps:$4 sm:$0x11] %v2050_v49   ;;  %2072 = vst [vmem:[#allocation5 + $0x23] ss:$16 sps:$4 sm:$0x22] %v2050_v49   ;;  %v2052_v15 = vadd.f32 %v2051_v27, %v10939_v8 }
 0x5ff   :  { %2074 = vst [vmem:[#allocation5 + $0x26] ss:$16 sps:$4 sm:$0x44] %v2050_v49   ;;  %2076 = vst [vmem:[#allocation5 + $0x29] ss:$16 sps:$4 sm:$0x88] %v2050_v49  }
 0x600   :  { %2055 = vst [vmem:[#allocation5 + $0xf] ss:$-16 sps:$4 sm:$0x88] %v2052_v15   ;;  %2057 = vst [vmem:[#allocation5 + $0x14] ss:$-16 sps:$4 sm:$0x44] %v2052_v15  }
 0x601   :  { %2059 = vst [vmem:[#allocation5 + $0x19] ss:$-16 sps:$4 sm:$0x22] %v2052_v15   ;;  %2061 = vst [vmem:[#allocation5 + $0x1e] ss:$-16 sps:$4 sm:$0x11] %v2052_v15  }
 0x602   :  { %v12398_v58 = vld [vmem:[#allocation17_spill] sm:$0xff]  ;;  %v12400_v49 = vld [vmem:[#allocation19_spill] sm:$0xff] }
 0x603   :  { %v12399_v21 = vld [vmem:[#allocation21_spill] sm:$0xff] }
 0x60e   :  { %v8730_v13 = vpop.f32.mrf.mxu1 }
 0x60f   :  { %v8746_v12 = vpop.f32.mrf.mxu0 }
 0x610   :  { %v2785_v18 = vpop.f32.mrf.mxu1 }
 0x611   :  { %v2990_v42 = vpop.f32.mrf.mxu0 }
 0x613   :  { %v8733_v32 = vpop.f32.mrf.mxu1 }
 0x614   :  { %v8749_v0 = vpop.f32.mrf.mxu0 }
 0x615   :  { %v2795_v54 = vpop.f32.mrf.mxu1 }
 0x616   :  { %v3000_v17 = vpop.f32.mrf.mxu0 }
 0x617   :  { %v8738_v31 = vpop.f32.mrf.mxu1 }
 0x618   :  { %v8762_v55 = vpop.f32.mrf.mxu0  ;;  %v2891_v9 = vadd.f32 %v8738_v31, %v8730_v13  ;;  %v12401_v13 = vld [vmem:[#allocation20_spill] sm:$0xff] }
 0x619   :  { %v2885_v60 = vpop.f32.mrf.mxu1 }
 0x61a   :  { %v3208_v51 = vpop.f32.mrf.mxu0  ;;  %v2886_v43 = vadd.f32 %v2885_v60, %v2785_v18  ;;  %v3010_v41 = vadd.f32 %v8746_v12, %v2891_v9 }
 0x61b   :  { %v8741_v44 = vpop.f32.mrf.mxu1 }
 0x61c   :  { %v2901_v11 = vadd.f32 %v8741_v44, %v8733_v32  ;;  %v8765_v35 = vpop.f32.mrf.mxu0  ;;  %v3009_v30 = vadd.f32 %v2990_v42, %v2886_v43 }
 0x61d   :  { %v2895_v22 = vpop.f32.mrf.mxu1 }
 0x61e   :  { %v2896_v26 = vadd.f32 %v2895_v22, %v2795_v54  ;;  %v3012_v46 = vadd.f32 %v8749_v0, %v2901_v11  ;;  %v3218_v57 = vpop.f32.mrf.mxu0  ;;  %v12402_v22 = vld [vmem:[#allocation22_spill] sm:$0xff] }
 0x61f   :  { %v8754_v7 = vpop.f32.mrf.mxu1 }
 0x620   :  { %v3011_v61 = vadd.f32 %v3000_v17, %v2896_v26  ;;  %v3119_v37 = vadd.f32 %v8754_v7, %v3010_v41  ;;  %v12404_v7 = vld [vmem:[#allocation24_spill] sm:$0xff] }
 0x621   :  { %v3099_v16 = vpop.f32.mrf.mxu1 }
 0x622   :  { %v3118_v4 = vadd.f32 %v3099_v16, %v3009_v30  ;;  %v3228_v3 = vadd.f32 %v8762_v55, %v3119_v37 }
 0x623   :  { %v8757_v28 = vpop.f32.mrf.mxu1 }
 0x624   :  { %v3121_v29 = vadd.f32 %v8757_v28, %v3012_v46  ;;  %v3227_v50 = vadd.f32 %v3208_v51, %v3118_v4  ;;  %v12403_v51 = vld [vmem:[#allocation23_spill] sm:$0xff] }
 0x625   :  { %v3109_v39 = vpop.f32.mrf.mxu1 }
 0x626   :  { %v3230_v33 = vadd.f32 %v8765_v35, %v3121_v29  ;;  %v3120_v1 = vadd.f32 %v3109_v39, %v3011_v61 }
 0x628   :  { %v3229_v38 = vadd.f32 %v3218_v57, %v3120_v1  ;;  %8766 = vmatprep.subr.mxu1 %v3230_v33 }
 0x629   :  { %8767 = vmatpush3.msra.mxu1 %v3230_v33 }
 0x62a   :  { %8768 = vmatprep.subr.mxu1 %v3229_v38 }
 0x62b   :  { %8769 = vmatpush3.msra.mxu1 %v3229_v38 }
 0x62c   :  { %8770 = vmatprep.subr.mxu1 %v3228_v3 }
 0x62d   :  { %8771 = vmatpush3.msra.mxu1 %v3228_v3 }
 0x62e   :  { %8772 = vmatprep.subr.mxu1 %v3227_v50 }
 0x62f   :  { %8773 = vmatpush3.msra.mxu1 %v3227_v50 }
 0x630   :  { %8775 = vmatmul.mubr.msk.f32.vlgmr.msra.gmra.mxu1 %vm1293_vm12, %v12390_v40  ;;  %8782 = vmatprep.subr.mxu1 %v12398_v58 }
 0x631   :  { %8783 = vmatpush3.msra.mxu1 %v12398_v58 }
 0x632   :  { %8792 = vmatprep.subr.mxu1 %v12399_v21 }
 0x6f0   :  { %v8776_v24 = vpop.f32.mrf.mxu1 }
 0x6f1   :  { %v3314_v27 = vmul.f32 %v8776_v24, %v12400_v49 }
 0x6f2   :  { %v3297_v15 = vpop.f32.mrf.mxu1 }
 0x6f3   :  { %v3323_v12 = vadd.f32 %v12401_v13, %v3314_v27  ;;  %v3313_v18 = vmul.f32 %v12400_v49, %v3297_v15 }
 0x6f5   :  { %vm3325_vm2 = vcmp.gt.f32.partialorder %v3323_v12, 0.0  ;;  %v3327_v42 = vmul.f32 0.1, %v3323_v12  ;;  %v3322_v32 = vadd.f32 %v12401_v13, %v3313_v18 }
 0x6f7   :  { %v3329_v0 = vsel %vm3325_vm2, %v3323_v12, %v3327_v42  ;;  %vm3324_vm7 = vcmp.gt.f32.partialorder %v3322_v32, 0.0  ;;  %v3326_v40 = vmul.f32 0.1, %v3322_v32  ;;  %vm9652_vm2 = vmmov 1  }
 0x6f8   :  { %3332 = vst.msk [vmem:[#allocation3 + $0x21] sm:$0xff] %vm88_vm13, %v3329_v0 }
 0x6f9   :  { %v3328_v54 = vsel %vm3324_vm7, %v3322_v32, %v3326_v40 }
 0x6fa   :  { %3331 = vst.msk [vmem:[#allocation3 + $0x19] sm:$0xff] %vm88_vm13, %v3328_v54 }
 0x6ff   :  { %v3337_v55 = vld [vmem:[#allocation3 + $0x21] sm:$0xff] }
 0x700   :  { %v3502_v11 = vld [vmem:[#allocation3 + $0x22] sm:$0xff] }
 0x701   :  { %v3336_v17 = vld [vmem:[#allocation3 + $0x19] sm:$0xff] }
 0x702   :  { %v3333_v31 = vld [vmem:[#allocation3 + $0x18] sm:$0xff]  ;;  %v3334_v60 = vld [vmem:[#allocation3 + $0x20] sm:$0xff]  ;;  %8779 = vmatprep.mubr.msk.f32.mxu0 %vm88_vm13, %v3336_v17 }
 0x703   :  { %8784 = vmatprep.mubr.msk.f32.mxu1 %vm88_vm13, %v3333_v31  ;;  %8780 = vmatmul.mubr.msk.f32.vlgmr.msra.gmra.mxu0 %vm88_vm13, %v3337_v55  ;;  %v3501_v44 = vld [vmem:[#allocation3 + $0x1a] sm:$0xff] }
 0x704   :  { %8785 = vmatmul.mubr.msk.f32.vlgmr.msra.gmra.mxu1 %vm88_vm13, %v3334_v60  ;;  %8788 = vmatpush3.msra.mxu0 %v12396_v63 }
 0x705   :  { %8789 = vmatprep.mubr.msk.f32.mxu0 %vm88_vm13, %v3501_v44  ;;  %8799 = vmatprep.subr.mxu0 %v12402_v22 }
 0x706   :  { %8793 = vmatpush3.msra.mxu1 %v12399_v21 }
 0x707   :  { %8794 = vmatprep.subr.mxu1 %v12403_v51  ;;  %8790 = vmatmul.mubr.msk.f32.vlgmr.msra.gmra.mxu0 %vm88_vm13, %v3502_v11 }
 0x708   :  { %8795 = vmatpush3.msra.mxu1 %v12403_v51  ;;  %8800 = vmatpush3.msra.mxu0 %v12402_v22 }
 0x709   :  { %8806 = vmatprep.subr.mxu1 %v10531_v52  ;;  %8801 = vmatprep.subr.mxu0 %v12404_v7 }
 0x70a   :  { %8802 = vmatpush3.msra.mxu0 %v12404_v7 }
 0x70b   :  { %3925 = vmatprep.subr.mxu0 %v10800_v19 }
 0x7c3   :  { %v8781_v63 = vpop.f32.mrf.mxu0 }
 0x7c4   :  { %v8786_v9 = vpop.f32.mrf.mxu1 }
 0x7c5   :  { %v3411_v26 = vpop.f32.mrf.mxu0  ;;  %v3498_v43 = vadd.f32 %v8786_v9, %v8781_v63 }
 0x7c6   :  { %v3492_v16 = vpop.f32.mrf.mxu1 }
 0x7c7   :  { %v8791_v46 = vpop.f32.mrf.mxu0  ;;  %v3493_v35 = vadd.f32 %v3492_v16, %v3411_v26 }
 0x7c8   :  { %v3586_v28 = vadd.f32 %v8791_v46, %v3498_v43  ;;  %v12405_v43 = vld [vmem:[#allocation9_spill] sm:$0xff] }
 0x7c9   :  { %v3576_v41 = vpop.f32.mrf.mxu0  ;;  %vm4010_vm8 = vcmp.ge.s32.totalorder %v12405_v43, 64  ;;  %vm4011_vm9 = vcmp.lt.s32.totalorder %v12405_v43, 96  ;;  %vm4016_vm14 = vcmp.lt.s32.totalorder %v12405_v43, 32 }
 0x7ca   :  { %v3595_v29 = vmul.f32 %v10613_v20, %v3586_v28  ;;  %v3585_v61 = vadd.f32 %v3576_v41, %v3493_v35  ;;  %vm4012_vm10 = vmand %vm4010_vm8, %vm4011_vm9  ;;  %vm7920_vm8 = vcmask 23552  }
 0x7cb   :  { %vm4017_vm15 = vmxor %vm4015_vm11, %vm4016_vm14 }
 0x7cc   :  { %v3604_v39 = vadd.f32 %v10639_v36, %v3595_v29  ;;  %v3594_v37 = vmul.f32 %v10613_v20, %v3585_v61  ;;  %vm4018_vm7 = vmxor %vm4017_vm15, %vm9652_vm2 }
 0x7ce   :  { %vm3606_vm0 = vcmp.gt.f32.partialorder %v3604_v39, 0.0  ;;  %v3608_v30 = vmul.f32 0.1, %v3604_v39  ;;  %v3603_v19 = vadd.f32 %v10639_v36, %v3594_v37 }
 0x7d0   :  { %v3610_v33 = vsel %vm3606_vm0, %v3604_v39, %v3608_v30  ;;  %vm3605_vm4 = vcmp.gt.f32.partialorder %v3603_v19, 0.0  ;;  %v3607_v1 = vmul.f32 0.1, %v3603_v19  ;;  %vm4135_vm0 = vcmask 519426  }
 0x7d1   :  { %3613 = vst.msk [vmem:[#allocation4 + $0x21] sm:$0xff] %vm96_vm3, %v3610_v33 }
 0x7d2   :  { %v3609_v57 = vsel %vm3605_vm4, %v3603_v19, %v3607_v1  ;;  %vm4133_vm4 = vcmask 254976  }
 0x7d3   :  { %3612 = vst.msk [vmem:[#allocation4 + $0x19] sm:$0xff] %vm96_vm3, %v3609_v57  ;;  %v11119_v57 = vsel %vm4018_vm7, 1.0, %v12386_v14 }
 0x7d8   :  { %v3619_v20 = vld [vmem:[#allocation4 + $0x21] sm:$0xff] }
 0x7d9   :  { %v3785_v50 = vld [vmem:[#allocation4 + $0x22] sm:$0xff] }
 0x7da   :  { %v3618_v4 = vld [vmem:[#allocation4 + $0x19] sm:$0xff] }
 0x7db   :  { %v3614_v38 = vld [vmem:[#allocation4 + $0x18] sm:$0xff]  ;;  %v3615_v3 = vld [vmem:[#allocation4 + $0x20] sm:$0xff]  ;;  %8796 = vmatprep.mubr.msk.f32.mxu1 %vm96_vm3, %v3618_v4 }
 0x7dc   :  { %8803 = vmatprep.mubr.msk.f32.mxu0 %vm96_vm3, %v3614_v38  ;;  %8797 = vmatmul.mubr.msk.f32.vlgmr.msra.gmra.mxu1 %vm96_vm3, %v3619_v20  ;;  %v3784_v36 = vld [vmem:[#allocation4 + $0x1a] sm:$0xff] }
 0x7dd   :  { %8804 = vmatmul.mubr.msk.f32.vlgmr.msra.gmra.mxu0 %vm96_vm3, %v3615_v3  ;;  %8807 = vmatpush3.msra.mxu1 %v10531_v52  ;;  %v11000_v52 = vld [vmem:[%s12304_s15 + $0x38] sm:$0xff] }
 0x7de   :  { %8810 = vmatprep.mubr.msk.f32.mxu1 %vm96_vm3, %v3784_v36  ;;  %8808 = vmatprep.subr.mxu1 %v10744_v62 }
 0x7df   :  { %3926 = vmatpush1.msra.mxu0 %v10806_v34  ;;  %8809 = vmatpush3.msra.mxu1 %v10744_v62  ;;  %v11005_v62 = vld [vmem:[%s12304_s15 + $0x30] sm:$0xff]  ;;  %v11014_v34 = vld [vmem:[%s12304_s15 + $0x28] sm:$0xff] }
 0x7e0   :  { %3927 = vmatprep.subr.mxu0 %v10812_v23  ;;  %8811 = vmatmul.mubr.msk.f32.vlgmr.msra.gmra.mxu1 %vm96_vm3, %v3785_v50  ;;  %v11019_v23 = vld [vmem:[%s12304_s15 + $0x20] sm:$0xff]  ;;  %vm9648_vm3 = vmmov 0  }
 0x7e1   :  { %3928 = vmatpush1.msra.mxu0 %v10818_v25  ;;  %3965 = vmatprep.mubr.f32.mxu0 %v12386_v14  ;;  %v11028_v25 = vld [vmem:[%s12304_s15 + $0x18] sm:$0xff] }
 0x7e2   :  { %3929 = vmatprep.subr.mxu0 %v10824_v53  ;;  %8813 = vmatprep.subr.mxu1 %v12386_v14  ;;  %v11035_v53 = vld [vmem:[%s12304_s15 + $0x10] sm:$0xff] }
 0x7e3   :  { %3930 = vmatpush1.msra.mxu0 %v10829_v59  ;;  %8814 = vmatpush3.msra.mxu1 %v11000_v52  ;;  %v11042_v59 = vld [vmem:[%s12304_s15 + $0x8] sm:$0xff] }
 0x7e4   :  { %3931 = vmatprep.subr.mxu0 %v10834_v48  ;;  %8815 = vmatprep.subr.mxu1 %v12386_v14  ;;  %v11049_v48 = vld [vmem:[%s12304_s15] sm:$0xff] }
 0x7e5   :  { %3932 = vmatpush1.msra.mxu0 %v10840_v56  ;;  %8816 = vmatpush3.msra.mxu1 %v11005_v62 }
 0x7e6   :  { %8832 = vmatprep.subr.mxu0 %v12386_v14  ;;  %8817 = vmatprep.subr.mxu1 %v12386_v14 }
 0x7e7   :  { %8818 = vmatpush3.msra.mxu1 %v11014_v34  ;;  %8829 = vmatprep.mubr.msk.f32.mxu1 %vm9648_vm3, %v12386_v14 }
 0x7e8   :  { %8819 = vmatprep.subr.mxu1 %v12386_v14 }
 0x7e9   :  { %8820 = vmatpush3.msra.mxu1 %v11019_v23 }
 0x7ea   :  { %8821 = vmatprep.subr.mxu1 %v12386_v14 }
 0x7eb   :  { %8822 = vmatpush3.msra.mxu1 %v11028_v25 }
 0x7ec   :  { %8823 = vmatprep.subr.mxu1 %v12386_v14 }
 0x7ed   :  { %8824 = vmatpush3.msra.mxu1 %v11035_v53 }
 0x7ee   :  { %8825 = vmatprep.subr.mxu1 %v12386_v14 }
 0x7ef   :  { %8826 = vmatpush3.msra.mxu1 %v11042_v59 }
 0x7f0   :  { %8827 = vmatprep.subr.mxu1 %v12386_v14 }
 0x7f1   :  { %8828 = vmatpush3.msra.mxu1 %v11049_v48 }
 0x7f2   :  { %8830 = vmatmul.mubr.f32.vlgmr.msra.gmra.mxu1 %v12386_v14  ;;  %8851 = vmatprep.subr.mxu1 %v12386_v14 }
 0x7f3   :  { %8852 = vmatpush3.msra.mxu1 %v11000_v52  ;;  %8867 = vmatprep.mubr.msk.f32.mxu1 %vm9648_vm3, %v12386_v14 }
 0x7f4   :  { %8853 = vmatprep.subr.mxu1 %v12386_v14 }
 0x7f5   :  { %8854 = vmatpush3.msra.mxu1 %v11005_v62 }
 0x7f6   :  { %8855 = vmatprep.subr.mxu1 %v12386_v14 }
 0x7f7   :  { %8856 = vmatpush3.msra.mxu1 %v11014_v34 }
 0x7f8   :  { %8857 = vmatprep.subr.mxu1 %v12386_v14 }
 0x7f9   :  { %8858 = vmatpush3.msra.mxu1 %v11019_v23 }
 0x7fa   :  { %8859 = vmatprep.subr.mxu1 %v12386_v14 }
 0x7fb   :  { %8860 = vmatpush3.msra.mxu1 %v11028_v25 }
 0x7fc   :  { %8861 = vmatprep.subr.mxu1 %v12386_v14 }
 0x7fd   :  { %8862 = vmatpush3.msra.mxu1 %v11035_v53 }
 0x7fe   :  { %8863 = vmatprep.subr.mxu1 %v12386_v14 }
 0x7ff   :  { %8864 = vmatpush3.msra.mxu1 %v11042_v59 }
 0x800   :  { %8865 = vmatprep.subr.mxu1 %v12386_v14 }
 0x801   :  { %8866 = vmatpush3.msra.mxu1 %v11049_v48 }
 0x802   :  { %8889 = vmatprep.subr.mxu1 %v12386_v14 }
 0x89c   :  { %v8798_v56 = vpop.f32.mrf.mxu1 }
 0x89d   :  { %v8805_v58 = vpop.f32.mrf.mxu0 }
 0x89e   :  { %v3694_v21 = vpop.f32.mrf.mxu1  ;;  %v3781_v49 = vadd.f32 %v8805_v58, %v8798_v56 }
 0x89f   :  { %v3775_v24 = vpop.f32.mrf.mxu0 }
 0x8a0   :  { %v8812_v27 = vpop.f32.mrf.mxu1  ;;  %v3776_v15 = vadd.f32 %v3775_v24, %v3694_v21 }
 0x8a1   :  { %v3870_v13 = vadd.f32 %v8812_v27, %v3781_v49 }
 0x8a2   :  { %v3860_v12 = vpop.f32.mrf.mxu1 }
 0x8a3   :  { %v3879_v18 = vmul.f32 %v10864_v10, %v3870_v13  ;;  %v3869_v42 = vadd.f32 %v3860_v12, %v3776_v15 }
 0x8a5   :  { %v3878_v32 = vmul.f32 %v10864_v10, %v3869_v42  ;;  %v3888_v0 = vadd.f32 %v10870_v2, %v3879_v18 }
 0x8a7   :  { %v3887_v40 = vadd.f32 %v10870_v2, %v3878_v32  ;;  %v3892_v31 = vmul.f32 0.1, %v3888_v0  ;;  %vm3890_vm6 = vcmp.gt.f32.partialorder %v3888_v0, 0.0 }
 0x8a9   :  { %v3891_v54 = vmul.f32 0.1, %v3887_v40  ;;  %vm3889_vm5 = vcmp.gt.f32.partialorder %v3887_v40, 0.0  ;;  %v3894_v60 = vsel %vm3890_vm6, %v3888_v0, %v3892_v31  ;;  %vm7915_vm6 = vcmask 15360  }
 0x8ab   :  { %v3893_v17 = vsel %vm3889_vm5, %v3887_v40, %v3891_v54 }
 0x8ac   :  { %8107 = vmatmul.mubr.msk.f32.vlgmr.msra.gmra.mxu0 %vm1293_vm12, %v3893_v17 }
 0x8ad   :  { %3971 = vmatprep.mubr.f32.mxu0 %v12386_v14  ;;  %8833 = vmatpush3.msra.mxu0 %v11000_v52 }
 0x8ae   :  { %8834 = vmatprep.subr.mxu0 %v12386_v14 }
 0x8af   :  { %8835 = vmatpush3.msra.mxu0 %v11005_v62 }
 0x8b0   :  { %8108 = vmatmul.mubr.msk.f32.gmra.mxu0 %vm1293_vm12, %v3894_v60  ;;  %8836 = vmatprep.subr.mxu0 %v12386_v14 }
 0x8b1   :  { %8837 = vmatpush3.msra.mxu0 %v11014_v34  ;;  %8848 = vmatprep.mubr.msk.f32.mxu0 %vm9648_vm3, %v12386_v14 }
 0x8b2   :  { %8838 = vmatprep.subr.mxu0 %v12386_v14  ;;  %v4099_v10 = vpop.f32.mrf.mxu1 }
 0x8b3   :  { %8839 = vmatpush3.msra.mxu0 %v11019_v23 }
 0x8b4   :  { %8840 = vmatprep.subr.mxu0 %v12386_v14  ;;  %v8831_v2 = vpop.f32.mrf.mxu1 }
 0x8b5   :  { %8841 = vmatpush3.msra.mxu0 %v11028_v25 }
 0x8b6   :  { %8842 = vmatprep.subr.mxu0 %v12386_v14 }
 0x8b7   :  { %8843 = vmatpush3.msra.mxu0 %v11035_v53 }
 0x8b8   :  { %8844 = vmatprep.subr.mxu0 %v12386_v14 }
 0x8b9   :  { %8845 = vmatpush3.msra.mxu0 %v11042_v59 }
 0x8ba   :  { %8846 = vmatprep.subr.mxu0 %v12386_v14 }
 0x8bb   :  { %8847 = vmatpush3.msra.mxu0 %v11049_v48 }
 0x8bc   :  { %8870 = vmatprep.subr.mxu0 %v12386_v14 }
 0x96c   :  { %v3967_v55 = vpop.f32.mrf.mxu0 }
 0x96d   :  { %v3968_v44 = vadd.f32 %v3967_v55, %v10935_v6 }
 0x96e   :  { %v3969_v22 = vpop.f32.mrf.mxu0 }
 0x96f   :  { %3978 = vst [vmem:[#allocation5 + $0x1] ss:$16 sps:$4 sm:$0x11] %v3968_v44   ;;  %3980 = vst [vmem:[#allocation5 + $0x4] ss:$16 sps:$4 sm:$0x22] %v3968_v44   ;;  %v3970_v11 = vadd.f32 %v3969_v22, %v10939_v8 }
 0x970   :  { %3982 = vst [vmem:[#allocation5 + $0x7] ss:$16 sps:$4 sm:$0x44] %v3968_v44   ;;  %3984 = vst [vmem:[#allocation5 + $0xa] ss:$16 sps:$4 sm:$0x88] %v3968_v44   ;;  %v3973_v51 = vpop.f32.mrf.mxu0 }
 0x971   :  { %3995 = vst [vmem:[#allocation5 + $0x30] ss:$-16 sps:$4 sm:$0x88] %v3970_v11   ;;  %3997 = vst [vmem:[#allocation5 + $0x35] ss:$-16 sps:$4 sm:$0x44] %v3970_v11   ;;  %v3974_v7 = vadd.f32 %v3973_v51, %v10935_v6 }
 0x972   :  { %3999 = vst [vmem:[#allocation5 + $0x3a] ss:$-16 sps:$4 sm:$0x22] %v3970_v11   ;;  %4001 = vst [vmem:[#allocation5 + $0x3f] ss:$-16 sps:$4 sm:$0x11] %v3970_v11   ;;  %v3975_v63 = vpop.f32.mrf.mxu0 }
 0x973   :  { %3994 = vst [vmem:[#allocation5 + $0x21] ss:$16 sps:$4 sm:$0x11] %v3974_v7   ;;  %3996 = vst [vmem:[#allocation5 + $0x24] ss:$16 sps:$4 sm:$0x22] %v3974_v7   ;;  %v3976_v9 = vadd.f32 %v3975_v63, %v10939_v8 }
 0x974   :  { %3998 = vst [vmem:[#allocation5 + $0x27] ss:$16 sps:$4 sm:$0x44] %v3974_v7   ;;  %4000 = vst [vmem:[#allocation5 + $0x2a] ss:$16 sps:$4 sm:$0x88] %v3974_v7  }
 0x975   :  { %3979 = vst [vmem:[#allocation5 + $0x10] ss:$-16 sps:$4 sm:$0x88] %v3976_v9   ;;  %3981 = vst [vmem:[#allocation5 + $0x15] ss:$-16 sps:$4 sm:$0x44] %v3976_v9  }
 0x976   :  { %3983 = vst [vmem:[#allocation5 + $0x1a] ss:$-16 sps:$4 sm:$0x22] %v3976_v9   ;;  %3985 = vst [vmem:[#allocation5 + $0x1f] ss:$-16 sps:$4 sm:$0x11] %v3976_v9  }
 0x977   :  { %v9649_v6 = vmov 0.5  }
 0x978   :  { %v11105_v46 = vsel %vm4012_vm10, 1.0, %v9649_v6  ;;  %v11107_v28 = vsel %vm4012_vm10, 0.0, %v9649_v6 }
 0x97c   :  { %v4029_v26 = vld [vmem:[#allocation5] sm:$0xf]  ;;  %v4137_v36 = vld [vmem:[#allocation5 + $0x4] sm:$0xf] }
 0x97d   :  { %v4103_v16 = vadd.f32 %v4099_v10, %v4029_v26  ;;  %v4243_v60 = vld [vmem:[#allocation5 + $0x8] sm:$0xf] }
 0x97f   :  { %9463 = vtanh.f32 %v4103_v16 }
 0x98c   :  { %v9464_v35 = vpop.eup %9463 }
 0x98d   :  { %v4105_v8 = vmul.f32 %v9464_v35, %v11105_v46 }
 0x98f   :  { %v4106_v41 = vadd.f32 %v4105_v8, %v11107_v28 }
 0x991   :  { %4109 = vrot.lane.b32.xlu0 %v4106_v41, %s9650_s11  ;;  %v4107_v39 = vmul.f32 0.0, %v4106_v41 }
 0xa03   :  { %v4110_v29 = vpop.permute.xlu0 %4109 }
 0xa04   :  { %v4112_v61 = vmul.f32 %v4110_v29, %v4106_v41 }
 0xa06   :  { %4114 = vrot.lane.b32.xlu1 %v4112_v61, %s9651_s7  ;;  %v4349_v61 = vld [vmem:[#allocation5 + $0xc] sm:$0xf] }
 0xa78   :  { %v4115_v37 = vpop.permute.xlu1 %4114 }
 0xa79   :  { %v4117_v30 = vadd.f32 %v4115_v37, %v4107_v39 }
 0xa7b   :  { %9465 = vtanh.f32 %v4117_v30 }
 0xa88   :  { %v9466_v19 = vpop.eup %9465 }
 0xa89   :  { %4120 = vrot.lane.b32.xlu0 %v9466_v19, %s9650_s11 }
 0xafb   :  { %v4121_v33 = vpop.permute.xlu0 %4120 }
 0xafc   :  { %v4123_v1 = vmul.f32 %v4121_v33, %v4106_v41 }
 0xafe   :  { %4128 = vrot.lane.b32.xlu0 %v4123_v1, %s9650_s11  ;;  %4125 = vrot.lane.b32.xlu1 %v4123_v1, %s9651_s7 }
 0xb70   :  { %v4129_v4 = vpop.permute.xlu0 %4128  ;;  %v4126_v38 = vpop.permute.xlu1 %4125 }
 0xb71   :  { %4136 = vst.msk [vmem:[#allocation6 + $0x1c] sm:$0xc] %vm4135_vm0, %v4129_v4  ;;  %v4131_v3 = vsel %vm1293_vm12, %v4126_v38, %v4129_v4 }
 0xb72   :  { %4134 = vst.msk [vmem:[#allocation6] sm:$0x3] %vm4133_vm4, %v4126_v38  ;;  %v4132_v20 = vmul.f32 %v11119_v57, %v4131_v3 }
 0xb74   :  { %8849 = vmatmul.mubr.msk.f32.vlgmr.msra.gmra.mxu0 %vm619_vm1, %v4132_v20 }
 0xb75   :  { %8871 = vmatpush3.msra.mxu0 %v11000_v52  ;;  %8886 = vmatprep.mubr.msk.f32.mxu0 %vm9648_vm3, %v12386_v14 }
 0xb76   :  { %8872 = vmatprep.subr.mxu0 %v12386_v14 }
 0xb77   :  { %8873 = vmatpush3.msra.mxu0 %v11005_v62 }
 0xb78   :  { %8874 = vmatprep.subr.mxu0 %v12386_v14 }
 0xb79   :  { %8875 = vmatpush3.msra.mxu0 %v11014_v34 }
 0xb7a   :  { %8876 = vmatprep.subr.mxu0 %v12386_v14 }
 0xb7b   :  { %8877 = vmatpush3.msra.mxu0 %v11019_v23 }
 0xb7c   :  { %8878 = vmatprep.subr.mxu0 %v12386_v14 }
 0xb7d   :  { %8879 = vmatpush3.msra.mxu0 %v11028_v25 }
 0xb7e   :  { %8880 = vmatprep.subr.mxu0 %v12386_v14 }
 0xb7f   :  { %8881 = vmatpush3.msra.mxu0 %v11035_v53 }
 0xb80   :  { %8882 = vmatprep.subr.mxu0 %v12386_v14 }
 0xb81   :  { %8883 = vmatpush3.msra.mxu0 %v11042_v59 }
 0xb82   :  { %8884 = vmatprep.subr.mxu0 %v12386_v14 }
 0xb83   :  { %8885 = vmatpush3.msra.mxu0 %v11049_v48 }
 0xb84   :  { %8908 = vmatprep.subr.mxu0 %v12386_v14 }
 0xc34   :  { %v4207_v50 = vpop.f32.mrf.mxu0 }
 0xc35   :  { %v4211_v56 = vadd.f32 %v4207_v50, %v4137_v36 }
 0xc36   :  { %v8850_v58 = vpop.f32.mrf.mxu0 }
 0xc37   :  { %9467 = vtanh.f32 %v4211_v56 }
 0xc44   :  { %v9468_v21 = vpop.eup %9467 }
 0xc45   :  { %v4213_v24 = vmul.f32 %v9468_v21, %v11105_v46 }
 0xc47   :  { %v4214_v49 = vadd.f32 %v4213_v24, %v11107_v28 }
 0xc49   :  { %4217 = vrot.lane.b32.xlu1 %v4214_v49, %s9650_s11  ;;  %v4215_v13 = vmul.f32 %v4214_v49, %v4117_v30 }
 0xcbb   :  { %v4218_v27 = vpop.permute.xlu1 %4217 }
 0xcbc   :  { %v4220_v15 = vmul.f32 %v4218_v27, %v4214_v49 }
 0xcbe   :  { %4222 = vrot.lane.b32.xlu0 %v4220_v15, %s9651_s7  ;;  %v4455_v15 = vld [vmem:[#allocation5 + $0x10] sm:$0xf] }
 0xd30   :  { %v4223_v12 = vpop.permute.xlu0 %4222 }
 0xd31   :  { %v4225_v18 = vadd.f32 %v4223_v12, %v4215_v13 }
 0xd33   :  { %9469 = vtanh.f32 %v4225_v18 }
 0xd40   :  { %v9470_v42 = vpop.eup %9469 }
 0xd41   :  { %4228 = vrot.lane.b32.xlu1 %v9470_v42, %s9650_s11 }
 0xdb3   :  { %v4229_v32 = vpop.permute.xlu1 %4228 }
 0xdb4   :  { %v4231_v0 = vmul.f32 %v4229_v32, %v4214_v49 }
 0xdb6   :  { %4236 = vrot.lane.b32.xlu1 %v4231_v0, %s9650_s11  ;;  %4233 = vrot.lane.b32.xlu0 %v4231_v0, %s9651_s7 }
 0xe28   :  { %v4237_v40 = vpop.permute.xlu1 %4236  ;;  %v4234_v54 = vpop.permute.xlu0 %4233 }
 0xe29   :  { %4242 = vst.msk [vmem:[#allocation6 + $0x1a] sm:$0xc] %vm4135_vm0, %v4237_v40  ;;  %v4239_v17 = vsel %vm1293_vm12, %v4234_v54, %v4237_v40 }
 0xe2a   :  { %4241 = vst.msk [vmem:[#allocation6 + $0x2] sm:$0x3] %vm4133_vm4, %v4234_v54  ;;  %v4240_v31 = vmul.f32 %v11119_v57, %v4239_v17 }
 0xe2c   :  { %8868 = vmatmul.mubr.msk.f32.vlgmr.msra.gmra.mxu1 %vm619_vm1, %v4240_v31 }
 0xe2d   :  { %8890 = vmatpush3.msra.mxu1 %v11000_v52  ;;  %8905 = vmatprep.mubr.msk.f32.mxu1 %vm9648_vm3, %v12386_v14 }
 0xe2e   :  { %8891 = vmatprep.subr.mxu1 %v12386_v14 }
 0xe2f   :  { %8892 = vmatpush3.msra.mxu1 %v11005_v62 }
 0xe30   :  { %8893 = vmatprep.subr.mxu1 %v12386_v14 }
 0xe31   :  { %8894 = vmatpush3.msra.mxu1 %v11014_v34 }
 0xe32   :  { %8895 = vmatprep.subr.mxu1 %v12386_v14 }
 0xe33   :  { %8896 = vmatpush3.msra.mxu1 %v11019_v23 }
 0xe34   :  { %8897 = vmatprep.subr.mxu1 %v12386_v14 }
 0xe35   :  { %8898 = vmatpush3.msra.mxu1 %v11028_v25 }
 0xe36   :  { %8899 = vmatprep.subr.mxu1 %v12386_v14 }
 0xe37   :  { %8900 = vmatpush3.msra.mxu1 %v11035_v53 }
 0xe38   :  { %8901 = vmatprep.subr.mxu1 %v12386_v14 }
 0xe39   :  { %8902 = vmatpush3.msra.mxu1 %v11042_v59 }
 0xe3a   :  { %8903 = vmatprep.subr.mxu1 %v12386_v14 }
 0xe3b   :  { %8904 = vmatpush3.msra.mxu1 %v11049_v48 }
 0xe3c   :  { %8927 = vmatprep.subr.mxu1 %v12386_v14 }
 0xeec   :  { %v4313_v10 = vpop.f32.mrf.mxu1 }
 0xeed   :  { %v4317_v2 = vadd.f32 %v4313_v10, %v4243_v60 }
 0xeee   :  { %v8869_v55 = vpop.f32.mrf.mxu1 }
 0xeef   :  { %9471 = vtanh.f32 %v4317_v2 }
 0xefc   :  { %v9472_v44 = vpop.eup %9471 }
 0xefd   :  { %v4319_v22 = vmul.f32 %v9472_v44, %v11105_v46 }
 0xeff   :  { %v4320_v11 = vadd.f32 %v4319_v22, %v11107_v28 }
 0xf01   :  { %4323 = vrot.lane.b32.xlu0 %v4320_v11, %s9650_s11  ;;  %v4321_v63 = vmul.f32 %v4320_v11, %v4225_v18 }
 0xf73   :  { %v4324_v51 = vpop.permute.xlu0 %4323 }
 0xf74   :  { %v4326_v7 = vmul.f32 %v4324_v51, %v4320_v11 }
 0xf76   :  { %4328 = vrot.lane.b32.xlu1 %v4326_v7, %s9651_s7  ;;  %v4561_v7 = vld [vmem:[#allocation5 + $0x14] sm:$0xf] }
 0xfe8   :  { %v4329_v9 = vpop.permute.xlu1 %4328 }
 0xfe9   :  { %v4331_v26 = vadd.f32 %v4329_v9, %v4321_v63 }
 0xfeb   :  { %9473 = vtanh.f32 %v4331_v26 }
 0xff8   :  { %v9474_v16 = vpop.eup %9473 }
 0xff9   :  { %4334 = vrot.lane.b32.xlu0 %v9474_v16, %s9650_s11 }
0x106b   :  { %v4335_v43 = vpop.permute.xlu0 %4334 }
0x106c   :  { %v4337_v6 = vmul.f32 %v4335_v43, %v4320_v11 }
0x106e   :  { %4342 = vrot.lane.b32.xlu0 %v4337_v6, %s9650_s11  ;;  %4339 = vrot.lane.b32.xlu1 %v4337_v6, %s9651_s7 }
0x10e0   :  { %v4343_v35 = vpop.permute.xlu0 %4342  ;;  %v4340_v8 = vpop.permute.xlu1 %4339 }
0x10e1   :  { %4348 = vst.msk [vmem:[#allocation6 + $0x18] sm:$0xc] %vm4135_vm0, %v4343_v35  ;;  %v4345_v41 = vsel %vm1293_vm12, %v4340_v8, %v4343_v35 }
0x10e2   :  { %4347 = vst.msk [vmem:[#allocation6 + $0x4] sm:$0x3] %vm4133_vm4, %v4340_v8  ;;  %v4346_v29 = vmul.f32 %v11119_v57, %v4345_v41 }
0x10e4   :  { %8887 = vmatmul.mubr.msk.f32.vlgmr.msra.gmra.mxu0 %vm619_vm1, %v4346_v29 }
0x10e5   :  { %8909 = vmatpush3.msra.mxu0 %v11000_v52  ;;  %8924 = vmatprep.mubr.msk.f32.mxu0 %vm9648_vm3, %v12386_v14 }
0x10e6   :  { %8910 = vmatprep.subr.mxu0 %v12386_v14 }
0x10e7   :  { %8911 = vmatpush3.msra.mxu0 %v11005_v62 }
0x10e8   :  { %8912 = vmatprep.subr.mxu0 %v12386_v14 }
0x10e9   :  { %8913 = vmatpush3.msra.mxu0 %v11014_v34 }
0x10ea   :  { %8914 = vmatprep.subr.mxu0 %v12386_v14 }
0x10eb   :  { %8915 = vmatpush3.msra.mxu0 %v11019_v23 }
0x10ec   :  { %8916 = vmatprep.subr.mxu0 %v12386_v14 }
0x10ed   :  { %8917 = vmatpush3.msra.mxu0 %v11028_v25 }
0x10ee   :  { %8918 = vmatprep.subr.mxu0 %v12386_v14 }
0x10ef   :  { %8919 = vmatpush3.msra.mxu0 %v11035_v53 }
0x10f0   :  { %8920 = vmatprep.subr.mxu0 %v12386_v14 }
0x10f1   :  { %8921 = vmatpush3.msra.mxu0 %v11042_v59 }
0x10f2   :  { %8922 = vmatprep.subr.mxu0 %v12386_v14 }
0x10f3   :  { %8923 = vmatpush3.msra.mxu0 %v11049_v48 }
0x10f4   :  { %8946 = vmatprep.subr.mxu0 %v12386_v14 }
0x11a4   :  { %v4419_v39 = vpop.f32.mrf.mxu0 }
0x11a5   :  { %v4423_v37 = vadd.f32 %v4419_v39, %v4349_v61 }
0x11a6   :  { %v8888_v30 = vpop.f32.mrf.mxu0 }
0x11a7   :  { %9475 = vtanh.f32 %v4423_v37 }
0x11b4   :  { %v9476_v19 = vpop.eup %9475 }
0x11b5   :  { %v4425_v33 = vmul.f32 %v9476_v19, %v11105_v46 }
0x11b7   :  { %v4426_v1 = vadd.f32 %v4425_v33, %v11107_v28 }
0x11b9   :  { %4429 = vrot.lane.b32.xlu1 %v4426_v1, %s9650_s11  ;;  %v4427_v3 = vmul.f32 %v4426_v1, %v4331_v26 }
0x122b   :  { %v4430_v4 = vpop.permute.xlu1 %4429 }
0x122c   :  { %v4432_v38 = vmul.f32 %v4430_v4, %v4426_v1 }
0x122e   :  { %4434 = vrot.lane.b32.xlu0 %v4432_v38, %s9651_s7  ;;  %v4667_v38 = vld [vmem:[#allocation5 + $0x18] sm:$0xf] }
0x12a0   :  { %v4435_v20 = vpop.permute.xlu0 %4434 }
0x12a1   :  { %v4437_v36 = vadd.f32 %v4435_v20, %v4427_v3 }
0x12a3   :  { %9477 = vtanh.f32 %v4437_v36 }
0x12b0   :  { %v9478_v50 = vpop.eup %9477 }
0x12b1   :  { %4440 = vrot.lane.b32.xlu1 %v9478_v50, %s9650_s11 }
0x1323   :  { %v4441_v56 = vpop.permute.xlu1 %4440 }
0x1324   :  { %v4443_v58 = vmul.f32 %v4441_v56, %v4426_v1 }
0x1326   :  { %4448 = vrot.lane.b32.xlu1 %v4443_v58, %s9650_s11  ;;  %4445 = vrot.lane.b32.xlu0 %v4443_v58, %s9651_s7 }
0x1398   :  { %v4449_v21 = vpop.permute.xlu1 %4448  ;;  %v4446_v24 = vpop.permute.xlu0 %4445 }
0x1399   :  { %4454 = vst.msk [vmem:[#allocation6 + $0x16] sm:$0xc] %vm4135_vm0, %v4449_v21  ;;  %v4451_v49 = vsel %vm1293_vm12, %v4446_v24, %v4449_v21 }
0x139a   :  { %4453 = vst.msk [vmem:[#allocation6 + $0x6] sm:$0x3] %vm4133_vm4, %v4446_v24  ;;  %v4452_v27 = vmul.f32 %v11119_v57, %v4451_v49 }
0x139c   :  { %8906 = vmatmul.mubr.msk.f32.vlgmr.msra.gmra.mxu1 %vm619_vm1, %v4452_v27 }
0x139d   :  { %8928 = vmatpush3.msra.mxu1 %v11000_v52  ;;  %8943 = vmatprep.mubr.msk.f32.mxu1 %vm9648_vm3, %v12386_v14 }
0x139e   :  { %8929 = vmatprep.subr.mxu1 %v12386_v14 }
0x139f   :  { %8930 = vmatpush3.msra.mxu1 %v11005_v62 }
0x13a0   :  { %8931 = vmatprep.subr.mxu1 %v12386_v14 }
0x13a1   :  { %8932 = vmatpush3.msra.mxu1 %v11014_v34 }
0x13a2   :  { %8933 = vmatprep.subr.mxu1 %v12386_v14 }
0x13a3   :  { %8934 = vmatpush3.msra.mxu1 %v11019_v23 }
0x13a4   :  { %8935 = vmatprep.subr.mxu1 %v12386_v14 }
0x13a5   :  { %8936 = vmatpush3.msra.mxu1 %v11028_v25 }
0x13a6   :  { %8937 = vmatprep.subr.mxu1 %v12386_v14 }
0x13a7   :  { %8938 = vmatpush3.msra.mxu1 %v11035_v53 }
0x13a8   :  { %8939 = vmatprep.subr.mxu1 %v12386_v14 }
0x13a9   :  { %8940 = vmatpush3.msra.mxu1 %v11042_v59 }
0x13aa   :  { %8941 = vmatprep.subr.mxu1 %v12386_v14 }
0x13ab   :  { %8942 = vmatpush3.msra.mxu1 %v11049_v48 }
0x13ac   :  { %8965 = vmatprep.subr.mxu1 %v12386_v14 }
0x145c   :  { %v4525_v13 = vpop.f32.mrf.mxu1 }
0x145d   :  { %v4529_v12 = vadd.f32 %v4525_v13, %v4455_v15 }
0x145e   :  { %v8907_v18 = vpop.f32.mrf.mxu1 }
0x145f   :  { %9479 = vtanh.f32 %v4529_v12 }
0x146c   :  { %v9480_v42 = vpop.eup %9479 }
0x146d   :  { %v4531_v32 = vmul.f32 %v9480_v42, %v11105_v46 }
0x146f   :  { %v4532_v0 = vadd.f32 %v4531_v32, %v11107_v28 }
0x1471   :  { %4535 = vrot.lane.b32.xlu0 %v4532_v0, %s9650_s11  ;;  %v4533_v17 = vmul.f32 %v4532_v0, %v4437_v36 }
0x14e3   :  { %v4536_v40 = vpop.permute.xlu0 %4535 }
0x14e4   :  { %v4538_v54 = vmul.f32 %v4536_v40, %v4532_v0 }
0x14e6   :  { %4540 = vrot.lane.b32.xlu1 %v4538_v54, %s9651_s7  ;;  %v4773_v54 = vld [vmem:[#allocation5 + $0x1c] sm:$0xf] }
0x1558   :  { %v4541_v31 = vpop.permute.xlu1 %4540 }
0x1559   :  { %v4543_v60 = vadd.f32 %v4541_v31, %v4533_v17 }
0x155b   :  { %9481 = vtanh.f32 %v4543_v60 }
0x1568   :  { %v9482_v10 = vpop.eup %9481 }
0x1569   :  { %4546 = vrot.lane.b32.xlu0 %v9482_v10, %s9650_s11 }
0x15db   :  { %v4547_v2 = vpop.permute.xlu0 %4546 }
0x15dc   :  { %v4549_v55 = vmul.f32 %v4547_v2, %v4532_v0 }
0x15de   :  { %4554 = vrot.lane.b32.xlu0 %v4549_v55, %s9650_s11  ;;  %4551 = vrot.lane.b32.xlu1 %v4549_v55, %s9651_s7 }
0x1650   :  { %v4555_v44 = vpop.permute.xlu0 %4554  ;;  %v4552_v22 = vpop.permute.xlu1 %4551 }
0x1651   :  { %4560 = vst.msk [vmem:[#allocation6 + $0x14] sm:$0xc] %vm4135_vm0, %v4555_v44  ;;  %v4557_v11 = vsel %vm1293_vm12, %v4552_v22, %v4555_v44 }
0x1652   :  { %4559 = vst.msk [vmem:[#allocation6 + $0x8] sm:$0x3] %vm4133_vm4, %v4552_v22  ;;  %v4558_v51 = vmul.f32 %v11119_v57, %v4557_v11 }
0x1654   :  { %8925 = vmatmul.mubr.msk.f32.vlgmr.msra.gmra.mxu0 %vm619_vm1, %v4558_v51 }
0x1655   :  { %8947 = vmatpush3.msra.mxu0 %v11000_v52  ;;  %8962 = vmatprep.mubr.msk.f32.mxu0 %vm9648_vm3, %v12386_v14 }
0x1656   :  { %8948 = vmatprep.subr.mxu0 %v12386_v14 }
0x1657   :  { %8949 = vmatpush3.msra.mxu0 %v11005_v62 }
0x1658   :  { %8950 = vmatprep.subr.mxu0 %v12386_v14 }
0x1659   :  { %8951 = vmatpush3.msra.mxu0 %v11014_v34 }
0x165a   :  { %8952 = vmatprep.subr.mxu0 %v12386_v14 }
0x165b   :  { %8953 = vmatpush3.msra.mxu0 %v11019_v23 }
0x165c   :  { %8954 = vmatprep.subr.mxu0 %v12386_v14 }
0x165d   :  { %8955 = vmatpush3.msra.mxu0 %v11028_v25 }
0x165e   :  { %8956 = vmatprep.subr.mxu0 %v12386_v14 }
0x165f   :  { %8957 = vmatpush3.msra.mxu0 %v11035_v53 }
0x1660   :  { %8958 = vmatprep.subr.mxu0 %v12386_v14 }
0x1661   :  { %8959 = vmatpush3.msra.mxu0 %v11042_v59 }
0x1662   :  { %8960 = vmatprep.subr.mxu0 %v12386_v14 }
0x1663   :  { %8961 = vmatpush3.msra.mxu0 %v11049_v48 }
0x1664   :  { %8984 = vmatprep.subr.mxu0 %v12386_v14 }
0x1714   :  { %v4631_v63 = vpop.f32.mrf.mxu0 }
0x1715   :  { %v4635_v9 = vadd.f32 %v4631_v63, %v4561_v7 }
0x1716   :  { %v8926_v26 = vpop.f32.mrf.mxu0 }
0x1717   :  { %9483 = vtanh.f32 %v4635_v9 }
0x1724   :  { %v9484_v16 = vpop.eup %9483 }
0x1725   :  { %v4637_v43 = vmul.f32 %v9484_v16, %v11105_v46 }
0x1727   :  { %v4638_v6 = vadd.f32 %v4637_v43, %v11107_v28 }
0x1729   :  { %4641 = vrot.lane.b32.xlu1 %v4638_v6, %s9650_s11  ;;  %v4639_v41 = vmul.f32 %v4638_v6, %v4543_v60 }
0x179b   :  { %v4642_v35 = vpop.permute.xlu1 %4641 }
0x179c   :  { %v4644_v8 = vmul.f32 %v4642_v35, %v4638_v6 }
0x179e   :  { %4646 = vrot.lane.b32.xlu0 %v4644_v8, %s9651_s7 }
0x1810   :  { %v4647_v29 = vpop.permute.xlu0 %4646 }
0x1811   :  { %v4649_v61 = vadd.f32 %v4647_v29, %v4639_v41 }
0x1813   :  { %9485 = vtanh.f32 %v4649_v61 }
0x1820   :  { %v9486_v39 = vpop.eup %9485 }
0x1821   :  { %4652 = vrot.lane.b32.xlu1 %v9486_v39, %s9650_s11 }
0x1893   :  { %v4653_v37 = vpop.permute.xlu1 %4652 }
0x1894   :  { %v4655_v30 = vmul.f32 %v4653_v37, %v4638_v6 }
0x1896   :  { %4660 = vrot.lane.b32.xlu1 %v4655_v30, %s9650_s11  ;;  %4657 = vrot.lane.b32.xlu0 %v4655_v30, %s9651_s7 }
0x1908   :  { %v4661_v19 = vpop.permute.xlu1 %4660  ;;  %v4658_v33 = vpop.permute.xlu0 %4657 }
0x1909   :  { %4666 = vst.msk [vmem:[#allocation6 + $0x12] sm:$0xc] %vm4135_vm0, %v4661_v19  ;;  %v4663_v1 = vsel %vm1293_vm12, %v4658_v33, %v4661_v19 }
0x190a   :  { %4665 = vst.msk [vmem:[#allocation6 + $0xa] sm:$0x3] %vm4133_vm4, %v4658_v33  ;;  %v4664_v4 = vmul.f32 %v11119_v57, %v4663_v1 }
0x190c   :  { %8944 = vmatmul.mubr.msk.f32.vlgmr.msra.gmra.mxu1 %vm619_vm1, %v4664_v4 }
0x190d   :  { %8966 = vmatpush3.msra.mxu1 %v11000_v52  ;;  %8981 = vmatprep.mubr.msk.f32.mxu1 %vm9648_vm3, %v12386_v14 }
0x190e   :  { %8967 = vmatprep.subr.mxu1 %v12386_v14 }
0x190f   :  { %8968 = vmatpush3.msra.mxu1 %v11005_v62 }
0x1910   :  { %8969 = vmatprep.subr.mxu1 %v12386_v14 }
0x1911   :  { %8970 = vmatpush3.msra.mxu1 %v11014_v34 }
0x1912   :  { %8971 = vmatprep.subr.mxu1 %v12386_v14 }
0x1913   :  { %8972 = vmatpush3.msra.mxu1 %v11019_v23 }
0x1914   :  { %8973 = vmatprep.subr.mxu1 %v12386_v14 }
0x1915   :  { %8974 = vmatpush3.msra.mxu1 %v11028_v25 }
0x1916   :  { %8975 = vmatprep.subr.mxu1 %v12386_v14 }
0x1917   :  { %8976 = vmatpush3.msra.mxu1 %v11035_v53 }
0x1918   :  { %8977 = vmatprep.subr.mxu1 %v12386_v14 }
0x1919   :  { %8978 = vmatpush3.msra.mxu1 %v11042_v59 }
0x191a   :  { %8979 = vmatprep.subr.mxu1 %v12386_v14 }
0x191b   :  { %8980 = vmatpush3.msra.mxu1 %v11049_v48 }
0x191c   :  { %9003 = vmatprep.subr.mxu1 %v12386_v14 }
0x19cc   :  { %v4737_v3 = vpop.f32.mrf.mxu1 }
0x19cd   :  { %v4741_v20 = vadd.f32 %v4737_v3, %v4667_v38  ;;  %v11369_v38 = vld [vmem:[%s12304_s15 + $0x38] sm:$0xff]  ;;  %v11378_v3 = vld [vmem:[%s12304_s15 + $0x30] sm:$0xff] }
0x19ce   :  { %v8945_v36 = vpop.f32.mrf.mxu1 }
0x19cf   :  { %9487 = vtanh.f32 %v4741_v20  ;;  %v11385_v20 = vld [vmem:[%s12304_s15 + $0x28] sm:$0xff]  ;;  %v11392_v36 = vld [vmem:[%s12304_s15 + $0x20] sm:$0xff] }
0x19dc   :  { %v9488_v50 = vpop.eup %9487 }
0x19dd   :  { %v4743_v56 = vmul.f32 %v9488_v50, %v11105_v46  ;;  %v11399_v50 = vld [vmem:[%s12304_s15 + $0x18] sm:$0xff] }
0x19df   :  { %v4744_v58 = vadd.f32 %v4743_v56, %v11107_v28  ;;  %v11406_v56 = vld [vmem:[%s12304_s15 + $0x10] sm:$0xff] }
0x19e1   :  { %4747 = vrot.lane.b32.xlu0 %v4744_v58, %s9650_s11  ;;  %v4745_v49 = vmul.f32 %v4744_v58, %v4649_v61 }
0x1a53   :  { %v4748_v21 = vpop.permute.xlu0 %4747 }
0x1a54   :  { %v4750_v24 = vmul.f32 %v4748_v21, %v4744_v58  ;;  %v11420_v21 = vld [vmem:[%s12304_s15] sm:$0xff] }
0x1a56   :  { %4752 = vrot.lane.b32.xlu1 %v4750_v24, %s9651_s7  ;;  %v4985_v24 = vld [vmem:[#allocation5 + $0x24] sm:$0xf] }
0x1ac8   :  { %v4753_v27 = vpop.permute.xlu1 %4752 }
0x1ac9   :  { %v4755_v15 = vadd.f32 %v4753_v27, %v4745_v49 }
0x1acb   :  { %9489 = vtanh.f32 %v4755_v15 }
0x1ad8   :  { %v9490_v13 = vpop.eup %9489 }
0x1ad9   :  { %4758 = vrot.lane.b32.xlu0 %v9490_v13, %s9650_s11 }
0x1b4b   :  { %v4759_v12 = vpop.permute.xlu0 %4758 }
0x1b4c   :  { %v4761_v18 = vmul.f32 %v4759_v12, %v4744_v58  ;;  %v11413_v58 = vld [vmem:[%s12304_s15 + $0x8] sm:$0xff] }
0x1b4e   :  { %4766 = vrot.lane.b32.xlu0 %v4761_v18, %s9650_s11  ;;  %4763 = vrot.lane.b32.xlu1 %v4761_v18, %s9651_s7 }
0x1bc0   :  { %v4767_v42 = vpop.permute.xlu0 %4766  ;;  %v4764_v32 = vpop.permute.xlu1 %4763 }
0x1bc1   :  { %4772 = vst.msk [vmem:[#allocation6 + $0x10] sm:$0xc] %vm4135_vm0, %v4767_v42  ;;  %v4769_v0 = vsel %vm1293_vm12, %v4764_v32, %v4767_v42 }
0x1bc2   :  { %4771 = vst.msk [vmem:[#allocation6 + $0xc] sm:$0x3] %vm4133_vm4, %v4764_v32  ;;  %v4770_v40 = vmul.f32 %v11119_v57, %v4769_v0 }
0x1bc4   :  { %8963 = vmatmul.mubr.msk.f32.vlgmr.msra.gmra.mxu0 %vm619_vm1, %v4770_v40 }
0x1bc5   :  { %8985 = vmatpush3.msra.mxu0 %v11000_v52  ;;  %9000 = vmatprep.mubr.msk.f32.mxu0 %vm9648_vm3, %v12386_v14 }
0x1bc6   :  { %8986 = vmatprep.subr.mxu0 %v12386_v14 }
0x1bc7   :  { %8987 = vmatpush3.msra.mxu0 %v11005_v62 }
0x1bc8   :  { %8988 = vmatprep.subr.mxu0 %v12386_v14 }
0x1bc9   :  { %8989 = vmatpush3.msra.mxu0 %v11014_v34 }
0x1bca   :  { %8990 = vmatprep.subr.mxu0 %v12386_v14 }
0x1bcb   :  { %8991 = vmatpush3.msra.mxu0 %v11019_v23 }
0x1bcc   :  { %8992 = vmatprep.subr.mxu0 %v12386_v14 }
0x1bcd   :  { %8993 = vmatpush3.msra.mxu0 %v11028_v25 }
0x1bce   :  { %8994 = vmatprep.subr.mxu0 %v12386_v14 }
0x1bcf   :  { %8995 = vmatpush3.msra.mxu0 %v11035_v53 }
0x1bd0   :  { %8996 = vmatprep.subr.mxu0 %v12386_v14 }
0x1bd1   :  { %8997 = vmatpush3.msra.mxu0 %v11042_v59 }
0x1bd2   :  { %8998 = vmatprep.subr.mxu0 %v12386_v14 }
0x1bd3   :  { %8999 = vmatpush3.msra.mxu0 %v11049_v48 }
0x1bd4   :  { %9022 = vmatprep.subr.mxu0 %v12386_v14 }
0x1c84   :  { %v4843_v17 = vpop.f32.mrf.mxu0 }
0x1c85   :  { %v4847_v31 = vadd.f32 %v4843_v17, %v4773_v54 }
0x1c86   :  { %v8964_v60 = vpop.f32.mrf.mxu0 }
0x1c87   :  { %9491 = vtanh.f32 %v4847_v31 }
0x1c94   :  { %v9492_v10 = vpop.eup %9491 }
0x1c95   :  { %v4849_v2 = vmul.f32 %v9492_v10, %v11105_v46 }
0x1c97   :  { %v4850_v55 = vadd.f32 %v4849_v2, %v11107_v28 }
0x1c99   :  { %4853 = vrot.lane.b32.xlu1 %v4850_v55, %s9650_s11  ;;  %v4851_v11 = vmul.f32 %v4850_v55, %v4755_v15 }
0x1d0b   :  { %v4854_v44 = vpop.permute.xlu1 %4853 }
0x1d0c   :  { %v4856_v22 = vmul.f32 %v4854_v44, %v4850_v55 }
0x1d0e   :  { %4858 = vrot.lane.b32.xlu0 %v4856_v22, %s9651_s7  ;;  %v5091_v22 = vld [vmem:[#allocation5 + $0x28] sm:$0xf] }
0x1d80   :  { %v4859_v51 = vpop.permute.xlu0 %4858 }
0x1d81   :  { %v4861_v7 = vadd.f32 %v4859_v51, %v4851_v11 }
0x1d83   :  { %9493 = vtanh.f32 %v4861_v7 }
0x1d90   :  { %v9494_v63 = vpop.eup %9493 }
0x1d91   :  { %4864 = vrot.lane.b32.xlu1 %v9494_v63, %s9650_s11 }
0x1e03   :  { %v4865_v9 = vpop.permute.xlu1 %4864 }
0x1e04   :  { %v4867_v26 = vmul.f32 %v4865_v9, %v4850_v55 }
0x1e06   :  { %4872 = vrot.lane.b32.xlu1 %v4867_v26, %s9650_s11  ;;  %4869 = vrot.lane.b32.xlu0 %v4867_v26, %s9651_s7 }
0x1e78   :  { %v4873_v16 = vpop.permute.xlu1 %4872  ;;  %v4870_v43 = vpop.permute.xlu0 %4869 }
0x1e79   :  { %4878 = vst.msk [vmem:[#allocation6 + $0xe] sm:$0xc] %vm4135_vm0, %v4873_v16  ;;  %v4875_v6 = vsel %vm1293_vm12, %v4870_v43, %v4873_v16 }
0x1e7a   :  { %4877 = vst.msk [vmem:[#allocation6 + $0xe] sm:$0x3] %vm4133_vm4, %v4870_v43  ;;  %v4876_v35 = vmul.f32 %v11119_v57, %v4875_v6 }
0x1e7c   :  { %8982 = vmatmul.mubr.msk.f32.vlgmr.msra.gmra.mxu1 %vm619_vm1, %v4876_v35 }
0x1e7d   :  { %9004 = vmatpush3.msra.mxu1 %v11000_v52  ;;  %9019 = vmatprep.mubr.msk.f32.mxu1 %vm9648_vm3, %v12386_v14  ;;  %v4879_v52 = vld [vmem:[#allocation5 + $0x20] sm:$0xf] }
0x1e7e   :  { %9005 = vmatprep.subr.mxu1 %v12386_v14 }
0x1e7f   :  { %9006 = vmatpush3.msra.mxu1 %v11005_v62 }
0x1e80   :  { %9007 = vmatprep.subr.mxu1 %v12386_v14 }
0x1e81   :  { %9008 = vmatpush3.msra.mxu1 %v11014_v34 }
0x1e82   :  { %9009 = vmatprep.subr.mxu1 %v12386_v14 }
0x1e83   :  { %9010 = vmatpush3.msra.mxu1 %v11019_v23 }
0x1e84   :  { %9011 = vmatprep.subr.mxu1 %v12386_v14 }
0x1e85   :  { %9012 = vmatpush3.msra.mxu1 %v11028_v25 }
0x1e86   :  { %9013 = vmatprep.subr.mxu1 %v12386_v14 }
0x1e87   :  { %9014 = vmatpush3.msra.mxu1 %v11035_v53 }
0x1e88   :  { %9015 = vmatprep.subr.mxu1 %v12386_v14 }
0x1e89   :  { %9016 = vmatpush3.msra.mxu1 %v11042_v59 }
0x1e8a   :  { %9017 = vmatprep.subr.mxu1 %v12386_v14 }
0x1e8b   :  { %9018 = vmatpush3.msra.mxu1 %v11049_v48 }
0x1e8c   :  { %9041 = vmatprep.subr.mxu1 %v12386_v14 }
0x1f3c   :  { %v4949_v62 = vpop.f32.mrf.mxu1 }
0x1f3d   :  { %v4953_v34 = vadd.f32 %v4949_v62, %v4879_v52 }
0x1f3e   :  { %v8983_v23 = vpop.f32.mrf.mxu1 }
0x1f3f   :  { %9495 = vtanh.f32 %v4953_v34 }
0x1f4c   :  { %v9496_v25 = vpop.eup %9495 }
0x1f4d   :  { %v4955_v8 = vmul.f32 %v9496_v25, %v11105_v46 }
0x1f4f   :  { %v4956_v53 = vadd.f32 %v4955_v8, %v11107_v28 }
0x1f51   :  { %4959 = vrot.lane.b32.xlu0 %v4956_v53, %s9650_s11  ;;  %v4957_v29 = vmul.f32 %v4956_v53, %v4861_v7 }
0x1fc3   :  { %v4960_v41 = vpop.permute.xlu0 %4959 }
0x1fc4   :  { %v4962_v59 = vmul.f32 %v4960_v41, %v4956_v53 }
0x1fc6   :  { %4964 = vrot.lane.b32.xlu1 %v4962_v59, %s9651_s7  ;;  %v5197_v59 = vld [vmem:[#allocation5 + $0x2c] sm:$0xf] }
0x2038   :  { %v4965_v48 = vpop.permute.xlu1 %4964 }
0x2039   :  { %v4967_v61 = vadd.f32 %v4965_v48, %v4957_v29 }
0x203b   :  { %9497 = vtanh.f32 %v4967_v61 }
0x2048   :  { %v9498_v39 = vpop.eup %9497 }
0x2049   :  { %4970 = vrot.lane.b32.xlu0 %v9498_v39, %s9650_s11 }
0x20bb   :  { %v4971_v37 = vpop.permute.xlu0 %4970 }
0x20bc   :  { %v4973_v30 = vmul.f32 %v4971_v37, %v4956_v53 }
0x20be   :  { %4978 = vrot.lane.b32.xlu0 %v4973_v30, %s9650_s11  ;;  %4975 = vrot.lane.b32.xlu1 %v4973_v30, %s9651_s7 }
0x2130   :  { %v4979_v19 = vpop.permute.xlu0 %4978  ;;  %v4976_v33 = vpop.permute.xlu1 %4975 }
0x2131   :  { %4984 = vst.msk [vmem:[#allocation6 + $0xc] sm:$0xc] %vm4135_vm0, %v4979_v19  ;;  %v4981_v1 = vsel %vm1293_vm12, %v4976_v33, %v4979_v19 }
0x2132   :  { %4983 = vst.msk [vmem:[#allocation6 + $0x10] sm:$0x3] %vm4133_vm4, %v4976_v33  ;;  %v4982_v4 = vmul.f32 %v11119_v57, %v4981_v1 }
0x2134   :  { %9001 = vmatmul.mubr.msk.f32.vlgmr.msra.gmra.mxu0 %vm619_vm1, %v4982_v4 }
0x2135   :  { %9023 = vmatpush3.msra.mxu0 %v11369_v38  ;;  %9038 = vmatprep.mubr.msk.f32.mxu0 %vm9648_vm3, %v12386_v14 }
0x2136   :  { %9024 = vmatprep.subr.mxu0 %v12386_v14 }
0x2137   :  { %9025 = vmatpush3.msra.mxu0 %v11378_v3 }
0x2138   :  { %9026 = vmatprep.subr.mxu0 %v12386_v14 }
0x2139   :  { %9027 = vmatpush3.msra.mxu0 %v11385_v20 }
0x213a   :  { %9028 = vmatprep.subr.mxu0 %v12386_v14 }
0x213b   :  { %9029 = vmatpush3.msra.mxu0 %v11392_v36 }
0x213c   :  { %9030 = vmatprep.subr.mxu0 %v12386_v14 }
0x213d   :  { %9031 = vmatpush3.msra.mxu0 %v11399_v50 }
0x213e   :  { %9032 = vmatprep.subr.mxu0 %v12386_v14 }
0x213f   :  { %9033 = vmatpush3.msra.mxu0 %v11406_v56 }
0x2140   :  { %9034 = vmatprep.subr.mxu0 %v12386_v14 }
0x2141   :  { %9035 = vmatpush3.msra.mxu0 %v11413_v58 }
0x2142   :  { %9036 = vmatprep.subr.mxu0 %v12386_v14 }
0x2143   :  { %9037 = vmatpush3.msra.mxu0 %v11420_v21 }
0x2144   :  { %9060 = vmatprep.subr.mxu0 %v12386_v14 }
0x21f4   :  { %v5055_v49 = vpop.f32.mrf.mxu0 }
0x21f5   :  { %v5059_v27 = vadd.f32 %v5055_v49, %v4985_v24 }
0x21f6   :  { %v9002_v15 = vpop.f32.mrf.mxu0 }
0x21f7   :  { %9499 = vtanh.f32 %v5059_v27 }
0x2204   :  { %v9500_v13 = vpop.eup %9499 }
0x2205   :  { %v5061_v12 = vmul.f32 %v9500_v13, %v11105_v46 }
0x2207   :  { %v5062_v18 = vadd.f32 %v5061_v12, %v11107_v28 }
0x2209   :  { %5065 = vrot.lane.b32.xlu1 %v5062_v18, %s9650_s11  ;;  %v5063_v0 = vmul.f32 %v5062_v18, %v4967_v61 }
0x227b   :  { %v5066_v42 = vpop.permute.xlu1 %5065 }
0x227c   :  { %v5068_v32 = vmul.f32 %v5066_v42, %v5062_v18 }
0x227e   :  { %5070 = vrot.lane.b32.xlu0 %v5068_v32, %s9651_s7  ;;  %v5303_v32 = vld [vmem:[#allocation5 + $0x30] sm:$0xf] }
0x22f0   :  { %v5071_v40 = vpop.permute.xlu0 %5070 }
0x22f1   :  { %v5073_v54 = vadd.f32 %v5071_v40, %v5063_v0 }
0x22f3   :  { %9501 = vtanh.f32 %v5073_v54 }
0x2300   :  { %v9502_v17 = vpop.eup %9501 }
0x2301   :  { %5076 = vrot.lane.b32.xlu1 %v9502_v17, %s9650_s11 }
0x2373   :  { %v5077_v31 = vpop.permute.xlu1 %5076 }
0x2374   :  { %v5079_v60 = vmul.f32 %v5077_v31, %v5062_v18 }
0x2376   :  { %5084 = vrot.lane.b32.xlu1 %v5079_v60, %s9650_s11  ;;  %5081 = vrot.lane.b32.xlu0 %v5079_v60, %s9651_s7 }
0x23e8   :  { %v5085_v10 = vpop.permute.xlu1 %5084  ;;  %v5082_v2 = vpop.permute.xlu0 %5081 }
0x23e9   :  { %5090 = vst.msk [vmem:[#allocation6 + $0xa] sm:$0xc] %vm4135_vm0, %v5085_v10  ;;  %v5087_v55 = vsel %vm1293_vm12, %v5082_v2, %v5085_v10 }
0x23ea   :  { %5089 = vst.msk [vmem:[#allocation6 + $0x12] sm:$0x3] %vm4133_vm4, %v5082_v2  ;;  %v5088_v44 = vmul.f32 %v11119_v57, %v5087_v55 }
0x23ec   :  { %9020 = vmatmul.mubr.msk.f32.vlgmr.msra.gmra.mxu1 %vm619_vm1, %v5088_v44 }
0x23ed   :  { %9042 = vmatpush3.msra.mxu1 %v11369_v38  ;;  %9057 = vmatprep.mubr.msk.f32.mxu1 %vm9648_vm3, %v12386_v14 }
0x23ee   :  { %9043 = vmatprep.subr.mxu1 %v12386_v14 }
0x23ef   :  { %9044 = vmatpush3.msra.mxu1 %v11378_v3 }
0x23f0   :  { %9045 = vmatprep.subr.mxu1 %v12386_v14 }
0x23f1   :  { %9046 = vmatpush3.msra.mxu1 %v11385_v20 }
0x23f2   :  { %9047 = vmatprep.subr.mxu1 %v12386_v14 }
0x23f3   :  { %9048 = vmatpush3.msra.mxu1 %v11392_v36 }
0x23f4   :  { %9049 = vmatprep.subr.mxu1 %v12386_v14 }
0x23f5   :  { %9050 = vmatpush3.msra.mxu1 %v11399_v50 }
0x23f6   :  { %9051 = vmatprep.subr.mxu1 %v12386_v14 }
0x23f7   :  { %9052 = vmatpush3.msra.mxu1 %v11406_v56 }
0x23f8   :  { %9053 = vmatprep.subr.mxu1 %v12386_v14 }
0x23f9   :  { %9054 = vmatpush3.msra.mxu1 %v11413_v58 }
0x23fa   :  { %9055 = vmatprep.subr.mxu1 %v12386_v14 }
0x23fb   :  { %9056 = vmatpush3.msra.mxu1 %v11420_v21 }
0x23fc   :  { %9079 = vmatprep.subr.mxu1 %v12386_v14 }
0x24ac   :  { %v5161_v11 = vpop.f32.mrf.mxu1 }
0x24ad   :  { %v5165_v51 = vadd.f32 %v5161_v11, %v5091_v22 }
0x24ae   :  { %v9021_v7 = vpop.f32.mrf.mxu1 }
0x24af   :  { %9503 = vtanh.f32 %v5165_v51 }
0x24bc   :  { %v9504_v63 = vpop.eup %9503 }
0x24bd   :  { %v5167_v9 = vmul.f32 %v9504_v63, %v11105_v46 }
0x24bf   :  { %v5168_v26 = vadd.f32 %v5167_v9, %v11107_v28 }
0x24c1   :  { %5171 = vrot.lane.b32.xlu0 %v5168_v26, %s9650_s11  ;;  %v5169_v6 = vmul.f32 %v5168_v26, %v5073_v54 }
0x2533   :  { %v5172_v16 = vpop.permute.xlu0 %5171 }
0x2534   :  { %v5174_v43 = vmul.f32 %v5172_v16, %v5168_v26 }
0x2536   :  { %5176 = vrot.lane.b32.xlu1 %v5174_v43, %s9651_s7 }
0x25a8   :  { %v5177_v35 = vpop.permute.xlu1 %5176 }
0x25a9   :  { %v5179_v52 = vadd.f32 %v5177_v35, %v5169_v6 }
0x25ab   :  { %9505 = vtanh.f32 %v5179_v52 }
0x25b8   :  { %v9506_v62 = vpop.eup %9505 }
0x25b9   :  { %5182 = vrot.lane.b32.xlu0 %v9506_v62, %s9650_s11 }
0x262b   :  { %v5183_v34 = vpop.permute.xlu0 %5182 }
0x262c   :  { %v5185_v23 = vmul.f32 %v5183_v34, %v5168_v26 }
0x262e   :  { %5190 = vrot.lane.b32.xlu0 %v5185_v23, %s9650_s11  ;;  %5187 = vrot.lane.b32.xlu1 %v5185_v23, %s9651_s7 }
0x26a0   :  { %v5191_v25 = vpop.permute.xlu0 %5190  ;;  %v5188_v8 = vpop.permute.xlu1 %5187 }
0x26a1   :  { %5196 = vst.msk [vmem:[#allocation6 + $0x8] sm:$0xc] %vm4135_vm0, %v5191_v25  ;;  %v5193_v53 = vsel %vm1293_vm12, %v5188_v8, %v5191_v25 }
0x26a2   :  { %5195 = vst.msk [vmem:[#allocation6 + $0x14] sm:$0x3] %vm4133_vm4, %v5188_v8  ;;  %v5194_v41 = vmul.f32 %v11119_v57, %v5193_v53 }
0x26a4   :  { %9039 = vmatmul.mubr.msk.f32.vlgmr.msra.gmra.mxu0 %vm619_vm1, %v5194_v41 }
0x26a5   :  { %9061 = vmatpush3.msra.mxu0 %v11369_v38  ;;  %9076 = vmatprep.mubr.msk.f32.mxu0 %vm9648_vm3, %v12386_v14 }
0x26a6   :  { %9062 = vmatprep.subr.mxu0 %v12386_v14 }
0x26a7   :  { %9063 = vmatpush3.msra.mxu0 %v11378_v3 }
0x26a8   :  { %9064 = vmatprep.subr.mxu0 %v12386_v14 }
0x26a9   :  { %9065 = vmatpush3.msra.mxu0 %v11385_v20 }
0x26aa   :  { %9066 = vmatprep.subr.mxu0 %v12386_v14 }
0x26ab   :  { %9067 = vmatpush3.msra.mxu0 %v11392_v36 }
0x26ac   :  { %9068 = vmatprep.subr.mxu0 %v12386_v14 }
0x26ad   :  { %9069 = vmatpush3.msra.mxu0 %v11399_v50 }
0x26ae   :  { %9070 = vmatprep.subr.mxu0 %v12386_v14 }
0x26af   :  { %9071 = vmatpush3.msra.mxu0 %v11406_v56 }
0x26b0   :  { %9072 = vmatprep.subr.mxu0 %v12386_v14 }
0x26b1   :  { %9073 = vmatpush3.msra.mxu0 %v11413_v58 }
0x26b2   :  { %9074 = vmatprep.subr.mxu0 %v12386_v14 }
0x26b3   :  { %9075 = vmatpush3.msra.mxu0 %v11420_v21 }
0x26b4   :  { %9098 = vmatprep.subr.mxu0 %v12386_v14 }
0x2764   :  { %v5267_v29 = vpop.f32.mrf.mxu0 }
0x2765   :  { %v5271_v48 = vadd.f32 %v5267_v29, %v5197_v59  ;;  %v5515_v59 = vld [vmem:[#allocation5 + $0x38] sm:$0xf] }
0x2766   :  { %v9040_v61 = vpop.f32.mrf.mxu0 }
0x2767   :  { %9507 = vtanh.f32 %v5271_v48 }
0x2774   :  { %v9508_v39 = vpop.eup %9507 }
0x2775   :  { %v5273_v37 = vmul.f32 %v9508_v39, %v11105_v46 }
0x2777   :  { %v5274_v30 = vadd.f32 %v5273_v37, %v11107_v28 }
0x2779   :  { %5277 = vrot.lane.b32.xlu1 %v5274_v30, %s9650_s11  ;;  %v5275_v1 = vmul.f32 %v5274_v30, %v5179_v52 }
0x27eb   :  { %v5278_v19 = vpop.permute.xlu1 %5277 }
0x27ec   :  { %v5280_v33 = vmul.f32 %v5278_v19, %v5274_v30 }
0x27ee   :  { %5282 = vrot.lane.b32.xlu0 %v5280_v33, %s9651_s7 }
0x2860   :  { %v5283_v4 = vpop.permute.xlu0 %5282 }
0x2861   :  { %v5285_v24 = vadd.f32 %v5283_v4, %v5275_v1 }
0x2863   :  { %9509 = vtanh.f32 %v5285_v24 }
0x2870   :  { %v9510_v49 = vpop.eup %9509 }
0x2871   :  { %5288 = vrot.lane.b32.xlu1 %v9510_v49, %s9650_s11 }
0x28e3   :  { %v5289_v27 = vpop.permute.xlu1 %5288 }
0x28e4   :  { %v5291_v15 = vmul.f32 %v5289_v27, %v5274_v30 }
0x28e6   :  { %5296 = vrot.lane.b32.xlu1 %v5291_v15, %s9650_s11  ;;  %5293 = vrot.lane.b32.xlu0 %v5291_v15, %s9651_s7 }
0x2958   :  { %v5297_v13 = vpop.permute.xlu1 %5296  ;;  %v5294_v12 = vpop.permute.xlu0 %5293 }
0x2959   :  { %5302 = vst.msk [vmem:[#allocation6 + $0x6] sm:$0xc] %vm4135_vm0, %v5297_v13  ;;  %v5299_v18 = vsel %vm1293_vm12, %v5294_v12, %v5297_v13 }
0x295a   :  { %5301 = vst.msk [vmem:[#allocation6 + $0x16] sm:$0x3] %vm4133_vm4, %v5294_v12  ;;  %v5300_v42 = vmul.f32 %v11119_v57, %v5299_v18 }
0x295c   :  { %9058 = vmatmul.mubr.msk.f32.vlgmr.msra.gmra.mxu1 %vm619_vm1, %v5300_v42 }
0x295d   :  { %9080 = vmatpush3.msra.mxu1 %v11369_v38  ;;  %9095 = vmatprep.mubr.msk.f32.mxu1 %vm9648_vm3, %v12386_v14 }
0x295e   :  { %9081 = vmatprep.subr.mxu1 %v12386_v14 }
0x295f   :  { %9082 = vmatpush3.msra.mxu1 %v11378_v3 }
0x2960   :  { %9083 = vmatprep.subr.mxu1 %v12386_v14 }
0x2961   :  { %9084 = vmatpush3.msra.mxu1 %v11385_v20 }
0x2962   :  { %9085 = vmatprep.subr.mxu1 %v12386_v14 }
0x2963   :  { %9086 = vmatpush3.msra.mxu1 %v11392_v36 }
0x2964   :  { %9087 = vmatprep.subr.mxu1 %v12386_v14 }
0x2965   :  { %9088 = vmatpush3.msra.mxu1 %v11399_v50 }
0x2966   :  { %9089 = vmatprep.subr.mxu1 %v12386_v14 }
0x2967   :  { %9090 = vmatpush3.msra.mxu1 %v11406_v56 }
0x2968   :  { %9091 = vmatprep.subr.mxu1 %v12386_v14 }
0x2969   :  { %9092 = vmatpush3.msra.mxu1 %v11413_v58 }
0x296a   :  { %9093 = vmatprep.subr.mxu1 %v12386_v14 }
0x296b   :  { %9094 = vmatpush3.msra.mxu1 %v11420_v21 }
0x2a1c   :  { %v5373_v0 = vpop.f32.mrf.mxu1 }
0x2a1d   :  { %v5377_v40 = vadd.f32 %v5373_v0, %v5303_v32  ;;  %v5621_v32 = vld [vmem:[#allocation5 + $0x3c] sm:$0xf] }
0x2a1e   :  { %v9059_v54 = vpop.f32.mrf.mxu1 }
0x2a1f   :  { %9511 = vtanh.f32 %v5377_v40 }
0x2a2c   :  { %v9512_v17 = vpop.eup %9511 }
0x2a2d   :  { %v5379_v31 = vmul.f32 %v9512_v17, %v11105_v46 }
0x2a2f   :  { %v5380_v60 = vadd.f32 %v5379_v31, %v11107_v28 }
0x2a31   :  { %5383 = vrot.lane.b32.xlu0 %v5380_v60, %s9650_s11  ;;  %v5381_v55 = vmul.f32 %v5380_v60, %v5285_v24 }
0x2aa3   :  { %v5384_v10 = vpop.permute.xlu0 %5383 }
0x2aa4   :  { %v5386_v2 = vmul.f32 %v5384_v10, %v5380_v60 }
0x2aa6   :  { %5388 = vrot.lane.b32.xlu1 %v5386_v2, %s9651_s7 }
0x2b18   :  { %v5389_v44 = vpop.permute.xlu1 %5388 }
0x2b19   :  { %v5391_v22 = vadd.f32 %v5389_v44, %v5381_v55 }
0x2b1b   :  { %9513 = vtanh.f32 %v5391_v22 }
0x2b28   :  { %v9514_v11 = vpop.eup %9513 }
0x2b29   :  { %5394 = vrot.lane.b32.xlu0 %v9514_v11, %s9650_s11  ;;  %v5740_v11 = vld [vmem:[%s12305_s16 + $0x78] sm:$0xff] }
0x2b2a   :  { %5785 = vmatprep.subr.mxu1 %v5740_v11 }
0x2b9b   :  { %v5395_v51 = vpop.permute.xlu0 %5394 }
0x2b9c   :  { %v5397_v7 = vmul.f32 %v5395_v51, %v5380_v60  ;;  %v5739_v51 = vld [vmem:[%s12305_s16 + $0x70] sm:$0xff] }
0x2b9e   :  { %5402 = vrot.lane.b32.xlu0 %v5397_v7, %s9650_s11  ;;  %5399 = vrot.lane.b32.xlu1 %v5397_v7, %s9651_s7  ;;  %v5738_v7 = vld [vmem:[%s12305_s16 + $0x68] sm:$0xff] }
0x2c10   :  { %v5403_v63 = vpop.permute.xlu0 %5402  ;;  %v5400_v9 = vpop.permute.xlu1 %5399 }
0x2c11   :  { %5408 = vst.msk [vmem:[#allocation6 + $0x4] sm:$0xc] %vm4135_vm0, %v5403_v63  ;;  %v5405_v26 = vsel %vm1293_vm12, %v5400_v9, %v5403_v63  ;;  %v5737_v63 = vld [vmem:[%s12305_s16 + $0x60] sm:$0xff] }
0x2c12   :  { %5407 = vst.msk [vmem:[#allocation6 + $0x18] sm:$0x3] %vm4133_vm4, %v5400_v9  ;;  %v5406_v16 = vmul.f32 %v11119_v57, %v5405_v26  ;;  %v5736_v9 = vld [vmem:[%s12305_s16 + $0x58] sm:$0xff]  ;;  %v5735_v26 = vld [vmem:[%s12305_s16 + $0x50] sm:$0xff] }
0x2c14   :  { %9077 = vmatmul.mubr.msk.f32.vlgmr.msra.gmra.mxu0 %vm619_vm1, %v5406_v16  ;;  %v5734_v16 = vld [vmem:[%s12305_s16 + $0x48] sm:$0xff] }
0x2c15   :  { %9099 = vmatpush3.msra.mxu0 %v11369_v38  ;;  %9114 = vmatprep.mubr.msk.f32.mxu0 %vm9648_vm3, %v12386_v14  ;;  %v5409_v38 = vld [vmem:[#allocation5 + $0x34] sm:$0xf] }
0x2c16   :  { %9100 = vmatprep.subr.mxu0 %v12386_v14 }
0x2c17   :  { %9101 = vmatpush3.msra.mxu0 %v11378_v3 }
0x2c18   :  { %9102 = vmatprep.subr.mxu0 %v12386_v14 }
0x2c19   :  { %9103 = vmatpush3.msra.mxu0 %v11385_v20 }
0x2c1a   :  { %9104 = vmatprep.subr.mxu0 %v12386_v14 }
0x2c1b   :  { %9105 = vmatpush3.msra.mxu0 %v11392_v36 }
0x2c1c   :  { %9106 = vmatprep.subr.mxu0 %v12386_v14 }
0x2c1d   :  { %9107 = vmatpush3.msra.mxu0 %v11399_v50 }
0x2c1e   :  { %9108 = vmatprep.subr.mxu0 %v12386_v14 }
0x2c1f   :  { %9109 = vmatpush3.msra.mxu0 %v11406_v56 }
0x2c20   :  { %9110 = vmatprep.subr.mxu0 %v12386_v14 }
0x2c21   :  { %9111 = vmatpush3.msra.mxu0 %v11413_v58 }
0x2c22   :  { %9112 = vmatprep.subr.mxu0 %v12386_v14 }
0x2c23   :  { %9113 = vmatpush3.msra.mxu0 %v11420_v21 }
0x2c24   :  { %9117 = vmatprep.subr.mxu0 %v12386_v14 }
0x2cd4   :  { %v5479_v3 = vpop.f32.mrf.mxu0 }
0x2cd5   :  { %v5483_v20 = vadd.f32 %v5479_v3, %v5409_v38  ;;  %v5733_v38 = vld [vmem:[%s12305_s16 + $0x40] sm:$0xff] }
0x2cd6   :  { %v9078_v36 = vpop.f32.mrf.mxu0 }
0x2cd7   :  { %9515 = vtanh.f32 %v5483_v20  ;;  %v5732_v20 = vld [vmem:[%s12305_s16 + $0x38] sm:$0xff]  ;;  %v5731_v36 = vld [vmem:[%s12305_s16 + $0x30] sm:$0xff] }
0x2ce4   :  { %v9516_v50 = vpop.eup %9515 }
0x2ce5   :  { %v5485_v43 = vmul.f32 %v9516_v50, %v11105_v46  ;;  %v5730_v50 = vld [vmem:[%s12305_s16 + $0x28] sm:$0xff] }
0x2ce7   :  { %v5486_v56 = vadd.f32 %v5485_v43, %v11107_v28  ;;  %v5729_v43 = vld [vmem:[%s12305_s16 + $0x20] sm:$0xff] }
0x2ce9   :  { %5489 = vrot.lane.b32.xlu1 %v5486_v56, %s9650_s11  ;;  %v5487_v35 = vmul.f32 %v5486_v56, %v5391_v22 }
0x2d5b   :  { %v5490_v6 = vpop.permute.xlu1 %5489 }
0x2d5c   :  { %v5492_v58 = vmul.f32 %v5490_v6, %v5486_v56  ;;  %v5727_v6 = vld [vmem:[%s12305_s16 + $0x10] sm:$0xff] }
0x2d5e   :  { %5494 = vrot.lane.b32.xlu0 %v5492_v58, %s9651_s7  ;;  %v5726_v58 = vld [vmem:[%s12305_s16 + $0x8] sm:$0xff] }
0x2dd0   :  { %v5495_v21 = vpop.permute.xlu0 %5494 }
0x2dd1   :  { %v5497_v52 = vadd.f32 %v5495_v21, %v5487_v35  ;;  %v5725_v35 = vld [vmem:[%s12305_s16] sm:$0xff] }
0x2dd3   :  { %9517 = vtanh.f32 %v5497_v52 }
0x2de0   :  { %v9518_v62 = vpop.eup %9517 }
0x2de1   :  { %5500 = vrot.lane.b32.xlu1 %v9518_v62, %s9650_s11  ;;  %v11629_v62 = vld [vmem:[%s12306_s18 + $0x38] sm:$0xff] }
0x2e53   :  { %v5501_v34 = vpop.permute.xlu1 %5500 }
0x2e54   :  { %v5503_v23 = vmul.f32 %v5501_v34, %v5486_v56  ;;  %v5728_v56 = vld [vmem:[%s12305_s16 + $0x18] sm:$0xff]  ;;  %v11634_v34 = vld [vmem:[%s12306_s18 + $0x30] sm:$0xff] }
0x2e56   :  { %5508 = vrot.lane.b32.xlu1 %v5503_v23, %s9650_s11  ;;  %5505 = vrot.lane.b32.xlu0 %v5503_v23, %s9651_s7  ;;  %v11642_v23 = vld [vmem:[%s12306_s18 + $0x28] sm:$0xff] }
0x2ec8   :  { %v5509_v25 = vpop.permute.xlu1 %5508  ;;  %v5506_v8 = vpop.permute.xlu0 %5505 }
0x2ec9   :  { %5514 = vst.msk [vmem:[#allocation6 + $0x2] sm:$0xc] %vm4135_vm0, %v5509_v25  ;;  %v5511_v53 = vsel %vm1293_vm12, %v5506_v8, %v5509_v25  ;;  %v11648_v25 = vld [vmem:[%s12306_s18 + $0x20] sm:$0xff] }
0x2eca   :  { %5513 = vst.msk [vmem:[#allocation6 + $0x1a] sm:$0x3] %vm4133_vm4, %v5506_v8  ;;  %v5512_v41 = vmul.f32 %v11119_v57, %v5511_v53  ;;  %v11655_v8 = vld [vmem:[%s12306_s18 + $0x18] sm:$0xff]  ;;  %v11662_v53 = vld [vmem:[%s12306_s18 + $0x10] sm:$0xff] }
0x2ecc   :  { %9096 = vmatmul.mubr.msk.f32.vlgmr.msra.gmra.mxu1 %vm619_vm1, %v5512_v41  ;;  %v11669_v41 = vld [vmem:[%s12306_s18 + $0x8] sm:$0xff] }
0x2ecd   :  { %5833 = vmatprep.mubr.f32.mxu1 %v12386_v14  ;;  %5786 = vmatpush1.msra.mxu1 %v5739_v51 }
0x2ece   :  { %5787 = vmatprep.subr.mxu1 %v5738_v7 }
0x2ecf   :  { %5788 = vmatpush1.msra.mxu1 %v5737_v63 }
0x2ed0   :  { %5789 = vmatprep.subr.mxu1 %v5736_v9 }
0x2ed1   :  { %5790 = vmatpush1.msra.mxu1 %v5735_v26 }
0x2ed2   :  { %5791 = vmatprep.subr.mxu1 %v5734_v16 }
0x2ed3   :  { %5792 = vmatpush1.msra.mxu1 %v5733_v38 }
0x2ed4   :  { %5793 = vmatprep.subr.mxu1 %v5732_v20 }
0x2ed5   :  { %5794 = vmatpush1.msra.mxu1 %v5731_v36 }
0x2ed6   :  { %5795 = vmatprep.subr.mxu1 %v5730_v50 }
0x2ed7   :  { %5796 = vmatpush1.msra.mxu1 %v5729_v43 }
0x2ed8   :  { %5797 = vmatprep.subr.mxu1 %v5728_v56 }
0x2ed9   :  { %5798 = vmatpush1.msra.mxu1 %v5727_v6 }
0x2eda   :  { %5799 = vmatprep.subr.mxu1 %v5726_v58 }
0x2edb   :  { %5800 = vmatpush1.msra.mxu1 %v5725_v35 }
0x2edc   :  { %9136 = vmatprep.subr.mxu1 %v12386_v14 }
0x2f8c   :  { %v5585_v29 = vpop.f32.mrf.mxu1 }
0x2f8d   :  { %v5589_v48 = vadd.f32 %v5585_v29, %v5515_v59  ;;  %v11676_v59 = vld [vmem:[%s12306_s18] sm:$0xff] }
0x2f8e   :  { %v9097_v61 = vpop.f32.mrf.mxu1 }
0x2f8f   :  { %9519 = vtanh.f32 %v5589_v48 }
0x2f9c   :  { %v9520_v39 = vpop.eup %9519 }
0x2f9d   :  { %v5591_v37 = vmul.f32 %v9520_v39, %v11105_v46  ;;  %v5743_v39 = vld [vmem:[#allocation6 + $0x8] sm:$0xff] }
0x2f9f   :  { %v5592_v30 = vadd.f32 %v5591_v37, %v11107_v28  ;;  %v5744_v37 = vld [vmem:[#allocation6 + $0x10] sm:$0xff] }
0x2fa1   :  { %5595 = vrot.lane.b32.xlu0 %v5592_v30, %s9650_s11  ;;  %v5593_v1 = vmul.f32 %v5592_v30, %v5497_v52 }
0x3013   :  { %v5596_v19 = vpop.permute.xlu0 %5595 }
0x3014   :  { %v5598_v33 = vmul.f32 %v5596_v19, %v5592_v30 }
0x3016   :  { %5600 = vrot.lane.b32.xlu1 %v5598_v33, %s9651_s7 }
0x3088   :  { %v5601_v4 = vpop.permute.xlu1 %5600 }
0x3089   :  { %v5603_v24 = vadd.f32 %v5601_v4, %v5593_v1  ;;  %v5741_v1 = vld [vmem:[%s12307_s17] sm:$0x3] }
0x308a   :  { %v5750_v4 = vrot.slane %v5741_v1, %v1963_v47 }
0x308b   :  { %9521 = vtanh.f32 %v5603_v24 }
0x3098   :  { %v9522_v49 = vpop.eup %9521 }
0x3099   :  { %5606 = vrot.lane.b32.xlu0 %v9522_v49, %s9650_s11 }
0x310b   :  { %v5607_v27 = vpop.permute.xlu0 %5606 }
0x310c   :  { %v5609_v15 = vmul.f32 %v5607_v27, %v5592_v30 }
0x310e   :  { %5614 = vrot.lane.b32.xlu0 %v5609_v15, %s9650_s11  ;;  %5611 = vrot.lane.b32.xlu1 %v5609_v15, %s9651_s7 }
0x3180   :  { %v5615_v13 = vpop.permute.xlu0 %5614  ;;  %v5612_v12 = vpop.permute.xlu1 %5611 }
0x3181   :  { %5620 = vst.msk [vmem:[#allocation6] sm:$0xc] %vm4135_vm0, %v5615_v13  ;;  %v5617_v18 = vsel %vm1293_vm12, %v5612_v12, %v5615_v13 }
0x3182   :  { %5619 = vst.msk [vmem:[#allocation6 + $0x1c] sm:$0x3] %vm4133_vm4, %v5612_v12  ;;  %v5618_v42 = vmul.f32 %v11119_v57, %v5617_v18 }
0x3184   :  { %9115 = vmatmul.mubr.msk.f32.vlgmr.msra.gmra.mxu0 %vm619_vm1, %v5618_v42 }
0x3185   :  { %9133 = vmatprep.mubr.msk.f32.mxu0 %vm9648_vm3, %v12386_v14  ;;  %9118 = vmatpush3.msra.mxu0 %v11629_v62 }
0x3186   :  { %9119 = vmatprep.subr.mxu0 %v12386_v14 }
0x3187   :  { %9120 = vmatpush3.msra.mxu0 %v11634_v34 }
0x3188   :  { %9121 = vmatprep.subr.mxu0 %v12386_v14 }
0x3189   :  { %9122 = vmatpush3.msra.mxu0 %v11642_v23 }
0x318a   :  { %9123 = vmatprep.subr.mxu0 %v12386_v14 }
0x318b   :  { %9124 = vmatpush3.msra.mxu0 %v11648_v25 }
0x318c   :  { %9125 = vmatprep.subr.mxu0 %v12386_v14 }
0x318d   :  { %9126 = vmatpush3.msra.mxu0 %v11655_v8 }
0x318e   :  { %9127 = vmatprep.subr.mxu0 %v12386_v14 }
0x318f   :  { %9128 = vmatpush3.msra.mxu0 %v11662_v53 }
0x3190   :  { %9129 = vmatprep.subr.mxu0 %v12386_v14 }
0x3191   :  { %9130 = vmatpush3.msra.mxu0 %v11669_v41 }
0x3192   :  { %9131 = vmatprep.subr.mxu0 %v12386_v14 }
0x3193   :  { %9132 = vmatpush3.msra.mxu0 %v11676_v59 }
0x3194   :  { %9134 = vmatmul.mubr.f32.vlgmr.msra.gmra.mxu0 %v12386_v14  ;;  %9155 = vmatprep.subr.mxu0 %v12386_v14 }
0x3195   :  { %9156 = vmatpush3.msra.mxu0 %v11629_v62  ;;  %9171 = vmatprep.mubr.msk.f32.mxu0 %vm9648_vm3, %v12386_v14 }
0x3196   :  { %9157 = vmatprep.subr.mxu0 %v12386_v14 }
0x3197   :  { %9158 = vmatpush3.msra.mxu0 %v11634_v34 }
0x3198   :  { %9159 = vmatprep.subr.mxu0 %v12386_v14 }
0x3199   :  { %9160 = vmatpush3.msra.mxu0 %v11642_v23 }
0x319a   :  { %9161 = vmatprep.subr.mxu0 %v12386_v14 }
0x319b   :  { %9162 = vmatpush3.msra.mxu0 %v11648_v25 }
0x319c   :  { %9163 = vmatprep.subr.mxu0 %v12386_v14 }
0x319d   :  { %9164 = vmatpush3.msra.mxu0 %v11655_v8 }
0x319e   :  { %9165 = vmatprep.subr.mxu0 %v12386_v14 }
0x319f   :  { %9166 = vmatpush3.msra.mxu0 %v11662_v53 }
0x31a0   :  { %9167 = vmatprep.subr.mxu0 %v12386_v14 }
0x31a1   :  { %9168 = vmatpush3.msra.mxu0 %v11669_v41 }
0x31a2   :  { %9169 = vmatprep.subr.mxu0 %v12386_v14 }
0x31a3   :  { %9170 = vmatpush3.msra.mxu0 %v11676_v59 }
0x31a4   :  { %9193 = vmatprep.subr.mxu0 %v12386_v14 }
0x3244   :  { %v5691_v0 = vpop.f32.mrf.mxu0 }
0x3245   :  { %v5695_v40 = vadd.f32 %v5691_v0, %v5621_v32 }
0x3246   :  { %v9116_v54 = vpop.f32.mrf.mxu0 }
0x3247   :  { %9523 = vtanh.f32 %v5695_v40 }
0x3254   :  { %v9524_v17 = vpop.eup %9523  ;;  %v5965_v19 = vpop.f32.mrf.mxu0 }
0x3255   :  { %v5697_v31 = vmul.f32 %v9524_v17, %v11105_v46 }
0x3256   :  { %v9135_v33 = vpop.f32.mrf.mxu0 }
0x3257   :  { %v5698_v60 = vadd.f32 %v5697_v31, %v11107_v28 }
0x3259   :  { %5701 = vrot.lane.b32.xlu1 %v5698_v60, %s9650_s11  ;;  %v5699_v55 = vmul.f32 %v5698_v60, %v5603_v24  ;;  %v5754_v24 = vrot.slane %v5741_v1, %v1967_v5 }
0x32cb   :  { %v5702_v10 = vpop.permute.xlu1 %5701 }
0x32cc   :  { %v5704_v2 = vmul.f32 %v5702_v10, %v5698_v60 }
0x32ce   :  { %5706 = vrot.lane.b32.xlu0 %v5704_v2, %s9651_s7 }
0x3340   :  { %v5707_v44 = vpop.permute.xlu0 %5706 }
0x3341   :  { %v5709_v22 = vadd.f32 %v5707_v44, %v5699_v55 }
0x3343   :  { %9525 = vtanh.f32 %v5709_v22 }
0x3350   :  { %v9526_v3 = vpop.eup %9525 }
0x3351   :  { %5712 = vrot.lane.b32.xlu1 %v9526_v3, %s9650_s11 }
0x33c3   :  { %v5713_v21 = vpop.permute.xlu1 %5712 }
0x33c4   :  { %v5715_v52 = vmul.f32 %v5713_v21, %v5698_v60 }
0x33c6   :  { %5717 = vrot.lane.b32.xlu1 %v5715_v52, %s9651_s7  ;;  %5721 = vrot.lane.b32.xlu0 %v5715_v52, %s9650_s11 }
0x3438   :  { %v5718_v29 = vpop.permute.xlu1 %5717  ;;  %v5722_v48 = vpop.permute.xlu0 %5721 }
0x3439   :  { %5720 = vst.msk [vmem:[#allocation6 + $0x1e] sm:$0x3] %vm4133_vm4, %v5718_v29 }
0x343a   :  { %5724 = vst.msk [vmem:[#allocation6 - $0x2] sm:$0xc] %vm4135_vm0, %v5722_v48 }
0x3440   :  { %v5745_v30 = vld [vmem:[#allocation6 + $0x18] sm:$0xff] }
0x3441   :  { %v5742_v61 = vld [vmem:[#allocation6] sm:$0xff] }
0x3442   :  { %8125 = vmatmul.mubr.msk.f32.vlgmr.msra.gmra.mxu1 %vm619_vm1, %v5742_v61 }
0x3443   :  { %5839 = vmatprep.mubr.f32.mxu1 %v12386_v14  ;;  %9137 = vmatpush3.msra.mxu1 %v11629_v62 }
0x3444   :  { %9138 = vmatprep.subr.mxu1 %v12386_v14 }
0x3445   :  { %9139 = vmatpush3.msra.mxu1 %v11634_v34 }
0x3446   :  { %8126 = vmatmul.mubr.msk.f32.gmra.mxu1 %vm619_vm1, %v5743_v39  ;;  %9140 = vmatprep.subr.mxu1 %v12386_v14 }
0x3447   :  { %5845 = vmatprep.mubr.f32.mxu1 %v12386_v14  ;;  %9141 = vmatpush3.msra.mxu1 %v11642_v23 }
0x3448   :  { %9142 = vmatprep.subr.mxu1 %v12386_v14 }
0x3449   :  { %9143 = vmatpush3.msra.mxu1 %v11648_v25 }
0x344a   :  { %8127 = vmatmul.mubr.msk.f32.gmra.mxu1 %vm619_vm1, %v5744_v37  ;;  %9144 = vmatprep.subr.mxu1 %v12386_v14 }
0x344b   :  { %5851 = vmatprep.mubr.f32.mxu1 %v12386_v14  ;;  %9145 = vmatpush3.msra.mxu1 %v11655_v8 }
0x344c   :  { %9146 = vmatprep.subr.mxu1 %v12386_v14 }
0x344d   :  { %9147 = vmatpush3.msra.mxu1 %v11662_v53 }
0x344e   :  { %8128 = vmatmul.mubr.msk.f32.gmra.mxu1 %vm619_vm1, %v5745_v30  ;;  %9148 = vmatprep.subr.mxu1 %v12386_v14 }
0x344f   :  { %9149 = vmatpush3.msra.mxu1 %v11669_v41  ;;  %9152 = vmatprep.mubr.msk.f32.mxu1 %vm9648_vm3, %v12386_v14 }
0x3450   :  { %9150 = vmatprep.subr.mxu1 %v12386_v14 }
0x3451   :  { %9151 = vmatpush3.msra.mxu1 %v11676_v59 }
0x3452   :  { %9174 = vmatprep.subr.mxu1 %v12386_v14 }
0x3502   :  { %v5835_v49 = vpop.f32.mrf.mxu1 }
0x3503   :  { %v5836_v27 = vadd.f32 %v5835_v49, %v5750_v4 }
0x3504   :  { %v5837_v15 = vpop.f32.mrf.mxu1 }
0x3505   :  { %5858 = vst [vmem:[#allocation5] ss:$8 sps:$4 sm:$0x33] %v5836_v27   ;;  %5860 = vst [vmem:[#allocation5 + $0x2] ss:$8 sps:$4 sm:$0xcc] %v5836_v27   ;;  %v5838_v13 = vadd.f32 %v5837_v15, %v5754_v24 }
0x3506   :  { %v5841_v12 = vpop.f32.mrf.mxu1 }
0x3507   :  { %5883 = vst [vmem:[#allocation5 + $0x38] ss:$-8 sps:$4 sm:$0xcc] %v5838_v13   ;;  %5885 = vst [vmem:[#allocation5 + $0x3e] ss:$-8 sps:$4 sm:$0x33] %v5838_v13   ;;  %v5842_v18 = vadd.f32 %v5841_v12, %v5750_v4 }
0x3508   :  { %v5843_v42 = vpop.f32.mrf.mxu1 }
0x3509   :  { %5866 = vst [vmem:[#allocation5 + $0x10] ss:$8 sps:$4 sm:$0x33] %v5842_v18   ;;  %5868 = vst [vmem:[#allocation5 + $0x12] ss:$8 sps:$4 sm:$0xcc] %v5842_v18   ;;  %v5844_v32 = vadd.f32 %v5843_v42, %v5754_v24 }
0x350a   :  { %v5847_v0 = vpop.f32.mrf.mxu1 }
0x350b   :  { %5875 = vst [vmem:[#allocation5 + $0x28] ss:$-8 sps:$4 sm:$0xcc] %v5844_v32   ;;  %5877 = vst [vmem:[#allocation5 + $0x2e] ss:$-8 sps:$4 sm:$0x33] %v5844_v32   ;;  %v5848_v47 = vadd.f32 %v5847_v0, %v5750_v4 }
0x350c   :  { %v5849_v45 = vpop.f32.mrf.mxu1 }
0x350d   :  { %5874 = vst [vmem:[#allocation5 + $0x20] ss:$8 sps:$4 sm:$0x33] %v5848_v47   ;;  %5876 = vst [vmem:[#allocation5 + $0x22] ss:$8 sps:$4 sm:$0xcc] %v5848_v47   ;;  %v5850_v5 = vadd.f32 %v5849_v45, %v5754_v24 }
0x350e   :  { %v5853_v40 = vpop.f32.mrf.mxu1 }
0x350f   :  { %5867 = vst [vmem:[#allocation5 + $0x18] ss:$-8 sps:$4 sm:$0xcc] %v5850_v5   ;;  %5869 = vst [vmem:[#allocation5 + $0x1e] ss:$-8 sps:$4 sm:$0x33] %v5850_v5   ;;  %v5854_v54 = vadd.f32 %v5853_v40, %v5750_v4 }
0x3510   :  { %v5855_v17 = vpop.f32.mrf.mxu1 }
0x3511   :  { %5882 = vst [vmem:[#allocation5 + $0x30] ss:$8 sps:$4 sm:$0x33] %v5854_v54   ;;  %5884 = vst [vmem:[#allocation5 + $0x32] ss:$8 sps:$4 sm:$0xcc] %v5854_v54   ;;  %v5856_v31 = vadd.f32 %v5855_v17, %v5754_v24 }
0x3513   :  { %5859 = vst [vmem:[#allocation5 + $0x8] ss:$-8 sps:$4 sm:$0xcc] %v5856_v31   ;;  %5861 = vst [vmem:[#allocation5 + $0xe] ss:$-8 sps:$4 sm:$0x33] %v5856_v31  }
0x351a   :  { %v5898_v60 = vld [vmem:[#allocation5] sm:$0xf]  ;;  %v6001_v50 = vld [vmem:[#allocation5 + $0x4] sm:$0xf]  ;;  %v6107_v49 = vld [vmem:[#allocation5 + $0x8] sm:$0xf] }
0x351b   :  { %v5969_v10 = vadd.f32 %v5965_v19, %v5898_v60 }
0x351d   :  { %9527 = vtanh.f32 %v5969_v10 }
0x352a   :  { %v9528_v2 = vpop.eup %9527 }
0x352b   :  { %v5971_v55 = vmul.f32 %v9528_v2, %v11105_v46 }
0x352d   :  { %v5972_v44 = vadd.f32 %v5971_v55, %v11107_v28  ;;  %v6213_v55 = vld [vmem:[#allocation5 + $0xc] sm:$0xf] }
0x352f   :  { %5975 = vrot.lane.b32.xlu0 %v5972_v44, %s9650_s11  ;;  %v5973_v51 = vmul.f32 0.0, %v5972_v44 }
0x35a1   :  { %v5976_v22 = vpop.permute.xlu0 %5975 }
0x35a2   :  { %v5978_v11 = vmul.f32 %v5976_v22, %v5972_v44 }
0x35a4   :  { %5980 = vrot.lane.b32.xlu1 %v5978_v11, %s9651_s7 }
0x3616   :  { %v5981_v7 = vpop.permute.xlu1 %5980 }
0x3617   :  { %v5983_v63 = vadd.f32 %v5981_v7, %v5973_v51 }
0x3619   :  { %9529 = vtanh.f32 %v5983_v63 }
0x3626   :  { %v9530_v9 = vpop.eup %9529 }
0x3627   :  { %5986 = vrot.lane.b32.xlu0 %v9530_v9, %s9650_s11 }
0x3699   :  { %v5987_v26 = vpop.permute.xlu0 %5986 }
0x369a   :  { %v5989_v16 = vmul.f32 %v5987_v26, %v5972_v44 }
0x369c   :  { %5994 = vrot.lane.b32.xlu0 %v5989_v16, %s9650_s11  ;;  %5991 = vrot.lane.b32.xlu1 %v5989_v16, %s9651_s7 }
0x370e   :  { %v5995_v38 = vpop.permute.xlu0 %5994  ;;  %v5992_v3 = vpop.permute.xlu1 %5991 }
0x370f   :  { %6000 = vst.msk [vmem:[#allocation6 + $0x1c] sm:$0xc] %vm4135_vm0, %v5995_v38  ;;  %v5997_v20 = vsel %vm1293_vm12, %v5992_v3, %v5995_v38 }
0x3710   :  { %5999 = vst.msk [vmem:[#allocation6] sm:$0x3] %vm4133_vm4, %v5992_v3  ;;  %v5998_v36 = vmul.f32 %v11119_v57, %v5997_v20 }
0x3712   :  { %9153 = vmatmul.mubr.msk.f32.vlgmr.msra.gmra.mxu1 %vm619_vm1, %v5998_v36 }
0x3713   :  { %9175 = vmatpush3.msra.mxu1 %v11629_v62  ;;  %9190 = vmatprep.mubr.msk.f32.mxu1 %vm9648_vm3, %v12386_v14 }
0x3714   :  { %9176 = vmatprep.subr.mxu1 %v12386_v14 }
0x3715   :  { %9177 = vmatpush3.msra.mxu1 %v11634_v34 }
0x3716   :  { %9178 = vmatprep.subr.mxu1 %v12386_v14 }
0x3717   :  { %9179 = vmatpush3.msra.mxu1 %v11642_v23 }
0x3718   :  { %9180 = vmatprep.subr.mxu1 %v12386_v14 }
0x3719   :  { %9181 = vmatpush3.msra.mxu1 %v11648_v25 }
0x371a   :  { %9182 = vmatprep.subr.mxu1 %v12386_v14 }
0x371b   :  { %9183 = vmatpush3.msra.mxu1 %v11655_v8 }
0x371c   :  { %9184 = vmatprep.subr.mxu1 %v12386_v14 }
0x371d   :  { %9185 = vmatpush3.msra.mxu1 %v11662_v53 }
0x371e   :  { %9186 = vmatprep.subr.mxu1 %v12386_v14 }
0x371f   :  { %9187 = vmatpush3.msra.mxu1 %v11669_v41 }
0x3720   :  { %9188 = vmatprep.subr.mxu1 %v12386_v14 }
0x3721   :  { %9189 = vmatpush3.msra.mxu1 %v11676_v59 }
0x3722   :  { %9212 = vmatprep.subr.mxu1 %v12386_v14 }
0x37d2   :  { %v6071_v43 = vpop.f32.mrf.mxu1 }
0x37d3   :  { %v6075_v56 = vadd.f32 %v6071_v43, %v6001_v50 }
0x37d4   :  { %v9154_v6 = vpop.f32.mrf.mxu1 }
0x37d5   :  { %9531 = vtanh.f32 %v6075_v56 }
0x37e2   :  { %v9532_v58 = vpop.eup %9531 }
0x37e3   :  { %v6077_v35 = vmul.f32 %v9532_v58, %v11105_v46 }
0x37e5   :  { %v6078_v21 = vadd.f32 %v6077_v35, %v11107_v28  ;;  %v6319_v35 = vld [vmem:[#allocation5 + $0x10] sm:$0xf] }
0x37e7   :  { %6081 = vrot.lane.b32.xlu1 %v6078_v21, %s9650_s11  ;;  %v6079_v48 = vmul.f32 %v6078_v21, %v5983_v63 }
0x3859   :  { %v6082_v52 = vpop.permute.xlu1 %6081 }
0x385a   :  { %v6084_v29 = vmul.f32 %v6082_v52, %v6078_v21 }
0x385c   :  { %6086 = vrot.lane.b32.xlu0 %v6084_v29, %s9651_s7 }
0x38ce   :  { %v6087_v61 = vpop.permute.xlu0 %6086 }
0x38cf   :  { %v6089_v39 = vadd.f32 %v6087_v61, %v6079_v48 }
0x38d1   :  { %9533 = vtanh.f32 %v6089_v39 }
0x38de   :  { %v9534_v37 = vpop.eup %9533 }
0x38df   :  { %6092 = vrot.lane.b32.xlu1 %v9534_v37, %s9650_s11 }
0x3951   :  { %v6093_v30 = vpop.permute.xlu1 %6092 }
0x3952   :  { %v6095_v19 = vmul.f32 %v6093_v30, %v6078_v21 }
0x3954   :  { %6100 = vrot.lane.b32.xlu1 %v6095_v19, %s9650_s11  ;;  %6097 = vrot.lane.b32.xlu0 %v6095_v19, %s9651_s7 }
0x39c6   :  { %v6101_v33 = vpop.permute.xlu1 %6100  ;;  %v6098_v1 = vpop.permute.xlu0 %6097 }
0x39c7   :  { %6106 = vst.msk [vmem:[#allocation6 + $0x1a] sm:$0xc] %vm4135_vm0, %v6101_v33  ;;  %v6103_v4 = vsel %vm1293_vm12, %v6098_v1, %v6101_v33 }
0x39c8   :  { %6105 = vst.msk [vmem:[#allocation6 + $0x2] sm:$0x3] %vm4133_vm4, %v6098_v1  ;;  %v6104_v24 = vmul.f32 %v11119_v57, %v6103_v4 }
0x39ca   :  { %9172 = vmatmul.mubr.msk.f32.vlgmr.msra.gmra.mxu0 %vm619_vm1, %v6104_v24 }
0x39cb   :  { %9194 = vmatpush3.msra.mxu0 %v11629_v62  ;;  %9209 = vmatprep.mubr.msk.f32.mxu0 %vm9648_vm3, %v12386_v14 }
0x39cc   :  { %9195 = vmatprep.subr.mxu0 %v12386_v14 }
0x39cd   :  { %9196 = vmatpush3.msra.mxu0 %v11634_v34 }
0x39ce   :  { %9197 = vmatprep.subr.mxu0 %v12386_v14 }
0x39cf   :  { %9198 = vmatpush3.msra.mxu0 %v11642_v23 }
0x39d0   :  { %9199 = vmatprep.subr.mxu0 %v12386_v14 }
0x39d1   :  { %9200 = vmatpush3.msra.mxu0 %v11648_v25 }
0x39d2   :  { %9201 = vmatprep.subr.mxu0 %v12386_v14 }
0x39d3   :  { %9202 = vmatpush3.msra.mxu0 %v11655_v8 }
0x39d4   :  { %9203 = vmatprep.subr.mxu0 %v12386_v14 }
0x39d5   :  { %9204 = vmatpush3.msra.mxu0 %v11662_v53 }
0x39d6   :  { %9205 = vmatprep.subr.mxu0 %v12386_v14 }
0x39d7   :  { %9206 = vmatpush3.msra.mxu0 %v11669_v41 }
0x39d8   :  { %9207 = vmatprep.subr.mxu0 %v12386_v14 }
0x39d9   :  { %9208 = vmatpush3.msra.mxu0 %v11676_v59 }
0x39da   :  { %9231 = vmatprep.subr.mxu0 %v12386_v14 }
0x3a8a   :  { %v6177_v27 = vpop.f32.mrf.mxu0 }
0x3a8b   :  { %v6181_v15 = vadd.f32 %v6177_v27, %v6107_v49 }
0x3a8c   :  { %v9173_v13 = vpop.f32.mrf.mxu0 }
0x3a8d   :  { %9535 = vtanh.f32 %v6181_v15 }
0x3a9a   :  { %v9536_v12 = vpop.eup %9535 }
0x3a9b   :  { %v6183_v18 = vmul.f32 %v9536_v12, %v11105_v46 }
0x3a9d   :  { %v6184_v42 = vadd.f32 %v6183_v18, %v11107_v28  ;;  %v6425_v18 = vld [vmem:[#allocation5 + $0x14] sm:$0xf] }
0x3a9f   :  { %6187 = vrot.lane.b32.xlu0 %v6184_v42, %s9650_s11  ;;  %v6185_v47 = vmul.f32 %v6184_v42, %v6089_v39 }
0x3b11   :  { %v6188_v32 = vpop.permute.xlu0 %6187 }
0x3b12   :  { %v6190_v0 = vmul.f32 %v6188_v32, %v6184_v42 }
0x3b14   :  { %6192 = vrot.lane.b32.xlu1 %v6190_v0, %s9651_s7 }
0x3b86   :  { %v6193_v45 = vpop.permute.xlu1 %6192 }
0x3b87   :  { %v6195_v5 = vadd.f32 %v6193_v45, %v6185_v47 }
0x3b89   :  { %9537 = vtanh.f32 %v6195_v5 }
0x3b96   :  { %v9538_v40 = vpop.eup %9537 }
0x3b97   :  { %6198 = vrot.lane.b32.xlu0 %v9538_v40, %s9650_s11 }
0x3c09   :  { %v6199_v54 = vpop.permute.xlu0 %6198 }
0x3c0a   :  { %v6201_v17 = vmul.f32 %v6199_v54, %v6184_v42 }
0x3c0c   :  { %6206 = vrot.lane.b32.xlu0 %v6201_v17, %s9650_s11  ;;  %6203 = vrot.lane.b32.xlu1 %v6201_v17, %s9651_s7 }
0x3c7e   :  { %v6207_v31 = vpop.permute.xlu0 %6206  ;;  %v6204_v60 = vpop.permute.xlu1 %6203 }
0x3c7f   :  { %6212 = vst.msk [vmem:[#allocation6 + $0x18] sm:$0xc] %vm4135_vm0, %v6207_v31  ;;  %v6209_v10 = vsel %vm1293_vm12, %v6204_v60, %v6207_v31 }
0x3c80   :  { %6211 = vst.msk [vmem:[#allocation6 + $0x4] sm:$0x3] %vm4133_vm4, %v6204_v60  ;;  %v6210_v2 = vmul.f32 %v11119_v57, %v6209_v10 }
0x3c82   :  { %9191 = vmatmul.mubr.msk.f32.vlgmr.msra.gmra.mxu1 %vm619_vm1, %v6210_v2 }
0x3c83   :  { %9213 = vmatpush3.msra.mxu1 %v11629_v62  ;;  %9228 = vmatprep.mubr.msk.f32.mxu1 %vm9648_vm3, %v12386_v14 }
0x3c84   :  { %9214 = vmatprep.subr.mxu1 %v12386_v14 }
0x3c85   :  { %9215 = vmatpush3.msra.mxu1 %v11634_v34 }
0x3c86   :  { %9216 = vmatprep.subr.mxu1 %v12386_v14 }
0x3c87   :  { %9217 = vmatpush3.msra.mxu1 %v11642_v23 }
0x3c88   :  { %9218 = vmatprep.subr.mxu1 %v12386_v14 }
0x3c89   :  { %9219 = vmatpush3.msra.mxu1 %v11648_v25 }
0x3c8a   :  { %9220 = vmatprep.subr.mxu1 %v12386_v14 }
0x3c8b   :  { %9221 = vmatpush3.msra.mxu1 %v11655_v8 }
0x3c8c   :  { %9222 = vmatprep.subr.mxu1 %v12386_v14 }
0x3c8d   :  { %9223 = vmatpush3.msra.mxu1 %v11662_v53 }
0x3c8e   :  { %9224 = vmatprep.subr.mxu1 %v12386_v14 }
0x3c8f   :  { %9225 = vmatpush3.msra.mxu1 %v11669_v41 }
0x3c90   :  { %9226 = vmatprep.subr.mxu1 %v12386_v14 }
0x3c91   :  { %9227 = vmatpush3.msra.mxu1 %v11676_v59 }
0x3c92   :  { %9250 = vmatprep.subr.mxu1 %v12386_v14 }
0x3d42   :  { %v6283_v44 = vpop.f32.mrf.mxu1 }
0x3d43   :  { %v6287_v22 = vadd.f32 %v6283_v44, %v6213_v55 }
0x3d44   :  { %v9192_v11 = vpop.f32.mrf.mxu1 }
0x3d45   :  { %9539 = vtanh.f32 %v6287_v22 }
0x3d52   :  { %v9540_v51 = vpop.eup %9539 }
0x3d53   :  { %v6289_v7 = vmul.f32 %v9540_v51, %v11105_v46 }
0x3d55   :  { %v6290_v63 = vadd.f32 %v6289_v7, %v11107_v28  ;;  %v6531_v7 = vld [vmem:[#allocation5 + $0x18] sm:$0xf] }
0x3d57   :  { %6293 = vrot.lane.b32.xlu1 %v6290_v63, %s9650_s11  ;;  %v6291_v16 = vmul.f32 %v6290_v63, %v6195_v5 }
0x3dc9   :  { %v6294_v9 = vpop.permute.xlu1 %6293 }
0x3dca   :  { %v6296_v26 = vmul.f32 %v6294_v9, %v6290_v63 }
0x3dcc   :  { %6298 = vrot.lane.b32.xlu0 %v6296_v26, %s9651_s7 }
0x3e3e   :  { %v6299_v38 = vpop.permute.xlu0 %6298 }
0x3e3f   :  { %v6301_v3 = vadd.f32 %v6299_v38, %v6291_v16 }
0x3e41   :  { %9541 = vtanh.f32 %v6301_v3 }
0x3e4e   :  { %v9542_v20 = vpop.eup %9541 }
0x3e4f   :  { %6304 = vrot.lane.b32.xlu1 %v9542_v20, %s9650_s11 }
0x3ec1   :  { %v6305_v36 = vpop.permute.xlu1 %6304 }
0x3ec2   :  { %v6307_v50 = vmul.f32 %v6305_v36, %v6290_v63 }
0x3ec4   :  { %6312 = vrot.lane.b32.xlu1 %v6307_v50, %s9650_s11  ;;  %6309 = vrot.lane.b32.xlu0 %v6307_v50, %s9651_s7 }
0x3f36   :  { %v6313_v43 = vpop.permute.xlu1 %6312  ;;  %v6310_v56 = vpop.permute.xlu0 %6309 }
0x3f37   :  { %6318 = vst.msk [vmem:[#allocation6 + $0x16] sm:$0xc] %vm4135_vm0, %v6313_v43  ;;  %v6315_v6 = vsel %vm1293_vm12, %v6310_v56, %v6313_v43 }
0x3f38   :  { %6317 = vst.msk [vmem:[#allocation6 + $0x6] sm:$0x3] %vm4133_vm4, %v6310_v56  ;;  %v6316_v58 = vmul.f32 %v11119_v57, %v6315_v6 }
0x3f3a   :  { %9210 = vmatmul.mubr.msk.f32.vlgmr.msra.gmra.mxu0 %vm619_vm1, %v6316_v58 }
0x3f3b   :  { %9232 = vmatpush3.msra.mxu0 %v11629_v62  ;;  %9247 = vmatprep.mubr.msk.f32.mxu0 %vm9648_vm3, %v12386_v14 }
0x3f3c   :  { %9233 = vmatprep.subr.mxu0 %v12386_v14 }
0x3f3d   :  { %9234 = vmatpush3.msra.mxu0 %v11634_v34 }
0x3f3e   :  { %9235 = vmatprep.subr.mxu0 %v12386_v14 }
0x3f3f   :  { %9236 = vmatpush3.msra.mxu0 %v11642_v23 }
0x3f40   :  { %9237 = vmatprep.subr.mxu0 %v12386_v14 }
0x3f41   :  { %9238 = vmatpush3.msra.mxu0 %v11648_v25 }
0x3f42   :  { %9239 = vmatprep.subr.mxu0 %v12386_v14 }
0x3f43   :  { %9240 = vmatpush3.msra.mxu0 %v11655_v8 }
0x3f44   :  { %9241 = vmatprep.subr.mxu0 %v12386_v14 }
0x3f45   :  { %9242 = vmatpush3.msra.mxu0 %v11662_v53 }
0x3f46   :  { %9243 = vmatprep.subr.mxu0 %v12386_v14 }
0x3f47   :  { %9244 = vmatpush3.msra.mxu0 %v11669_v41 }
0x3f48   :  { %9245 = vmatprep.subr.mxu0 %v12386_v14 }
0x3f49   :  { %9246 = vmatpush3.msra.mxu0 %v11676_v59 }
0x3f4a   :  { %9269 = vmatprep.subr.mxu0 %v12386_v14 }
0x3ffa   :  { %v6389_v21 = vpop.f32.mrf.mxu0 }
0x3ffb   :  { %v6393_v52 = vadd.f32 %v6389_v21, %v6319_v35 }
0x3ffc   :  { %v9211_v29 = vpop.f32.mrf.mxu0 }
0x3ffd   :  { %9543 = vtanh.f32 %v6393_v52 }
0x400a   :  { %v9544_v48 = vpop.eup %9543 }
0x400b   :  { %v6395_v61 = vmul.f32 %v9544_v48, %v11105_v46 }
0x400d   :  { %v6396_v39 = vadd.f32 %v6395_v61, %v11107_v28  ;;  %v6637_v61 = vld [vmem:[#allocation5 + $0x1c] sm:$0xf] }
0x400f   :  { %6399 = vrot.lane.b32.xlu0 %v6396_v39, %s9650_s11  ;;  %v6397_v19 = vmul.f32 %v6396_v39, %v6301_v3 }
0x4081   :  { %v6400_v37 = vpop.permute.xlu0 %6399 }
0x4082   :  { %v6402_v30 = vmul.f32 %v6400_v37, %v6396_v39 }
0x4084   :  { %6404 = vrot.lane.b32.xlu1 %v6402_v30, %s9651_s7 }
0x40f6   :  { %v6405_v33 = vpop.permute.xlu1 %6404 }
0x40f7   :  { %v6407_v1 = vadd.f32 %v6405_v33, %v6397_v19 }
0x40f9   :  { %9545 = vtanh.f32 %v6407_v1 }
0x4106   :  { %v9546_v4 = vpop.eup %9545 }
0x4107   :  { %6410 = vrot.lane.b32.xlu0 %v9546_v4, %s9650_s11 }
0x4179   :  { %v6411_v24 = vpop.permute.xlu0 %6410 }
0x417a   :  { %v6413_v49 = vmul.f32 %v6411_v24, %v6396_v39 }
0x417c   :  { %6418 = vrot.lane.b32.xlu0 %v6413_v49, %s9650_s11  ;;  %6415 = vrot.lane.b32.xlu1 %v6413_v49, %s9651_s7 }
0x41ee   :  { %v6419_v27 = vpop.permute.xlu0 %6418  ;;  %v6416_v15 = vpop.permute.xlu1 %6415 }
0x41ef   :  { %6424 = vst.msk [vmem:[#allocation6 + $0x14] sm:$0xc] %vm4135_vm0, %v6419_v27  ;;  %v6421_v13 = vsel %vm1293_vm12, %v6416_v15, %v6419_v27 }
0x41f0   :  { %6423 = vst.msk [vmem:[#allocation6 + $0x8] sm:$0x3] %vm4133_vm4, %v6416_v15  ;;  %v6422_v12 = vmul.f32 %v11119_v57, %v6421_v13 }
0x41f2   :  { %9229 = vmatmul.mubr.msk.f32.vlgmr.msra.gmra.mxu1 %vm619_vm1, %v6422_v12 }
0x41f3   :  { %9251 = vmatpush3.msra.mxu1 %v11629_v62  ;;  %9266 = vmatprep.mubr.msk.f32.mxu1 %vm9648_vm3, %v12386_v14 }
0x41f4   :  { %9252 = vmatprep.subr.mxu1 %v12386_v14 }
0x41f5   :  { %9253 = vmatpush3.msra.mxu1 %v11634_v34 }
0x41f6   :  { %9254 = vmatprep.subr.mxu1 %v12386_v14 }
0x41f7   :  { %9255 = vmatpush3.msra.mxu1 %v11642_v23 }
0x41f8   :  { %9256 = vmatprep.subr.mxu1 %v12386_v14 }
0x41f9   :  { %9257 = vmatpush3.msra.mxu1 %v11648_v25 }
0x41fa   :  { %9258 = vmatprep.subr.mxu1 %v12386_v14 }
0x41fb   :  { %9259 = vmatpush3.msra.mxu1 %v11655_v8 }
0x41fc   :  { %9260 = vmatprep.subr.mxu1 %v12386_v14 }
0x41fd   :  { %9261 = vmatpush3.msra.mxu1 %v11662_v53 }
0x41fe   :  { %9262 = vmatprep.subr.mxu1 %v12386_v14 }
0x41ff   :  { %9263 = vmatpush3.msra.mxu1 %v11669_v41 }
0x4200   :  { %9264 = vmatprep.subr.mxu1 %v12386_v14 }
0x4201   :  { %9265 = vmatpush3.msra.mxu1 %v11676_v59 }
0x4202   :  { %9288 = vmatprep.subr.mxu1 %v12386_v14 }
0x42b2   :  { %v6495_v42 = vpop.f32.mrf.mxu1 }
0x42b3   :  { %v6499_v32 = vadd.f32 %v6495_v42, %v6425_v18 }
0x42b4   :  { %v9230_v0 = vpop.f32.mrf.mxu1 }
0x42b5   :  { %9547 = vtanh.f32 %v6499_v32 }
0x42c2   :  { %v9548_v47 = vpop.eup %9547 }
0x42c3   :  { %v6501_v45 = vmul.f32 %v9548_v47, %v11105_v46 }
0x42c5   :  { %v6502_v5 = vadd.f32 %v6501_v45, %v11107_v28  ;;  %v6743_v45 = vld [vmem:[#allocation5 + $0x20] sm:$0xf] }
0x42c7   :  { %6505 = vrot.lane.b32.xlu1 %v6502_v5, %s9650_s11  ;;  %v6503_v17 = vmul.f32 %v6502_v5, %v6407_v1 }
0x4339   :  { %v6506_v40 = vpop.permute.xlu1 %6505 }
0x433a   :  { %v6508_v54 = vmul.f32 %v6506_v40, %v6502_v5 }
0x433c   :  { %6510 = vrot.lane.b32.xlu0 %v6508_v54, %s9651_s7 }
0x43ae   :  { %v6511_v31 = vpop.permute.xlu0 %6510 }
0x43af   :  { %v6513_v60 = vadd.f32 %v6511_v31, %v6503_v17 }
0x43b1   :  { %9549 = vtanh.f32 %v6513_v60 }
0x43be   :  { %v9550_v10 = vpop.eup %9549 }
0x43bf   :  { %6516 = vrot.lane.b32.xlu1 %v9550_v10, %s9650_s11 }
0x4431   :  { %v6517_v2 = vpop.permute.xlu1 %6516 }
0x4432   :  { %v6519_v55 = vmul.f32 %v6517_v2, %v6502_v5 }
0x4434   :  { %6524 = vrot.lane.b32.xlu1 %v6519_v55, %s9650_s11  ;;  %6521 = vrot.lane.b32.xlu0 %v6519_v55, %s9651_s7 }
0x44a6   :  { %v6525_v44 = vpop.permute.xlu1 %6524  ;;  %v6522_v22 = vpop.permute.xlu0 %6521 }
0x44a7   :  { %6530 = vst.msk [vmem:[#allocation6 + $0x12] sm:$0xc] %vm4135_vm0, %v6525_v44  ;;  %v6527_v11 = vsel %vm1293_vm12, %v6522_v22, %v6525_v44 }
0x44a8   :  { %6529 = vst.msk [vmem:[#allocation6 + $0xa] sm:$0x3] %vm4133_vm4, %v6522_v22  ;;  %v6528_v51 = vmul.f32 %v11119_v57, %v6527_v11 }
0x44aa   :  { %9248 = vmatmul.mubr.msk.f32.vlgmr.msra.gmra.mxu0 %vm619_vm1, %v6528_v51 }
0x44ab   :  { %9270 = vmatpush3.msra.mxu0 %v11629_v62  ;;  %9285 = vmatprep.mubr.msk.f32.mxu0 %vm9648_vm3, %v12386_v14 }
0x44ac   :  { %9271 = vmatprep.subr.mxu0 %v12386_v14 }
0x44ad   :  { %9272 = vmatpush3.msra.mxu0 %v11634_v34 }
0x44ae   :  { %9273 = vmatprep.subr.mxu0 %v12386_v14 }
0x44af   :  { %9274 = vmatpush3.msra.mxu0 %v11642_v23 }
0x44b0   :  { %9275 = vmatprep.subr.mxu0 %v12386_v14 }
0x44b1   :  { %9276 = vmatpush3.msra.mxu0 %v11648_v25 }
0x44b2   :  { %9277 = vmatprep.subr.mxu0 %v12386_v14 }
0x44b3   :  { %9278 = vmatpush3.msra.mxu0 %v11655_v8 }
0x44b4   :  { %9279 = vmatprep.subr.mxu0 %v12386_v14 }
0x44b5   :  { %9280 = vmatpush3.msra.mxu0 %v11662_v53 }
0x44b6   :  { %9281 = vmatprep.subr.mxu0 %v12386_v14 }
0x44b7   :  { %9282 = vmatpush3.msra.mxu0 %v11669_v41 }
0x44b8   :  { %9283 = vmatprep.subr.mxu0 %v12386_v14 }
0x44b9   :  { %9284 = vmatpush3.msra.mxu0 %v11676_v59 }
0x44ba   :  { %9307 = vmatprep.subr.mxu0 %v12386_v14 }
0x456a   :  { %v6601_v63 = vpop.f32.mrf.mxu0 }
0x456b   :  { %v6605_v9 = vadd.f32 %v6601_v63, %v6531_v7 }
0x456c   :  { %v9249_v26 = vpop.f32.mrf.mxu0 }
0x456d   :  { %9551 = vtanh.f32 %v6605_v9 }
0x457a   :  { %v9552_v16 = vpop.eup %9551 }
0x457b   :  { %v6607_v38 = vmul.f32 %v9552_v16, %v11105_v46 }
0x457d   :  { %v6608_v3 = vadd.f32 %v6607_v38, %v11107_v28 }
0x457f   :  { %6611 = vrot.lane.b32.xlu0 %v6608_v3, %s9650_s11  ;;  %v6609_v50 = vmul.f32 %v6608_v3, %v6513_v60 }
0x45f1   :  { %v6612_v20 = vpop.permute.xlu0 %6611 }
0x45f2   :  { %v6614_v36 = vmul.f32 %v6612_v20, %v6608_v3 }
0x45f4   :  { %6616 = vrot.lane.b32.xlu1 %v6614_v36, %s9651_s7 }
0x4666   :  { %v6617_v43 = vpop.permute.xlu1 %6616 }
0x4667   :  { %v6619_v56 = vadd.f32 %v6617_v43, %v6609_v50 }
0x4669   :  { %9553 = vtanh.f32 %v6619_v56 }
0x4676   :  { %v9554_v6 = vpop.eup %9553 }
0x4677   :  { %6622 = vrot.lane.b32.xlu0 %v9554_v6, %s9650_s11 }
0x46e9   :  { %v6623_v58 = vpop.permute.xlu0 %6622 }
0x46ea   :  { %v6625_v35 = vmul.f32 %v6623_v58, %v6608_v3 }
0x46ec   :  { %6630 = vrot.lane.b32.xlu0 %v6625_v35, %s9650_s11  ;;  %6627 = vrot.lane.b32.xlu1 %v6625_v35, %s9651_s7 }
0x475e   :  { %v6631_v21 = vpop.permute.xlu0 %6630  ;;  %v6628_v52 = vpop.permute.xlu1 %6627 }
0x475f   :  { %6636 = vst.msk [vmem:[#allocation6 + $0x10] sm:$0xc] %vm4135_vm0, %v6631_v21  ;;  %v6633_v29 = vsel %vm1293_vm12, %v6628_v52, %v6631_v21 }
0x4760   :  { %6635 = vst.msk [vmem:[#allocation6 + $0xc] sm:$0x3] %vm4133_vm4, %v6628_v52  ;;  %v6634_v48 = vmul.f32 %v11119_v57, %v6633_v29  ;;  %v12020_v52 = vld [vmem:[%s12306_s18 + $0x38] sm:$0xff]  ;;  %v12029_v29 = vld [vmem:[%s12306_s18 + $0x30] sm:$0xff] }
0x4762   :  { %9267 = vmatmul.mubr.msk.f32.vlgmr.msra.gmra.mxu1 %vm619_vm1, %v6634_v48  ;;  %v12036_v48 = vld [vmem:[%s12306_s18 + $0x28] sm:$0xff] }
0x4763   :  { %9289 = vmatpush3.msra.mxu1 %v11629_v62  ;;  %9304 = vmatprep.mubr.msk.f32.mxu1 %vm9648_vm3, %v12386_v14 }
0x4764   :  { %9290 = vmatprep.subr.mxu1 %v12386_v14 }
0x4765   :  { %9291 = vmatpush3.msra.mxu1 %v11634_v34 }
0x4766   :  { %9292 = vmatprep.subr.mxu1 %v12386_v14 }
0x4767   :  { %9293 = vmatpush3.msra.mxu1 %v11642_v23 }
0x4768   :  { %9294 = vmatprep.subr.mxu1 %v12386_v14 }
0x4769   :  { %9295 = vmatpush3.msra.mxu1 %v11648_v25 }
0x476a   :  { %9296 = vmatprep.subr.mxu1 %v12386_v14 }
0x476b   :  { %9297 = vmatpush3.msra.mxu1 %v11655_v8 }
0x476c   :  { %9298 = vmatprep.subr.mxu1 %v12386_v14 }
0x476d   :  { %9299 = vmatpush3.msra.mxu1 %v11662_v53 }
0x476e   :  { %9300 = vmatprep.subr.mxu1 %v12386_v14 }
0x476f   :  { %9301 = vmatpush3.msra.mxu1 %v11669_v41 }
0x4770   :  { %9302 = vmatprep.subr.mxu1 %v12386_v14 }
0x4771   :  { %9303 = vmatpush3.msra.mxu1 %v11676_v59 }
0x4772   :  { %9326 = vmatprep.subr.mxu1 %v12386_v14 }
0x4822   :  { %v6707_v39 = vpop.f32.mrf.mxu1 }
0x4823   :  { %v6711_v37 = vadd.f32 %v6707_v39, %v6637_v61  ;;  %v12043_v61 = vld [vmem:[%s12306_s18 + $0x20] sm:$0xff]  ;;  %v12050_v39 = vld [vmem:[%s12306_s18 + $0x18] sm:$0xff] }
0x4824   :  { %v9268_v30 = vpop.f32.mrf.mxu1 }
0x4825   :  { %9555 = vtanh.f32 %v6711_v37  ;;  %v12057_v37 = vld [vmem:[%s12306_s18 + $0x10] sm:$0xff]  ;;  %v12064_v30 = vld [vmem:[%s12306_s18 + $0x8] sm:$0xff] }
0x4832   :  { %v9556_v19 = vpop.eup %9555 }
0x4833   :  { %v6713_v33 = vmul.f32 %v9556_v19, %v11105_v46  ;;  %v12071_v19 = vld [vmem:[%s12306_s18] sm:$0xff] }
0x4835   :  { %v6714_v1 = vadd.f32 %v6713_v33, %v11107_v28  ;;  %v6955_v33 = vld [vmem:[#allocation5 + $0x28] sm:$0xf] }
0x4837   :  { %6717 = vrot.lane.b32.xlu1 %v6714_v1, %s9650_s11  ;;  %v6715_v49 = vmul.f32 %v6714_v1, %v6619_v56 }
0x48a9   :  { %v6718_v4 = vpop.permute.xlu1 %6717 }
0x48aa   :  { %v6720_v24 = vmul.f32 %v6718_v4, %v6714_v1 }
0x48ac   :  { %6722 = vrot.lane.b32.xlu0 %v6720_v24, %s9651_s7 }
0x491e   :  { %v6723_v27 = vpop.permute.xlu0 %6722 }
0x491f   :  { %v6725_v15 = vadd.f32 %v6723_v27, %v6715_v49 }
0x4921   :  { %9557 = vtanh.f32 %v6725_v15 }
0x492e   :  { %v9558_v13 = vpop.eup %9557 }
0x492f   :  { %6728 = vrot.lane.b32.xlu1 %v9558_v13, %s9650_s11 }
0x49a1   :  { %v6729_v12 = vpop.permute.xlu1 %6728 }
0x49a2   :  { %v6731_v18 = vmul.f32 %v6729_v12, %v6714_v1 }
0x49a4   :  { %6736 = vrot.lane.b32.xlu1 %v6731_v18, %s9650_s11  ;;  %6733 = vrot.lane.b32.xlu0 %v6731_v18, %s9651_s7 }
0x4a16   :  { %v6737_v42 = vpop.permute.xlu1 %6736  ;;  %v6734_v32 = vpop.permute.xlu0 %6733 }
0x4a17   :  { %6742 = vst.msk [vmem:[#allocation6 + $0xe] sm:$0xc] %vm4135_vm0, %v6737_v42  ;;  %v6739_v0 = vsel %vm1293_vm12, %v6734_v32, %v6737_v42 }
0x4a18   :  { %6741 = vst.msk [vmem:[#allocation6 + $0xe] sm:$0x3] %vm4133_vm4, %v6734_v32  ;;  %v6740_v47 = vmul.f32 %v11119_v57, %v6739_v0 }
0x4a1a   :  { %9286 = vmatmul.mubr.msk.f32.vlgmr.msra.gmra.mxu0 %vm619_vm1, %v6740_v47 }
0x4a1b   :  { %9308 = vmatpush3.msra.mxu0 %v11629_v62  ;;  %9323 = vmatprep.mubr.msk.f32.mxu0 %vm9648_vm3, %v12386_v14 }
0x4a1c   :  { %9309 = vmatprep.subr.mxu0 %v12386_v14 }
0x4a1d   :  { %9310 = vmatpush3.msra.mxu0 %v11634_v34 }
0x4a1e   :  { %9311 = vmatprep.subr.mxu0 %v12386_v14 }
0x4a1f   :  { %9312 = vmatpush3.msra.mxu0 %v11642_v23 }
0x4a20   :  { %9313 = vmatprep.subr.mxu0 %v12386_v14 }
0x4a21   :  { %9314 = vmatpush3.msra.mxu0 %v11648_v25 }
0x4a22   :  { %9315 = vmatprep.subr.mxu0 %v12386_v14 }
0x4a23   :  { %9316 = vmatpush3.msra.mxu0 %v11655_v8 }
0x4a24   :  { %9317 = vmatprep.subr.mxu0 %v12386_v14 }
0x4a25   :  { %9318 = vmatpush3.msra.mxu0 %v11662_v53 }
0x4a26   :  { %9319 = vmatprep.subr.mxu0 %v12386_v14 }
0x4a27   :  { %9320 = vmatpush3.msra.mxu0 %v11669_v41 }
0x4a28   :  { %9321 = vmatprep.subr.mxu0 %v12386_v14 }
0x4a29   :  { %9322 = vmatpush3.msra.mxu0 %v11676_v59 }
0x4a2a   :  { %9345 = vmatprep.subr.mxu0 %v12386_v14 }
0x4ada   :  { %v6813_v5 = vpop.f32.mrf.mxu0 }
0x4adb   :  { %v6817_v40 = vadd.f32 %v6813_v5, %v6743_v45 }
0x4adc   :  { %v9287_v54 = vpop.f32.mrf.mxu0 }
0x4add   :  { %9559 = vtanh.f32 %v6817_v40 }
0x4aea   :  { %v9560_v17 = vpop.eup %9559 }
0x4aeb   :  { %v6819_v31 = vmul.f32 %v9560_v17, %v11105_v46 }
0x4aed   :  { %v6820_v60 = vadd.f32 %v6819_v31, %v11107_v28  ;;  %v7061_v31 = vld [vmem:[#allocation5 + $0x2c] sm:$0xf] }
0x4aef   :  { %6823 = vrot.lane.b32.xlu0 %v6820_v60, %s9650_s11  ;;  %v6821_v55 = vmul.f32 %v6820_v60, %v6725_v15 }
0x4b61   :  { %v6824_v10 = vpop.permute.xlu0 %6823 }
0x4b62   :  { %v6826_v2 = vmul.f32 %v6824_v10, %v6820_v60 }
0x4b64   :  { %6828 = vrot.lane.b32.xlu1 %v6826_v2, %s9651_s7 }
0x4bd6   :  { %v6829_v44 = vpop.permute.xlu1 %6828 }
0x4bd7   :  { %v6831_v22 = vadd.f32 %v6829_v44, %v6821_v55 }
0x4bd9   :  { %9561 = vtanh.f32 %v6831_v22 }
0x4be6   :  { %v9562_v11 = vpop.eup %9561 }
0x4be7   :  { %6834 = vrot.lane.b32.xlu0 %v9562_v11, %s9650_s11 }
0x4c59   :  { %v6835_v51 = vpop.permute.xlu0 %6834 }
0x4c5a   :  { %v6837_v7 = vmul.f32 %v6835_v51, %v6820_v60 }
0x4c5c   :  { %6842 = vrot.lane.b32.xlu0 %v6837_v7, %s9650_s11  ;;  %6839 = vrot.lane.b32.xlu1 %v6837_v7, %s9651_s7 }
0x4cce   :  { %v6843_v63 = vpop.permute.xlu0 %6842  ;;  %v6840_v9 = vpop.permute.xlu1 %6839 }
0x4ccf   :  { %6848 = vst.msk [vmem:[#allocation6 + $0xc] sm:$0xc] %vm4135_vm0, %v6843_v63  ;;  %v6845_v26 = vsel %vm1293_vm12, %v6840_v9, %v6843_v63 }
0x4cd0   :  { %6847 = vst.msk [vmem:[#allocation6 + $0x10] sm:$0x3] %vm4133_vm4, %v6840_v9  ;;  %v6846_v16 = vmul.f32 %v11119_v57, %v6845_v26 }
0x4cd2   :  { %9305 = vmatmul.mubr.msk.f32.vlgmr.msra.gmra.mxu1 %vm619_vm1, %v6846_v16 }
0x4cd3   :  { %9327 = vmatpush3.msra.mxu1 %v11629_v62  ;;  %9342 = vmatprep.mubr.msk.f32.mxu1 %vm9648_vm3, %v12386_v14  ;;  %v6849_v62 = vld [vmem:[#allocation5 + $0x24] sm:$0xf] }
0x4cd4   :  { %9328 = vmatprep.subr.mxu1 %v12386_v14 }
0x4cd5   :  { %9329 = vmatpush3.msra.mxu1 %v11634_v34 }
0x4cd6   :  { %9330 = vmatprep.subr.mxu1 %v12386_v14 }
0x4cd7   :  { %9331 = vmatpush3.msra.mxu1 %v11642_v23 }
0x4cd8   :  { %9332 = vmatprep.subr.mxu1 %v12386_v14 }
0x4cd9   :  { %9333 = vmatpush3.msra.mxu1 %v11648_v25 }
0x4cda   :  { %9334 = vmatprep.subr.mxu1 %v12386_v14 }
0x4cdb   :  { %9335 = vmatpush3.msra.mxu1 %v11655_v8 }
0x4cdc   :  { %9336 = vmatprep.subr.mxu1 %v12386_v14 }
0x4cdd   :  { %9337 = vmatpush3.msra.mxu1 %v11662_v53 }
0x4cde   :  { %9338 = vmatprep.subr.mxu1 %v12386_v14 }
0x4cdf   :  { %9339 = vmatpush3.msra.mxu1 %v11669_v41 }
0x4ce0   :  { %9340 = vmatprep.subr.mxu1 %v12386_v14 }
0x4ce1   :  { %9341 = vmatpush3.msra.mxu1 %v11676_v59 }
0x4ce2   :  { %9364 = vmatprep.subr.mxu1 %v12386_v14 }
0x4d92   :  { %v6919_v34 = vpop.f32.mrf.mxu1 }
0x4d93   :  { %v6923_v23 = vadd.f32 %v6919_v34, %v6849_v62 }
0x4d94   :  { %v9306_v25 = vpop.f32.mrf.mxu1 }
0x4d95   :  { %9563 = vtanh.f32 %v6923_v23 }
0x4da2   :  { %v9564_v8 = vpop.eup %9563 }
0x4da3   :  { %v6925_v38 = vmul.f32 %v9564_v8, %v11105_v46 }
0x4da5   :  { %v6926_v53 = vadd.f32 %v6925_v38, %v11107_v28  ;;  %v7167_v38 = vld [vmem:[#allocation5 + $0x30] sm:$0xf] }
0x4da7   :  { %6929 = vrot.lane.b32.xlu1 %v6926_v53, %s9650_s11  ;;  %v6927_v20 = vmul.f32 %v6926_v53, %v6831_v22 }
0x4e19   :  { %v6930_v3 = vpop.permute.xlu1 %6929 }
0x4e1a   :  { %v6932_v41 = vmul.f32 %v6930_v3, %v6926_v53 }
0x4e1c   :  { %6934 = vrot.lane.b32.xlu0 %v6932_v41, %s9651_s7 }
0x4e8e   :  { %v6935_v59 = vpop.permute.xlu0 %6934 }
0x4e8f   :  { %v6937_v36 = vadd.f32 %v6935_v59, %v6927_v20 }
0x4e91   :  { %9565 = vtanh.f32 %v6937_v36 }
0x4e9e   :  { %v9566_v50 = vpop.eup %9565 }
0x4e9f   :  { %6940 = vrot.lane.b32.xlu1 %v9566_v50, %s9650_s11 }
0x4f11   :  { %v6941_v43 = vpop.permute.xlu1 %6940 }
0x4f12   :  { %v6943_v56 = vmul.f32 %v6941_v43, %v6926_v53 }
0x4f14   :  { %6948 = vrot.lane.b32.xlu1 %v6943_v56, %s9650_s11  ;;  %6945 = vrot.lane.b32.xlu0 %v6943_v56, %s9651_s7 }
0x4f86   :  { %v6949_v6 = vpop.permute.xlu1 %6948  ;;  %v6946_v58 = vpop.permute.xlu0 %6945 }
0x4f87   :  { %6954 = vst.msk [vmem:[#allocation6 + $0xa] sm:$0xc] %vm4135_vm0, %v6949_v6  ;;  %v6951_v35 = vsel %vm1293_vm12, %v6946_v58, %v6949_v6 }
0x4f88   :  { %6953 = vst.msk [vmem:[#allocation6 + $0x12] sm:$0x3] %vm4133_vm4, %v6946_v58  ;;  %v6952_v21 = vmul.f32 %v11119_v57, %v6951_v35 }
0x4f8a   :  { %9324 = vmatmul.mubr.msk.f32.vlgmr.msra.gmra.mxu0 %vm619_vm1, %v6952_v21 }
0x4f8b   :  { %9346 = vmatpush3.msra.mxu0 %v12020_v52  ;;  %9361 = vmatprep.mubr.msk.f32.mxu0 %vm9648_vm3, %v12386_v14 }
0x4f8c   :  { %9347 = vmatprep.subr.mxu0 %v12386_v14 }
0x4f8d   :  { %9348 = vmatpush3.msra.mxu0 %v12029_v29 }
0x4f8e   :  { %9349 = vmatprep.subr.mxu0 %v12386_v14 }
0x4f8f   :  { %9350 = vmatpush3.msra.mxu0 %v12036_v48 }
0x4f90   :  { %9351 = vmatprep.subr.mxu0 %v12386_v14 }
0x4f91   :  { %9352 = vmatpush3.msra.mxu0 %v12043_v61 }
0x4f92   :  { %9353 = vmatprep.subr.mxu0 %v12386_v14 }
0x4f93   :  { %9354 = vmatpush3.msra.mxu0 %v12050_v39 }
0x4f94   :  { %9355 = vmatprep.subr.mxu0 %v12386_v14 }
0x4f95   :  { %9356 = vmatpush3.msra.mxu0 %v12057_v37 }
0x4f96   :  { %9357 = vmatprep.subr.mxu0 %v12386_v14 }
0x4f97   :  { %9358 = vmatpush3.msra.mxu0 %v12064_v30 }
0x4f98   :  { %9359 = vmatprep.subr.mxu0 %v12386_v14 }
0x4f99   :  { %9360 = vmatpush3.msra.mxu0 %v12071_v19 }
0x4f9a   :  { %9383 = vmatprep.subr.mxu0 %v12386_v14 }
0x504a   :  { %v7025_v1 = vpop.f32.mrf.mxu0 }
0x504b   :  { %v7029_v4 = vadd.f32 %v7025_v1, %v6955_v33 }
0x504c   :  { %v9325_v24 = vpop.f32.mrf.mxu0 }
0x504d   :  { %9567 = vtanh.f32 %v7029_v4 }
0x505a   :  { %v9568_v49 = vpop.eup %9567 }
0x505b   :  { %v7031_v27 = vmul.f32 %v9568_v49, %v11105_v46 }
0x505d   :  { %v7032_v15 = vadd.f32 %v7031_v27, %v11107_v28 }
0x505f   :  { %7035 = vrot.lane.b32.xlu0 %v7032_v15, %s9650_s11  ;;  %v7033_v18 = vmul.f32 %v7032_v15, %v6937_v36 }
0x50d1   :  { %v7036_v13 = vpop.permute.xlu0 %7035 }
0x50d2   :  { %v7038_v12 = vmul.f32 %v7036_v13, %v7032_v15 }
0x50d4   :  { %7040 = vrot.lane.b32.xlu1 %v7038_v12, %s9651_s7 }
0x5146   :  { %v7041_v42 = vpop.permute.xlu1 %7040 }
0x5147   :  { %v7043_v32 = vadd.f32 %v7041_v42, %v7033_v18 }
0x5149   :  { %9569 = vtanh.f32 %v7043_v32 }
0x5156   :  { %v9570_v0 = vpop.eup %9569 }
0x5157   :  { %7046 = vrot.lane.b32.xlu0 %v9570_v0, %s9650_s11 }
0x51c9   :  { %v7047_v47 = vpop.permute.xlu0 %7046 }
0x51ca   :  { %v7049_v45 = vmul.f32 %v7047_v47, %v7032_v15 }
0x51cc   :  { %7054 = vrot.lane.b32.xlu0 %v7049_v45, %s9650_s11  ;;  %7051 = vrot.lane.b32.xlu1 %v7049_v45, %s9651_s7 }
0x523e   :  { %v7055_v5 = vpop.permute.xlu0 %7054  ;;  %v7052_v40 = vpop.permute.xlu1 %7051 }
0x523f   :  { %7060 = vst.msk [vmem:[#allocation6 + $0x8] sm:$0xc] %vm4135_vm0, %v7055_v5  ;;  %v7057_v54 = vsel %vm1293_vm12, %v7052_v40, %v7055_v5  ;;  %v7379_v5 = vld [vmem:[#allocation5 + $0x38] sm:$0xf] }
0x5240   :  { %7059 = vst.msk [vmem:[#allocation6 + $0x14] sm:$0x3] %vm4133_vm4, %v7052_v40  ;;  %v7058_v17 = vmul.f32 %v11119_v57, %v7057_v54 }
0x5242   :  { %9343 = vmatmul.mubr.msk.f32.vlgmr.msra.gmra.mxu1 %vm619_vm1, %v7058_v17 }
0x5243   :  { %9365 = vmatpush3.msra.mxu1 %v12020_v52  ;;  %9380 = vmatprep.mubr.msk.f32.mxu1 %vm9648_vm3, %v12386_v14 }
0x5244   :  { %9366 = vmatprep.subr.mxu1 %v12386_v14 }
0x5245   :  { %9367 = vmatpush3.msra.mxu1 %v12029_v29 }
0x5246   :  { %9368 = vmatprep.subr.mxu1 %v12386_v14 }
0x5247   :  { %9369 = vmatpush3.msra.mxu1 %v12036_v48 }
0x5248   :  { %9370 = vmatprep.subr.mxu1 %v12386_v14 }
0x5249   :  { %9371 = vmatpush3.msra.mxu1 %v12043_v61 }
0x524a   :  { %9372 = vmatprep.subr.mxu1 %v12386_v14 }
0x524b   :  { %9373 = vmatpush3.msra.mxu1 %v12050_v39 }
0x524c   :  { %9374 = vmatprep.subr.mxu1 %v12386_v14 }
0x524d   :  { %9375 = vmatpush3.msra.mxu1 %v12057_v37 }
0x524e   :  { %9376 = vmatprep.subr.mxu1 %v12386_v14 }
0x524f   :  { %9377 = vmatpush3.msra.mxu1 %v12064_v30 }
0x5250   :  { %9378 = vmatprep.subr.mxu1 %v12386_v14 }
0x5251   :  { %9379 = vmatpush3.msra.mxu1 %v12071_v19 }
0x5252   :  { %9402 = vmatprep.subr.mxu1 %v12386_v14 }
0x5302   :  { %v7131_v60 = vpop.f32.mrf.mxu1 }
0x5303   :  { %v7135_v10 = vadd.f32 %v7131_v60, %v7061_v31 }
0x5304   :  { %v9344_v2 = vpop.f32.mrf.mxu1 }
0x5305   :  { %9571 = vtanh.f32 %v7135_v10 }
0x5312   :  { %v9572_v55 = vpop.eup %9571 }
0x5313   :  { %v7137_v44 = vmul.f32 %v9572_v55, %v11105_v46 }
0x5315   :  { %v7138_v22 = vadd.f32 %v7137_v44, %v11107_v28 }
0x5317   :  { %7141 = vrot.lane.b32.xlu1 %v7138_v22, %s9650_s11  ;;  %v7139_v7 = vmul.f32 %v7138_v22, %v7043_v32 }
0x5389   :  { %v7142_v11 = vpop.permute.xlu1 %7141 }
0x538a   :  { %v7144_v51 = vmul.f32 %v7142_v11, %v7138_v22 }
0x538c   :  { %7146 = vrot.lane.b32.xlu0 %v7144_v51, %s9651_s7 }
0x53fe   :  { %v7147_v63 = vpop.permute.xlu0 %7146 }
0x53ff   :  { %v7149_v9 = vadd.f32 %v7147_v63, %v7139_v7 }
0x5401   :  { %9573 = vtanh.f32 %v7149_v9 }
0x540e   :  { %v9574_v26 = vpop.eup %9573 }
0x540f   :  { %7152 = vrot.lane.b32.xlu1 %v9574_v26, %s9650_s11 }
0x5481   :  { %v7153_v16 = vpop.permute.xlu1 %7152 }
0x5482   :  { %v7155_v62 = vmul.f32 %v7153_v16, %v7138_v22 }
0x5484   :  { %7160 = vrot.lane.b32.xlu1 %v7155_v62, %s9650_s11  ;;  %7157 = vrot.lane.b32.xlu0 %v7155_v62, %s9651_s7 }
0x54f6   :  { %v7161_v34 = vpop.permute.xlu1 %7160  ;;  %v7158_v23 = vpop.permute.xlu0 %7157 }
0x54f7   :  { %7166 = vst.msk [vmem:[#allocation6 + $0x6] sm:$0xc] %vm4135_vm0, %v7161_v34  ;;  %v7163_v25 = vsel %vm1293_vm12, %v7158_v23, %v7161_v34  ;;  %v7485_v34 = vld [vmem:[#allocation5 + $0x3c] sm:$0xf] }
0x54f8   :  { %7165 = vst.msk [vmem:[#allocation6 + $0x16] sm:$0x3] %vm4133_vm4, %v7158_v23  ;;  %v7164_v8 = vmul.f32 %v11119_v57, %v7163_v25 }
0x54fa   :  { %9362 = vmatmul.mubr.msk.f32.vlgmr.msra.gmra.mxu0 %vm619_vm1, %v7164_v8 }
0x54fb   :  { %9384 = vmatpush3.msra.mxu0 %v12020_v52  ;;  %9399 = vmatprep.mubr.msk.f32.mxu0 %vm9648_vm3, %v12386_v14 }
0x54fc   :  { %9385 = vmatprep.subr.mxu0 %v12386_v14 }
0x54fd   :  { %9386 = vmatpush3.msra.mxu0 %v12029_v29 }
0x54fe   :  { %9387 = vmatprep.subr.mxu0 %v12386_v14 }
0x54ff   :  { %9388 = vmatpush3.msra.mxu0 %v12036_v48 }
0x5500   :  { %9389 = vmatprep.subr.mxu0 %v12386_v14 }
0x5501   :  { %9390 = vmatpush3.msra.mxu0 %v12043_v61 }
0x5502   :  { %9391 = vmatprep.subr.mxu0 %v12386_v14 }
0x5503   :  { %9392 = vmatpush3.msra.mxu0 %v12050_v39 }
0x5504   :  { %9393 = vmatprep.subr.mxu0 %v12386_v14 }
0x5505   :  { %9394 = vmatpush3.msra.mxu0 %v12057_v37 }
0x5506   :  { %9395 = vmatprep.subr.mxu0 %v12386_v14 }
0x5507   :  { %9396 = vmatpush3.msra.mxu0 %v12064_v30 }
0x5508   :  { %9397 = vmatprep.subr.mxu0 %v12386_v14 }
0x5509   :  { %9398 = vmatpush3.msra.mxu0 %v12071_v19 }
0x55ba   :  { %v7237_v53 = vpop.f32.mrf.mxu0 }
0x55bb   :  { %v7241_v3 = vadd.f32 %v7237_v53, %v7167_v38 }
0x55bc   :  { %v9363_v41 = vpop.f32.mrf.mxu0 }
0x55bd   :  { %9575 = vtanh.f32 %v7241_v3 }
0x55ca   :  { %v9576_v20 = vpop.eup %9575 }
0x55cb   :  { %v7243_v59 = vmul.f32 %v9576_v20, %v11105_v46 }
0x55cd   :  { %v7244_v36 = vadd.f32 %v7243_v59, %v11107_v28 }
0x55cf   :  { %7247 = vrot.lane.b32.xlu0 %v7244_v36, %s9650_s11  ;;  %v7245_v56 = vmul.f32 %v7244_v36, %v7149_v9 }
0x5641   :  { %v7248_v50 = vpop.permute.xlu0 %7247 }
0x5642   :  { %v7250_v43 = vmul.f32 %v7248_v50, %v7244_v36  ;;  %v7600_v50 = vld [vmem:[%s12308_s19 + $0x38] sm:$0xff] }
0x5643   :  { %9421 = vmatprep.subr.mxu0 %v7600_v50 }
0x5644   :  { %7252 = vrot.lane.b32.xlu1 %v7250_v43, %s9651_s7  ;;  %v7597_v43 = vld [vmem:[%s12308_s19 + $0x20] sm:$0xff] }
0x56b6   :  { %v7253_v6 = vpop.permute.xlu1 %7252 }
0x56b7   :  { %v7255_v58 = vadd.f32 %v7253_v6, %v7245_v56  ;;  %v7596_v6 = vld [vmem:[%s12308_s19 + $0x18] sm:$0xff] }
0x56b9   :  { %9577 = vtanh.f32 %v7255_v58 }
0x56c6   :  { %v9578_v35 = vpop.eup %9577 }
0x56c7   :  { %7258 = vrot.lane.b32.xlu0 %v9578_v35, %s9650_s11  ;;  %v7594_v35 = vld [vmem:[%s12308_s19 + $0x8] sm:$0xff] }
0x5739   :  { %v7259_v21 = vpop.permute.xlu0 %7258 }
0x573a   :  { %v7261_v33 = vmul.f32 %v7259_v21, %v7244_v36  ;;  %v7593_v21 = vld [vmem:[%s12308_s19] sm:$0xff] }
0x573c   :  { %7266 = vrot.lane.b32.xlu0 %v7261_v33, %s9650_s11  ;;  %7263 = vrot.lane.b32.xlu1 %v7261_v33, %s9651_s7 }
0x57ae   :  { %v7267_v1 = vpop.permute.xlu0 %7266  ;;  %v7264_v4 = vpop.permute.xlu1 %7263 }
0x57af   :  { %7272 = vst.msk [vmem:[#allocation6 + $0x4] sm:$0xc] %vm4135_vm0, %v7267_v1  ;;  %v7269_v24 = vsel %vm1293_vm12, %v7264_v4, %v7267_v1 }
0x57b0   :  { %7271 = vst.msk [vmem:[#allocation6 + $0x18] sm:$0x3] %vm4133_vm4, %v7264_v4  ;;  %v7270_v49 = vmul.f32 %v11119_v57, %v7269_v24 }
0x57b2   :  { %9381 = vmatmul.mubr.msk.f32.vlgmr.msra.gmra.mxu1 %vm619_vm1, %v7270_v49 }
0x57b3   :  { %9403 = vmatpush3.msra.mxu1 %v12020_v52  ;;  %9418 = vmatprep.mubr.msk.f32.mxu1 %vm9648_vm3, %v12386_v14  ;;  %v7273_v52 = vld [vmem:[#allocation5 + $0x34] sm:$0xf] }
0x57b4   :  { %9404 = vmatprep.subr.mxu1 %v12386_v14 }
0x57b5   :  { %9405 = vmatpush3.msra.mxu1 %v12029_v29 }
0x57b6   :  { %9406 = vmatprep.subr.mxu1 %v12386_v14 }
0x57b7   :  { %9407 = vmatpush3.msra.mxu1 %v12036_v48 }
0x57b8   :  { %9408 = vmatprep.subr.mxu1 %v12386_v14 }
0x57b9   :  { %9409 = vmatpush3.msra.mxu1 %v12043_v61 }
0x57ba   :  { %9410 = vmatprep.subr.mxu1 %v12386_v14 }
0x57bb   :  { %9411 = vmatpush3.msra.mxu1 %v12050_v39 }
0x57bc   :  { %9412 = vmatprep.subr.mxu1 %v12386_v14 }
0x57bd   :  { %9413 = vmatpush3.msra.mxu1 %v12057_v37 }
0x57be   :  { %9414 = vmatprep.subr.mxu1 %v12386_v14 }
0x57bf   :  { %9415 = vmatpush3.msra.mxu1 %v12064_v30 }
0x57c0   :  { %9416 = vmatprep.subr.mxu1 %v12386_v14 }
0x57c1   :  { %9417 = vmatpush3.msra.mxu1 %v12071_v19 }
0x5872   :  { %v7343_v29 = vpop.f32.mrf.mxu1 }
0x5873   :  { %v7347_v48 = vadd.f32 %v7343_v29, %v7273_v52  ;;  %v7590_v52 = vld [vmem:[#allocation6 + $0x8] sm:$0xff]  ;;  %v7591_v29 = vld [vmem:[#allocation6 + $0x10] sm:$0xff] }
0x5874   :  { %v9382_v61 = vpop.f32.mrf.mxu1 }
0x5875   :  { %9579 = vtanh.f32 %v7347_v48  ;;  %v7717_v61 = vld [vmem:[%s12309_s21] sm:$0xff] }
0x5876   :  { %9443 = vmatprep.subr.mxu1 %v7717_v61 }
0x5882   :  { %v9580_v27 = vpop.eup %9579 }
0x5883   :  { %v7349_v39 = vmul.f32 %v9580_v27, %v11105_v46  ;;  %v8144_v27 = vld [vmem:[%s12310_s20] ss:$0 sm:$0xff]  ;;  %s9653_s20 = smov 127  }
0x5885   :  { %v7350_v15 = vadd.f32 %v7349_v39, %v11107_v28 }
0x5887   :  { %7353 = vrot.lane.b32.xlu1 %v7350_v15, %s9650_s11  ;;  %v7351_v30 = vmul.f32 %v7350_v15, %v7255_v58  ;;  %v7595_v58 = vld [vmem:[%s12308_s19 + $0x10] sm:$0xff] }
0x58f9   :  { %v7354_v37 = vpop.permute.xlu1 %7353 }
0x58fa   :  { %v7356_v13 = vmul.f32 %v7354_v37, %v7350_v15 }
0x58fc   :  { %7358 = vrot.lane.b32.xlu0 %v7356_v13, %s9651_s7 }
0x596e   :  { %v7359_v14 = vpop.permute.xlu0 %7358 }
0x596f   :  { %v7361_v12 = vadd.f32 %v7359_v14, %v7351_v30 }
0x5971   :  { %9581 = vtanh.f32 %v7361_v12 }
0x597e   :  { %v9582_v19 = vpop.eup %9581 }
0x597f   :  { %7364 = vrot.lane.b32.xlu1 %v9582_v19, %s9650_s11 }
0x59f1   :  { %v7365_v18 = vpop.permute.xlu1 %7364 }
0x59f2   :  { %v7367_v42 = vmul.f32 %v7365_v18, %v7350_v15 }
0x59f4   :  { %7372 = vrot.lane.b32.xlu1 %v7367_v42, %s9650_s11  ;;  %7369 = vrot.lane.b32.xlu0 %v7367_v42, %s9651_s7 }
0x5a66   :  { %v7373_v32 = vpop.permute.xlu1 %7372  ;;  %v7370_v0 = vpop.permute.xlu0 %7369 }
0x5a67   :  { %7378 = vst.msk [vmem:[#allocation6 + $0x2] sm:$0xc] %vm4135_vm0, %v7373_v32  ;;  %v7375_v47 = vsel %vm1293_vm12, %v7370_v0, %v7373_v32 }
0x5a68   :  { %7377 = vst.msk [vmem:[#allocation6 + $0x1a] sm:$0x3] %vm4133_vm4, %v7370_v0  ;;  %v7376_v45 = vmul.f32 %v11119_v57, %v7375_v47 }
0x5a6a   :  { %9400 = vmatmul.mubr.msk.f32.vlgmr.msra.gmra.mxu0 %vm619_vm1, %v7376_v45 }
0x5a6b   :  { %9422 = vmatpush3.msra.mxu0 %v7600_v50 }
0x5b2a   :  { %v7449_v40 = vpop.f32.mrf.mxu0 }
0x5b2b   :  { %v7453_v54 = vadd.f32 %v7449_v40, %v7379_v5 }
0x5b2c   :  { %v9401_v17 = vpop.f32.mrf.mxu0 }
0x5b2d   :  { %9583 = vtanh.f32 %v7453_v54 }
0x5b3a   :  { %v9584_v31 = vpop.eup %9583 }
0x5b3b   :  { %v7455_v60 = vmul.f32 %v9584_v31, %v11105_v46 }
0x5b3d   :  { %v7456_v10 = vadd.f32 %v7455_v60, %v11107_v28 }
0x5b3f   :  { %7459 = vrot.lane.b32.xlu0 %v7456_v10, %s9650_s11  ;;  %v7457_v44 = vmul.f32 %v7456_v10, %v7361_v12 }
0x5bb1   :  { %v7460_v2 = vpop.permute.xlu0 %7459 }
0x5bb2   :  { %v7462_v55 = vmul.f32 %v7460_v2, %v7456_v10 }
0x5bb4   :  { %7464 = vrot.lane.b32.xlu1 %v7462_v55, %s9651_s7 }
0x5c26   :  { %v7465_v22 = vpop.permute.xlu1 %7464 }
0x5c27   :  { %v7467_v11 = vadd.f32 %v7465_v22, %v7457_v44 }
0x5c29   :  { %9585 = vtanh.f32 %v7467_v11 }
0x5c36   :  { %v9586_v51 = vpop.eup %9585 }
0x5c37   :  { %7470 = vrot.lane.b32.xlu0 %v9586_v51, %s9650_s11 }
0x5ca9   :  { %v7471_v7 = vpop.permute.xlu0 %7470 }
0x5caa   :  { %v7473_v63 = vmul.f32 %v7471_v7, %v7456_v10 }
0x5cac   :  { %7478 = vrot.lane.b32.xlu0 %v7473_v63, %s9650_s11  ;;  %7475 = vrot.lane.b32.xlu1 %v7473_v63, %s9651_s7  ;;  %v28_v63 = vstv %s12311_s22  ;;  %s9655_s22 = smov 2  }
0x5cad   :  { %29 = vst [vmem:[#allocation7] sm:$0x1] %v28_v63 }
0x5d1e   :  { %v7479_v9 = vpop.permute.xlu0 %7478  ;;  %v7476_v26 = vpop.permute.xlu1 %7475 }
0x5d1f   :  { %7484 = vst.msk [vmem:[#allocation6] sm:$0xc] %vm4135_vm0, %v7479_v9  ;;  %v7481_v16 = vsel %vm1293_vm12, %v7476_v26, %v7479_v9 }
0x5d20   :  { %7483 = vst.msk [vmem:[#allocation6 + $0x1c] sm:$0x3] %vm4133_vm4, %v7476_v26  ;;  %v7482_v62 = vmul.f32 %v11119_v57, %v7481_v16 }
0x5d22   :  { %9419 = vmatmul.mubr.msk.f32.vlgmr.msra.gmra.mxu1 %vm619_vm1, %v7482_v62 }
0x5d23   :  { %9444 = vmatpush3.msra.mxu1 %v7717_v61 }
0x5de2   :  { %v7555_v23 = vpop.f32.mrf.mxu1 }
0x5de3   :  { %v7559_v25 = vadd.f32 %v7555_v23, %v7485_v34 }
0x5de4   :  { %v9420_v8 = vpop.f32.mrf.mxu1 }
0x5de5   :  { %9587 = vtanh.f32 %v7559_v25 }
0x5df2   :  { %v9588_v38 = vpop.eup %9587 }
0x5df3   :  { %v7561_v53 = vmul.f32 %v9588_v38, %v11105_v46  ;;  %v7599_v46 = vld [vmem:[%s12308_s19 + $0x30] sm:$0xff] }
0x5df4   :  { %9423 = vmatprep.subr.mxu0 %v7599_v46  ;;  %v8149_v38 = vld [vmem:[#allocation7] ss:$0 sm:$0xff] }
0x5df5   :  { %v7562_v3 = vadd.f32 %v7561_v53, %v11107_v28  ;;  %v7598_v28 = vld [vmem:[%s12308_s19 + $0x28] sm:$0xff]  ;;  %9424 = vmatpush3.msra.mxu0 %v7599_v46 }
0x5df6   :  { %9425 = vmatprep.subr.mxu0 %v7598_v28 }
0x5df7   :  { %7565 = vrot.lane.b32.xlu1 %v7562_v3, %s9650_s11  ;;  %v7563_v59 = vmul.f32 %v7562_v3, %v7467_v11  ;;  %9426 = vmatpush3.msra.mxu0 %v7598_v28 }
0x5df8   :  { %9427 = vmatprep.subr.mxu0 %v7597_v43 }
0x5df9   :  { %9428 = vmatpush3.msra.mxu0 %v7597_v43 }
0x5dfa   :  { %9429 = vmatprep.subr.mxu0 %v7596_v6 }
0x5dfb   :  { %9430 = vmatpush3.msra.mxu0 %v7596_v6 }
0x5dfc   :  { %9431 = vmatprep.subr.mxu0 %v7595_v58 }
0x5dfd   :  { %9432 = vmatpush3.msra.mxu0 %v7595_v58 }
0x5dfe   :  { %9433 = vmatprep.subr.mxu0 %v7594_v35 }
0x5dff   :  { %9434 = vmatpush3.msra.mxu0 %v7594_v35 }
0x5e00   :  { %9435 = vmatprep.subr.mxu0 %v7593_v21 }
0x5e01   :  { %9436 = vmatpush3.msra.mxu0 %v7593_v21 }
0x5e69   :  { %v7566_v41 = vpop.permute.xlu1 %7565 }
0x5e6a   :  { %v7568_v20 = vmul.f32 %v7566_v41, %v7562_v3 }
0x5e6c   :  { %7570 = vrot.lane.b32.xlu0 %v7568_v20, %s9651_s7 }
0x5ede   :  { %v7571_v57 = vpop.permute.xlu0 %7570 }
0x5edf   :  { %v7573_v36 = vadd.f32 %v7571_v57, %v7563_v59 }
0x5ee1   :  { %9589 = vtanh.f32 %v7573_v36 }
0x5eee   :  { %v9590_v56 = vpop.eup %9589 }
0x5eef   :  { %7576 = vrot.lane.b32.xlu1 %v9590_v56, %s9650_s11 }
0x5f61   :  { %v7577_v33 = vpop.permute.xlu1 %7576 }
0x5f62   :  { %v7579_v1 = vmul.f32 %v7577_v33, %v7562_v3 }
0x5f64   :  { %7581 = vrot.lane.b32.xlu1 %v7579_v1, %s9651_s7  ;;  %7585 = vrot.lane.b32.xlu0 %v7579_v1, %s9650_s11 }
0x5fd6   :  { %v7582_v4 = vpop.permute.xlu1 %7581  ;;  %v7586_v24 = vpop.permute.xlu0 %7585 }
0x5fd7   :  { %7584 = vst.msk [vmem:[#allocation6 + $0x1e] sm:$0x3] %vm4133_vm4, %v7582_v4 }
0x5fd8   :  { %7588 = vst.msk [vmem:[#allocation6 - $0x2] sm:$0xc] %vm4135_vm0, %v7586_v24 }
0x5fde   :  { %v7592_v48 = vld [vmem:[#allocation6 + $0x18] sm:$0xff] }
0x5fdf   :  { %v7589_v49 = vld [vmem:[#allocation6] sm:$0xff] }
0x5fe0   :  { %9437 = vmatprep.mubr.msk.f32.mxu0 %vm619_vm1, %v7589_v49 }
0x5fe1   :  { %9438 = vmatmul.mubr.msk.f32.vlgmr.msra.gmra.mxu0 %vm619_vm1, %v7590_v52 }
0x5fe2   :  { %9440 = vmatprep.mubr.msk.f32.mxu0 %vm619_vm1, %v7591_v29 }
0x5fe5   :  { %9441 = vmatmul.mubr.msk.f32.gmra.mxu0 %vm619_vm1, %v7592_v48 }
0x60a1   :  { %v9439_v39 = vpop.f32.mrf.mxu0 }
0x60a2   :  { %v12230_v15 = vadd.f32 %v9439_v39, %v8144_v27 }
0x60a3   :  { %v7686_v37 = vpop.f32.mrf.mxu0 }
0x60a4   :  { %v8159_v13 = vmul.f32 -1.442695, %v12230_v15  ;;  %v12233_v30 = vadd.f32 %v8144_v27, %v7686_v37  ;;  %vm7706_vm1 = vcmp.gt.f32.partialorder %v12230_v15, 0.0  ;;  %v7710_v14 = vmul.f32 0.1, %v12230_v15 }
0x60a5   :  { %v9442_v12 = vpop.f32.mrf.mxu0 }
0x60a6   :  { %9591 = vpow2.f32 %v8159_v13  ;;  %v8158_v19 = vmul.f32 -1.442695, %v12233_v30  ;;  %v12238_v18 = vadd.f32 %v9442_v12, %v8144_v27  ;;  %v7714_v42 = vsel %vm7706_vm1, %v12230_v15, %v7710_v14 }
0x60a7   :  { %7731 = vrot.lane.b32.xlu1 %v7714_v42, %s9653_s20  ;;  %v7696_v32 = vpop.f32.mrf.mxu0  ;;  %vm7705_vm12 = vcmp.gt.f32.partialorder %v12233_v30, 0.0  ;;  %v7709_v0 = vmul.f32 0.1, %v12233_v30 }
0x60a8   :  { %9593 = vpow2.f32 %v8158_v19  ;;  %v8161_v47 = vmul.f32 -1.442695, %v12238_v18  ;;  %v12244_v45 = vadd.f32 %v8144_v27, %v7696_v32  ;;  %vm7708_vm3 = vcmp.gt.f32.partialorder %v12238_v18, 0.0 }
0x60a9   :  { %v7713_v5 = vsel %vm7705_vm12, %v12233_v30, %v7709_v0  ;;  %v7712_v40 = vmul.f32 0.1, %v12238_v18 }
0x60aa   :  { %9595 = vpow2.f32 %v8161_v47  ;;  %v8160_v54 = vmul.f32 -1.442695, %v12244_v45  ;;  %7729 = vrot.lane.b32.xlu0 %v7713_v5, %s9653_s20  ;;  %vm7707_vm5 = vcmp.gt.f32.partialorder %v12244_v45, 0.0  ;;  %v7711_v17 = vmul.f32 0.1, %v12244_v45 }
0x60ab   :  { %v7716_v31 = vsel %vm7708_vm3, %v12238_v18, %v7712_v40 }
0x60ac   :  { %9597 = vpow2.f32 %v8160_v54  ;;  %7735 = vrot.lane.b32.xlu1 %v7716_v31, %s9653_s20  ;;  %v7715_v60 = vsel %vm7707_vm5, %v12244_v45, %v7711_v17 }
0x60ae   :  { %7733 = vrot.lane.b32.xlu0 %v7715_v60, %s9653_s20 }
0x60b3   :  { %v9592_v10 = vpop.eup %9591 }
0x60b4   :  { %v7867_v2 = vadd.f32 1.0, %v9592_v10 }
0x60b5   :  { %v9594_v55 = vpop.eup %9593 }
0x60b6   :  { %9599 = vrcp.f32 %v7867_v2  ;;  %v7866_v44 = vadd.f32 1.0, %v9594_v55 }
0x60b7   :  { %v9596_v22 = vpop.eup %9595 }
0x60b8   :  { %9601 = vrcp.f32 %v7866_v44  ;;  %v7869_v11 = vadd.f32 1.0, %v9596_v22 }
0x60b9   :  { %v9598_v51 = vpop.eup %9597 }
0x60ba   :  { %9603 = vrcp.f32 %v7869_v11  ;;  %v7868_v7 = vadd.f32 1.0, %v9598_v51 }
0x60bc   :  { %9605 = vrcp.f32 %v7868_v7 }
0x60c3   :  { %v9600_v9 = vpop.eup %9599 }
0x60c4   :  { %7884 = vrot.lane.b32.xlu1 %v9600_v9, %s9654_s6 }
0x60c5   :  { %v9602_v26 = vpop.eup %9601 }
0x60c6   :  { %7882 = vrot.lane.b32.xlu0 %v9602_v26, %s9654_s6 }
0x60c7   :  { %v9604_v16 = vpop.eup %9603 }
0x60c8   :  { %7888 = vrot.lane.b32.xlu1 %v9604_v16, %s9654_s6 }
0x60c9   :  { %v9606_v62 = vpop.eup %9605 }
0x60ca   :  { %7886 = vrot.lane.b32.xlu0 %v9606_v62, %s9654_s6 }
0x6119   :  { %v7732_v34 = vpop.permute.xlu1 %7731 }
0x611c   :  { %v7730_v23 = vpop.permute.xlu0 %7729 }
0x611d   :  { %9445 = vmatprep.mubr.msk.f32.mxu1 %vm88_vm13, %v7730_v23 }
0x611e   :  { %9446 = vmatmul.mubr.msk.f32.vlgmr.msra.gmra.mxu1 %vm88_vm13, %v7732_v34  ;;  %v7736_v8 = vpop.permute.xlu1 %7735 }
0x6120   :  { %v7734_v25 = vpop.permute.xlu0 %7733 }
0x6121   :  { %9448 = vmatprep.mubr.msk.f32.mxu1 %vm88_vm13, %v7734_v25 }
0x6122   :  { %9449 = vmatmul.mubr.msk.f32.gmra.mxu1 %vm88_vm13, %v7736_v8  ;;  %vm7910_vm13 = vcmask 7168  }
0x6136   :  { %v7885_v61 = vpop.permute.xlu1 %7884 }
0x6137   :  { %v7912_v13 = vsel %vm7910_vm13, %v12230_v15, %v7885_v61 }
0x6138   :  { %v7883_v27 = vpop.permute.xlu0 %7882 }
0x6139   :  { %v7911_v19 = vsel %vm7910_vm13, %v12233_v30, %v7883_v27 }
0x613a   :  { %v7889_v39 = vpop.permute.xlu1 %7888 }
0x613b   :  { %v7914_v0 = vsel %vm7910_vm13, %v12238_v18, %v7889_v39 }
0x613c   :  { %v7887_v37 = vpop.permute.xlu0 %7886 }
0x613d   :  { %v7913_v30 = vsel %vm7910_vm13, %v12244_v45, %v7887_v37 }
0x61de   :  { %v9447_v53 = vpop.f32.mrf.mxu1 }
0x61df   :  { %v7817_v3 = vadd.f32 %v9447_v53, %v8149_v38 }
0x61e0   :  { %v7811_v41 = vpop.f32.mrf.mxu1 }
0x61e1   :  { %v8155_v20 = vmul.f32 -1.442695, %v7817_v3  ;;  %v7812_v59 = vadd.f32 %v8149_v38, %v7811_v41 }
0x61e2   :  { %v9450_v57 = vpop.f32.mrf.mxu1 }
0x61e3   :  { %9607 = vpow2.f32 %v8155_v20  ;;  %v8154_v36 = vmul.f32 -1.442695, %v7812_v59  ;;  %v7827_v50 = vadd.f32 %v9450_v57, %v8149_v38 }
0x61e4   :  { %v7821_v46 = vpop.f32.mrf.mxu1 }
0x61e5   :  { %9609 = vpow2.f32 %v8154_v36  ;;  %v8157_v28 = vmul.f32 -1.442695, %v7827_v50  ;;  %v7822_v43 = vadd.f32 %v8149_v38, %v7821_v46 }
0x61e7   :  { %9611 = vpow2.f32 %v8157_v28  ;;  %v8156_v56 = vmul.f32 -1.442695, %v7822_v43 }
0x61e9   :  { %9613 = vpow2.f32 %v8156_v56 }
0x61f0   :  { %v9608_v6 = vpop.eup %9607 }
0x61f1   :  { %v7843_v58 = vadd.f32 1.0, %v9608_v6 }
0x61f2   :  { %v9610_v35 = vpop.eup %9609 }
0x61f3   :  { %9615 = vrcp.f32 %v7843_v58  ;;  %v7842_v21 = vadd.f32 1.0, %v9610_v35 }
0x61f4   :  { %v9612_v33 = vpop.eup %9611 }
0x61f5   :  { %9617 = vrcp.f32 %v7842_v21  ;;  %v7845_v1 = vadd.f32 1.0, %v9612_v33 }
0x61f6   :  { %v9614_v4 = vpop.eup %9613 }
0x61f7   :  { %9619 = vrcp.f32 %v7845_v1  ;;  %v7844_v24 = vadd.f32 1.0, %v9614_v4 }
0x61f9   :  { %9621 = vrcp.f32 %v7844_v24 }
0x6200   :  { %v9616_v49 = vpop.eup %9615 }
0x6201   :  { %7900 = vrot.lane.b32.xlu1 %v9616_v49, %s9655_s22 }
0x6202   :  { %v9618_v52 = vpop.eup %9617 }
0x6203   :  { %7898 = vrot.lane.b32.xlu0 %v9618_v52, %s9655_s22 }
0x6204   :  { %v9620_v29 = vpop.eup %9619 }
0x6205   :  { %7904 = vrot.lane.b32.xlu1 %v9620_v29, %s9655_s22 }
0x6206   :  { %v9622_v48 = vpop.eup %9621 }
0x6207   :  { %7902 = vrot.lane.b32.xlu0 %v9622_v48, %s9655_s22 }
0x6273   :  { %v7901_v14 = vpop.permute.xlu1 %7900 }
0x6274   :  { %v7917_v12 = vsel %vm7915_vm6, %v7912_v13, %v7901_v14 }
0x6275   :  { %7922 = vst.msk [vmem:[%s12312_s23 + $0x8] sm:$0xff] %vm7920_vm8, %v7917_v12  ;;  %v7899_v42 = vpop.permute.xlu0 %7898 }
0x6276   :  { %v7916_v32 = vsel %vm7915_vm6, %v7911_v19, %v7899_v42 }
0x6277   :  { %7921 = vst.msk [vmem:[%s12312_s23] sm:$0xff] %vm7920_vm8, %v7916_v32  ;;  %v7905_v15 = vpop.permute.xlu1 %7904 }
0x6278   :  { %v7919_v47 = vsel %vm7915_vm6, %v7914_v0, %v7905_v15 }
0x6279   :  { %7924 = vst.msk [vmem:[%s12312_s23 + $0x18] sm:$0xff] %vm7920_vm8, %v7919_v47  ;;  %v7903_v5 = vpop.permute.xlu0 %7902 }
0x627a   :  { %v7918_v40 = vsel %vm7915_vm6, %v7913_v30, %v7903_v5 }
0x627b   :  { %7923 = vst.msk [vmem:[%s12312_s23 + $0x10] sm:$0xff] %vm7920_vm8, %v7918_v40 }

</bundles_post_ra>
